<compile_context>
chip_gen: v7x
topology: tpu7x:2x2x1
jax: 0.10.0
libtpu: 0.0.40
codegen_flags: <defaults>
</compile_context>

<pallas_src>
import functools

import jax
import jax.numpy as jnp
from jax.experimental import pallas as pl
from jax.experimental.pallas import tpu as pltpu


# -----------------------------------------------------------------------------
# Pallas kernels
# -----------------------------------------------------------------------------
def _matmul_bias_act_kernel(x_ref, w_ref, bias_ref, o_ref, *, relu):
    # x: (TM, K) bf16, w: (K, N) bf16 (BN scale folded), bias: (1, N) f32
    acc = jnp.dot(x_ref[...], w_ref[...], preferred_element_type=jnp.float32)
    y = acc + bias_ref[...]
    if relu:
        y = jnp.maximum(y, 0.0)
    o_ref[...] = y.astype(o_ref.dtype)


def _matmul_bias_act_res_kernel(x_ref, w_ref, bias_ref, res_ref, o_ref, *, relu):
    # Same as above plus a fused residual add after the (optional) ReLU.
    acc = jnp.dot(x_ref[...], w_ref[...], preferred_element_type=jnp.float32)
    y = acc + bias_ref[...]
    if relu:
        y = jnp.maximum(y, 0.0)
    y = y + res_ref[...].astype(jnp.float32)
    o_ref[...] = y.astype(o_ref.dtype)


def matmul_bias_act(x2d, w, bias, relu, residual=None, out_dtype=jnp.bfloat16):
    """Fused (x @ w) + bias (+ReLU) (+residual). BN scale pre-folded into w."""
    M, K = x2d.shape
    K2, N = w.shape
    assert K == K2
    # Round M up to a sublane multiple only when needed (only the tiny FC).
    Mp = ((M + 7) // 8) * 8
    if Mp != M:
        x2d = jnp.pad(x2d, ((0, Mp - M), (0, 0)))
        if residual is not None:
            residual = jnp.pad(residual, ((0, Mp - M), (0, 0)))
    TM = Mp if Mp <= 512 else 512           # big M-tiles: few grid steps
    grid = (pl.cdiv(Mp, TM),)

    in_specs = [
        pl.BlockSpec((TM, K), lambda i: (i, 0)),
        pl.BlockSpec((K, N), lambda i: (0, 0)),
        pl.BlockSpec((1, N), lambda i: (0, 0)),
    ]
    args = [x2d, w, bias.reshape(1, N)]
    if residual is None:
        kernel = functools.partial(_matmul_bias_act_kernel, relu=relu)
    else:
        kernel = functools.partial(_matmul_bias_act_res_kernel, relu=relu)
        in_specs.append(pl.BlockSpec((TM, N), lambda i: (i, 0)))
        args.append(residual)

    out = pl.pallas_call(
        kernel,
        out_shape=jax.ShapeDtypeStruct((Mp, N), out_dtype),
        grid=grid,
        in_specs=in_specs,
        out_specs=pl.BlockSpec((TM, N), lambda i: (i, 0)),
        compiler_params=pltpu.CompilerParams(
            dimension_semantics=("parallel",)),
    )(*args)
    return out if Mp == M else out[:M]


def _dwconv3x3_bias_kernel(x_ref, w_ref, bias_ref, o_ref):
    # x: (1, H+2, W+2, C) zero-padded bf16; w: (9, C) f32 (BN scale folded);
    # bias: (1, C) f32; out: (1, H, W, C).
    # Vertical taps accumulate on the full padded width; only 2 shifted slices
    # (dx = 1, 2) are needed for the horizontal taps.
    H, W, C = o_ref.shape[1], o_ref.shape[2], o_ref.shape[3]
    r0 = x_ref[0, 0:H, :, :].astype(jnp.float32)          # (H, W+2, C)
    r1 = x_ref[0, 1:H + 1, :, :].astype(jnp.float32)
    r2 = x_ref[0, 2:H + 2, :, :].astype(jnp.float32)
    acc = jnp.zeros((H, W, C), jnp.float32)
    for dx in range(3):
        col = (r0 * w_ref[dx, :] + r1 * w_ref[3 + dx, :] + r2 * w_ref[6 + dx, :])
        acc = acc + col[:, dx:dx + W, :]
    y = acc + bias_ref[0, :]
    o_ref[0] = y.astype(o_ref.dtype)


def dwconv3x3_bias(x_nhwc, w9, bias):
    """Depthwise 3x3, stride 1, pad 1, fused with folded BN (no ReLU)."""
    # TODO(synk): at 224x224-scale inputs, tile this grid over rows with a
    # 1-row halo instead of whole images to bound the per-step VMEM footprint.
    N, H, W, C = x_nhwc.shape
    xp = jnp.pad(x_nhwc, ((0, 0), (1, 1), (1, 1), (0, 0)))
    return pl.pallas_call(
        _dwconv3x3_bias_kernel,
        out_shape=jax.ShapeDtypeStruct((N, H, W, C), x_nhwc.dtype),
        grid=(N,),
        in_specs=[
            pl.BlockSpec((1, H + 2, W + 2, C), lambda n: (n, 0, 0, 0)),
            pl.BlockSpec((9, C), lambda n: (0, 0)),
            pl.BlockSpec((1, C), lambda n: (0, 0)),
        ],
        out_specs=pl.BlockSpec((1, H, W, C), lambda n: (n, 0, 0, 0)),
        compiler_params=pltpu.CompilerParams(
            dimension_semantics=("parallel",)),
    )(xp, w9, bias.reshape(1, C))


# -----------------------------------------------------------------------------
# Plain-JAX glue (fused into the surrounding XLA program)
# -----------------------------------------------------------------------------
def maxpool3x3_s2(x_nhwc):
    N, H, W, C = x_nhwc.shape
    Ho = (H + 2 - 3) // 2 + 1
    Wo = (W + 2 - 3) // 2 + 1
    xp = jnp.pad(x_nhwc, ((0, 0), (1, 1), (1, 1), (0, 0)),
                 constant_values=float('-inf'))
    out = None
    for dy in range(3):
        for dx in range(3):
            s = xp[:, dy:dy + 2 * (Ho - 1) + 1:2, dx:dx + 2 * (Wo - 1) + 1:2, :]
            out = s if out is None else jnp.maximum(out, s)
    return out


def im2col_3x3_s2(x_nhwc):
    # 3x3 conv, stride 2, pad 1 -> patch matrix (N*Ho*Wo, 9*Cin), (dy,dx,c) order
    N, H, W, C = x_nhwc.shape
    Ho = (H + 2 - 3) // 2 + 1
    Wo = (W + 2 - 3) // 2 + 1
    xp = jnp.pad(x_nhwc, ((0, 0), (1, 1), (1, 1), (0, 0)))
    cols = []
    for dy in range(3):
        for dx in range(3):
            cols.append(
                xp[:, dy:dy + 2 * (Ho - 1) + 1:2, dx:dx + 2 * (Wo - 1) + 1:2, :])
    patches = jnp.concatenate(cols, axis=-1)
    return patches.reshape(N * Ho * Wo, 9 * C), (N, Ho, Wo)


# -----------------------------------------------------------------------------
# One-time weight preparation (hoisted out of the forward path)
# -----------------------------------------------------------------------------
def group_conv1x1_to_dense(w, groups):
    # PyTorch weight (Cout, Cin//G, 1, 1) -> block-diagonal dense (Cin, Cout)
    cout, cig = w.shape[0], w.shape[1]
    cog = cout // groups
    cin = cig * groups
    dense = jnp.zeros((cin, cout), jnp.float32)
    for g in range(groups):
        blk = w[g * cog:(g + 1) * cog, :, 0, 0].T  # (cig, cog)
        dense = dense.at[g * cig:(g + 1) * cig, g * cog:(g + 1) * cog].set(blk)
    return dense


def dwweight_to_9c(w):
    # PyTorch depthwise weight (C, 1, 3, 3) -> (9, C), tap-major (dy, dx)
    return jnp.transpose(w[:, 0, :, :], (1, 2, 0)).reshape(9, w.shape[0])


def _shuffle_inv_perm(C, groups):
    # channel_shuffle: shuffled[..., c'] = x[..., perm[c']] with
    # perm[c'] = (c' % G) * (C // G) + (c' // G).  Return its inverse.
    cpg = C // groups
    c = jnp.arange(C)
    perm = (c % groups) * cpg + (c // groups)
    return jnp.argsort(perm)


def prepare_params(params, groups):
    """Fold BN scale into weights, fold channel shuffle into w3 rows, build
    dense group-conv matrices, cast MXU operands to bf16.  Runs once."""

    def fold(w_dense, scale):
        return (w_dense * scale[None, :]).astype(jnp.bfloat16)

    prep = {}
    s1, b1 = params['bn1']
    w1 = params['conv1_w']                                    # (C0, 3, 3, 3)
    wm = jnp.transpose(w1, (2, 3, 1, 0)).reshape(-1, w1.shape[0])  # (27, C0)
    prep['conv1_w'] = fold(wm, s1)
    prep['conv1_b'] = b1

    for stage in ('stage2', 'stage3', 'stage4'):
        units = []
        for u in params[stage]:
            mid = u['w1'].shape[0]
            d = {}
            d['w1'] = fold(group_conv1x1_to_dense(u['w1'], groups), u['bn1'][0])
            d['b1'] = u['bn1'][1]
            d['w2_9c'] = dwweight_to_9c(u['w2']) * u['bn2'][0][None, :]
            d['b2'] = u['bn2'][1]
            w3 = group_conv1x1_to_dense(u['w3'], groups)
            w3 = w3[_shuffle_inv_perm(mid, groups), :]   # fold channel shuffle
            d['w3'] = fold(w3, u['bn3'][0])
            d['b3'] = u['bn3'][1]
            if 'wsc' in u:
                d['wsc'] = fold(u['wsc'][:, :, 0, 0].T, u['bnsc'][0])
                d['bsc'] = u['bnsc'][1]
            units.append(d)
        prep[stage] = units

    s5, b5 = params['bn5']
    prep['conv5_w'] = fold(params['conv5_w'][:, :, 0, 0].T, s5)
    prep['conv5_b'] = b5
    prep['fc_w'] = params['fc_w'].T.astype(jnp.bfloat16)      # (1024, classes)
    prep['fc_b'] = params['fc_b']
    return prep


# -----------------------------------------------------------------------------
# Model forward
# -----------------------------------------------------------------------------
def shuffle_unit_forward(x, u):
    N, H, W, Cin = x.shape
    M = N * H * W
    x2d = x.reshape(M, Cin)
    mid = u['w1'].shape[1]
    cout = u['w3'].shape[1]
    out = matmul_bias_act(x2d, u['w1'], u['b1'], relu=True)          # (M, mid)
    out = dwconv3x3_bias(out.reshape(N, H, W, mid), u['w2_9c'], u['b2'])
    if 'wsc' in u:
        res = matmul_bias_act(x2d, u['wsc'], u['bsc'], relu=False)   # (M, cout)
    else:
        res = x2d                                                    # identity
    # third group conv (shuffle folded into weights) with fused residual add
    y = matmul_bias_act(out.reshape(M, mid), u['w3'], u['b3'], relu=True,
                        residual=res)
    return y.reshape(N, H, W, cout)


@jax.jit
def shufflenet_forward(prep, x_nchw):
    x = jnp.transpose(x_nchw, (0, 2, 3, 1)).astype(jnp.bfloat16)     # NHWC bf16
    # Stem: conv 3x3 s2 p1 + BN + ReLU via im2col + fused Pallas matmul
    patches, (N, Ho, Wo) = im2col_3x3_s2(x)
    x = matmul_bias_act(patches, prep['conv1_w'], prep['conv1_b'], relu=True)
    x = x.reshape(N, Ho, Wo, -1)
    x = maxpool3x3_s2(x)
    for stage in ('stage2', 'stage3', 'stage4'):
        for u in prep[stage]:
            x = shuffle_unit_forward(x, u)
    # conv5 1x1 + BN + ReLU
    N2, H2, W2, C = x.shape
    x = matmul_bias_act(x.reshape(N2 * H2 * W2, C), prep['conv5_w'],
                        prep['conv5_b'], relu=True)
    x = x.reshape(N2, H2, W2, -1).astype(jnp.float32)
    x = jnp.mean(x, axis=(1, 2))                                     # (N, 1024)
    logits = matmul_bias_act(x.astype(jnp.bfloat16), prep['fc_w'],
                             prep['fc_b'], relu=False,
                             out_dtype=jnp.float32)
    return logits


# -----------------------------------------------------------------------------
# Deterministic parameter init (mirrors nn.Module __init__ shapes; BN folded)
# -----------------------------------------------------------------------------
def init_params(key, num_classes, groups, stages_repeats, stages_out_channels):
    keys = iter(jax.random.split(key, 1024))

    def nk():
        return next(keys)

    def conv_w(shape):  # PyTorch layout (Cout, Cin_per_group, kh, kw)
        fan_in = shape[1] * shape[2] * shape[3]
        return jax.random.normal(nk(), shape, jnp.float32) / jnp.sqrt(fan_in)

    def bn(C):
        gamma = 1.0 + 0.1 * jax.random.normal(nk(), (C,), jnp.float32)
        beta = 0.1 * jax.random.normal(nk(), (C,), jnp.float32)
        mean = 0.1 * jax.random.normal(nk(), (C,), jnp.float32)
        var = 0.5 + jax.random.uniform(nk(), (C,), jnp.float32)
        scale = gamma / jnp.sqrt(var + 1e-5)
        bias = beta - mean * scale
        return (scale, bias)

    def make_unit(cin, cout):
        assert cout % 4 == 0
        mid = cout // 4
        u = {
            'w1': conv_w((mid, cin // groups, 1, 1)),
            'bn1': bn(mid),
            'w2': conv_w((mid, 1, 3, 3)),
            'bn2': bn(mid),
            'w3': conv_w((cout, mid // groups, 1, 1)),
            'bn3': bn(cout),
        }
        if cin != cout:
            u['wsc'] = conv_w((cout, cin, 1, 1))
            u['bnsc'] = bn(cout)
        return u

    params = {}
    c0 = stages_out_channels[0]
    params['conv1_w'] = conv_w((c0, 3, 3, 3))
    params['bn1'] = bn(c0)
    for si, (cin, cout, rep) in enumerate(
            zip(stages_out_channels[:-1], stages_out_channels[1:],
                stages_repeats), start=2):
        units = [make_unit(cin, cout)]
        for _ in range(1, rep):
            units.append(make_unit(cout, cout))
        params[f'stage{si}'] = units
    params['conv5_w'] = conv_w((1024, stages_out_channels[-1], 1, 1))
    params['bn5'] = bn(1024)
    params['fc_w'] = jax.random.normal(nk(), (num_classes, 1024),
                                       jnp.float32) / jnp.sqrt(1024.0)
    params['fc_b'] = 0.01 * jax.random.normal(nk(), (num_classes,), jnp.float32)
    return params


# -----------------------------------------------------------------------------
if __name__ == "__main__":
    key = jax.random.PRNGKey(0)
    pkey, xkey = jax.random.split(key)

    # Small config consistent with the module (same code path as defaults):
    batch, H, W = 2, 32, 32
    num_classes, groups = 16, 3
    stages_repeats = [2, 2, 2]
    stages_out_channels = [24, 48, 96, 192]  # each divisible by 4 and by groups

    params = init_params(pkey, num_classes, groups, stages_repeats,
                         stages_out_channels)
    prep = prepare_params(params, groups)      # one-time weight prep (hoisted)
    x = jax.random.normal(xkey, (batch, 3, H, W), jnp.float32)  # NCHW input

    out = shufflenet_forward(prep, x)
    out = jax.block_until_ready(out)
    assert out.shape == (batch, num_classes), out.shape
    assert bool(jnp.all(jnp.isfinite(out)))
    print("KERNEL_OK")
</pallas_src>

<mosaic_0001>
module attributes {stable_mosaic.version = 11 : i64} {
  func.func @_matmul_bias_act_kernel(%arg0: i32, %arg1: memref<512x27xbf16, #tpu.memory_space<vmem>>, %arg2: memref<27x24xbf16, #tpu.memory_space<vmem>>, %arg3: memref<1x24xf32, #tpu.memory_space<vmem>>, %arg4: memref<512x24xbf16, #tpu.memory_space<vmem>>) attributes {dimension_semantics = [#tpu.dimension_semantics<parallel>], iteration_bounds = array<i64: 1>, scalar_prefetch = 0 : i64, scratch_operands = 0 : i64, tpu.core_type = #tpu.core_type<tc>, window_params = [{transform_indices = @transform_0, window_bounds = array<i64: 512, 27>}, {pipeline_mode = #tpu.pipeline_mode<synchronous>, transform_indices = @transform_1, window_bounds = array<i64: 27, 24>}, {pipeline_mode = #tpu.pipeline_mode<synchronous>, transform_indices = @transform_2, window_bounds = array<i64: 1, 24>}, {transform_indices = @transform_3, window_bounds = array<i64: 512, 24>}]} {
    %c0 = arith.constant 0 : index
    %c0_0 = arith.constant 0 : index
    %0 = vector.load %arg1[%c0, %c0_0] : memref<512x27xbf16, #tpu.memory_space<vmem>>, vector<512x27xbf16>
    %c0_1 = arith.constant 0 : index
    %c0_2 = arith.constant 0 : index
    %1 = vector.load %arg2[%c0_1, %c0_2] : memref<27x24xbf16, #tpu.memory_space<vmem>>, vector<27x24xbf16>
    %cst = arith.constant dense<0.000000e+00> : vector<512x24xf32>
    %2 = tpu.matmul %0, %1, %cst {dimension_numbers = #tpu.dot_dimension_numbers<[1], [0], [0], [1], [0, 0, 1, 1], [], []>} : vector<512x27xbf16>, vector<27x24xbf16>, vector<512x24xf32> -> vector<512x24xf32>
    %c0_3 = arith.constant 0 : index
    %c0_4 = arith.constant 0 : index
    %3 = vector.load %arg3[%c0_3, %c0_4] : memref<1x24xf32, #tpu.memory_space<vmem>>, vector<1x24xf32>
    %4 = vector.broadcast %3 : vector<1x24xf32> to vector<512x24xf32>
    %5 = arith.addf %2, %4 : vector<512x24xf32>
    %cst_5 = arith.constant 0.000000e+00 : f32
    %6 = vector.broadcast %cst_5 : f32 to vector<512x24xf32>
    %7 = arith.maximumf %5, %6 : vector<512x24xf32>
    %8 = arith.truncf %7 : vector<512x24xf32> to vector<512x24xbf16>
    %c0_6 = arith.constant 0 : index
    %c0_7 = arith.constant 0 : index
    %9 = vector.load %arg4[%c0_6, %c0_7] : memref<512x24xbf16, #tpu.memory_space<vmem>>, vector<512x24xbf16>
    tpu.vector_store %arg4[%c0_6, %c0_7], %8 {strides = array<i32>} : memref<512x24xbf16, #tpu.memory_space<vmem>>, vector<512x24xbf16>,
    return
  }
  func.func @transform_0(%arg0: i32) -> (i32, i32) {
    %c0_i32 = arith.constant 0 : i32
    %c0_i32_0 = arith.constant 0 : i32
    return %arg0, %c0_i32 : i32, i32
  }
  func.func @transform_1(%arg0: i32) -> (i32, i32) {
    %c0_i32 = arith.constant 0 : i32
    %c0_i32_0 = arith.constant 0 : i32
    %c0_i32_1 = arith.constant 0 : i32
    return %c0_i32, %c0_i32_0 : i32, i32
  }
  func.func @transform_2(%arg0: i32) -> (i32, i32) {
    %c0_i32 = arith.constant 0 : i32
    %c0_i32_0 = arith.constant 0 : i32
    %c0_i32_1 = arith.constant 0 : i32
    return %c0_i32, %c0_i32_0 : i32, i32
  }
  func.func @transform_3(%arg0: i32) -> (i32, i32) {
    %c0_i32 = arith.constant 0 : i32
    %c0_i32_0 = arith.constant 0 : i32
    return %arg0, %c0_i32 : i32, i32
  }
}

module attributes {stable_mosaic.version = 11 : i64} {
  func.func @_matmul_bias_act_kernel(%arg0: i32, %arg1: memref<128x24xbf16, #tpu.memory_space<vmem>>, %arg2: memref<24x48xbf16, #tpu.memory_space<vmem>>, %arg3: memref<1x48xf32, #tpu.memory_space<vmem>>, %arg4: memref<128x48xbf16, #tpu.memory_space<vmem>>) attributes {dimension_semantics = [#tpu.dimension_semantics<parallel>], iteration_bounds = array<i64: 1>, scalar_prefetch = 0 : i64, scratch_operands = 0 : i64, tpu.core_type = #tpu.core_type<tc>, window_params = [{transform_indices = @transform_0, window_bounds = array<i64: 128, 24>}, {pipeline_mode = #tpu.pipeline_mode<synchronous>, transform_indices = @transform_1, window_bounds = array<i64: 24, 48>}, {pipeline_mode = #tpu.pipeline_mode<synchronous>, transform_indices = @transform_2, window_bounds = array<i64: 1, 48>}, {transform_indices = @transform_3, window_bounds = array<i64: 128, 48>}]} {
    %c0 = arith.constant 0 : index
    %c0_0 = arith.constant 0 : index
    %0 = vector.load %arg1[%c0, %c0_0] : memref<128x24xbf16, #tpu.memory_space<vmem>>, vector<128x24xbf16>
    %c0_1 = arith.constant 0 : index
    %c0_2 = arith.constant 0 : index
    %1 = vector.load %arg2[%c0_1, %c0_2] : memref<24x48xbf16, #tpu.memory_space<vmem>>, vector<24x48xbf16>
    %cst = arith.constant dense<0.000000e+00> : vector<128x48xf32>
    %2 = tpu.matmul %0, %1, %cst {dimension_numbers = #tpu.dot_dimension_numbers<[1], [0], [0], [1], [0, 0, 1, 1], [], []>} : vector<128x24xbf16>, vector<24x48xbf16>, vector<128x48xf32> -> vector<128x48xf32>
    %c0_3 = arith.constant 0 : index
    %c0_4 = arith.constant 0 : index
    %3 = vector.load %arg3[%c0_3, %c0_4] : memref<1x48xf32, #tpu.memory_space<vmem>>, vector<1x48xf32>
    %4 = vector.broadcast %3 : vector<1x48xf32> to vector<128x48xf32>
    %5 = arith.addf %2, %4 : vector<128x48xf32>
    %6 = arith.truncf %5 : vector<128x48xf32> to vector<128x48xbf16>
    %c0_5 = arith.constant 0 : index
    %c0_6 = arith.constant 0 : index
    %7 = vector.load %arg4[%c0_5, %c0_6] : memref<128x48xbf16, #tpu.memory_space<vmem>>, vector<128x48xbf16>
    tpu.vector_store %arg4[%c0_5, %c0_6], %6 {strides = array<i32>} : memref<128x48xbf16, #tpu.memory_space<vmem>>, vector<128x48xbf16>,
    return
  }
  func.func @transform_0(%arg0: i32) -> (i32, i32) {
    %c0_i32 = arith.constant 0 : i32
    %c0_i32_0 = arith.constant 0 : i32
    return %arg0, %c0_i32 : i32, i32
  }
  func.func @transform_1(%arg0: i32) -> (i32, i32) {
    %c0_i32 = arith.constant 0 : i32
    %c0_i32_0 = arith.constant 0 : i32
    %c0_i32_1 = arith.constant 0 : i32
    return %c0_i32, %c0_i32_0 : i32, i32
  }
  func.func @transform_2(%arg0: i32) -> (i32, i32) {
    %c0_i32 = arith.constant 0 : i32
    %c0_i32_0 = arith.constant 0 : i32
    %c0_i32_1 = arith.constant 0 : i32
    return %c0_i32, %c0_i32_0 : i32, i32
  }
  func.func @transform_3(%arg0: i32) -> (i32, i32) {
    %c0_i32 = arith.constant 0 : i32
    %c0_i32_0 = arith.constant 0 : i32
    return %arg0, %c0_i32 : i32, i32
  }
}

module attributes {stable_mosaic.version = 11 : i64} {
  func.func @_matmul_bias_act_kernel(%arg0: i32, %arg1: memref<128x24xbf16, #tpu.memory_space<vmem>>, %arg2: memref<24x12xbf16, #tpu.memory_space<vmem>>, %arg3: memref<1x12xf32, #tpu.memory_space<vmem>>, %arg4: memref<128x12xbf16, #tpu.memory_space<vmem>>) attributes {dimension_semantics = [#tpu.dimension_semantics<parallel>], iteration_bounds = array<i64: 1>, scalar_prefetch = 0 : i64, scratch_operands = 0 : i64, tpu.core_type = #tpu.core_type<tc>, window_params = [{transform_indices = @transform_0, window_bounds = array<i64: 128, 24>}, {pipeline_mode = #tpu.pipeline_mode<synchronous>, transform_indices = @transform_1, window_bounds = array<i64: 24, 12>}, {pipeline_mode = #tpu.pipeline_mode<synchronous>, transform_indices = @transform_2, window_bounds = array<i64: 1, 12>}, {transform_indices = @transform_3, window_bounds = array<i64: 128, 12>}]} {
    %c0 = arith.constant 0 : index
    %c0_0 = arith.constant 0 : index
    %0 = vector.load %arg1[%c0, %c0_0] : memref<128x24xbf16, #tpu.memory_space<vmem>>, vector<128x24xbf16>
    %c0_1 = arith.constant 0 : index
    %c0_2 = arith.constant 0 : index
    %1 = vector.load %arg2[%c0_1, %c0_2] : memref<24x12xbf16, #tpu.memory_space<vmem>>, vector<24x12xbf16>
    %cst = arith.constant dense<0.000000e+00> : vector<128x12xf32>
    %2 = tpu.matmul %0, %1, %cst {dimension_numbers = #tpu.dot_dimension_numbers<[1], [0], [0], [1], [0, 0, 1, 1], [], []>} : vector<128x24xbf16>, vector<24x12xbf16>, vector<128x12xf32> -> vector<128x12xf32>
    %c0_3 = arith.constant 0 : index
    %c0_4 = arith.constant 0 : index
    %3 = vector.load %arg3[%c0_3, %c0_4] : memref<1x12xf32, #tpu.memory_space<vmem>>, vector<1x12xf32>
    %4 = vector.broadcast %3 : vector<1x12xf32> to vector<128x12xf32>
    %5 = arith.addf %2, %4 : vector<128x12xf32>
    %cst_5 = arith.constant 0.000000e+00 : f32
    %6 = vector.broadcast %cst_5 : f32 to vector<128x12xf32>
    %7 = arith.maximumf %5, %6 : vector<128x12xf32>
    %8 = arith.truncf %7 : vector<128x12xf32> to vector<128x12xbf16>
    %c0_6 = arith.constant 0 : index
    %c0_7 = arith.constant 0 : index
    %9 = vector.load %arg4[%c0_6, %c0_7] : memref<128x12xbf16, #tpu.memory_space<vmem>>, vector<128x12xbf16>
    tpu.vector_store %arg4[%c0_6, %c0_7], %8 {strides = array<i32>} : memref<128x12xbf16, #tpu.memory_space<vmem>>, vector<128x12xbf16>,
    return
  }
  func.func @transform_0(%arg0: i32) -> (i32, i32) {
    %c0_i32 = arith.constant 0 : i32
    %c0_i32_0 = arith.constant 0 : i32
    return %arg0, %c0_i32 : i32, i32
  }
  func.func @transform_1(%arg0: i32) -> (i32, i32) {
    %c0_i32 = arith.constant 0 : i32
    %c0_i32_0 = arith.constant 0 : i32
    %c0_i32_1 = arith.constant 0 : i32
    return %c0_i32, %c0_i32_0 : i32, i32
  }
  func.func @transform_2(%arg0: i32) -> (i32, i32) {
    %c0_i32 = arith.constant 0 : i32
    %c0_i32_0 = arith.constant 0 : i32
    %c0_i32_1 = arith.constant 0 : i32
    return %c0_i32, %c0_i32_0 : i32, i32
  }
  func.func @transform_3(%arg0: i32) -> (i32, i32) {
    %c0_i32 = arith.constant 0 : i32
    %c0_i32_0 = arith.constant 0 : i32
    return %arg0, %c0_i32 : i32, i32
  }
}

module attributes {stable_mosaic.version = 11 : i64} {
  func.func @_matmul_bias_act_kernel(%arg0: i32, %arg1: memref<128x48xbf16, #tpu.memory_space<vmem>>, %arg2: memref<48x12xbf16, #tpu.memory_space<vmem>>, %arg3: memref<1x12xf32, #tpu.memory_space<vmem>>, %arg4: memref<128x12xbf16, #tpu.memory_space<vmem>>) attributes {dimension_semantics = [#tpu.dimension_semantics<parallel>], iteration_bounds = array<i64: 1>, scalar_prefetch = 0 : i64, scratch_operands = 0 : i64, tpu.core_type = #tpu.core_type<tc>, window_params = [{transform_indices = @transform_0, window_bounds = array<i64: 128, 48>}, {pipeline_mode = #tpu.pipeline_mode<synchronous>, transform_indices = @transform_1, window_bounds = array<i64: 48, 12>}, {pipeline_mode = #tpu.pipeline_mode<synchronous>, transform_indices = @transform_2, window_bounds = array<i64: 1, 12>}, {transform_indices = @transform_3, window_bounds = array<i64: 128, 12>}]} {
    %c0 = arith.constant 0 : index
    %c0_0 = arith.constant 0 : index
    %0 = vector.load %arg1[%c0, %c0_0] : memref<128x48xbf16, #tpu.memory_space<vmem>>, vector<128x48xbf16>
    %c0_1 = arith.constant 0 : index
    %c0_2 = arith.constant 0 : index
    %1 = vector.load %arg2[%c0_1, %c0_2] : memref<48x12xbf16, #tpu.memory_space<vmem>>, vector<48x12xbf16>
    %cst = arith.constant dense<0.000000e+00> : vector<128x12xf32>
    %2 = tpu.matmul %0, %1, %cst {dimension_numbers = #tpu.dot_dimension_numbers<[1], [0], [0], [1], [0, 0, 1, 1], [], []>} : vector<128x48xbf16>, vector<48x12xbf16>, vector<128x12xf32> -> vector<128x12xf32>
    %c0_3 = arith.constant 0 : index
    %c0_4 = arith.constant 0 : index
    %3 = vector.load %arg3[%c0_3, %c0_4] : memref<1x12xf32, #tpu.memory_space<vmem>>, vector<1x12xf32>
    %4 = vector.broadcast %3 : vector<1x12xf32> to vector<128x12xf32>
    %5 = arith.addf %2, %4 : vector<128x12xf32>
    %cst_5 = arith.constant 0.000000e+00 : f32
    %6 = vector.broadcast %cst_5 : f32 to vector<128x12xf32>
    %7 = arith.maximumf %5, %6 : vector<128x12xf32>
    %8 = arith.truncf %7 : vector<128x12xf32> to vector<128x12xbf16>
    %c0_6 = arith.constant 0 : index
    %c0_7 = arith.constant 0 : index
    %9 = vector.load %arg4[%c0_6, %c0_7] : memref<128x12xbf16, #tpu.memory_space<vmem>>, vector<128x12xbf16>
    tpu.vector_store %arg4[%c0_6, %c0_7], %8 {strides = array<i32>} : memref<128x12xbf16, #tpu.memory_space<vmem>>, vector<128x12xbf16>,
    return
  }
  func.func @transform_0(%arg0: i32) -> (i32, i32) {
    %c0_i32 = arith.constant 0 : i32
    %c0_i32_0 = arith.constant 0 : i32
    return %arg0, %c0_i32 : i32, i32
  }
  func.func @transform_1(%arg0: i32) -> (i32, i32) {
    %c0_i32 = arith.constant 0 : i32
    %c0_i32_0 = arith.constant 0 : i32
    %c0_i32_1 = arith.constant 0 : i32
    return %c0_i32, %c0_i32_0 : i32, i32
  }
  func.func @transform_2(%arg0: i32) -> (i32, i32) {
    %c0_i32 = arith.constant 0 : i32
    %c0_i32_0 = arith.constant 0 : i32
    %c0_i32_1 = arith.constant 0 : i32
    return %c0_i32, %c0_i32_0 : i32, i32
  }
  func.func @transform_3(%arg0: i32) -> (i32, i32) {
    %c0_i32 = arith.constant 0 : i32
    %c0_i32_0 = arith.constant 0 : i32
    return %arg0, %c0_i32 : i32, i32
  }
}

module attributes {stable_mosaic.version = 11 : i64} {
  func.func @_dwconv3x3_bias_kernel(%arg0: i32, %arg1: memref<1x10x10x12xbf16, #tpu.memory_space<vmem>>, %arg2: memref<9x12xf32, #tpu.memory_space<vmem>>, %arg3: memref<1x12xf32, #tpu.memory_space<vmem>>, %arg4: memref<1x8x8x12xbf16, #tpu.memory_space<vmem>>) attributes {dimension_semantics = [#tpu.dimension_semantics<parallel>], iteration_bounds = array<i64: 2>, scalar_prefetch = 0 : i64, scratch_operands = 0 : i64, tpu.core_type = #tpu.core_type<tc>, window_params = [{transform_indices = @transform_0, window_bounds = array<i64: 1, 10, 10, 12>}, {pipeline_mode = #tpu.pipeline_mode<synchronous>, transform_indices = @transform_1, window_bounds = array<i64: 9, 12>}, {pipeline_mode = #tpu.pipeline_mode<synchronous>, transform_indices = @transform_2, window_bounds = array<i64: 1, 12>}, {transform_indices = @transform_3, window_bounds = array<i64: 1, 8, 8, 12>}]} {
    %c0 = arith.constant 0 : index
    %c0_0 = arith.constant 0 : index
    %c0_1 = arith.constant 0 : index
    %c0_2 = arith.constant 0 : index
    %0 = vector.load %arg1[%c0, %c0_0, %c0_1, %c0_2] : memref<1x10x10x12xbf16, #tpu.memory_space<vmem>>, vector<1x8x10x12xbf16>
    %1 = vector.shape_cast %0 : vector<1x8x10x12xbf16> to vector<8x10x12xbf16>
    %2 = arith.extf %1 : vector<8x10x12xbf16> to vector<8x10x12xf32>
    %c0_3 = arith.constant 0 : index
    %c1 = arith.constant 1 : index
    %c0_4 = arith.constant 0 : index
    %c0_5 = arith.constant 0 : index
    %3 = vector.load %arg1[%c0_3, %c1, %c0_4, %c0_5] : memref<1x10x10x12xbf16, #tpu.memory_space<vmem>>, vector<1x8x10x12xbf16>
    %4 = vector.shape_cast %3 : vector<1x8x10x12xbf16> to vector<8x10x12xbf16>
    %5 = arith.extf %4 : vector<8x10x12xbf16> to vector<8x10x12xf32>
    %c0_6 = arith.constant 0 : index
    %c2 = arith.constant 2 : index
    %c0_7 = arith.constant 0 : index
    %c0_8 = arith.constant 0 : index
    %6 = vector.load %arg1[%c0_6, %c2, %c0_7, %c0_8] : memref<1x10x10x12xbf16, #tpu.memory_space<vmem>>, vector<1x8x10x12xbf16>
    %7 = vector.shape_cast %6 : vector<1x8x10x12xbf16> to vector<8x10x12xbf16>
    %8 = arith.extf %7 : vector<8x10x12xbf16> to vector<8x10x12xf32>
    %cst = arith.constant 0.000000e+00 : f32
    %9 = vector.broadcast %cst : f32 to vector<8x8x12xf32>
    %c0_9 = arith.constant 0 : index
    %c0_10 = arith.constant 0 : index
    %10 = vector.load %arg2[%c0_9, %c0_10] : memref<9x12xf32, #tpu.memory_space<vmem>>, vector<1x12xf32>
    %11 = vector.shape_cast %10 : vector<1x12xf32> to vector<12xf32>
    %12 = vector.shape_cast %11 : vector<12xf32> to vector<1x1x12xf32>
    %13 = vector.broadcast %12 : vector<1x1x12xf32> to vector<8x10x12xf32>
    %14 = arith.mulf %2, %13 : vector<8x10x12xf32>
    %c3 = arith.constant 3 : index
    %c0_11 = arith.constant 0 : index
    %15 = vector.load %arg2[%c3, %c0_11] : memref<9x12xf32, #tpu.memory_space<vmem>>, vector<1x12xf32>
    %16 = vector.shape_cast %15 : vector<1x12xf32> to vector<12xf32>
    %17 = vector.shape_cast %16 : vector<12xf32> to vector<1x1x12xf32>
    %18 = vector.broadcast %17 : vector<1x1x12xf32> to vector<8x10x12xf32>
    %19 = arith.mulf %5, %18 : vector<8x10x12xf32>
    %20 = arith.addf %14, %19 : vector<8x10x12xf32>
    %c6 = arith.constant 6 : index
    %c0_12 = arith.constant 0 : index
    %21 = vector.load %arg2[%c6, %c0_12] : memref<9x12xf32, #tpu.memory_space<vmem>>, vector<1x12xf32>
    %22 = vector.shape_cast %21 : vector<1x12xf32> to vector<12xf32>
    %23 = vector.shape_cast %22 : vector<12xf32> to vector<1x1x12xf32>
    %24 = vector.broadcast %23 : vector<1x1x12xf32> to vector<8x10x12xf32>
    %25 = arith.mulf %8, %24 : vector<8x10x12xf32>
    %26 = arith.addf %20, %25 : vector<8x10x12xf32>
    %27 = vector.extract_strided_slice %26 {offsets = [0, 0, 0], sizes = [8, 8, 12], strides = [1, 1, 1]} : vector<8x10x12xf32> to vector<8x8x12xf32>
    %28 = arith.addf %9, %27 : vector<8x8x12xf32>
    %c1_13 = arith.constant 1 : index
    %c0_14 = arith.constant 0 : index
    %29 = vector.load %arg2[%c1_13, %c0_14] : memref<9x12xf32, #tpu.memory_space<vmem>>, vector<1x12xf32>
    %30 = vector.shape_cast %29 : vector<1x12xf32> to vector<12xf32>
    %31 = vector.shape_cast %30 : vector<12xf32> to vector<1x1x12xf32>
    %32 = vector.broadcast %31 : vector<1x1x12xf32> to vector<8x10x12xf32>
    %33 = arith.mulf %2, %32 : vector<8x10x12xf32>
    %c4 = arith.constant 4 : index
    %c0_15 = arith.constant 0 : index
    %34 = vector.load %arg2[%c4, %c0_15] : memref<9x12xf32, #tpu.memory_space<vmem>>, vector<1x12xf32>
    %35 = vector.shape_cast %34 : vector<1x12xf32> to vector<12xf32>
    %36 = vector.shape_cast %35 : vector<12xf32> to vector<1x1x12xf32>
    %37 = vector.broadcast %36 : vector<1x1x12xf32> to vector<8x10x12xf32>
    %38 = arith.mulf %5, %37 : vector<8x10x12xf32>
    %39 = arith.addf %33, %38 : vector<8x10x12xf32>
    %c7 = arith.constant 7 : index
    %c0_16 = arith.constant 0 : index
    %40 = vector.load %arg2[%c7, %c0_16] : memref<9x12xf32, #tpu.memory_space<vmem>>, vector<1x12xf32>
    %41 = vector.shape_cast %40 : vector<1x12xf32> to vector<12xf32>
    %42 = vector.shape_cast %41 : vector<12xf32> to vector<1x1x12xf32>
    %43 = vector.broadcast %42 : vector<1x1x12xf32> to vector<8x10x12xf32>
    %44 = arith.mulf %8, %43 : vector<8x10x12xf32>
    %45 = arith.addf %39, %44 : vector<8x10x12xf32>
    %46 = vector.extract_strided_slice %45 {offsets = [0, 1, 0], sizes = [8, 8, 12], strides = [1, 1, 1]} : vector<8x10x12xf32> to vector<8x8x12xf32>
    %47 = arith.addf %28, %46 : vector<8x8x12xf32>
    %c2_17 = arith.constant 2 : index
    %c0_18 = arith.constant 0 : index
    %48 = vector.load %arg2[%c2_17, %c0_18] : memref<9x12xf32, #tpu.memory_space<vmem>>, vector<1x12xf32>
    %49 = vector.shape_cast %48 : vector<1x12xf32> to vector<12xf32>
    %50 = vector.shape_cast %49 : vector<12xf32> to vector<1x1x12xf32>
    %51 = vector.broadcast %50 : vector<1x1x12xf32> to vector<8x10x12xf32>
    %52 = arith.mulf %2, %51 : vector<8x10x12xf32>
    %c5 = arith.constant 5 : index
    %c0_19 = arith.constant 0 : index
    %53 = vector.load %arg2[%c5, %c0_19] : memref<9x12xf32, #tpu.memory_space<vmem>>, vector<1x12xf32>
    %54 = vector.shape_cast %53 : vector<1x12xf32> to vector<12xf32>
    %55 = vector.shape_cast %54 : vector<12xf32> to vector<1x1x12xf32>
    %56 = vector.broadcast %55 : vector<1x1x12xf32> to vector<8x10x12xf32>
    %57 = arith.mulf %5, %56 : vector<8x10x12xf32>
    %58 = arith.addf %52, %57 : vector<8x10x12xf32>
    %c8 = arith.constant 8 : index
    %c0_20 = arith.constant 0 : index
    %59 = vector.load %arg2[%c8, %c0_20] : memref<9x12xf32, #tpu.memory_space<vmem>>, vector<1x12xf32>
    %60 = vector.shape_cast %59 : vector<1x12xf32> to vector<12xf32>
    %61 = vector.shape_cast %60 : vector<12xf32> to vector<1x1x12xf32>
    %62 = vector.broadcast %61 : vector<1x1x12xf32> to vector<8x10x12xf32>
    %63 = arith.mulf %8, %62 : vector<8x10x12xf32>
    %64 = arith.addf %58, %63 : vector<8x10x12xf32>
    %65 = vector.extract_strided_slice %64 {offsets = [0, 2, 0], sizes = [8, 8, 12], strides = [1, 1, 1]} : vector<8x10x12xf32> to vector<8x8x12xf32>
    %66 = arith.addf %47, %65 : vector<8x8x12xf32>
    %c0_21 = arith.constant 0 : index
    %c0_22 = arith.constant 0 : index
    %67 = vector.load %arg3[%c0_21, %c0_22] : memref<1x12xf32, #tpu.memory_space<vmem>>, vector<1x12xf32>
    %68 = vector.shape_cast %67 : vector<1x12xf32> to vector<12xf32>
    %69 = vector.shape_cast %68 : vector<12xf32> to vector<1x1x12xf32>
    %70 = vector.broadcast %69 : vector<1x1x12xf32> to vector<8x8x12xf32>
    %71 = arith.addf %66, %70 : vector<8x8x12xf32>
    %72 = arith.truncf %71 : vector<8x8x12xf32> to vector<8x8x12xbf16>
    %c0_23 = arith.constant 0 : index
    %c0_24 = arith.constant 0 : index
    %c0_25 = arith.constant 0 : index
    %c0_26 = arith.constant 0 : index
    %73 = vector.load %arg4[%c0_23, %c0_24, %c0_25, %c0_26] : memref<1x8x8x12xbf16, #tpu.memory_space<vmem>>, vector<1x8x8x12xbf16>
    %74 = vector.shape_cast %73 : vector<1x8x8x12xbf16> to vector<8x8x12xbf16>
    %75 = vector.shape_cast %72 : vector<8x8x12xbf16> to vector<1x8x8x12xbf16>
    tpu.vector_store %arg4[%c0_23, %c0_24, %c0_25, %c0_26], %75 {strides = array<i32>} : memref<1x8x8x12xbf16, #tpu.memory_space<vmem>>, vector<1x8x8x12xbf16>,
    return
  }
  func.func @transform_0(%arg0: i32) -> (i32, i32, i32, i32) {
    %c0_i32 = arith.constant 0 : i32
    %c0_i32_0 = arith.constant 0 : i32
    %c0_i32_1 = arith.constant 0 : i32
    %c0_i32_2 = arith.constant 0 : i32
    return %arg0, %c0_i32, %c0_i32_0, %c0_i32_1 : i32, i32, i32, i32
  }
  func.func @transform_1(%arg0: i32) -> (i32, i32) {
    %c0_i32 = arith.constant 0 : i32
    %c0_i32_0 = arith.constant 0 : i32
    %c0_i32_1 = arith.constant 0 : i32
    return %c0_i32, %c0_i32_0 : i32, i32
  }
  func.func @transform_2(%arg0: i32) -> (i32, i32) {
    %c0_i32 = arith.constant 0 : i32
    %c0_i32_0 = arith.constant 0 : i32
    %c0_i32_1 = arith.constant 0 : i32
    return %c0_i32, %c0_i32_0 : i32, i32
  }
  func.func @transform_3(%arg0: i32) -> (i32, i32, i32, i32) {
    %c0_i32 = arith.constant 0 : i32
    %c0_i32_0 = arith.constant 0 : i32
    %c0_i32_1 = arith.constant 0 : i32
    %c0_i32_2 = arith.constant 0 : i32
    return %arg0, %c0_i32, %c0_i32_0, %c0_i32_1 : i32, i32, i32, i32
  }
}

module attributes {stable_mosaic.version = 11 : i64} {
  func.func @_matmul_bias_act_res_kernel(%arg0: i32, %arg1: memref<128x12xbf16, #tpu.memory_space<vmem>>, %arg2: memref<12x48xbf16, #tpu.memory_space<vmem>>, %arg3: memref<1x48xf32, #tpu.memory_space<vmem>>, %arg4: memref<128x48xbf16, #tpu.memory_space<vmem>>, %arg5: memref<128x48xbf16, #tpu.memory_space<vmem>>) attributes {dimension_semantics = [#tpu.dimension_semantics<parallel>], iteration_bounds = array<i64: 1>, scalar_prefetch = 0 : i64, scratch_operands = 0 : i64, tpu.core_type = #tpu.core_type<tc>, window_params = [{transform_indices = @transform_0, window_bounds = array<i64: 128, 12>}, {pipeline_mode = #tpu.pipeline_mode<synchronous>, transform_indices = @transform_1, window_bounds = array<i64: 12, 48>}, {pipeline_mode = #tpu.pipeline_mode<synchronous>, transform_indices = @transform_2, window_bounds = array<i64: 1, 48>}, {transform_indices = @transform_3, window_bounds = array<i64: 128, 48>}, {transform_indices = @transform_4, window_bounds = array<i64: 128, 48>}]} {
    %c0 = arith.constant 0 : index
    %c0_0 = arith.constant 0 : index
    %0 = vector.load %arg1[%c0, %c0_0] : memref<128x12xbf16, #tpu.memory_space<vmem>>, vector<128x12xbf16>
    %c0_1 = arith.constant 0 : index
    %c0_2 = arith.constant 0 : index
    %1 = vector.load %arg2[%c0_1, %c0_2] : memref<12x48xbf16, #tpu.memory_space<vmem>>, vector<12x48xbf16>
    %cst = arith.constant dense<0.000000e+00> : vector<128x48xf32>
    %2 = tpu.matmul %0, %1, %cst {dimension_numbers = #tpu.dot_dimension_numbers<[1], [0], [0], [1], [0, 0, 1, 1], [], []>} : vector<128x12xbf16>, vector<12x48xbf16>, vector<128x48xf32> -> vector<128x48xf32>
    %c0_3 = arith.constant 0 : index
    %c0_4 = arith.constant 0 : index
    %3 = vector.load %arg3[%c0_3, %c0_4] : memref<1x48xf32, #tpu.memory_space<vmem>>, vector<1x48xf32>
    %4 = vector.broadcast %3 : vector<1x48xf32> to vector<128x48xf32>
    %5 = arith.addf %2, %4 : vector<128x48xf32>
    %cst_5 = arith.constant 0.000000e+00 : f32
    %6 = vector.broadcast %cst_5 : f32 to vector<128x48xf32>
    %7 = arith.maximumf %5, %6 : vector<128x48xf32>
    %c0_6 = arith.constant 0 : index
    %c0_7 = arith.constant 0 : index
    %8 = vector.load %arg4[%c0_6, %c0_7] : memref<128x48xbf16, #tpu.memory_space<vmem>>, vector<128x48xbf16>
    %9 = arith.extf %8 : vector<128x48xbf16> to vector<128x48xf32>
    %10 = arith.addf %7, %9 : vector<128x48xf32>
    %11 = arith.truncf %10 : vector<128x48xf32> to vector<128x48xbf16>
    %c0_8 = arith.constant 0 : index
    %c0_9 = arith.constant 0 : index
    %12 = vector.load %arg5[%c0_8, %c0_9] : memref<128x48xbf16, #tpu.memory_space<vmem>>, vector<128x48xbf16>
    tpu.vector_store %arg5[%c0_8, %c0_9], %11 {strides = array<i32>} : memref<128x48xbf16, #tpu.memory_space<vmem>>, vector<128x48xbf16>,
    return
  }
  func.func @transform_0(%arg0: i32) -> (i32, i32) {
    %c0_i32 = arith.constant 0 : i32
    %c0_i32_0 = arith.constant 0 : i32
    return %arg0, %c0_i32 : i32, i32
  }
  func.func @transform_1(%arg0: i32) -> (i32, i32) {
    %c0_i32 = arith.constant 0 : i32
    %c0_i32_0 = arith.constant 0 : i32
    %c0_i32_1 = arith.constant 0 : i32
    return %c0_i32, %c0_i32_0 : i32, i32
  }
  func.func @transform_2(%arg0: i32) -> (i32, i32) {
    %c0_i32 = arith.constant 0 : i32
    %c0_i32_0 = arith.constant 0 : i32
    %c0_i32_1 = arith.constant 0 : i32
    return %c0_i32, %c0_i32_0 : i32, i32
  }
  func.func @transform_3(%arg0: i32) -> (i32, i32) {
    %c0_i32 = arith.constant 0 : i32
    %c0_i32_0 = arith.constant 0 : i32
    return %arg0, %c0_i32 : i32, i32
  }
  func.func @transform_4(%arg0: i32) -> (i32, i32) {
    %c0_i32 = arith.constant 0 : i32
    %c0_i32_0 = arith.constant 0 : i32
    return %arg0, %c0_i32 : i32, i32
  }
}

module attributes {stable_mosaic.version = 11 : i64} {
  func.func @_matmul_bias_act_kernel(%arg0: i32, %arg1: memref<128x48xbf16, #tpu.memory_space<vmem>>, %arg2: memref<48x24xbf16, #tpu.memory_space<vmem>>, %arg3: memref<1x24xf32, #tpu.memory_space<vmem>>, %arg4: memref<128x24xbf16, #tpu.memory_space<vmem>>) attributes {dimension_semantics = [#tpu.dimension_semantics<parallel>], iteration_bounds = array<i64: 1>, scalar_prefetch = 0 : i64, scratch_operands = 0 : i64, tpu.core_type = #tpu.core_type<tc>, window_params = [{transform_indices = @transform_0, window_bounds = array<i64: 128, 48>}, {pipeline_mode = #tpu.pipeline_mode<synchronous>, transform_indices = @transform_1, window_bounds = array<i64: 48, 24>}, {pipeline_mode = #tpu.pipeline_mode<synchronous>, transform_indices = @transform_2, window_bounds = array<i64: 1, 24>}, {transform_indices = @transform_3, window_bounds = array<i64: 128, 24>}]} {
    %c0 = arith.constant 0 : index
    %c0_0 = arith.constant 0 : index
    %0 = vector.load %arg1[%c0, %c0_0] : memref<128x48xbf16, #tpu.memory_space<vmem>>, vector<128x48xbf16>
    %c0_1 = arith.constant 0 : index
    %c0_2 = arith.constant 0 : index
    %1 = vector.load %arg2[%c0_1, %c0_2] : memref<48x24xbf16, #tpu.memory_space<vmem>>, vector<48x24xbf16>
    %cst = arith.constant dense<0.000000e+00> : vector<128x24xf32>
    %2 = tpu.matmul %0, %1, %cst {dimension_numbers = #tpu.dot_dimension_numbers<[1], [0], [0], [1], [0, 0, 1, 1], [], []>} : vector<128x48xbf16>, vector<48x24xbf16>, vector<128x24xf32> -> vector<128x24xf32>
    %c0_3 = arith.constant 0 : index
    %c0_4 = arith.constant 0 : index
    %3 = vector.load %arg3[%c0_3, %c0_4] : memref<1x24xf32, #tpu.memory_space<vmem>>, vector<1x24xf32>
    %4 = vector.broadcast %3 : vector<1x24xf32> to vector<128x24xf32>
    %5 = arith.addf %2, %4 : vector<128x24xf32>
    %cst_5 = arith.constant 0.000000e+00 : f32
    %6 = vector.broadcast %cst_5 : f32 to vector<128x24xf32>
    %7 = arith.maximumf %5, %6 : vector<128x24xf32>
    %8 = arith.truncf %7 : vector<128x24xf32> to vector<128x24xbf16>
    %c0_6 = arith.constant 0 : index
    %c0_7 = arith.constant 0 : index
    %9 = vector.load %arg4[%c0_6, %c0_7] : memref<128x24xbf16, #tpu.memory_space<vmem>>, vector<128x24xbf16>
    tpu.vector_store %arg4[%c0_6, %c0_7], %8 {strides = array<i32>} : memref<128x24xbf16, #tpu.memory_space<vmem>>, vector<128x24xbf16>,
    return
  }
  func.func @transform_0(%arg0: i32) -> (i32, i32) {
    %c0_i32 = arith.constant 0 : i32
    %c0_i32_0 = arith.constant 0 : i32
    return %arg0, %c0_i32 : i32, i32
  }
  func.func @transform_1(%arg0: i32) -> (i32, i32) {
    %c0_i32 = arith.constant 0 : i32
    %c0_i32_0 = arith.constant 0 : i32
    %c0_i32_1 = arith.constant 0 : i32
    return %c0_i32, %c0_i32_0 : i32, i32
  }
  func.func @transform_2(%arg0: i32) -> (i32, i32) {
    %c0_i32 = arith.constant 0 : i32
    %c0_i32_0 = arith.constant 0 : i32
    %c0_i32_1 = arith.constant 0 : i32
    return %c0_i32, %c0_i32_0 : i32, i32
  }
  func.func @transform_3(%arg0: i32) -> (i32, i32) {
    %c0_i32 = arith.constant 0 : i32
    %c0_i32_0 = arith.constant 0 : i32
    return %arg0, %c0_i32 : i32, i32
  }
}

module attributes {stable_mosaic.version = 11 : i64} {
  func.func @_matmul_bias_act_kernel(%arg0: i32, %arg1: memref<128x48xbf16, #tpu.memory_space<vmem>>, %arg2: memref<48x96xbf16, #tpu.memory_space<vmem>>, %arg3: memref<1x96xf32, #tpu.memory_space<vmem>>, %arg4: memref<128x96xbf16, #tpu.memory_space<vmem>>) attributes {dimension_semantics = [#tpu.dimension_semantics<parallel>], iteration_bounds = array<i64: 1>, scalar_prefetch = 0 : i64, scratch_operands = 0 : i64, tpu.core_type = #tpu.core_type<tc>, window_params = [{transform_indices = @transform_0, window_bounds = array<i64: 128, 48>}, {pipeline_mode = #tpu.pipeline_mode<synchronous>, transform_indices = @transform_1, window_bounds = array<i64: 48, 96>}, {pipeline_mode = #tpu.pipeline_mode<synchronous>, transform_indices = @transform_2, window_bounds = array<i64: 1, 96>}, {transform_indices = @transform_3, window_bounds = array<i64: 128, 96>}]} {
    %c0 = arith.constant 0 : index
    %c0_0 = arith.constant 0 : index
    %0 = vector.load %arg1[%c0, %c0_0] : memref<128x48xbf16, #tpu.memory_space<vmem>>, vector<128x48xbf16>
    %c0_1 = arith.constant 0 : index
    %c0_2 = arith.constant 0 : index
    %1 = vector.load %arg2[%c0_1, %c0_2] : memref<48x96xbf16, #tpu.memory_space<vmem>>, vector<48x96xbf16>
    %cst = arith.constant dense<0.000000e+00> : vector<128x96xf32>
    %2 = tpu.matmul %0, %1, %cst {dimension_numbers = #tpu.dot_dimension_numbers<[1], [0], [0], [1], [0, 0, 1, 1], [], []>} : vector<128x48xbf16>, vector<48x96xbf16>, vector<128x96xf32> -> vector<128x96xf32>
    %c0_3 = arith.constant 0 : index
    %c0_4 = arith.constant 0 : index
    %3 = vector.load %arg3[%c0_3, %c0_4] : memref<1x96xf32, #tpu.memory_space<vmem>>, vector<1x96xf32>
    %4 = vector.broadcast %3 : vector<1x96xf32> to vector<128x96xf32>
    %5 = arith.addf %2, %4 : vector<128x96xf32>
    %6 = arith.truncf %5 : vector<128x96xf32> to vector<128x96xbf16>
    %c0_5 = arith.constant 0 : index
    %c0_6 = arith.constant 0 : index
    %7 = vector.load %arg4[%c0_5, %c0_6] : memref<128x96xbf16, #tpu.memory_space<vmem>>, vector<128x96xbf16>
    tpu.vector_store %arg4[%c0_5, %c0_6], %6 {strides = array<i32>} : memref<128x96xbf16, #tpu.memory_space<vmem>>, vector<128x96xbf16>,
    return
  }
  func.func @transform_0(%arg0: i32) -> (i32, i32) {
    %c0_i32 = arith.constant 0 : i32
    %c0_i32_0 = arith.constant 0 : i32
    return %arg0, %c0_i32 : i32, i32
  }
  func.func @transform_1(%arg0: i32) -> (i32, i32) {
    %c0_i32 = arith.constant 0 : i32
    %c0_i32_0 = arith.constant 0 : i32
    %c0_i32_1 = arith.constant 0 : i32
    return %c0_i32, %c0_i32_0 : i32, i32
  }
  func.func @transform_2(%arg0: i32) -> (i32, i32) {
    %c0_i32 = arith.constant 0 : i32
    %c0_i32_0 = arith.constant 0 : i32
    %c0_i32_1 = arith.constant 0 : i32
    return %c0_i32, %c0_i32_0 : i32, i32
  }
  func.func @transform_3(%arg0: i32) -> (i32, i32) {
    %c0_i32 = arith.constant 0 : i32
    %c0_i32_0 = arith.constant 0 : i32
    return %arg0, %c0_i32 : i32, i32
  }
}

module attributes {stable_mosaic.version = 11 : i64} {
  func.func @_dwconv3x3_bias_kernel(%arg0: i32, %arg1: memref<1x10x10x24xbf16, #tpu.memory_space<vmem>>, %arg2: memref<9x24xf32, #tpu.memory_space<vmem>>, %arg3: memref<1x24xf32, #tpu.memory_space<vmem>>, %arg4: memref<1x8x8x24xbf16, #tpu.memory_space<vmem>>) attributes {dimension_semantics = [#tpu.dimension_semantics<parallel>], iteration_bounds = array<i64: 2>, scalar_prefetch = 0 : i64, scratch_operands = 0 : i64, tpu.core_type = #tpu.core_type<tc>, window_params = [{transform_indices = @transform_0, window_bounds = array<i64: 1, 10, 10, 24>}, {pipeline_mode = #tpu.pipeline_mode<synchronous>, transform_indices = @transform_1, window_bounds = array<i64: 9, 24>}, {pipeline_mode = #tpu.pipeline_mode<synchronous>, transform_indices = @transform_2, window_bounds = array<i64: 1, 24>}, {transform_indices = @transform_3, window_bounds = array<i64: 1, 8, 8, 24>}]} {
    %c0 = arith.constant 0 : index
    %c0_0 = arith.constant 0 : index
    %c0_1 = arith.constant 0 : index
    %c0_2 = arith.constant 0 : index
    %0 = vector.load %arg1[%c0, %c0_0, %c0_1, %c0_2] : memref<1x10x10x24xbf16, #tpu.memory_space<vmem>>, vector<1x8x10x24xbf16>
    %1 = vector.shape_cast %0 : vector<1x8x10x24xbf16> to vector<8x10x24xbf16>
    %2 = arith.extf %1 : vector<8x10x24xbf16> to vector<8x10x24xf32>
    %c0_3 = arith.constant 0 : index
    %c1 = arith.constant 1 : index
    %c0_4 = arith.constant 0 : index
    %c0_5 = arith.constant 0 : index
    %3 = vector.load %arg1[%c0_3, %c1, %c0_4, %c0_5] : memref<1x10x10x24xbf16, #tpu.memory_space<vmem>>, vector<1x8x10x24xbf16>
    %4 = vector.shape_cast %3 : vector<1x8x10x24xbf16> to vector<8x10x24xbf16>
    %5 = arith.extf %4 : vector<8x10x24xbf16> to vector<8x10x24xf32>
    %c0_6 = arith.constant 0 : index
    %c2 = arith.constant 2 : index
    %c0_7 = arith.constant 0 : index
    %c0_8 = arith.constant 0 : index
    %6 = vector.load %arg1[%c0_6, %c2, %c0_7, %c0_8] : memref<1x10x10x24xbf16, #tpu.memory_space<vmem>>, vector<1x8x10x24xbf16>
    %7 = vector.shape_cast %6 : vector<1x8x10x24xbf16> to vector<8x10x24xbf16>
    %8 = arith.extf %7 : vector<8x10x24xbf16> to vector<8x10x24xf32>
    %cst = arith.constant 0.000000e+00 : f32
    %9 = vector.broadcast %cst : f32 to vector<8x8x24xf32>
    %c0_9 = arith.constant 0 : index
    %c0_10 = arith.constant 0 : index
    %10 = vector.load %arg2[%c0_9, %c0_10] : memref<9x24xf32, #tpu.memory_space<vmem>>, vector<1x24xf32>
    %11 = vector.shape_cast %10 : vector<1x24xf32> to vector<24xf32>
    %12 = vector.shape_cast %11 : vector<24xf32> to vector<1x1x24xf32>
    %13 = vector.broadcast %12 : vector<1x1x24xf32> to vector<8x10x24xf32>
    %14 = arith.mulf %2, %13 : vector<8x10x24xf32>
    %c3 = arith.constant 3 : index
    %c0_11 = arith.constant 0 : index
    %15 = vector.load %arg2[%c3, %c0_11] : memref<9x24xf32, #tpu.memory_space<vmem>>, vector<1x24xf32>
    %16 = vector.shape_cast %15 : vector<1x24xf32> to vector<24xf32>
    %17 = vector.shape_cast %16 : vector<24xf32> to vector<1x1x24xf32>
    %18 = vector.broadcast %17 : vector<1x1x24xf32> to vector<8x10x24xf32>
    %19 = arith.mulf %5, %18 : vector<8x10x24xf32>
    %20 = arith.addf %14, %19 : vector<8x10x24xf32>
    %c6 = arith.constant 6 : index
    %c0_12 = arith.constant 0 : index
    %21 = vector.load %arg2[%c6, %c0_12] : memref<9x24xf32, #tpu.memory_space<vmem>>, vector<1x24xf32>
    %22 = vector.shape_cast %21 : vector<1x24xf32> to vector<24xf32>
    %23 = vector.shape_cast %22 : vector<24xf32> to vector<1x1x24xf32>
    %24 = vector.broadcast %23 : vector<1x1x24xf32> to vector<8x10x24xf32>
    %25 = arith.mulf %8, %24 : vector<8x10x24xf32>
    %26 = arith.addf %20, %25 : vector<8x10x24xf32>
    %27 = vector.extract_strided_slice %26 {offsets = [0, 0, 0], sizes = [8, 8, 24], strides = [1, 1, 1]} : vector<8x10x24xf32> to vector<8x8x24xf32>
    %28 = arith.addf %9, %27 : vector<8x8x24xf32>
    %c1_13 = arith.constant 1 : index
    %c0_14 = arith.constant 0 : index
    %29 = vector.load %arg2[%c1_13, %c0_14] : memref<9x24xf32, #tpu.memory_space<vmem>>, vector<1x24xf32>
    %30 = vector.shape_cast %29 : vector<1x24xf32> to vector<24xf32>
    %31 = vector.shape_cast %30 : vector<24xf32> to vector<1x1x24xf32>
    %32 = vector.broadcast %31 : vector<1x1x24xf32> to vector<8x10x24xf32>
    %33 = arith.mulf %2, %32 : vector<8x10x24xf32>
    %c4 = arith.constant 4 : index
    %c0_15 = arith.constant 0 : index
    %34 = vector.load %arg2[%c4, %c0_15] : memref<9x24xf32, #tpu.memory_space<vmem>>, vector<1x24xf32>
    %35 = vector.shape_cast %34 : vector<1x24xf32> to vector<24xf32>
    %36 = vector.shape_cast %35 : vector<24xf32> to vector<1x1x24xf32>
    %37 = vector.broadcast %36 : vector<1x1x24xf32> to vector<8x10x24xf32>
    %38 = arith.mulf %5, %37 : vector<8x10x24xf32>
    %39 = arith.addf %33, %38 : vector<8x10x24xf32>
    %c7 = arith.constant 7 : index
    %c0_16 = arith.constant 0 : index
    %40 = vector.load %arg2[%c7, %c0_16] : memref<9x24xf32, #tpu.memory_space<vmem>>, vector<1x24xf32>
    %41 = vector.shape_cast %40 : vector<1x24xf32> to vector<24xf32>
    %42 = vector.shape_cast %41 : vector<24xf32> to vector<1x1x24xf32>
    %43 = vector.broadcast %42 : vector<1x1x24xf32> to vector<8x10x24xf32>
    %44 = arith.mulf %8, %43 : vector<8x10x24xf32>
    %45 = arith.addf %39, %44 : vector<8x10x24xf32>
    %46 = vector.extract_strided_slice %45 {offsets = [0, 1, 0], sizes = [8, 8, 24], strides = [1, 1, 1]} : vector<8x10x24xf32> to vector<8x8x24xf32>
    %47 = arith.addf %28, %46 : vector<8x8x24xf32>
    %c2_17 = arith.constant 2 : index
    %c0_18 = arith.constant 0 : index
    %48 = vector.load %arg2[%c2_17, %c0_18] : memref<9x24xf32, #tpu.memory_space<vmem>>, vector<1x24xf32>
    %49 = vector.shape_cast %48 : vector<1x24xf32> to vector<24xf32>
    %50 = vector.shape_cast %49 : vector<24xf32> to vector<1x1x24xf32>
    %51 = vector.broadcast %50 : vector<1x1x24xf32> to vector<8x10x24xf32>
    %52 = arith.mulf %2, %51 : vector<8x10x24xf32>
    %c5 = arith.constant 5 : index
    %c0_19 = arith.constant 0 : index
    %53 = vector.load %arg2[%c5, %c0_19] : memref<9x24xf32, #tpu.memory_space<vmem>>, vector<1x24xf32>
    %54 = vector.shape_cast %53 : vector<1x24xf32> to vector<24xf32>
    %55 = vector.shape_cast %54 : vector<24xf32> to vector<1x1x24xf32>
    %56 = vector.broadcast %55 : vector<1x1x24xf32> to vector<8x10x24xf32>
    %57 = arith.mulf %5, %56 : vector<8x10x24xf32>
    %58 = arith.addf %52, %57 : vector<8x10x24xf32>
    %c8 = arith.constant 8 : index
    %c0_20 = arith.constant 0 : index
    %59 = vector.load %arg2[%c8, %c0_20] : memref<9x24xf32, #tpu.memory_space<vmem>>, vector<1x24xf32>
    %60 = vector.shape_cast %59 : vector<1x24xf32> to vector<24xf32>
    %61 = vector.shape_cast %60 : vector<24xf32> to vector<1x1x24xf32>
    %62 = vector.broadcast %61 : vector<1x1x24xf32> to vector<8x10x24xf32>
    %63 = arith.mulf %8, %62 : vector<8x10x24xf32>
    %64 = arith.addf %58, %63 : vector<8x10x24xf32>
    %65 = vector.extract_strided_slice %64 {offsets = [0, 2, 0], sizes = [8, 8, 24], strides = [1, 1, 1]} : vector<8x10x24xf32> to vector<8x8x24xf32>
    %66 = arith.addf %47, %65 : vector<8x8x24xf32>
    %c0_21 = arith.constant 0 : index
    %c0_22 = arith.constant 0 : index
    %67 = vector.load %arg3[%c0_21, %c0_22] : memref<1x24xf32, #tpu.memory_space<vmem>>, vector<1x24xf32>
    %68 = vector.shape_cast %67 : vector<1x24xf32> to vector<24xf32>
    %69 = vector.shape_cast %68 : vector<24xf32> to vector<1x1x24xf32>
    %70 = vector.broadcast %69 : vector<1x1x24xf32> to vector<8x8x24xf32>
    %71 = arith.addf %66, %70 : vector<8x8x24xf32>
    %72 = arith.truncf %71 : vector<8x8x24xf32> to vector<8x8x24xbf16>
    %c0_23 = arith.constant 0 : index
    %c0_24 = arith.constant 0 : index
    %c0_25 = arith.constant 0 : index
    %c0_26 = arith.constant 0 : index
    %73 = vector.load %arg4[%c0_23, %c0_24, %c0_25, %c0_26] : memref<1x8x8x24xbf16, #tpu.memory_space<vmem>>, vector<1x8x8x24xbf16>
    %74 = vector.shape_cast %73 : vector<1x8x8x24xbf16> to vector<8x8x24xbf16>
    %75 = vector.shape_cast %72 : vector<8x8x24xbf16> to vector<1x8x8x24xbf16>
    tpu.vector_store %arg4[%c0_23, %c0_24, %c0_25, %c0_26], %75 {strides = array<i32>} : memref<1x8x8x24xbf16, #tpu.memory_space<vmem>>, vector<1x8x8x24xbf16>,
    return
  }
  func.func @transform_0(%arg0: i32) -> (i32, i32, i32, i32) {
    %c0_i32 = arith.constant 0 : i32
    %c0_i32_0 = arith.constant 0 : i32
    %c0_i32_1 = arith.constant 0 : i32
    %c0_i32_2 = arith.constant 0 : i32
    return %arg0, %c0_i32, %c0_i32_0, %c0_i32_1 : i32, i32, i32, i32
  }
  func.func @transform_1(%arg0: i32) -> (i32, i32) {
    %c0_i32 = arith.constant 0 : i32
    %c0_i32_0 = arith.constant 0 : i32
    %c0_i32_1 = arith.constant 0 : i32
    return %c0_i32, %c0_i32_0 : i32, i32
  }
  func.func @transform_2(%arg0: i32) -> (i32, i32) {
    %c0_i32 = arith.constant 0 : i32
    %c0_i32_0 = arith.constant 0 : i32
    %c0_i32_1 = arith.constant 0 : i32
    return %c0_i32, %c0_i32_0 : i32, i32
  }
  func.func @transform_3(%arg0: i32) -> (i32, i32, i32, i32) {
    %c0_i32 = arith.constant 0 : i32
    %c0_i32_0 = arith.constant 0 : i32
    %c0_i32_1 = arith.constant 0 : i32
    %c0_i32_2 = arith.constant 0 : i32
    return %arg0, %c0_i32, %c0_i32_0, %c0_i32_1 : i32, i32, i32, i32
  }
}

module attributes {stable_mosaic.version = 11 : i64} {
  func.func @_matmul_bias_act_res_kernel(%arg0: i32, %arg1: memref<128x24xbf16, #tpu.memory_space<vmem>>, %arg2: memref<24x96xbf16, #tpu.memory_space<vmem>>, %arg3: memref<1x96xf32, #tpu.memory_space<vmem>>, %arg4: memref<128x96xbf16, #tpu.memory_space<vmem>>, %arg5: memref<128x96xbf16, #tpu.memory_space<vmem>>) attributes {dimension_semantics = [#tpu.dimension_semantics<parallel>], iteration_bounds = array<i64: 1>, scalar_prefetch = 0 : i64, scratch_operands = 0 : i64, tpu.core_type = #tpu.core_type<tc>, window_params = [{transform_indices = @transform_0, window_bounds = array<i64: 128, 24>}, {pipeline_mode = #tpu.pipeline_mode<synchronous>, transform_indices = @transform_1, window_bounds = array<i64: 24, 96>}, {pipeline_mode = #tpu.pipeline_mode<synchronous>, transform_indices = @transform_2, window_bounds = array<i64: 1, 96>}, {transform_indices = @transform_3, window_bounds = array<i64: 128, 96>}, {transform_indices = @transform_4, window_bounds = array<i64: 128, 96>}]} {
    %c0 = arith.constant 0 : index
    %c0_0 = arith.constant 0 : index
    %0 = vector.load %arg1[%c0, %c0_0] : memref<128x24xbf16, #tpu.memory_space<vmem>>, vector<128x24xbf16>
    %c0_1 = arith.constant 0 : index
    %c0_2 = arith.constant 0 : index
    %1 = vector.load %arg2[%c0_1, %c0_2] : memref<24x96xbf16, #tpu.memory_space<vmem>>, vector<24x96xbf16>
    %cst = arith.constant dense<0.000000e+00> : vector<128x96xf32>
    %2 = tpu.matmul %0, %1, %cst {dimension_numbers = #tpu.dot_dimension_numbers<[1], [0], [0], [1], [0, 0, 1, 1], [], []>} : vector<128x24xbf16>, vector<24x96xbf16>, vector<128x96xf32> -> vector<128x96xf32>
    %c0_3 = arith.constant 0 : index
    %c0_4 = arith.constant 0 : index
    %3 = vector.load %arg3[%c0_3, %c0_4] : memref<1x96xf32, #tpu.memory_space<vmem>>, vector<1x96xf32>
    %4 = vector.broadcast %3 : vector<1x96xf32> to vector<128x96xf32>
    %5 = arith.addf %2, %4 : vector<128x96xf32>
    %cst_5 = arith.constant 0.000000e+00 : f32
    %6 = vector.broadcast %cst_5 : f32 to vector<128x96xf32>
    %7 = arith.maximumf %5, %6 : vector<128x96xf32>
    %c0_6 = arith.constant 0 : index
    %c0_7 = arith.constant 0 : index
    %8 = vector.load %arg4[%c0_6, %c0_7] : memref<128x96xbf16, #tpu.memory_space<vmem>>, vector<128x96xbf16>
    %9 = arith.extf %8 : vector<128x96xbf16> to vector<128x96xf32>
    %10 = arith.addf %7, %9 : vector<128x96xf32>
    %11 = arith.truncf %10 : vector<128x96xf32> to vector<128x96xbf16>
    %c0_8 = arith.constant 0 : index
    %c0_9 = arith.constant 0 : index
    %12 = vector.load %arg5[%c0_8, %c0_9] : memref<128x96xbf16, #tpu.memory_space<vmem>>, vector<128x96xbf16>
    tpu.vector_store %arg5[%c0_8, %c0_9], %11 {strides = array<i32>} : memref<128x96xbf16, #tpu.memory_space<vmem>>, vector<128x96xbf16>,
    return
  }
  func.func @transform_0(%arg0: i32) -> (i32, i32) {
    %c0_i32 = arith.constant 0 : i32
    %c0_i32_0 = arith.constant 0 : i32
    return %arg0, %c0_i32 : i32, i32
  }
  func.func @transform_1(%arg0: i32) -> (i32, i32) {
    %c0_i32 = arith.constant 0 : i32
    %c0_i32_0 = arith.constant 0 : i32
    %c0_i32_1 = arith.constant 0 : i32
    return %c0_i32, %c0_i32_0 : i32, i32
  }
  func.func @transform_2(%arg0: i32) -> (i32, i32) {
    %c0_i32 = arith.constant 0 : i32
    %c0_i32_0 = arith.constant 0 : i32
    %c0_i32_1 = arith.constant 0 : i32
    return %c0_i32, %c0_i32_0 : i32, i32
  }
  func.func @transform_3(%arg0: i32) -> (i32, i32) {
    %c0_i32 = arith.constant 0 : i32
    %c0_i32_0 = arith.constant 0 : i32
    return %arg0, %c0_i32 : i32, i32
  }
  func.func @transform_4(%arg0: i32) -> (i32, i32) {
    %c0_i32 = arith.constant 0 : i32
    %c0_i32_0 = arith.constant 0 : i32
    return %arg0, %c0_i32 : i32, i32
  }
}

module attributes {stable_mosaic.version = 11 : i64} {
  func.func @_matmul_bias_act_kernel(%arg0: i32, %arg1: memref<128x96xbf16, #tpu.memory_space<vmem>>, %arg2: memref<96x24xbf16, #tpu.memory_space<vmem>>, %arg3: memref<1x24xf32, #tpu.memory_space<vmem>>, %arg4: memref<128x24xbf16, #tpu.memory_space<vmem>>) attributes {dimension_semantics = [#tpu.dimension_semantics<parallel>], iteration_bounds = array<i64: 1>, scalar_prefetch = 0 : i64, scratch_operands = 0 : i64, tpu.core_type = #tpu.core_type<tc>, window_params = [{transform_indices = @transform_0, window_bounds = array<i64: 128, 96>}, {pipeline_mode = #tpu.pipeline_mode<synchronous>, transform_indices = @transform_1, window_bounds = array<i64: 96, 24>}, {pipeline_mode = #tpu.pipeline_mode<synchronous>, transform_indices = @transform_2, window_bounds = array<i64: 1, 24>}, {transform_indices = @transform_3, window_bounds = array<i64: 128, 24>}]} {
    %c0 = arith.constant 0 : index
    %c0_0 = arith.constant 0 : index
    %0 = vector.load %arg1[%c0, %c0_0] : memref<128x96xbf16, #tpu.memory_space<vmem>>, vector<128x96xbf16>
    %c0_1 = arith.constant 0 : index
    %c0_2 = arith.constant 0 : index
    %1 = vector.load %arg2[%c0_1, %c0_2] : memref<96x24xbf16, #tpu.memory_space<vmem>>, vector<96x24xbf16>
    %cst = arith.constant dense<0.000000e+00> : vector<128x24xf32>
    %2 = tpu.matmul %0, %1, %cst {dimension_numbers = #tpu.dot_dimension_numbers<[1], [0], [0], [1], [0, 0, 1, 1], [], []>} : vector<128x96xbf16>, vector<96x24xbf16>, vector<128x24xf32> -> vector<128x24xf32>
    %c0_3 = arith.constant 0 : index
    %c0_4 = arith.constant 0 : index
    %3 = vector.load %arg3[%c0_3, %c0_4] : memref<1x24xf32, #tpu.memory_space<vmem>>, vector<1x24xf32>
    %4 = vector.broadcast %3 : vector<1x24xf32> to vector<128x24xf32>
    %5 = arith.addf %2, %4 : vector<128x24xf32>
    %cst_5 = arith.constant 0.000000e+00 : f32
    %6 = vector.broadcast %cst_5 : f32 to vector<128x24xf32>
    %7 = arith.maximumf %5, %6 : vector<128x24xf32>
    %8 = arith.truncf %7 : vector<128x24xf32> to vector<128x24xbf16>
    %c0_6 = arith.constant 0 : index
    %c0_7 = arith.constant 0 : index
    %9 = vector.load %arg4[%c0_6, %c0_7] : memref<128x24xbf16, #tpu.memory_space<vmem>>, vector<128x24xbf16>
    tpu.vector_store %arg4[%c0_6, %c0_7], %8 {strides = array<i32>} : memref<128x24xbf16, #tpu.memory_space<vmem>>, vector<128x24xbf16>,
    return
  }
  func.func @transform_0(%arg0: i32) -> (i32, i32) {
    %c0_i32 = arith.constant 0 : i32
    %c0_i32_0 = arith.constant 0 : i32
    return %arg0, %c0_i32 : i32, i32
  }
  func.func @transform_1(%arg0: i32) -> (i32, i32) {
    %c0_i32 = arith.constant 0 : i32
    %c0_i32_0 = arith.constant 0 : i32
    %c0_i32_1 = arith.constant 0 : i32
    return %c0_i32, %c0_i32_0 : i32, i32
  }
  func.func @transform_2(%arg0: i32) -> (i32, i32) {
    %c0_i32 = arith.constant 0 : i32
    %c0_i32_0 = arith.constant 0 : i32
    %c0_i32_1 = arith.constant 0 : i32
    return %c0_i32, %c0_i32_0 : i32, i32
  }
  func.func @transform_3(%arg0: i32) -> (i32, i32) {
    %c0_i32 = arith.constant 0 : i32
    %c0_i32_0 = arith.constant 0 : i32
    return %arg0, %c0_i32 : i32, i32
  }
}

module attributes {stable_mosaic.version = 11 : i64} {
  func.func @_matmul_bias_act_kernel(%arg0: i32, %arg1: memref<128x96xbf16, #tpu.memory_space<vmem>>, %arg2: memref<96x48xbf16, #tpu.memory_space<vmem>>, %arg3: memref<1x48xf32, #tpu.memory_space<vmem>>, %arg4: memref<128x48xbf16, #tpu.memory_space<vmem>>) attributes {dimension_semantics = [#tpu.dimension_semantics<parallel>], iteration_bounds = array<i64: 1>, scalar_prefetch = 0 : i64, scratch_operands = 0 : i64, tpu.core_type = #tpu.core_type<tc>, window_params = [{transform_indices = @transform_0, window_bounds = array<i64: 128, 96>}, {pipeline_mode = #tpu.pipeline_mode<synchronous>, transform_indices = @transform_1, window_bounds = array<i64: 96, 48>}, {pipeline_mode = #tpu.pipeline_mode<synchronous>, transform_indices = @transform_2, window_bounds = array<i64: 1, 48>}, {transform_indices = @transform_3, window_bounds = array<i64: 128, 48>}]} {
    %c0 = arith.constant 0 : index
    %c0_0 = arith.constant 0 : index
    %0 = vector.load %arg1[%c0, %c0_0] : memref<128x96xbf16, #tpu.memory_space<vmem>>, vector<128x96xbf16>
    %c0_1 = arith.constant 0 : index
    %c0_2 = arith.constant 0 : index
    %1 = vector.load %arg2[%c0_1, %c0_2] : memref<96x48xbf16, #tpu.memory_space<vmem>>, vector<96x48xbf16>
    %cst = arith.constant dense<0.000000e+00> : vector<128x48xf32>
    %2 = tpu.matmul %0, %1, %cst {dimension_numbers = #tpu.dot_dimension_numbers<[1], [0], [0], [1], [0, 0, 1, 1], [], []>} : vector<128x96xbf16>, vector<96x48xbf16>, vector<128x48xf32> -> vector<128x48xf32>
    %c0_3 = arith.constant 0 : index
    %c0_4 = arith.constant 0 : index
    %3 = vector.load %arg3[%c0_3, %c0_4] : memref<1x48xf32, #tpu.memory_space<vmem>>, vector<1x48xf32>
    %4 = vector.broadcast %3 : vector<1x48xf32> to vector<128x48xf32>
    %5 = arith.addf %2, %4 : vector<128x48xf32>
    %cst_5 = arith.constant 0.000000e+00 : f32
    %6 = vector.broadcast %cst_5 : f32 to vector<128x48xf32>
    %7 = arith.maximumf %5, %6 : vector<128x48xf32>
    %8 = arith.truncf %7 : vector<128x48xf32> to vector<128x48xbf16>
    %c0_6 = arith.constant 0 : index
    %c0_7 = arith.constant 0 : index
    %9 = vector.load %arg4[%c0_6, %c0_7] : memref<128x48xbf16, #tpu.memory_space<vmem>>, vector<128x48xbf16>
    tpu.vector_store %arg4[%c0_6, %c0_7], %8 {strides = array<i32>} : memref<128x48xbf16, #tpu.memory_space<vmem>>, vector<128x48xbf16>,
    return
  }
  func.func @transform_0(%arg0: i32) -> (i32, i32) {
    %c0_i32 = arith.constant 0 : i32
    %c0_i32_0 = arith.constant 0 : i32
    return %arg0, %c0_i32 : i32, i32
  }
  func.func @transform_1(%arg0: i32) -> (i32, i32) {
    %c0_i32 = arith.constant 0 : i32
    %c0_i32_0 = arith.constant 0 : i32
    %c0_i32_1 = arith.constant 0 : i32
    return %c0_i32, %c0_i32_0 : i32, i32
  }
  func.func @transform_2(%arg0: i32) -> (i32, i32) {
    %c0_i32 = arith.constant 0 : i32
    %c0_i32_0 = arith.constant 0 : i32
    %c0_i32_1 = arith.constant 0 : i32
    return %c0_i32, %c0_i32_0 : i32, i32
  }
  func.func @transform_3(%arg0: i32) -> (i32, i32) {
    %c0_i32 = arith.constant 0 : i32
    %c0_i32_0 = arith.constant 0 : i32
    return %arg0, %c0_i32 : i32, i32
  }
}

module attributes {stable_mosaic.version = 11 : i64} {
  func.func @_matmul_bias_act_kernel(%arg0: i32, %arg1: memref<128x96xbf16, #tpu.memory_space<vmem>>, %arg2: memref<96x192xbf16, #tpu.memory_space<vmem>>, %arg3: memref<1x192xf32, #tpu.memory_space<vmem>>, %arg4: memref<128x192xbf16, #tpu.memory_space<vmem>>) attributes {dimension_semantics = [#tpu.dimension_semantics<parallel>], iteration_bounds = array<i64: 1>, scalar_prefetch = 0 : i64, scratch_operands = 0 : i64, tpu.core_type = #tpu.core_type<tc>, window_params = [{transform_indices = @transform_0, window_bounds = array<i64: 128, 96>}, {pipeline_mode = #tpu.pipeline_mode<synchronous>, transform_indices = @transform_1, window_bounds = array<i64: 96, 192>}, {pipeline_mode = #tpu.pipeline_mode<synchronous>, transform_indices = @transform_2, window_bounds = array<i64: 1, 192>}, {transform_indices = @transform_3, window_bounds = array<i64: 128, 192>}]} {
    %c0 = arith.constant 0 : index
    %c0_0 = arith.constant 0 : index
    %0 = vector.load %arg1[%c0, %c0_0] : memref<128x96xbf16, #tpu.memory_space<vmem>>, vector<128x96xbf16>
    %c0_1 = arith.constant 0 : index
    %c0_2 = arith.constant 0 : index
    %1 = vector.load %arg2[%c0_1, %c0_2] : memref<96x192xbf16, #tpu.memory_space<vmem>>, vector<96x192xbf16>
    %cst = arith.constant dense<0.000000e+00> : vector<128x192xf32>
    %2 = tpu.matmul %0, %1, %cst {dimension_numbers = #tpu.dot_dimension_numbers<[1], [0], [0], [1], [0, 0, 1, 1], [], []>} : vector<128x96xbf16>, vector<96x192xbf16>, vector<128x192xf32> -> vector<128x192xf32>
    %c0_3 = arith.constant 0 : index
    %c0_4 = arith.constant 0 : index
    %3 = vector.load %arg3[%c0_3, %c0_4] : memref<1x192xf32, #tpu.memory_space<vmem>>, vector<1x192xf32>
    %4 = vector.broadcast %3 : vector<1x192xf32> to vector<128x192xf32>
    %5 = arith.addf %2, %4 : vector<128x192xf32>
    %6 = arith.truncf %5 : vector<128x192xf32> to vector<128x192xbf16>
    %c0_5 = arith.constant 0 : index
    %c0_6 = arith.constant 0 : index
    %7 = vector.load %arg4[%c0_5, %c0_6] : memref<128x192xbf16, #tpu.memory_space<vmem>>, vector<128x192xbf16>
    tpu.vector_store %arg4[%c0_5, %c0_6], %6 {strides = array<i32>} : memref<128x192xbf16, #tpu.memory_space<vmem>>, vector<128x192xbf16>,
    return
  }
  func.func @transform_0(%arg0: i32) -> (i32, i32) {
    %c0_i32 = arith.constant 0 : i32
    %c0_i32_0 = arith.constant 0 : i32
    return %arg0, %c0_i32 : i32, i32
  }
  func.func @transform_1(%arg0: i32) -> (i32, i32) {
    %c0_i32 = arith.constant 0 : i32
    %c0_i32_0 = arith.constant 0 : i32
    %c0_i32_1 = arith.constant 0 : i32
    return %c0_i32, %c0_i32_0 : i32, i32
  }
  func.func @transform_2(%arg0: i32) -> (i32, i32) {
    %c0_i32 = arith.constant 0 : i32
    %c0_i32_0 = arith.constant 0 : i32
    %c0_i32_1 = arith.constant 0 : i32
    return %c0_i32, %c0_i32_0 : i32, i32
  }
  func.func @transform_3(%arg0: i32) -> (i32, i32) {
    %c0_i32 = arith.constant 0 : i32
    %c0_i32_0 = arith.constant 0 : i32
    return %arg0, %c0_i32 : i32, i32
  }
}

module attributes {stable_mosaic.version = 11 : i64} {
  func.func @_dwconv3x3_bias_kernel(%arg0: i32, %arg1: memref<1x10x10x48xbf16, #tpu.memory_space<vmem>>, %arg2: memref<9x48xf32, #tpu.memory_space<vmem>>, %arg3: memref<1x48xf32, #tpu.memory_space<vmem>>, %arg4: memref<1x8x8x48xbf16, #tpu.memory_space<vmem>>) attributes {dimension_semantics = [#tpu.dimension_semantics<parallel>], iteration_bounds = array<i64: 2>, scalar_prefetch = 0 : i64, scratch_operands = 0 : i64, tpu.core_type = #tpu.core_type<tc>, window_params = [{transform_indices = @transform_0, window_bounds = array<i64: 1, 10, 10, 48>}, {pipeline_mode = #tpu.pipeline_mode<synchronous>, transform_indices = @transform_1, window_bounds = array<i64: 9, 48>}, {pipeline_mode = #tpu.pipeline_mode<synchronous>, transform_indices = @transform_2, window_bounds = array<i64: 1, 48>}, {transform_indices = @transform_3, window_bounds = array<i64: 1, 8, 8, 48>}]} {
    %c0 = arith.constant 0 : index
    %c0_0 = arith.constant 0 : index
    %c0_1 = arith.constant 0 : index
    %c0_2 = arith.constant 0 : index
    %0 = vector.load %arg1[%c0, %c0_0, %c0_1, %c0_2] : memref<1x10x10x48xbf16, #tpu.memory_space<vmem>>, vector<1x8x10x48xbf16>
    %1 = vector.shape_cast %0 : vector<1x8x10x48xbf16> to vector<8x10x48xbf16>
    %2 = arith.extf %1 : vector<8x10x48xbf16> to vector<8x10x48xf32>
    %c0_3 = arith.constant 0 : index
    %c1 = arith.constant 1 : index
    %c0_4 = arith.constant 0 : index
    %c0_5 = arith.constant 0 : index
    %3 = vector.load %arg1[%c0_3, %c1, %c0_4, %c0_5] : memref<1x10x10x48xbf16, #tpu.memory_space<vmem>>, vector<1x8x10x48xbf16>
    %4 = vector.shape_cast %3 : vector<1x8x10x48xbf16> to vector<8x10x48xbf16>
    %5 = arith.extf %4 : vector<8x10x48xbf16> to vector<8x10x48xf32>
    %c0_6 = arith.constant 0 : index
    %c2 = arith.constant 2 : index
    %c0_7 = arith.constant 0 : index
    %c0_8 = arith.constant 0 : index
    %6 = vector.load %arg1[%c0_6, %c2, %c0_7, %c0_8] : memref<1x10x10x48xbf16, #tpu.memory_space<vmem>>, vector<1x8x10x48xbf16>
    %7 = vector.shape_cast %6 : vector<1x8x10x48xbf16> to vector<8x10x48xbf16>
    %8 = arith.extf %7 : vector<8x10x48xbf16> to vector<8x10x48xf32>
    %cst = arith.constant 0.000000e+00 : f32
    %9 = vector.broadcast %cst : f32 to vector<8x8x48xf32>
    %c0_9 = arith.constant 0 : index
    %c0_10 = arith.constant 0 : index
    %10 = vector.load %arg2[%c0_9, %c0_10] : memref<9x48xf32, #tpu.memory_space<vmem>>, vector<1x48xf32>
    %11 = vector.shape_cast %10 : vector<1x48xf32> to vector<48xf32>
    %12 = vector.shape_cast %11 : vector<48xf32> to vector<1x1x48xf32>
    %13 = vector.broadcast %12 : vector<1x1x48xf32> to vector<8x10x48xf32>
    %14 = arith.mulf %2, %13 : vector<8x10x48xf32>
    %c3 = arith.constant 3 : index
    %c0_11 = arith.constant 0 : index
    %15 = vector.load %arg2[%c3, %c0_11] : memref<9x48xf32, #tpu.memory_space<vmem>>, vector<1x48xf32>
    %16 = vector.shape_cast %15 : vector<1x48xf32> to vector<48xf32>
    %17 = vector.shape_cast %16 : vector<48xf32> to vector<1x1x48xf32>
    %18 = vector.broadcast %17 : vector<1x1x48xf32> to vector<8x10x48xf32>
    %19 = arith.mulf %5, %18 : vector<8x10x48xf32>
    %20 = arith.addf %14, %19 : vector<8x10x48xf32>
    %c6 = arith.constant 6 : index
    %c0_12 = arith.constant 0 : index
    %21 = vector.load %arg2[%c6, %c0_12] : memref<9x48xf32, #tpu.memory_space<vmem>>, vector<1x48xf32>
    %22 = vector.shape_cast %21 : vector<1x48xf32> to vector<48xf32>
    %23 = vector.shape_cast %22 : vector<48xf32> to vector<1x1x48xf32>
    %24 = vector.broadcast %23 : vector<1x1x48xf32> to vector<8x10x48xf32>
    %25 = arith.mulf %8, %24 : vector<8x10x48xf32>
    %26 = arith.addf %20, %25 : vector<8x10x48xf32>
    %27 = vector.extract_strided_slice %26 {offsets = [0, 0, 0], sizes = [8, 8, 48], strides = [1, 1, 1]} : vector<8x10x48xf32> to vector<8x8x48xf32>
    %28 = arith.addf %9, %27 : vector<8x8x48xf32>
    %c1_13 = arith.constant 1 : index
    %c0_14 = arith.constant 0 : index
    %29 = vector.load %arg2[%c1_13, %c0_14] : memref<9x48xf32, #tpu.memory_space<vmem>>, vector<1x48xf32>
    %30 = vector.shape_cast %29 : vector<1x48xf32> to vector<48xf32>
    %31 = vector.shape_cast %30 : vector<48xf32> to vector<1x1x48xf32>
    %32 = vector.broadcast %31 : vector<1x1x48xf32> to vector<8x10x48xf32>
    %33 = arith.mulf %2, %32 : vector<8x10x48xf32>
    %c4 = arith.constant 4 : index
    %c0_15 = arith.constant 0 : index
    %34 = vector.load %arg2[%c4, %c0_15] : memref<9x48xf32, #tpu.memory_space<vmem>>, vector<1x48xf32>
    %35 = vector.shape_cast %34 : vector<1x48xf32> to vector<48xf32>
    %36 = vector.shape_cast %35 : vector<48xf32> to vector<1x1x48xf32>
    %37 = vector.broadcast %36 : vector<1x1x48xf32> to vector<8x10x48xf32>
    %38 = arith.mulf %5, %37 : vector<8x10x48xf32>
    %39 = arith.addf %33, %38 : vector<8x10x48xf32>
    %c7 = arith.constant 7 : index
    %c0_16 = arith.constant 0 : index
    %40 = vector.load %arg2[%c7, %c0_16] : memref<9x48xf32, #tpu.memory_space<vmem>>, vector<1x48xf32>
    %41 = vector.shape_cast %40 : vector<1x48xf32> to vector<48xf32>
    %42 = vector.shape_cast %41 : vector<48xf32> to vector<1x1x48xf32>
    %43 = vector.broadcast %42 : vector<1x1x48xf32> to vector<8x10x48xf32>
    %44 = arith.mulf %8, %43 : vector<8x10x48xf32>
    %45 = arith.addf %39, %44 : vector<8x10x48xf32>
    %46 = vector.extract_strided_slice %45 {offsets = [0, 1, 0], sizes = [8, 8, 48], strides = [1, 1, 1]} : vector<8x10x48xf32> to vector<8x8x48xf32>
    %47 = arith.addf %28, %46 : vector<8x8x48xf32>
    %c2_17 = arith.constant 2 : index
    %c0_18 = arith.constant 0 : index
    %48 = vector.load %arg2[%c2_17, %c0_18] : memref<9x48xf32, #tpu.memory_space<vmem>>, vector<1x48xf32>
    %49 = vector.shape_cast %48 : vector<1x48xf32> to vector<48xf32>
    %50 = vector.shape_cast %49 : vector<48xf32> to vector<1x1x48xf32>
    %51 = vector.broadcast %50 : vector<1x1x48xf32> to vector<8x10x48xf32>
    %52 = arith.mulf %2, %51 : vector<8x10x48xf32>
    %c5 = arith.constant 5 : index
    %c0_19 = arith.constant 0 : index
    %53 = vector.load %arg2[%c5, %c0_19] : memref<9x48xf32, #tpu.memory_space<vmem>>, vector<1x48xf32>
    %54 = vector.shape_cast %53 : vector<1x48xf32> to vector<48xf32>
    %55 = vector.shape_cast %54 : vector<48xf32> to vector<1x1x48xf32>
    %56 = vector.broadcast %55 : vector<1x1x48xf32> to vector<8x10x48xf32>
    %57 = arith.mulf %5, %56 : vector<8x10x48xf32>
    %58 = arith.addf %52, %57 : vector<8x10x48xf32>
    %c8 = arith.constant 8 : index
    %c0_20 = arith.constant 0 : index
    %59 = vector.load %arg2[%c8, %c0_20] : memref<9x48xf32, #tpu.memory_space<vmem>>, vector<1x48xf32>
    %60 = vector.shape_cast %59 : vector<1x48xf32> to vector<48xf32>
    %61 = vector.shape_cast %60 : vector<48xf32> to vector<1x1x48xf32>
    %62 = vector.broadcast %61 : vector<1x1x48xf32> to vector<8x10x48xf32>
    %63 = arith.mulf %8, %62 : vector<8x10x48xf32>
    %64 = arith.addf %58, %63 : vector<8x10x48xf32>
    %65 = vector.extract_strided_slice %64 {offsets = [0, 2, 0], sizes = [8, 8, 48], strides = [1, 1, 1]} : vector<8x10x48xf32> to vector<8x8x48xf32>
    %66 = arith.addf %47, %65 : vector<8x8x48xf32>
    %c0_21 = arith.constant 0 : index
    %c0_22 = arith.constant 0 : index
    %67 = vector.load %arg3[%c0_21, %c0_22] : memref<1x48xf32, #tpu.memory_space<vmem>>, vector<1x48xf32>
    %68 = vector.shape_cast %67 : vector<1x48xf32> to vector<48xf32>
    %69 = vector.shape_cast %68 : vector<48xf32> to vector<1x1x48xf32>
    %70 = vector.broadcast %69 : vector<1x1x48xf32> to vector<8x8x48xf32>
    %71 = arith.addf %66, %70 : vector<8x8x48xf32>
    %72 = arith.truncf %71 : vector<8x8x48xf32> to vector<8x8x48xbf16>
    %c0_23 = arith.constant 0 : index
    %c0_24 = arith.constant 0 : index
    %c0_25 = arith.constant 0 : index
    %c0_26 = arith.constant 0 : index
    %73 = vector.load %arg4[%c0_23, %c0_24, %c0_25, %c0_26] : memref<1x8x8x48xbf16, #tpu.memory_space<vmem>>, vector<1x8x8x48xbf16>
    %74 = vector.shape_cast %73 : vector<1x8x8x48xbf16> to vector<8x8x48xbf16>
    %75 = vector.shape_cast %72 : vector<8x8x48xbf16> to vector<1x8x8x48xbf16>
    tpu.vector_store %arg4[%c0_23, %c0_24, %c0_25, %c0_26], %75 {strides = array<i32>} : memref<1x8x8x48xbf16, #tpu.memory_space<vmem>>, vector<1x8x8x48xbf16>,
    return
  }
  func.func @transform_0(%arg0: i32) -> (i32, i32, i32, i32) {
    %c0_i32 = arith.constant 0 : i32
    %c0_i32_0 = arith.constant 0 : i32
    %c0_i32_1 = arith.constant 0 : i32
    %c0_i32_2 = arith.constant 0 : i32
    return %arg0, %c0_i32, %c0_i32_0, %c0_i32_1 : i32, i32, i32, i32
  }
  func.func @transform_1(%arg0: i32) -> (i32, i32) {
    %c0_i32 = arith.constant 0 : i32
    %c0_i32_0 = arith.constant 0 : i32
    %c0_i32_1 = arith.constant 0 : i32
    return %c0_i32, %c0_i32_0 : i32, i32
  }
  func.func @transform_2(%arg0: i32) -> (i32, i32) {
    %c0_i32 = arith.constant 0 : i32
    %c0_i32_0 = arith.constant 0 : i32
    %c0_i32_1 = arith.constant 0 : i32
    return %c0_i32, %c0_i32_0 : i32, i32
  }
  func.func @transform_3(%arg0: i32) -> (i32, i32, i32, i32) {
    %c0_i32 = arith.constant 0 : i32
    %c0_i32_0 = arith.constant 0 : i32
    %c0_i32_1 = arith.constant 0 : i32
    %c0_i32_2 = arith.constant 0 : i32
    return %arg0, %c0_i32, %c0_i32_0, %c0_i32_1 : i32, i32, i32, i32
  }
}

module attributes {stable_mosaic.version = 11 : i64} {
  func.func @_matmul_bias_act_res_kernel(%arg0: i32, %arg1: memref<128x48xbf16, #tpu.memory_space<vmem>>, %arg2: memref<48x192xbf16, #tpu.memory_space<vmem>>, %arg3: memref<1x192xf32, #tpu.memory_space<vmem>>, %arg4: memref<128x192xbf16, #tpu.memory_space<vmem>>, %arg5: memref<128x192xbf16, #tpu.memory_space<vmem>>) attributes {dimension_semantics = [#tpu.dimension_semantics<parallel>], iteration_bounds = array<i64: 1>, scalar_prefetch = 0 : i64, scratch_operands = 0 : i64, tpu.core_type = #tpu.core_type<tc>, window_params = [{transform_indices = @transform_0, window_bounds = array<i64: 128, 48>}, {pipeline_mode = #tpu.pipeline_mode<synchronous>, transform_indices = @transform_1, window_bounds = array<i64: 48, 192>}, {pipeline_mode = #tpu.pipeline_mode<synchronous>, transform_indices = @transform_2, window_bounds = array<i64: 1, 192>}, {transform_indices = @transform_3, window_bounds = array<i64: 128, 192>}, {transform_indices = @transform_4, window_bounds = array<i64: 128, 192>}]} {
    %c0 = arith.constant 0 : index
    %c0_0 = arith.constant 0 : index
    %0 = vector.load %arg1[%c0, %c0_0] : memref<128x48xbf16, #tpu.memory_space<vmem>>, vector<128x48xbf16>
    %c0_1 = arith.constant 0 : index
    %c0_2 = arith.constant 0 : index
    %1 = vector.load %arg2[%c0_1, %c0_2] : memref<48x192xbf16, #tpu.memory_space<vmem>>, vector<48x192xbf16>
    %cst = arith.constant dense<0.000000e+00> : vector<128x192xf32>
    %2 = tpu.matmul %0, %1, %cst {dimension_numbers = #tpu.dot_dimension_numbers<[1], [0], [0], [1], [0, 0, 1, 1], [], []>} : vector<128x48xbf16>, vector<48x192xbf16>, vector<128x192xf32> -> vector<128x192xf32>
    %c0_3 = arith.constant 0 : index
    %c0_4 = arith.constant 0 : index
    %3 = vector.load %arg3[%c0_3, %c0_4] : memref<1x192xf32, #tpu.memory_space<vmem>>, vector<1x192xf32>
    %4 = vector.broadcast %3 : vector<1x192xf32> to vector<128x192xf32>
    %5 = arith.addf %2, %4 : vector<128x192xf32>
    %cst_5 = arith.constant 0.000000e+00 : f32
    %6 = vector.broadcast %cst_5 : f32 to vector<128x192xf32>
    %7 = arith.maximumf %5, %6 : vector<128x192xf32>
    %c0_6 = arith.constant 0 : index
    %c0_7 = arith.constant 0 : index
    %8 = vector.load %arg4[%c0_6, %c0_7] : memref<128x192xbf16, #tpu.memory_space<vmem>>, vector<128x192xbf16>
    %9 = arith.extf %8 : vector<128x192xbf16> to vector<128x192xf32>
    %10 = arith.addf %7, %9 : vector<128x192xf32>
    %11 = arith.truncf %10 : vector<128x192xf32> to vector<128x192xbf16>
    %c0_8 = arith.constant 0 : index
    %c0_9 = arith.constant 0 : index
    %12 = vector.load %arg5[%c0_8, %c0_9] : memref<128x192xbf16, #tpu.memory_space<vmem>>, vector<128x192xbf16>
    tpu.vector_store %arg5[%c0_8, %c0_9], %11 {strides = array<i32>} : memref<128x192xbf16, #tpu.memory_space<vmem>>, vector<128x192xbf16>,
    return
  }
  func.func @transform_0(%arg0: i32) -> (i32, i32) {
    %c0_i32 = arith.constant 0 : i32
    %c0_i32_0 = arith.constant 0 : i32
    return %arg0, %c0_i32 : i32, i32
  }
  func.func @transform_1(%arg0: i32) -> (i32, i32) {
    %c0_i32 = arith.constant 0 : i32
    %c0_i32_0 = arith.constant 0 : i32
    %c0_i32_1 = arith.constant 0 : i32
    return %c0_i32, %c0_i32_0 : i32, i32
  }
  func.func @transform_2(%arg0: i32) -> (i32, i32) {
    %c0_i32 = arith.constant 0 : i32
    %c0_i32_0 = arith.constant 0 : i32
    %c0_i32_1 = arith.constant 0 : i32
    return %c0_i32, %c0_i32_0 : i32, i32
  }
  func.func @transform_3(%arg0: i32) -> (i32, i32) {
    %c0_i32 = arith.constant 0 : i32
    %c0_i32_0 = arith.constant 0 : i32
    return %arg0, %c0_i32 : i32, i32
  }
  func.func @transform_4(%arg0: i32) -> (i32, i32) {
    %c0_i32 = arith.constant 0 : i32
    %c0_i32_0 = arith.constant 0 : i32
    return %arg0, %c0_i32 : i32, i32
  }
}

module attributes {stable_mosaic.version = 11 : i64} {
  func.func @_matmul_bias_act_kernel(%arg0: i32, %arg1: memref<128x192xbf16, #tpu.memory_space<vmem>>, %arg2: memref<192x48xbf16, #tpu.memory_space<vmem>>, %arg3: memref<1x48xf32, #tpu.memory_space<vmem>>, %arg4: memref<128x48xbf16, #tpu.memory_space<vmem>>) attributes {dimension_semantics = [#tpu.dimension_semantics<parallel>], iteration_bounds = array<i64: 1>, scalar_prefetch = 0 : i64, scratch_operands = 0 : i64, tpu.core_type = #tpu.core_type<tc>, window_params = [{transform_indices = @transform_0, window_bounds = array<i64: 128, 192>}, {pipeline_mode = #tpu.pipeline_mode<synchronous>, transform_indices = @transform_1, window_bounds = array<i64: 192, 48>}, {pipeline_mode = #tpu.pipeline_mode<synchronous>, transform_indices = @transform_2, window_bounds = array<i64: 1, 48>}, {transform_indices = @transform_3, window_bounds = array<i64: 128, 48>}]} {
    %c0 = arith.constant 0 : index
    %c0_0 = arith.constant 0 : index
    %0 = vector.load %arg1[%c0, %c0_0] : memref<128x192xbf16, #tpu.memory_space<vmem>>, vector<128x192xbf16>
    %c0_1 = arith.constant 0 : index
    %c0_2 = arith.constant 0 : index
    %1 = vector.load %arg2[%c0_1, %c0_2] : memref<192x48xbf16, #tpu.memory_space<vmem>>, vector<192x48xbf16>
    %cst = arith.constant dense<0.000000e+00> : vector<128x48xf32>
    %2 = tpu.matmul %0, %1, %cst {dimension_numbers = #tpu.dot_dimension_numbers<[1], [0], [0], [1], [0, 0, 1, 1], [], []>} : vector<128x192xbf16>, vector<192x48xbf16>, vector<128x48xf32> -> vector<128x48xf32>
    %c0_3 = arith.constant 0 : index
    %c0_4 = arith.constant 0 : index
    %3 = vector.load %arg3[%c0_3, %c0_4] : memref<1x48xf32, #tpu.memory_space<vmem>>, vector<1x48xf32>
    %4 = vector.broadcast %3 : vector<1x48xf32> to vector<128x48xf32>
    %5 = arith.addf %2, %4 : vector<128x48xf32>
    %cst_5 = arith.constant 0.000000e+00 : f32
    %6 = vector.broadcast %cst_5 : f32 to vector<128x48xf32>
    %7 = arith.maximumf %5, %6 : vector<128x48xf32>
    %8 = arith.truncf %7 : vector<128x48xf32> to vector<128x48xbf16>
    %c0_6 = arith.constant 0 : index
    %c0_7 = arith.constant 0 : index
    %9 = vector.load %arg4[%c0_6, %c0_7] : memref<128x48xbf16, #tpu.memory_space<vmem>>, vector<128x48xbf16>
    tpu.vector_store %arg4[%c0_6, %c0_7], %8 {strides = array<i32>} : memref<128x48xbf16, #tpu.memory_space<vmem>>, vector<128x48xbf16>,
    return
  }
  func.func @transform_0(%arg0: i32) -> (i32, i32) {
    %c0_i32 = arith.constant 0 : i32
    %c0_i32_0 = arith.constant 0 : i32
    return %arg0, %c0_i32 : i32, i32
  }
  func.func @transform_1(%arg0: i32) -> (i32, i32) {
    %c0_i32 = arith.constant 0 : i32
    %c0_i32_0 = arith.constant 0 : i32
    %c0_i32_1 = arith.constant 0 : i32
    return %c0_i32, %c0_i32_0 : i32, i32
  }
  func.func @transform_2(%arg0: i32) -> (i32, i32) {
    %c0_i32 = arith.constant 0 : i32
    %c0_i32_0 = arith.constant 0 : i32
    %c0_i32_1 = arith.constant 0 : i32
    return %c0_i32, %c0_i32_0 : i32, i32
  }
  func.func @transform_3(%arg0: i32) -> (i32, i32) {
    %c0_i32 = arith.constant 0 : i32
    %c0_i32_0 = arith.constant 0 : i32
    return %arg0, %c0_i32 : i32, i32
  }
}

module attributes {stable_mosaic.version = 11 : i64} {
  func.func @_matmul_bias_act_kernel(%arg0: i32, %arg1: memref<128x192xbf16, #tpu.memory_space<vmem>>, %arg2: memref<192x1024xbf16, #tpu.memory_space<vmem>>, %arg3: memref<1x1024xf32, #tpu.memory_space<vmem>>, %arg4: memref<128x1024xbf16, #tpu.memory_space<vmem>>) attributes {dimension_semantics = [#tpu.dimension_semantics<parallel>], iteration_bounds = array<i64: 1>, scalar_prefetch = 0 : i64, scratch_operands = 0 : i64, tpu.core_type = #tpu.core_type<tc>, window_params = [{transform_indices = @transform_0, window_bounds = array<i64: 128, 192>}, {pipeline_mode = #tpu.pipeline_mode<synchronous>, transform_indices = @transform_1, window_bounds = array<i64: 192, 1024>}, {pipeline_mode = #tpu.pipeline_mode<synchronous>, transform_indices = @transform_2, window_bounds = array<i64: 1, 1024>}, {transform_indices = @transform_3, window_bounds = array<i64: 128, 1024>}]} {
    %c0 = arith.constant 0 : index
    %c0_0 = arith.constant 0 : index
    %0 = vector.load %arg1[%c0, %c0_0] : memref<128x192xbf16, #tpu.memory_space<vmem>>, vector<128x192xbf16>
    %c0_1 = arith.constant 0 : index
    %c0_2 = arith.constant 0 : index
    %1 = vector.load %arg2[%c0_1, %c0_2] : memref<192x1024xbf16, #tpu.memory_space<vmem>>, vector<192x1024xbf16>
    %cst = arith.constant dense<0.000000e+00> : vector<128x1024xf32>
    %2 = tpu.matmul %0, %1, %cst {dimension_numbers = #tpu.dot_dimension_numbers<[1], [0], [0], [1], [0, 0, 1, 1], [], []>} : vector<128x192xbf16>, vector<192x1024xbf16>, vector<128x1024xf32> -> vector<128x1024xf32>
    %c0_3 = arith.constant 0 : index
    %c0_4 = arith.constant 0 : index
    %3 = vector.load %arg3[%c0_3, %c0_4] : memref<1x1024xf32, #tpu.memory_space<vmem>>, vector<1x1024xf32>
    %4 = vector.broadcast %3 : vector<1x1024xf32> to vector<128x1024xf32>
    %5 = arith.addf %2, %4 : vector<128x1024xf32>
    %cst_5 = arith.constant 0.000000e+00 : f32
    %6 = vector.broadcast %cst_5 : f32 to vector<128x1024xf32>
    %7 = arith.maximumf %5, %6 : vector<128x1024xf32>
    %8 = arith.truncf %7 : vector<128x1024xf32> to vector<128x1024xbf16>
    %c0_6 = arith.constant 0 : index
    %c0_7 = arith.constant 0 : index
    %9 = vector.load %arg4[%c0_6, %c0_7] : memref<128x1024xbf16, #tpu.memory_space<vmem>>, vector<128x1024xbf16>
    tpu.vector_store %arg4[%c0_6, %c0_7], %8 {strides = array<i32>} : memref<128x1024xbf16, #tpu.memory_space<vmem>>, vector<128x1024xbf16>,
    return
  }
  func.func @transform_0(%arg0: i32) -> (i32, i32) {
    %c0_i32 = arith.constant 0 : i32
    %c0_i32_0 = arith.constant 0 : i32
    return %arg0, %c0_i32 : i32, i32
  }
  func.func @transform_1(%arg0: i32) -> (i32, i32) {
    %c0_i32 = arith.constant 0 : i32
    %c0_i32_0 = arith.constant 0 : i32
    %c0_i32_1 = arith.constant 0 : i32
    return %c0_i32, %c0_i32_0 : i32, i32
  }
  func.func @transform_2(%arg0: i32) -> (i32, i32) {
    %c0_i32 = arith.constant 0 : i32
    %c0_i32_0 = arith.constant 0 : i32
    %c0_i32_1 = arith.constant 0 : i32
    return %c0_i32, %c0_i32_0 : i32, i32
  }
  func.func @transform_3(%arg0: i32) -> (i32, i32) {
    %c0_i32 = arith.constant 0 : i32
    %c0_i32_0 = arith.constant 0 : i32
    return %arg0, %c0_i32 : i32, i32
  }
}

module attributes {stable_mosaic.version = 11 : i64} {
  func.func @_matmul_bias_act_kernel(%arg0: i32, %arg1: memref<8x1024xbf16, #tpu.memory_space<vmem>>, %arg2: memref<1024x16xbf16, #tpu.memory_space<vmem>>, %arg3: memref<1x16xf32, #tpu.memory_space<vmem>>, %arg4: memref<8x16xf32, #tpu.memory_space<vmem>>) attributes {dimension_semantics = [#tpu.dimension_semantics<parallel>], iteration_bounds = array<i64: 1>, scalar_prefetch = 0 : i64, scratch_operands = 0 : i64, tpu.core_type = #tpu.core_type<tc>, window_params = [{transform_indices = @transform_0, window_bounds = array<i64: 8, 1024>}, {pipeline_mode = #tpu.pipeline_mode<synchronous>, transform_indices = @transform_1, window_bounds = array<i64: 1024, 16>}, {pipeline_mode = #tpu.pipeline_mode<synchronous>, transform_indices = @transform_2, window_bounds = array<i64: 1, 16>}, {transform_indices = @transform_3, window_bounds = array<i64: 8, 16>}]} {
    %c0 = arith.constant 0 : index
    %c0_0 = arith.constant 0 : index
    %0 = vector.load %arg1[%c0, %c0_0] : memref<8x1024xbf16, #tpu.memory_space<vmem>>, vector<8x1024xbf16>
    %c0_1 = arith.constant 0 : index
    %c0_2 = arith.constant 0 : index
    %1 = vector.load %arg2[%c0_1, %c0_2] : memref<1024x16xbf16, #tpu.memory_space<vmem>>, vector<1024x16xbf16>
    %cst = arith.constant dense<0.000000e+00> : vector<8x16xf32>
    %2 = tpu.matmul %0, %1, %cst {dimension_numbers = #tpu.dot_dimension_numbers<[1], [0], [0], [1], [0, 0, 1, 1], [], []>} : vector<8x1024xbf16>, vector<1024x16xbf16>, vector<8x16xf32> -> vector<8x16xf32>
    %c0_3 = arith.constant 0 : index
    %c0_4 = arith.constant 0 : index
    %3 = vector.load %arg3[%c0_3, %c0_4] : memref<1x16xf32, #tpu.memory_space<vmem>>, vector<1x16xf32>
    %4 = vector.broadcast %3 : vector<1x16xf32> to vector<8x16xf32>
    %5 = arith.addf %2, %4 : vector<8x16xf32>
    %c0_5 = arith.constant 0 : index
    %c0_6 = arith.constant 0 : index
    %6 = vector.load %arg4[%c0_5, %c0_6] : memref<8x16xf32, #tpu.memory_space<vmem>>, vector<8x16xf32>
    tpu.vector_store %arg4[%c0_5, %c0_6], %5 {strides = array<i32>} : memref<8x16xf32, #tpu.memory_space<vmem>>, vector<8x16xf32>,
    return
  }
  func.func @transform_0(%arg0: i32) -> (i32, i32) {
    %c0_i32 = arith.constant 0 : i32
    %c0_i32_0 = arith.constant 0 : i32
    return %arg0, %c0_i32 : i32, i32
  }
  func.func @transform_1(%arg0: i32) -> (i32, i32) {
    %c0_i32 = arith.constant 0 : i32
    %c0_i32_0 = arith.constant 0 : i32
    %c0_i32_1 = arith.constant 0 : i32
    return %c0_i32, %c0_i32_0 : i32, i32
  }
  func.func @transform_2(%arg0: i32) -> (i32, i32) {
    %c0_i32 = arith.constant 0 : i32
    %c0_i32_0 = arith.constant 0 : i32
    %c0_i32_1 = arith.constant 0 : i32
    return %c0_i32, %c0_i32_0 : i32, i32
  }
  func.func @transform_3(%arg0: i32) -> (i32, i32) {
    %c0_i32 = arith.constant 0 : i32
    %c0_i32_0 = arith.constant 0 : i32
    return %arg0, %c0_i32 : i32, i32
  }
}

</mosaic_0001>

<bundles_post_ra>
// kernel: shufflenet_forward.27
= control target key start
LH: loop header
LB: loop body
LE: loop exit
PB: predicated region body
PF: predicated region fallthrough
CT: control target
= control target key end

     0   :  { %vm115_vm0 = vcmask 1043456   ;;  %vm90_vm1 = vcmask 195584   ;;  %vm280_vm2 = vcmask 388096   ;;  %s523_s1 = inlined_call_operand.vmem [shape: bf16[24,48], index: 1, kind: input, shape index: {}]   ;;  %s524_s0 = inlined_call_operand.vmem [shape: bf16[128,24], index: 0, kind: input, shape index: {}]   ;;  %s525_s2 = inlined_call_operand.vmem [shape: f32[1,48], index: 2, kind: input, shape index: {}]   ;;  %s526_s3 = inlined_call_operand.vmem [shape: bf16[128,48], index: 3, kind: output, shape index: {}]  }
   0x1   :  { %v388_v0 = vld [vmem:[%s523_s1] sm:$0xff]   ;;  %v389_v1 = vld [vmem:[%s523_s1 + $0x8] ss:$0 sps:$4 sm:$0xff]   ;;  %v394_v7 = vld [vmem:[%s524_s0 + $0x10] sm:$0xff]  }
   0x2   :  { %362 = vmatprep.subr.bf16.mxu0 %v388_v0  ;;  %382 = vmatprep.subr.bf16.mxu1 %v388_v0  ;;  %v390_v2 = vld [vmem:[%s524_s0] sm:$0xff]   ;;  %v117_v4 = vsel %vm115_vm0, %v389_v1, 0  ;;  %v392_v5 = vld [vmem:[%s524_s0 + $0x8] sm:$0xff]   ;;  %v395_v8 = vld [vmem:[%s524_s0 + $0x30] sm:$0xff]  }
   0x3   :  { %363 = vmatpush3.bf16.msra.mxu0 %v388_v0  ;;  %384 = vmatpush3.bf16.msra.mxu1 %v388_v0  ;;  %v391_v3 = vld [vmem:[%s524_s0 + $0x20] sm:$0xff]   ;;  %v393_v6 = vld [vmem:[%s524_s0 + $0x28] sm:$0xff]   ;;  %v396_v9 = vld [vmem:[%s524_s0 + $0x18] sm:$0xff]  }
   0x4   :  { %386 = vmatprep.subr.msk.bf16.mxu0 %vm115_vm0, %v389_v1  ;;  %387 = vmatprep.subr.msk.bf16.mxu1 %vm115_vm0, %v389_v1  ;;  %v397_v10 = vld [vmem:[%s524_s0 + $0x38] sm:$0xff]   ;;  %v301_v11 = vld [vmem:[%s525_s2] ss:$0 sm:$0xff] }
   0x5   :  { %366 = vmatprep.mubr.msk.bf16.mxu0 %vm90_vm1, %v390_v2  ;;  %374 = vmatprep.mubr.msk.bf16.mxu1 %vm90_vm1, %v391_v3 }
   0x7   :  { %365 = vmatpush3.bf16.msra.mxu0 %v117_v4  ;;  %385 = vmatpush3.bf16.msra.mxu1 %v117_v4 }
   0xa   :  { %367 = vmatmul.mubr.msk.bf16.vlgmr.msra.gmra.mrb[0].mxu0 %vm90_vm1, %v392_v5  ;;  %375 = vmatmul.mubr.msk.bf16.vlgmr.msra.gmra.mrb[0].mxu1 %vm90_vm1, %v393_v6 }
   0xb   :  { %370 = vmatprep.mubr.msk.bf16.mxu0 %vm90_vm1, %v394_v7  ;;  %378 = vmatprep.mubr.msk.bf16.mxu1 %vm90_vm1, %v395_v8 }
  0x12   :  { %371 = vmatmul.mubr.msk.bf16.gmra.mrb[4].mxu0 %vm90_vm1, %v396_v9  ;;  %379 = vmatmul.mubr.msk.bf16.gmra.mrb[4].mxu1 %vm90_vm1, %v397_v10 }
  0xdd   :  { %v368_v12 = vpop.f32.mrb[0].mxu0  ;;  %v376_v13 = vpop.f32.mrb[0].mxu1 }
  0xde   :  { %v162_v14 = vadd.f32 %v368_v12, %v301_v11  ;;  %v194_v15 = vadd.f32 %v376_v13, %v301_v11  ;;  %v153_v16 = vpop.f32.mrb[1].mxu0  ;;  %v185_v17 = vpop.f32.mrb[1].mxu1 }
  0xdf   :  { %v154_v18 = vadd.f32 %v301_v11, %v153_v16  ;;  %v186_v19 = vadd.f32 %v301_v11, %v185_v17  ;;  %v369_v20 = vpop.f32.mrb[2].mxu0  ;;  %v377_v21 = vpop.f32.mrb[2].mxu1 }
  0xe0   :  { %v338_v22 = vpack.c.bf16 %v162_v14, %v162_v14  ;;  %v346_v23 = vpack.c.bf16 %v194_v15, %v194_v15  ;;  %v165_v24 = vadd.f32 %v369_v20, %v301_v11  ;;  %v197_v25 = vadd.f32 %v377_v21, %v301_v11  ;;  %v156_v26 = vpop.f32.mrb[3].mxu0  ;;  %v188_v27 = vpop.f32.mrb[3].mxu1 }
  0xe1   :  { %v336_v28 = vpack.c.bf16 %v154_v18, %v154_v18  ;;  %v344_v29 = vpack.c.bf16 %v186_v19, %v186_v19  ;;  %v157_v30 = vadd.f32 %v301_v11, %v156_v26  ;;  %v189_v31 = vadd.f32 %v301_v11, %v188_v27 }
  0xe2   :  { %283 = vst.msk [vmem:[%s526_s3 + $0x8] sm:$0xf] %vm280_vm2, %v338_v22  ;;  %291 = vst.msk [vmem:[%s526_s3 + $0x28] sm:$0xf] %vm280_vm2, %v346_v23  ;;  %v339_v32 = vpack.c.bf16 %v165_v24, %v165_v24  ;;  %v347_v33 = vpack.c.bf16 %v197_v25, %v197_v25 }
  0xe3   :  { %281 = vst.msk [vmem:[%s526_s3] sm:$0xf] %vm280_vm2, %v336_v28  ;;  %289 = vst.msk [vmem:[%s526_s3 + $0x20] sm:$0xf] %vm280_vm2, %v344_v29  ;;  %v337_v34 = vpack.c.bf16 %v157_v30, %v157_v30  ;;  %v345_v35 = vpack.c.bf16 %v189_v31, %v189_v31 }
  0xe4   :  { %284 = vst.msk [vmem:[%s526_s3 + $0xc] sm:$0xf] %vm280_vm2, %v339_v32  ;;  %292 = vst.msk [vmem:[%s526_s3 + $0x2c] sm:$0xf] %vm280_vm2, %v347_v33 }
  0xe5   :  { %282 = vst.msk [vmem:[%s526_s3 + $0x4] sm:$0xf] %vm280_vm2, %v337_v34  ;;  %290 = vst.msk [vmem:[%s526_s3 + $0x24] sm:$0xf] %vm280_vm2, %v345_v35  ;;  %v372_v36 = vpop.f32.mrb[4].mxu0  ;;  %v380_v37 = vpop.f32.mrb[4].mxu1 }
  0xe6   :  { %v178_v38 = vadd.f32 %v372_v36, %v301_v11  ;;  %v210_v39 = vadd.f32 %v380_v37, %v301_v11  ;;  %v169_v40 = vpop.f32.mrb[5].mxu0  ;;  %v201_v41 = vpop.f32.mrb[5].mxu1 }
  0xe7   :  { %v170_v42 = vadd.f32 %v301_v11, %v169_v40  ;;  %v202_v43 = vadd.f32 %v301_v11, %v201_v41  ;;  %v373_v44 = vpop.f32.mrb[6].mxu0  ;;  %v381_v45 = vpop.f32.mrb[6].mxu1 }
  0xe8   :  { %v342_v46 = vpack.c.bf16 %v178_v38, %v178_v38  ;;  %v350_v47 = vpack.c.bf16 %v210_v39, %v210_v39  ;;  %v181_v48 = vadd.f32 %v373_v44, %v301_v11  ;;  %v213_v49 = vadd.f32 %v381_v45, %v301_v11  ;;  %v172_v50 = vpop.f32.mrb[7].mxu0  ;;  %v204_v51 = vpop.f32.mrb[7].mxu1 }
  0xe9   :  { %v340_v52 = vpack.c.bf16 %v170_v42, %v170_v42  ;;  %v348_v53 = vpack.c.bf16 %v202_v43, %v202_v43  ;;  %v173_v54 = vadd.f32 %v301_v11, %v172_v50  ;;  %v205_v55 = vadd.f32 %v301_v11, %v204_v51 }
  0xea   :  { %287 = vst.msk [vmem:[%s526_s3 + $0x18] sm:$0xf] %vm280_vm2, %v342_v46  ;;  %295 = vst.msk [vmem:[%s526_s3 + $0x38] sm:$0xf] %vm280_vm2, %v350_v47  ;;  %v343_v56 = vpack.c.bf16 %v181_v48, %v181_v48  ;;  %v351_v57 = vpack.c.bf16 %v213_v49, %v213_v49 }
  0xeb   :  { %285 = vst.msk [vmem:[%s526_s3 + $0x10] sm:$0xf] %vm280_vm2, %v340_v52  ;;  %293 = vst.msk [vmem:[%s526_s3 + $0x30] sm:$0xf] %vm280_vm2, %v348_v53  ;;  %v341_v58 = vpack.c.bf16 %v173_v54, %v173_v54  ;;  %v349_v59 = vpack.c.bf16 %v205_v55, %v205_v55 }
  0xec   :  { %288 = vst.msk [vmem:[%s526_s3 + $0x1c] sm:$0xf] %vm280_vm2, %v343_v56  ;;  %296 = vst.msk [vmem:[%s526_s3 + $0x3c] sm:$0xf] %vm280_vm2, %v351_v57 }
  0xed   :  { %286 = vst.msk [vmem:[%s526_s3 + $0x14] sm:$0xf] %vm280_vm2, %v341_v58  ;;  %294 = vst.msk [vmem:[%s526_s3 + $0x34] sm:$0xf] %vm280_vm2, %v349_v59 }

// kernel: shufflenet_forward.25
= control target key start
LH: loop header
LB: loop body
LE: loop exit
PB: predicated region body
PF: predicated region fallthrough
CT: control target
= control target key end

     0   :  { %vm115_vm0 = vcmask 1043456   ;;  %vm90_vm1 = vcmask 195584   ;;  %vm296_vm2 = vcmask 93184   ;;  %s539_s1 = inlined_call_operand.vmem [shape: bf16[24,12], index: 1, kind: input, shape index: {}]   ;;  %s540_s0 = inlined_call_operand.vmem [shape: bf16[128,24], index: 0, kind: input, shape index: {}]   ;;  %s541_s2 = inlined_call_operand.vmem [shape: f32[1,12], index: 2, kind: input, shape index: {}]   ;;  %s542_s3 = inlined_call_operand.vmem [shape: bf16[128,12], index: 3, kind: output, shape index: {}]  }
   0x1   :  { %v404_v0 = vld [vmem:[%s539_s1] sm:$0xff]   ;;  %v405_v1 = vld [vmem:[%s539_s1 + $0x8] ss:$0 sps:$4 sm:$0xff]   ;;  %v410_v7 = vld [vmem:[%s540_s0 + $0x10] sm:$0xff]  }
   0x2   :  { %378 = vmatprep.subr.bf16.mxu0 %v404_v0  ;;  %398 = vmatprep.subr.bf16.mxu1 %v404_v0  ;;  %v406_v2 = vld [vmem:[%s540_s0] sm:$0xff]   ;;  %v117_v4 = vsel %vm115_vm0, %v405_v1, 0  ;;  %v408_v5 = vld [vmem:[%s540_s0 + $0x8] sm:$0xff]   ;;  %v411_v8 = vld [vmem:[%s540_s0 + $0x30] sm:$0xff]  }
   0x3   :  { %379 = vmatpush3.bf16.msra.mxu0 %v404_v0  ;;  %400 = vmatpush3.bf16.msra.mxu1 %v404_v0  ;;  %v407_v3 = vld [vmem:[%s540_s0 + $0x20] sm:$0xff]   ;;  %v409_v6 = vld [vmem:[%s540_s0 + $0x28] sm:$0xff]   ;;  %v412_v9 = vld [vmem:[%s540_s0 + $0x18] sm:$0xff]  }
   0x4   :  { %402 = vmatprep.subr.msk.bf16.mxu0 %vm115_vm0, %v405_v1  ;;  %403 = vmatprep.subr.msk.bf16.mxu1 %vm115_vm0, %v405_v1  ;;  %v413_v10 = vld [vmem:[%s540_s0 + $0x38] sm:$0xff]   ;;  %v317_v11 = vld [vmem:[%s541_s2] ss:$0 sm:$0xff] }
   0x5   :  { %382 = vmatprep.mubr.msk.bf16.mxu0 %vm90_vm1, %v406_v2  ;;  %390 = vmatprep.mubr.msk.bf16.mxu1 %vm90_vm1, %v407_v3 }
   0x7   :  { %381 = vmatpush3.bf16.msra.mxu0 %v117_v4  ;;  %401 = vmatpush3.bf16.msra.mxu1 %v117_v4 }
   0xa   :  { %383 = vmatmul.mubr.msk.bf16.vlgmr.msra.gmra.mrb[0].mxu0 %vm90_vm1, %v408_v5  ;;  %391 = vmatmul.mubr.msk.bf16.vlgmr.msra.gmra.mrb[0].mxu1 %vm90_vm1, %v409_v6 }
   0xb   :  { %386 = vmatprep.mubr.msk.bf16.mxu0 %vm90_vm1, %v410_v7  ;;  %394 = vmatprep.mubr.msk.bf16.mxu1 %vm90_vm1, %v411_v8 }
  0x12   :  { %387 = vmatmul.mubr.msk.bf16.gmra.mrb[4].mxu0 %vm90_vm1, %v412_v9  ;;  %395 = vmatmul.mubr.msk.bf16.gmra.mrb[4].mxu1 %vm90_vm1, %v413_v10 }
  0xdd   :  { %v384_v12 = vpop.f32.mrb[0].mxu0  ;;  %v392_v13 = vpop.f32.mrb[0].mxu1 }
  0xde   :  { %v162_v14 = vadd.f32 %v384_v12, %v317_v11  ;;  %v194_v15 = vadd.f32 %v392_v13, %v317_v11  ;;  %v153_v16 = vpop.f32.mrb[1].mxu0  ;;  %v185_v17 = vpop.f32.mrb[1].mxu1 }
  0xdf   :  { %v154_v18 = vadd.f32 %v317_v11, %v153_v16  ;;  %v186_v19 = vadd.f32 %v317_v11, %v185_v17  ;;  %v385_v20 = vpop.f32.mrb[2].mxu0  ;;  %v393_v21 = vpop.f32.mrb[2].mxu1 }
  0xe0   :  { %v218_v22 = vmax.f32 %v162_v14, 0.0  ;;  %v226_v23 = vmax.f32 %v194_v15, 0.0  ;;  %v165_v24 = vadd.f32 %v385_v20, %v317_v11  ;;  %v197_v25 = vadd.f32 %v393_v21, %v317_v11  ;;  %v156_v26 = vpop.f32.mrb[3].mxu0  ;;  %v188_v27 = vpop.f32.mrb[3].mxu1 }
  0xe1   :  { %v216_v28 = vmax.f32 %v154_v18, 0.0  ;;  %v224_v29 = vmax.f32 %v186_v19, 0.0  ;;  %v157_v30 = vadd.f32 %v317_v11, %v156_v26  ;;  %v189_v31 = vadd.f32 %v317_v11, %v188_v27 }
  0xe2   :  { %v354_v32 = vpack.c.bf16 %v218_v22, %v218_v22  ;;  %v362_v33 = vpack.c.bf16 %v226_v23, %v226_v23  ;;  %v219_v34 = vmax.f32 %v165_v24, 0.0  ;;  %v227_v35 = vmax.f32 %v197_v25, 0.0 }
  0xe3   :  { %v352_v36 = vpack.c.bf16 %v216_v28, %v216_v28  ;;  %v360_v37 = vpack.c.bf16 %v224_v29, %v224_v29  ;;  %v217_v38 = vmax.f32 %v157_v30, 0.0  ;;  %v225_v39 = vmax.f32 %v189_v31, 0.0 }
  0xe4   :  { %299 = vst.msk [vmem:[%s542_s3 + $0x8] sm:$0xf] %vm296_vm2, %v354_v32  ;;  %307 = vst.msk [vmem:[%s542_s3 + $0x28] sm:$0xf] %vm296_vm2, %v362_v33  ;;  %v355_v40 = vpack.c.bf16 %v219_v34, %v219_v34  ;;  %v363_v41 = vpack.c.bf16 %v227_v35, %v227_v35 }
  0xe5   :  { %297 = vst.msk [vmem:[%s542_s3] sm:$0xf] %vm296_vm2, %v352_v36  ;;  %305 = vst.msk [vmem:[%s542_s3 + $0x20] sm:$0xf] %vm296_vm2, %v360_v37  ;;  %v353_v42 = vpack.c.bf16 %v217_v38, %v217_v38  ;;  %v361_v43 = vpack.c.bf16 %v225_v39, %v225_v39  ;;  %v388_v44 = vpop.f32.mrb[4].mxu0  ;;  %v396_v45 = vpop.f32.mrb[4].mxu1 }
  0xe6   :  { %300 = vst.msk [vmem:[%s542_s3 + $0xc] sm:$0xf] %vm296_vm2, %v355_v40  ;;  %308 = vst.msk [vmem:[%s542_s3 + $0x2c] sm:$0xf] %vm296_vm2, %v363_v41  ;;  %v178_v46 = vadd.f32 %v388_v44, %v317_v11  ;;  %v210_v47 = vadd.f32 %v396_v45, %v317_v11  ;;  %v169_v48 = vpop.f32.mrb[5].mxu0  ;;  %v201_v49 = vpop.f32.mrb[5].mxu1 }
  0xe7   :  { %298 = vst.msk [vmem:[%s542_s3 + $0x4] sm:$0xf] %vm296_vm2, %v353_v42  ;;  %306 = vst.msk [vmem:[%s542_s3 + $0x24] sm:$0xf] %vm296_vm2, %v361_v43  ;;  %v170_v50 = vadd.f32 %v317_v11, %v169_v48  ;;  %v202_v51 = vadd.f32 %v317_v11, %v201_v49  ;;  %v389_v52 = vpop.f32.mrb[6].mxu0  ;;  %v397_v53 = vpop.f32.mrb[6].mxu1 }
  0xe8   :  { %v222_v54 = vmax.f32 %v178_v46, 0.0  ;;  %v230_v55 = vmax.f32 %v210_v47, 0.0  ;;  %v181_v56 = vadd.f32 %v389_v52, %v317_v11  ;;  %v213_v57 = vadd.f32 %v397_v53, %v317_v11  ;;  %v172_v58 = vpop.f32.mrb[7].mxu0  ;;  %v204_v59 = vpop.f32.mrb[7].mxu1 }
  0xe9   :  { %v220_v60 = vmax.f32 %v170_v50, 0.0  ;;  %v228_v61 = vmax.f32 %v202_v51, 0.0  ;;  %v173_v62 = vadd.f32 %v317_v11, %v172_v58  ;;  %v205_v63 = vadd.f32 %v317_v11, %v204_v59 }
  0xea   :  { %v358_v0 = vpack.c.bf16 %v222_v54, %v222_v54  ;;  %v366_v1 = vpack.c.bf16 %v230_v55, %v230_v55  ;;  %v223_v2 = vmax.f32 %v181_v56, 0.0  ;;  %v231_v3 = vmax.f32 %v213_v57, 0.0 }
  0xeb   :  { %v356_v4 = vpack.c.bf16 %v220_v60, %v220_v60  ;;  %v364_v5 = vpack.c.bf16 %v228_v61, %v228_v61  ;;  %v221_v6 = vmax.f32 %v173_v62, 0.0  ;;  %v229_v7 = vmax.f32 %v205_v63, 0.0 }
  0xec   :  { %303 = vst.msk [vmem:[%s542_s3 + $0x18] sm:$0xf] %vm296_vm2, %v358_v0  ;;  %311 = vst.msk [vmem:[%s542_s3 + $0x38] sm:$0xf] %vm296_vm2, %v366_v1  ;;  %v359_v8 = vpack.c.bf16 %v223_v2, %v223_v2  ;;  %v367_v9 = vpack.c.bf16 %v231_v3, %v231_v3 }
  0xed   :  { %301 = vst.msk [vmem:[%s542_s3 + $0x10] sm:$0xf] %vm296_vm2, %v356_v4  ;;  %309 = vst.msk [vmem:[%s542_s3 + $0x30] sm:$0xf] %vm296_vm2, %v364_v5  ;;  %v357_v10 = vpack.c.bf16 %v221_v6, %v221_v6  ;;  %v365_v11 = vpack.c.bf16 %v229_v7, %v229_v7 }
  0xee   :  { %304 = vst.msk [vmem:[%s542_s3 + $0x1c] sm:$0xf] %vm296_vm2, %v359_v8  ;;  %312 = vst.msk [vmem:[%s542_s3 + $0x3c] sm:$0xf] %vm296_vm2, %v367_v9 }
  0xef   :  { %302 = vst.msk [vmem:[%s542_s3 + $0x14] sm:$0xf] %vm296_vm2, %v357_v10  ;;  %310 = vst.msk [vmem:[%s542_s3 + $0x34] sm:$0xf] %vm296_vm2, %v365_v11 }

// kernel: shufflenet_forward.24
= control target key start
LH: loop header
LB: loop body
LE: loop exit
PB: predicated region body
PF: predicated region fallthrough
CT: control target
= control target key end

     0   :  { %vm358_vm0 = vcmask 1044480   ;;  %vm359_vm1 = vcmask 1045504   ;;  %vm261_vm2 = vcmask 220160   ;;  %v1379_v1 = vmov 65535   ;;  %s1859_s1 = inlined_call_operand.vmem [shape: bf16[27,24], index: 1, kind: input, shape index: {}]   ;;  %s1860_s0 = inlined_call_operand.vmem [shape: bf16[512,27], index: 0, kind: input, shape index: {}]   ;;  %s1861_s2 = inlined_call_operand.vmem [shape: f32[1,24], index: 2, kind: input, shape index: {}]   ;;  %s1862_s3 = inlined_call_operand.vmem [shape: bf16[512,24], index: 3, kind: output, shape index: {}]  }
   0x1   :  { %v1345_v0 = vld [vmem:[%s1859_s1] sm:$0xff]   ;;  %v360_v2 = vsel %vm358_vm0, 4294967295, %v1379_v1  ;;  %v1346_v3 = vld [vmem:[%s1859_s1 + $0x8] sm:$0x3f]   ;;  %v1351_v10 = vld [vmem:[%s1860_s0 + $0x10] sm:$0xff]   ;;  %vm974_vm3 = vcmask 191488  }
   0x2   :  { %1272 = vmatprep.subr.bf16.mxu0 %v1345_v0  ;;  %1340 = vmatprep.subr.bf16.mxu1 %v1345_v0  ;;  %v361_v4 = vsel %vm359_vm1, %v360_v2, 0  ;;  %v1347_v5 = vld [vmem:[%s1860_s0] sm:$0xff]   ;;  %v1349_v8 = vld [vmem:[%s1860_s0 + $0x8] sm:$0xff]   ;;  %v1352_v11 = vld [vmem:[%s1860_s0 + $0x90] sm:$0xff]  }
   0x3   :  { %1273 = vmatpush3.bf16.msra.mxu0 %v1345_v0  ;;  %1342 = vmatpush3.bf16.msra.mxu1 %v1345_v0  ;;  %v363_v6 = vand.u32 %v1346_v3, %v361_v4  ;;  %v1348_v7 = vld [vmem:[%s1860_s0 + $0x80] sm:$0xff]   ;;  %v1350_v9 = vld [vmem:[%s1860_s0 + $0x88] sm:$0xff]   ;;  %v1353_v12 = vld [vmem:[%s1860_s0 + $0x18] sm:$0xff]  }
   0x4   :  { %1276 = vmatprep.mubr.msk.bf16.mxu0 %vm261_vm2, %v1347_v5  ;;  %1308 = vmatprep.mubr.msk.bf16.mxu1 %vm261_vm2, %v1348_v7  ;;  %v1354_v13 = vld [vmem:[%s1860_s0 + $0x98] sm:$0xff]   ;;  %v1355_v14 = vld [vmem:[%s1860_s0 + $0x20] sm:$0xff]   ;;  %v1357_v16 = vld [vmem:[%s1860_s0 + $0x28] sm:$0xff]  }
   0x5   :  { %1274 = vmatprep.subr.bf16.mxu0 %v363_v6  ;;  %1341 = vmatprep.subr.bf16.mxu1 %v363_v6  ;;  %v1356_v15 = vld [vmem:[%s1860_s0 + $0xa0] sm:$0xff]   ;;  %v1358_v17 = vld [vmem:[%s1860_s0 + $0xa8] sm:$0xff]   ;;  %v1359_v18 = vld [vmem:[%s1860_s0 + $0x30] sm:$0xff]  }
   0x6   :  { %v1360_v19 = vld [vmem:[%s1860_s0 + $0xb0] sm:$0xff]   ;;  %v1361_v20 = vld [vmem:[%s1860_s0 + $0x38] sm:$0xff]   ;;  %v1363_v22 = vld [vmem:[%s1860_s0 + $0x40] sm:$0xff]  }
   0x7   :  { %1275 = vmatpush3.bf16.msra.mxu0 %v363_v6  ;;  %1343 = vmatpush3.bf16.msra.mxu1 %v363_v6  ;;  %v1362_v21 = vld [vmem:[%s1860_s0 + $0xb8] sm:$0xff]   ;;  %v1364_v23 = vld [vmem:[%s1860_s0 + $0xc0] sm:$0xff]   ;;  %v1365_v24 = vld [vmem:[%s1860_s0 + $0x48] sm:$0xff]  }
   0x8   :  { %v1366_v25 = vld [vmem:[%s1860_s0 + $0xc8] sm:$0xff]   ;;  %v1367_v26 = vld [vmem:[%s1860_s0 + $0x50] sm:$0xff]   ;;  %v1369_v28 = vld [vmem:[%s1860_s0 + $0x58] sm:$0xff]  }
   0x9   :  { %v1368_v27 = vld [vmem:[%s1860_s0 + $0xd0] sm:$0xff]   ;;  %v1370_v29 = vld [vmem:[%s1860_s0 + $0xd8] sm:$0xff]   ;;  %v1371_v30 = vld [vmem:[%s1860_s0 + $0x60] sm:$0xff]  }
   0xa   :  { %1277 = vmatmul.mubr.msk.bf16.vlgmr.msra.gmra.mrb[0].mxu0 %vm261_vm2, %v1349_v8  ;;  %1309 = vmatmul.mubr.msk.bf16.vlgmr.msra.gmra.mrb[0].mxu1 %vm261_vm2, %v1350_v9  ;;  %v1372_v31 = vld [vmem:[%s1860_s0 + $0xe0] sm:$0xff]   ;;  %v1373_v32 = vld [vmem:[%s1860_s0 + $0x68] sm:$0xff]   ;;  %v1375_v34 = vld [vmem:[%s1860_s0 + $0x70] sm:$0xff]  }
   0xb   :  { %1280 = vmatprep.mubr.msk.bf16.mxu0 %vm261_vm2, %v1351_v10  ;;  %1312 = vmatprep.mubr.msk.bf16.mxu1 %vm261_vm2, %v1352_v11  ;;  %v1374_v33 = vld [vmem:[%s1860_s0 + $0xe8] sm:$0xff]   ;;  %v1376_v35 = vld [vmem:[%s1860_s0 + $0xf0] sm:$0xff]   ;;  %v1377_v36 = vld [vmem:[%s1860_s0 + $0x78] sm:$0xff]  }
   0xc   :  { %v1378_v37 = vld [vmem:[%s1860_s0 + $0xf8] sm:$0xff]   ;;  %v1537_v38 = vld [vmem:[%s1861_s2] ss:$0 sm:$0xff] }
  0x12   :  { %1281 = vmatmul.mubr.msk.bf16.gmra.mrb[4].mxu0 %vm261_vm2, %v1353_v12  ;;  %1313 = vmatmul.mubr.msk.bf16.gmra.mrb[4].mxu1 %vm261_vm2, %v1354_v13 }
  0x13   :  { %1284 = vmatprep.mubr.msk.bf16.mxu0 %vm261_vm2, %v1355_v14  ;;  %1316 = vmatprep.mubr.msk.bf16.mxu1 %vm261_vm2, %v1356_v15 }
  0x1a   :  { %1285 = vmatmul.mubr.msk.bf16.gmra.mrb[8].mxu0 %vm261_vm2, %v1357_v16  ;;  %1317 = vmatmul.mubr.msk.bf16.gmra.mrb[8].mxu1 %vm261_vm2, %v1358_v17 }
  0x1b   :  { %1288 = vmatprep.mubr.msk.bf16.mxu0 %vm261_vm2, %v1359_v18  ;;  %1320 = vmatprep.mubr.msk.bf16.mxu1 %vm261_vm2, %v1360_v19 }
  0x22   :  { %1289 = vmatmul.mubr.msk.bf16.gmra.mrb[12].mxu0 %vm261_vm2, %v1361_v20  ;;  %1321 = vmatmul.mubr.msk.bf16.gmra.mrb[12].mxu1 %vm261_vm2, %v1362_v21 }
  0x23   :  { %1292 = vmatprep.mubr.msk.bf16.mxu0 %vm261_vm2, %v1363_v22  ;;  %1324 = vmatprep.mubr.msk.bf16.mxu1 %vm261_vm2, %v1364_v23 }
  0x2a   :  { %1293 = vmatmul.mubr.msk.bf16.gmra.mrb[16].mxu0 %vm261_vm2, %v1365_v24  ;;  %1325 = vmatmul.mubr.msk.bf16.gmra.mrb[16].mxu1 %vm261_vm2, %v1366_v25 }
  0x2b   :  { %1296 = vmatprep.mubr.msk.bf16.mxu0 %vm261_vm2, %v1367_v26  ;;  %1328 = vmatprep.mubr.msk.bf16.mxu1 %vm261_vm2, %v1368_v27 }
  0x32   :  { %1297 = vmatmul.mubr.msk.bf16.gmra.mrb[20].mxu0 %vm261_vm2, %v1369_v28  ;;  %1329 = vmatmul.mubr.msk.bf16.gmra.mrb[20].mxu1 %vm261_vm2, %v1370_v29 }
  0x33   :  { %1300 = vmatprep.mubr.msk.bf16.mxu0 %vm261_vm2, %v1371_v30  ;;  %1332 = vmatprep.mubr.msk.bf16.mxu1 %vm261_vm2, %v1372_v31 }
  0x3a   :  { %1301 = vmatmul.mubr.msk.bf16.gmra.mrb[24].mxu0 %vm261_vm2, %v1373_v32  ;;  %1333 = vmatmul.mubr.msk.bf16.gmra.mrb[24].mxu1 %vm261_vm2, %v1374_v33 }
  0x3b   :  { %1304 = vmatprep.mubr.msk.bf16.mxu0 %vm261_vm2, %v1375_v34  ;;  %1336 = vmatprep.mubr.msk.bf16.mxu1 %vm261_vm2, %v1376_v35 }
  0x42   :  { %1305 = vmatmul.mubr.msk.bf16.gmra.mrb[28].mxu0 %vm261_vm2, %v1377_v36  ;;  %1337 = vmatmul.mubr.msk.bf16.gmra.mrb[28].mxu1 %vm261_vm2, %v1378_v37 }
  0xdd   :  { %v1278_v39 = vpop.f32.mrb[0].mxu0  ;;  %v1310_v40 = vpop.f32.mrb[0].mxu1 }
  0xde   :  { %v408_v41 = vadd.f32 %v1278_v39, %v1537_v38  ;;  %v536_v42 = vadd.f32 %v1310_v40, %v1537_v38  ;;  %v399_v43 = vpop.f32.mrb[1].mxu0  ;;  %v527_v44 = vpop.f32.mrb[1].mxu1 }
  0xdf   :  { %v400_v45 = vadd.f32 %v1537_v38, %v399_v43  ;;  %v528_v46 = vadd.f32 %v1537_v38, %v527_v44  ;;  %v1279_v47 = vpop.f32.mrb[2].mxu0  ;;  %v1311_v48 = vpop.f32.mrb[2].mxu1 }
  0xe0   :  { %v656_v49 = vmax.f32 %v408_v41, 0.0  ;;  %v688_v50 = vmax.f32 %v536_v42, 0.0  ;;  %v411_v51 = vadd.f32 %v1279_v47, %v1537_v38  ;;  %v539_v52 = vadd.f32 %v1311_v48, %v1537_v38  ;;  %v402_v53 = vpop.f32.mrb[3].mxu0  ;;  %v530_v54 = vpop.f32.mrb[3].mxu1 }
  0xe1   :  { %v654_v55 = vmax.f32 %v400_v45, 0.0  ;;  %v686_v56 = vmax.f32 %v528_v46, 0.0  ;;  %v403_v57 = vadd.f32 %v1537_v38, %v402_v53  ;;  %v531_v58 = vadd.f32 %v1537_v38, %v530_v54 }
  0xe2   :  { %v1176_v59 = vpack.c.bf16 %v656_v49, %v656_v49  ;;  %v1208_v60 = vpack.c.bf16 %v688_v50, %v688_v50  ;;  %v657_v61 = vmax.f32 %v411_v51, 0.0  ;;  %v689_v62 = vmax.f32 %v539_v52, 0.0 }
  0xe3   :  { %v1174_v63 = vpack.c.bf16 %v654_v55, %v654_v55  ;;  %v1206_v0 = vpack.c.bf16 %v686_v56, %v686_v56  ;;  %v655_v1 = vmax.f32 %v403_v57, 0.0  ;;  %v687_v2 = vmax.f32 %v531_v58, 0.0 }
  0xe4   :  { %977 = vst.msk [vmem:[%s1862_s3 + $0x8] sm:$0xf] %vm974_vm3, %v1176_v59  ;;  %1009 = vst.msk [vmem:[%s1862_s3 + $0x88] sm:$0xf] %vm974_vm3, %v1208_v60  ;;  %v1177_v3 = vpack.c.bf16 %v657_v61, %v657_v61  ;;  %v1209_v4 = vpack.c.bf16 %v689_v62, %v689_v62 }
  0xe5   :  { %975 = vst.msk [vmem:[%s1862_s3] sm:$0xf] %vm974_vm3, %v1174_v63  ;;  %1007 = vst.msk [vmem:[%s1862_s3 + $0x80] sm:$0xf] %vm974_vm3, %v1206_v0  ;;  %v1175_v5 = vpack.c.bf16 %v655_v1, %v655_v1  ;;  %v1207_v6 = vpack.c.bf16 %v687_v2, %v687_v2  ;;  %v1282_v7 = vpop.f32.mrb[4].mxu0  ;;  %v1314_v8 = vpop.f32.mrb[4].mxu1 }
  0xe6   :  { %978 = vst.msk [vmem:[%s1862_s3 + $0xc] sm:$0xf] %vm974_vm3, %v1177_v3  ;;  %1010 = vst.msk [vmem:[%s1862_s3 + $0x8c] sm:$0xf] %vm974_vm3, %v1209_v4  ;;  %v424_v9 = vadd.f32 %v1282_v7, %v1537_v38  ;;  %v552_v10 = vadd.f32 %v1314_v8, %v1537_v38  ;;  %v415_v11 = vpop.f32.mrb[5].mxu0  ;;  %v543_v12 = vpop.f32.mrb[5].mxu1 }
  0xe7   :  { %976 = vst.msk [vmem:[%s1862_s3 + $0x4] sm:$0xf] %vm974_vm3, %v1175_v5  ;;  %1008 = vst.msk [vmem:[%s1862_s3 + $0x84] sm:$0xf] %vm974_vm3, %v1207_v6  ;;  %v416_v13 = vadd.f32 %v1537_v38, %v415_v11  ;;  %v544_v14 = vadd.f32 %v1537_v38, %v543_v12  ;;  %v1283_v15 = vpop.f32.mrb[6].mxu0  ;;  %v1315_v16 = vpop.f32.mrb[6].mxu1 }
  0xe8   :  { %v660_v17 = vmax.f32 %v424_v9, 0.0  ;;  %v692_v18 = vmax.f32 %v552_v10, 0.0  ;;  %v427_v19 = vadd.f32 %v1283_v15, %v1537_v38  ;;  %v555_v20 = vadd.f32 %v1315_v16, %v1537_v38  ;;  %v418_v21 = vpop.f32.mrb[7].mxu0  ;;  %v546_v22 = vpop.f32.mrb[7].mxu1 }
  0xe9   :  { %v658_v23 = vmax.f32 %v416_v13, 0.0  ;;  %v690_v24 = vmax.f32 %v544_v14, 0.0  ;;  %v419_v25 = vadd.f32 %v1537_v38, %v418_v21  ;;  %v547_v26 = vadd.f32 %v1537_v38, %v546_v22 }
  0xea   :  { %v1180_v27 = vpack.c.bf16 %v660_v17, %v660_v17  ;;  %v1212_v28 = vpack.c.bf16 %v692_v18, %v692_v18  ;;  %v661_v29 = vmax.f32 %v427_v19, 0.0  ;;  %v693_v30 = vmax.f32 %v555_v20, 0.0 }
  0xeb   :  { %v1178_v31 = vpack.c.bf16 %v658_v23, %v658_v23  ;;  %v1210_v32 = vpack.c.bf16 %v690_v24, %v690_v24  ;;  %v659_v33 = vmax.f32 %v419_v25, 0.0  ;;  %v691_v34 = vmax.f32 %v547_v26, 0.0 }
  0xec   :  { %981 = vst.msk [vmem:[%s1862_s3 + $0x18] sm:$0xf] %vm974_vm3, %v1180_v27  ;;  %1013 = vst.msk [vmem:[%s1862_s3 + $0x98] sm:$0xf] %vm974_vm3, %v1212_v28  ;;  %v1181_v35 = vpack.c.bf16 %v661_v29, %v661_v29  ;;  %v1213_v36 = vpack.c.bf16 %v693_v30, %v693_v30 }
  0xed   :  { %979 = vst.msk [vmem:[%s1862_s3 + $0x10] sm:$0xf] %vm974_vm3, %v1178_v31  ;;  %1011 = vst.msk [vmem:[%s1862_s3 + $0x90] sm:$0xf] %vm974_vm3, %v1210_v32  ;;  %v1179_v37 = vpack.c.bf16 %v659_v33, %v659_v33  ;;  %v1211_v39 = vpack.c.bf16 %v691_v34, %v691_v34  ;;  %v1286_v40 = vpop.f32.mrb[8].mxu0  ;;  %v1318_v41 = vpop.f32.mrb[8].mxu1 }
  0xee   :  { %982 = vst.msk [vmem:[%s1862_s3 + $0x1c] sm:$0xf] %vm974_vm3, %v1181_v35  ;;  %1014 = vst.msk [vmem:[%s1862_s3 + $0x9c] sm:$0xf] %vm974_vm3, %v1213_v36  ;;  %v440_v42 = vadd.f32 %v1286_v40, %v1537_v38  ;;  %v568_v43 = vadd.f32 %v1318_v41, %v1537_v38  ;;  %v431_v44 = vpop.f32.mrb[9].mxu0  ;;  %v559_v45 = vpop.f32.mrb[9].mxu1 }
  0xef   :  { %980 = vst.msk [vmem:[%s1862_s3 + $0x14] sm:$0xf] %vm974_vm3, %v1179_v37  ;;  %1012 = vst.msk [vmem:[%s1862_s3 + $0x94] sm:$0xf] %vm974_vm3, %v1211_v39  ;;  %v432_v46 = vadd.f32 %v1537_v38, %v431_v44  ;;  %v560_v47 = vadd.f32 %v1537_v38, %v559_v45  ;;  %v1287_v48 = vpop.f32.mrb[10].mxu0  ;;  %v1319_v49 = vpop.f32.mrb[10].mxu1 }
  0xf0   :  { %v664_v50 = vmax.f32 %v440_v42, 0.0  ;;  %v696_v51 = vmax.f32 %v568_v43, 0.0  ;;  %v443_v52 = vadd.f32 %v1287_v48, %v1537_v38  ;;  %v571_v53 = vadd.f32 %v1319_v49, %v1537_v38  ;;  %v434_v54 = vpop.f32.mrb[11].mxu0  ;;  %v562_v55 = vpop.f32.mrb[11].mxu1 }
  0xf1   :  { %v662_v56 = vmax.f32 %v432_v46, 0.0  ;;  %v694_v57 = vmax.f32 %v560_v47, 0.0  ;;  %v435_v58 = vadd.f32 %v1537_v38, %v434_v54  ;;  %v563_v59 = vadd.f32 %v1537_v38, %v562_v55 }
  0xf2   :  { %v1184_v60 = vpack.c.bf16 %v664_v50, %v664_v50  ;;  %v1216_v61 = vpack.c.bf16 %v696_v51, %v696_v51  ;;  %v665_v62 = vmax.f32 %v443_v52, 0.0  ;;  %v697_v63 = vmax.f32 %v571_v53, 0.0 }
  0xf3   :  { %v1182_v0 = vpack.c.bf16 %v662_v56, %v662_v56  ;;  %v1214_v1 = vpack.c.bf16 %v694_v57, %v694_v57  ;;  %v663_v2 = vmax.f32 %v435_v58, 0.0  ;;  %v695_v3 = vmax.f32 %v563_v59, 0.0 }
  0xf4   :  { %985 = vst.msk [vmem:[%s1862_s3 + $0x28] sm:$0xf] %vm974_vm3, %v1184_v60  ;;  %1017 = vst.msk [vmem:[%s1862_s3 + $0xa8] sm:$0xf] %vm974_vm3, %v1216_v61  ;;  %v1185_v4 = vpack.c.bf16 %v665_v62, %v665_v62  ;;  %v1217_v5 = vpack.c.bf16 %v697_v63, %v697_v63 }
  0xf5   :  { %983 = vst.msk [vmem:[%s1862_s3 + $0x20] sm:$0xf] %vm974_vm3, %v1182_v0  ;;  %1015 = vst.msk [vmem:[%s1862_s3 + $0xa0] sm:$0xf] %vm974_vm3, %v1214_v1  ;;  %v1183_v6 = vpack.c.bf16 %v663_v2, %v663_v2  ;;  %v1215_v7 = vpack.c.bf16 %v695_v3, %v695_v3  ;;  %v1290_v8 = vpop.f32.mrb[12].mxu0  ;;  %v1322_v9 = vpop.f32.mrb[12].mxu1 }
  0xf6   :  { %986 = vst.msk [vmem:[%s1862_s3 + $0x2c] sm:$0xf] %vm974_vm3, %v1185_v4  ;;  %1018 = vst.msk [vmem:[%s1862_s3 + $0xac] sm:$0xf] %vm974_vm3, %v1217_v5  ;;  %v456_v10 = vadd.f32 %v1290_v8, %v1537_v38  ;;  %v584_v11 = vadd.f32 %v1322_v9, %v1537_v38  ;;  %v447_v12 = vpop.f32.mrb[13].mxu0  ;;  %v575_v13 = vpop.f32.mrb[13].mxu1 }
  0xf7   :  { %984 = vst.msk [vmem:[%s1862_s3 + $0x24] sm:$0xf] %vm974_vm3, %v1183_v6  ;;  %1016 = vst.msk [vmem:[%s1862_s3 + $0xa4] sm:$0xf] %vm974_vm3, %v1215_v7  ;;  %v448_v14 = vadd.f32 %v1537_v38, %v447_v12  ;;  %v576_v15 = vadd.f32 %v1537_v38, %v575_v13  ;;  %v1291_v16 = vpop.f32.mrb[14].mxu0  ;;  %v1323_v17 = vpop.f32.mrb[14].mxu1 }
  0xf8   :  { %v668_v18 = vmax.f32 %v456_v10, 0.0  ;;  %v700_v19 = vmax.f32 %v584_v11, 0.0  ;;  %v459_v20 = vadd.f32 %v1291_v16, %v1537_v38  ;;  %v587_v21 = vadd.f32 %v1323_v17, %v1537_v38  ;;  %v450_v22 = vpop.f32.mrb[15].mxu0  ;;  %v578_v23 = vpop.f32.mrb[15].mxu1 }
  0xf9   :  { %v666_v24 = vmax.f32 %v448_v14, 0.0  ;;  %v698_v25 = vmax.f32 %v576_v15, 0.0  ;;  %v451_v26 = vadd.f32 %v1537_v38, %v450_v22  ;;  %v579_v27 = vadd.f32 %v1537_v38, %v578_v23 }
  0xfa   :  { %v1188_v28 = vpack.c.bf16 %v668_v18, %v668_v18  ;;  %v1220_v29 = vpack.c.bf16 %v700_v19, %v700_v19  ;;  %v669_v30 = vmax.f32 %v459_v20, 0.0  ;;  %v701_v31 = vmax.f32 %v587_v21, 0.0 }
  0xfb   :  { %v1186_v32 = vpack.c.bf16 %v666_v24, %v666_v24  ;;  %v1218_v33 = vpack.c.bf16 %v698_v25, %v698_v25  ;;  %v667_v34 = vmax.f32 %v451_v26, 0.0  ;;  %v699_v35 = vmax.f32 %v579_v27, 0.0 }
  0xfc   :  { %989 = vst.msk [vmem:[%s1862_s3 + $0x38] sm:$0xf] %vm974_vm3, %v1188_v28  ;;  %1021 = vst.msk [vmem:[%s1862_s3 + $0xb8] sm:$0xf] %vm974_vm3, %v1220_v29  ;;  %v1189_v36 = vpack.c.bf16 %v669_v30, %v669_v30  ;;  %v1221_v37 = vpack.c.bf16 %v701_v31, %v701_v31 }
  0xfd   :  { %987 = vst.msk [vmem:[%s1862_s3 + $0x30] sm:$0xf] %vm974_vm3, %v1186_v32  ;;  %1019 = vst.msk [vmem:[%s1862_s3 + $0xb0] sm:$0xf] %vm974_vm3, %v1218_v33  ;;  %v1187_v39 = vpack.c.bf16 %v667_v34, %v667_v34  ;;  %v1219_v40 = vpack.c.bf16 %v699_v35, %v699_v35  ;;  %v1294_v41 = vpop.f32.mrb[16].mxu0  ;;  %v1326_v42 = vpop.f32.mrb[16].mxu1 }
  0xfe   :  { %990 = vst.msk [vmem:[%s1862_s3 + $0x3c] sm:$0xf] %vm974_vm3, %v1189_v36  ;;  %1022 = vst.msk [vmem:[%s1862_s3 + $0xbc] sm:$0xf] %vm974_vm3, %v1221_v37  ;;  %v472_v43 = vadd.f32 %v1294_v41, %v1537_v38  ;;  %v600_v44 = vadd.f32 %v1326_v42, %v1537_v38  ;;  %v463_v45 = vpop.f32.mrb[17].mxu0  ;;  %v591_v46 = vpop.f32.mrb[17].mxu1 }
  0xff   :  { %988 = vst.msk [vmem:[%s1862_s3 + $0x34] sm:$0xf] %vm974_vm3, %v1187_v39  ;;  %1020 = vst.msk [vmem:[%s1862_s3 + $0xb4] sm:$0xf] %vm974_vm3, %v1219_v40  ;;  %v464_v47 = vadd.f32 %v1537_v38, %v463_v45  ;;  %v592_v48 = vadd.f32 %v1537_v38, %v591_v46  ;;  %v1295_v49 = vpop.f32.mrb[18].mxu0  ;;  %v1327_v50 = vpop.f32.mrb[18].mxu1 }
 0x100   :  { %v672_v51 = vmax.f32 %v472_v43, 0.0  ;;  %v704_v52 = vmax.f32 %v600_v44, 0.0  ;;  %v475_v53 = vadd.f32 %v1295_v49, %v1537_v38  ;;  %v603_v54 = vadd.f32 %v1327_v50, %v1537_v38  ;;  %v466_v55 = vpop.f32.mrb[19].mxu0  ;;  %v594_v56 = vpop.f32.mrb[19].mxu1 }
 0x101   :  { %v670_v57 = vmax.f32 %v464_v47, 0.0  ;;  %v702_v58 = vmax.f32 %v592_v48, 0.0  ;;  %v467_v59 = vadd.f32 %v1537_v38, %v466_v55  ;;  %v595_v60 = vadd.f32 %v1537_v38, %v594_v56 }
 0x102   :  { %v1192_v61 = vpack.c.bf16 %v672_v51, %v672_v51  ;;  %v1224_v62 = vpack.c.bf16 %v704_v52, %v704_v52  ;;  %v673_v63 = vmax.f32 %v475_v53, 0.0  ;;  %v705_v0 = vmax.f32 %v603_v54, 0.0 }
 0x103   :  { %v1190_v1 = vpack.c.bf16 %v670_v57, %v670_v57  ;;  %v1222_v2 = vpack.c.bf16 %v702_v58, %v702_v58  ;;  %v671_v3 = vmax.f32 %v467_v59, 0.0  ;;  %v703_v4 = vmax.f32 %v595_v60, 0.0 }
 0x104   :  { %993 = vst.msk [vmem:[%s1862_s3 + $0x48] sm:$0xf] %vm974_vm3, %v1192_v61  ;;  %1025 = vst.msk [vmem:[%s1862_s3 + $0xc8] sm:$0xf] %vm974_vm3, %v1224_v62  ;;  %v1193_v5 = vpack.c.bf16 %v673_v63, %v673_v63  ;;  %v1225_v6 = vpack.c.bf16 %v705_v0, %v705_v0 }
 0x105   :  { %991 = vst.msk [vmem:[%s1862_s3 + $0x40] sm:$0xf] %vm974_vm3, %v1190_v1  ;;  %1023 = vst.msk [vmem:[%s1862_s3 + $0xc0] sm:$0xf] %vm974_vm3, %v1222_v2  ;;  %v1191_v7 = vpack.c.bf16 %v671_v3, %v671_v3  ;;  %v1223_v8 = vpack.c.bf16 %v703_v4, %v703_v4  ;;  %v1298_v9 = vpop.f32.mrb[20].mxu0  ;;  %v1330_v10 = vpop.f32.mrb[20].mxu1 }
 0x106   :  { %994 = vst.msk [vmem:[%s1862_s3 + $0x4c] sm:$0xf] %vm974_vm3, %v1193_v5  ;;  %1026 = vst.msk [vmem:[%s1862_s3 + $0xcc] sm:$0xf] %vm974_vm3, %v1225_v6  ;;  %v488_v11 = vadd.f32 %v1298_v9, %v1537_v38  ;;  %v616_v12 = vadd.f32 %v1330_v10, %v1537_v38  ;;  %v479_v13 = vpop.f32.mrb[21].mxu0  ;;  %v607_v14 = vpop.f32.mrb[21].mxu1 }
 0x107   :  { %992 = vst.msk [vmem:[%s1862_s3 + $0x44] sm:$0xf] %vm974_vm3, %v1191_v7  ;;  %1024 = vst.msk [vmem:[%s1862_s3 + $0xc4] sm:$0xf] %vm974_vm3, %v1223_v8  ;;  %v480_v15 = vadd.f32 %v1537_v38, %v479_v13  ;;  %v608_v16 = vadd.f32 %v1537_v38, %v607_v14  ;;  %v1299_v17 = vpop.f32.mrb[22].mxu0  ;;  %v1331_v18 = vpop.f32.mrb[22].mxu1 }
 0x108   :  { %v676_v19 = vmax.f32 %v488_v11, 0.0  ;;  %v708_v20 = vmax.f32 %v616_v12, 0.0  ;;  %v491_v21 = vadd.f32 %v1299_v17, %v1537_v38  ;;  %v619_v22 = vadd.f32 %v1331_v18, %v1537_v38  ;;  %v482_v23 = vpop.f32.mrb[23].mxu0  ;;  %v610_v24 = vpop.f32.mrb[23].mxu1 }
 0x109   :  { %v674_v25 = vmax.f32 %v480_v15, 0.0  ;;  %v706_v26 = vmax.f32 %v608_v16, 0.0  ;;  %v483_v27 = vadd.f32 %v1537_v38, %v482_v23  ;;  %v611_v28 = vadd.f32 %v1537_v38, %v610_v24 }
 0x10a   :  { %v1196_v29 = vpack.c.bf16 %v676_v19, %v676_v19  ;;  %v1228_v30 = vpack.c.bf16 %v708_v20, %v708_v20  ;;  %v677_v31 = vmax.f32 %v491_v21, 0.0  ;;  %v709_v32 = vmax.f32 %v619_v22, 0.0 }
 0x10b   :  { %v1194_v33 = vpack.c.bf16 %v674_v25, %v674_v25  ;;  %v1226_v34 = vpack.c.bf16 %v706_v26, %v706_v26  ;;  %v675_v35 = vmax.f32 %v483_v27, 0.0  ;;  %v707_v36 = vmax.f32 %v611_v28, 0.0 }
 0x10c   :  { %997 = vst.msk [vmem:[%s1862_s3 + $0x58] sm:$0xf] %vm974_vm3, %v1196_v29  ;;  %1029 = vst.msk [vmem:[%s1862_s3 + $0xd8] sm:$0xf] %vm974_vm3, %v1228_v30  ;;  %v1197_v37 = vpack.c.bf16 %v677_v31, %v677_v31  ;;  %v1229_v39 = vpack.c.bf16 %v709_v32, %v709_v32 }
 0x10d   :  { %995 = vst.msk [vmem:[%s1862_s3 + $0x50] sm:$0xf] %vm974_vm3, %v1194_v33  ;;  %1027 = vst.msk [vmem:[%s1862_s3 + $0xd0] sm:$0xf] %vm974_vm3, %v1226_v34  ;;  %v1195_v40 = vpack.c.bf16 %v675_v35, %v675_v35  ;;  %v1227_v41 = vpack.c.bf16 %v707_v36, %v707_v36  ;;  %v1302_v42 = vpop.f32.mrb[24].mxu0  ;;  %v1334_v43 = vpop.f32.mrb[24].mxu1 }
 0x10e   :  { %998 = vst.msk [vmem:[%s1862_s3 + $0x5c] sm:$0xf] %vm974_vm3, %v1197_v37  ;;  %1030 = vst.msk [vmem:[%s1862_s3 + $0xdc] sm:$0xf] %vm974_vm3, %v1229_v39  ;;  %v504_v44 = vadd.f32 %v1302_v42, %v1537_v38  ;;  %v632_v45 = vadd.f32 %v1334_v43, %v1537_v38  ;;  %v495_v46 = vpop.f32.mrb[25].mxu0  ;;  %v623_v47 = vpop.f32.mrb[25].mxu1 }
 0x10f   :  { %996 = vst.msk [vmem:[%s1862_s3 + $0x54] sm:$0xf] %vm974_vm3, %v1195_v40  ;;  %1028 = vst.msk [vmem:[%s1862_s3 + $0xd4] sm:$0xf] %vm974_vm3, %v1227_v41  ;;  %v496_v48 = vadd.f32 %v1537_v38, %v495_v46  ;;  %v624_v49 = vadd.f32 %v1537_v38, %v623_v47  ;;  %v1303_v50 = vpop.f32.mrb[26].mxu0  ;;  %v1335_v51 = vpop.f32.mrb[26].mxu1 }
 0x110   :  { %v680_v52 = vmax.f32 %v504_v44, 0.0  ;;  %v712_v53 = vmax.f32 %v632_v45, 0.0  ;;  %v507_v54 = vadd.f32 %v1303_v50, %v1537_v38  ;;  %v635_v55 = vadd.f32 %v1335_v51, %v1537_v38  ;;  %v498_v56 = vpop.f32.mrb[27].mxu0  ;;  %v626_v57 = vpop.f32.mrb[27].mxu1 }
 0x111   :  { %v678_v58 = vmax.f32 %v496_v48, 0.0  ;;  %v710_v59 = vmax.f32 %v624_v49, 0.0  ;;  %v499_v60 = vadd.f32 %v1537_v38, %v498_v56  ;;  %v627_v61 = vadd.f32 %v1537_v38, %v626_v57 }
 0x112   :  { %v1200_v62 = vpack.c.bf16 %v680_v52, %v680_v52  ;;  %v1232_v63 = vpack.c.bf16 %v712_v53, %v712_v53  ;;  %v681_v0 = vmax.f32 %v507_v54, 0.0  ;;  %v713_v1 = vmax.f32 %v635_v55, 0.0 }
 0x113   :  { %v1198_v2 = vpack.c.bf16 %v678_v58, %v678_v58  ;;  %v1230_v3 = vpack.c.bf16 %v710_v59, %v710_v59  ;;  %v679_v4 = vmax.f32 %v499_v60, 0.0  ;;  %v711_v5 = vmax.f32 %v627_v61, 0.0 }
 0x114   :  { %1001 = vst.msk [vmem:[%s1862_s3 + $0x68] sm:$0xf] %vm974_vm3, %v1200_v62  ;;  %1033 = vst.msk [vmem:[%s1862_s3 + $0xe8] sm:$0xf] %vm974_vm3, %v1232_v63  ;;  %v1201_v6 = vpack.c.bf16 %v681_v0, %v681_v0  ;;  %v1233_v7 = vpack.c.bf16 %v713_v1, %v713_v1 }
 0x115   :  { %999 = vst.msk [vmem:[%s1862_s3 + $0x60] sm:$0xf] %vm974_vm3, %v1198_v2  ;;  %1031 = vst.msk [vmem:[%s1862_s3 + $0xe0] sm:$0xf] %vm974_vm3, %v1230_v3  ;;  %v1199_v8 = vpack.c.bf16 %v679_v4, %v679_v4  ;;  %v1231_v9 = vpack.c.bf16 %v711_v5, %v711_v5  ;;  %v1306_v10 = vpop.f32.mrb[28].mxu0  ;;  %v1338_v11 = vpop.f32.mrb[28].mxu1 }
 0x116   :  { %1002 = vst.msk [vmem:[%s1862_s3 + $0x6c] sm:$0xf] %vm974_vm3, %v1201_v6  ;;  %1034 = vst.msk [vmem:[%s1862_s3 + $0xec] sm:$0xf] %vm974_vm3, %v1233_v7  ;;  %v520_v12 = vadd.f32 %v1306_v10, %v1537_v38  ;;  %v648_v13 = vadd.f32 %v1338_v11, %v1537_v38  ;;  %v511_v14 = vpop.f32.mrb[29].mxu0  ;;  %v639_v15 = vpop.f32.mrb[29].mxu1 }
 0x117   :  { %1000 = vst.msk [vmem:[%s1862_s3 + $0x64] sm:$0xf] %vm974_vm3, %v1199_v8  ;;  %1032 = vst.msk [vmem:[%s1862_s3 + $0xe4] sm:$0xf] %vm974_vm3, %v1231_v9  ;;  %v512_v16 = vadd.f32 %v1537_v38, %v511_v14  ;;  %v640_v17 = vadd.f32 %v1537_v38, %v639_v15  ;;  %v1307_v18 = vpop.f32.mrb[30].mxu0  ;;  %v1339_v19 = vpop.f32.mrb[30].mxu1 }
 0x118   :  { %v684_v20 = vmax.f32 %v520_v12, 0.0  ;;  %v716_v21 = vmax.f32 %v648_v13, 0.0  ;;  %v523_v22 = vadd.f32 %v1307_v18, %v1537_v38  ;;  %v651_v23 = vadd.f32 %v1339_v19, %v1537_v38  ;;  %v514_v24 = vpop.f32.mrb[31].mxu0  ;;  %v642_v25 = vpop.f32.mrb[31].mxu1 }
 0x119   :  { %v682_v26 = vmax.f32 %v512_v16, 0.0  ;;  %v714_v27 = vmax.f32 %v640_v17, 0.0  ;;  %v515_v28 = vadd.f32 %v1537_v38, %v514_v24  ;;  %v643_v29 = vadd.f32 %v1537_v38, %v642_v25 }
 0x11a   :  { %v1204_v30 = vpack.c.bf16 %v684_v20, %v684_v20  ;;  %v1236_v31 = vpack.c.bf16 %v716_v21, %v716_v21  ;;  %v685_v32 = vmax.f32 %v523_v22, 0.0  ;;  %v717_v33 = vmax.f32 %v651_v23, 0.0 }
 0x11b   :  { %v1202_v34 = vpack.c.bf16 %v682_v26, %v682_v26  ;;  %v1234_v35 = vpack.c.bf16 %v714_v27, %v714_v27  ;;  %v683_v36 = vmax.f32 %v515_v28, 0.0  ;;  %v715_v37 = vmax.f32 %v643_v29, 0.0 }
 0x11c   :  { %1005 = vst.msk [vmem:[%s1862_s3 + $0x78] sm:$0xf] %vm974_vm3, %v1204_v30  ;;  %1037 = vst.msk [vmem:[%s1862_s3 + $0xf8] sm:$0xf] %vm974_vm3, %v1236_v31  ;;  %v1205_v39 = vpack.c.bf16 %v685_v32, %v685_v32  ;;  %v1237_v38 = vpack.c.bf16 %v717_v33, %v717_v33 }
 0x11d   :  { %1003 = vst.msk [vmem:[%s1862_s3 + $0x70] sm:$0xf] %vm974_vm3, %v1202_v34  ;;  %1035 = vst.msk [vmem:[%s1862_s3 + $0xf0] sm:$0xf] %vm974_vm3, %v1234_v35  ;;  %v1203_v40 = vpack.c.bf16 %v683_v36, %v683_v36  ;;  %v1235_v41 = vpack.c.bf16 %v715_v37, %v715_v37 }
 0x11e   :  { %1006 = vst.msk [vmem:[%s1862_s3 + $0x7c] sm:$0xf] %vm974_vm3, %v1205_v39  ;;  %1038 = vst.msk [vmem:[%s1862_s3 + $0xfc] sm:$0xf] %vm974_vm3, %v1237_v38 }
 0x11f   :  { %1004 = vst.msk [vmem:[%s1862_s3 + $0x74] sm:$0xf] %vm974_vm3, %v1203_v40  ;;  %1036 = vst.msk [vmem:[%s1862_s3 + $0xf4] sm:$0xf] %vm974_vm3, %v1235_v41 }

// kernel: shufflenet_forward.29
= control target key start
LH: loop header
LB: loop body
LE: loop exit
PB: predicated region body
PF: predicated region fallthrough
CT: control target
= control target key end

     0   :  { %vm102_vm0 = vcmask 392192   ;;  %vm304_vm1 = vcmask 93184   ;;  %s555_s1 = inlined_call_operand.vmem [shape: bf16[48,12], index: 1, kind: input, shape index: {}]   ;;  %s556_s0 = inlined_call_operand.vmem [shape: bf16[128,48], index: 0, kind: input, shape index: {}]   ;;  %s557_s2 = inlined_call_operand.vmem [shape: f32[1,12], index: 2, kind: input, shape index: {}]   ;;  %s558_s3 = inlined_call_operand.vmem [shape: bf16[128,12], index: 3, kind: output, shape index: {}]  }
   0x1   :  { %v416_v0 = vld [vmem:[%s555_s1] sm:$0xff]   ;;  %v417_v1 = vld [vmem:[%s555_s1 + $0x8] sm:$0xff]   ;;  %v418_v2 = vld [vmem:[%s555_s1 + $0x10] sm:$0xff]  }
   0x2   :  { %388 = vmatprep.subr.bf16.mxu0 %v416_v0  ;;  %410 = vmatprep.subr.bf16.mxu1 %v416_v0  ;;  %v419_v3 = vld [vmem:[%s556_s0] sm:$0xff]   ;;  %v421_v5 = vld [vmem:[%s556_s0 + $0x8] sm:$0xff]   ;;  %v423_v7 = vld [vmem:[%s556_s0 + $0x10] sm:$0xff]  }
   0x3   :  { %389 = vmatpush3.bf16.msra.mxu0 %v416_v0  ;;  %413 = vmatpush3.bf16.msra.mxu1 %v416_v0  ;;  %v420_v4 = vld [vmem:[%s556_s0 + $0x20] sm:$0xff]   ;;  %v422_v6 = vld [vmem:[%s556_s0 + $0x28] sm:$0xff]   ;;  %v424_v8 = vld [vmem:[%s556_s0 + $0x30] sm:$0xff]  }
   0x4   :  { %390 = vmatprep.subr.bf16.mxu0 %v417_v1  ;;  %411 = vmatprep.subr.bf16.mxu1 %v417_v1  ;;  %v425_v9 = vld [vmem:[%s556_s0 + $0x18] sm:$0xff]   ;;  %v325_v11 = vld [vmem:[%s557_s2] ss:$0 sm:$0xff] }
   0x5   :  { %394 = vmatprep.mubr.msk.bf16.mxu0 %vm102_vm0, %v419_v3  ;;  %402 = vmatprep.mubr.msk.bf16.mxu1 %vm102_vm0, %v420_v4  ;;  %v426_v10 = vld [vmem:[%s556_s0 + $0x38] sm:$0xff]  }
   0x7   :  { %391 = vmatpush3.bf16.msra.mxu0 %v417_v1  ;;  %414 = vmatpush3.bf16.msra.mxu1 %v417_v1 }
   0x8   :  { %392 = vmatprep.subr.bf16.mxu0 %v418_v2  ;;  %412 = vmatprep.subr.bf16.mxu1 %v418_v2 }
   0xb   :  { %393 = vmatpush3.bf16.msra.mxu0 %v418_v2  ;;  %415 = vmatpush3.bf16.msra.mxu1 %v418_v2 }
   0xe   :  { %395 = vmatmul.mubr.msk.bf16.vlgmr.msra.gmra.mrb[0].mxu0 %vm102_vm0, %v421_v5  ;;  %403 = vmatmul.mubr.msk.bf16.vlgmr.msra.gmra.mrb[0].mxu1 %vm102_vm0, %v422_v6 }
   0xf   :  { %398 = vmatprep.mubr.msk.bf16.mxu0 %vm102_vm0, %v423_v7  ;;  %406 = vmatprep.mubr.msk.bf16.mxu1 %vm102_vm0, %v424_v8 }
  0x16   :  { %399 = vmatmul.mubr.msk.bf16.gmra.mrb[4].mxu0 %vm102_vm0, %v425_v9  ;;  %407 = vmatmul.mubr.msk.bf16.gmra.mrb[4].mxu1 %vm102_vm0, %v426_v10 }
  0xe1   :  { %v396_v12 = vpop.f32.mrb[0].mxu0  ;;  %v404_v13 = vpop.f32.mrb[0].mxu1 }
  0xe2   :  { %v170_v14 = vadd.f32 %v396_v12, %v325_v11  ;;  %v202_v15 = vadd.f32 %v404_v13, %v325_v11  ;;  %v161_v16 = vpop.f32.mrb[1].mxu0  ;;  %v193_v17 = vpop.f32.mrb[1].mxu1 }
  0xe3   :  { %v162_v18 = vadd.f32 %v325_v11, %v161_v16  ;;  %v194_v19 = vadd.f32 %v325_v11, %v193_v17  ;;  %v397_v20 = vpop.f32.mrb[2].mxu0  ;;  %v405_v21 = vpop.f32.mrb[2].mxu1 }
  0xe4   :  { %v226_v22 = vmax.f32 %v170_v14, 0.0  ;;  %v234_v23 = vmax.f32 %v202_v15, 0.0  ;;  %v173_v24 = vadd.f32 %v397_v20, %v325_v11  ;;  %v205_v25 = vadd.f32 %v405_v21, %v325_v11  ;;  %v164_v26 = vpop.f32.mrb[3].mxu0  ;;  %v196_v27 = vpop.f32.mrb[3].mxu1 }
  0xe5   :  { %v224_v28 = vmax.f32 %v162_v18, 0.0  ;;  %v232_v29 = vmax.f32 %v194_v19, 0.0  ;;  %v165_v30 = vadd.f32 %v325_v11, %v164_v26  ;;  %v197_v31 = vadd.f32 %v325_v11, %v196_v27 }
  0xe6   :  { %v363_v32 = vpack.c.bf16 %v226_v22, %v226_v22  ;;  %v371_v33 = vpack.c.bf16 %v234_v23, %v234_v23  ;;  %v227_v34 = vmax.f32 %v173_v24, 0.0  ;;  %v235_v35 = vmax.f32 %v205_v25, 0.0 }
  0xe7   :  { %v361_v36 = vpack.c.bf16 %v224_v28, %v224_v28  ;;  %v369_v37 = vpack.c.bf16 %v232_v29, %v232_v29  ;;  %v225_v38 = vmax.f32 %v165_v30, 0.0  ;;  %v233_v39 = vmax.f32 %v197_v31, 0.0 }
  0xe8   :  { %307 = vst.msk [vmem:[%s558_s3 + $0x8] sm:$0xf] %vm304_vm1, %v363_v32  ;;  %315 = vst.msk [vmem:[%s558_s3 + $0x28] sm:$0xf] %vm304_vm1, %v371_v33  ;;  %v364_v40 = vpack.c.bf16 %v227_v34, %v227_v34  ;;  %v372_v41 = vpack.c.bf16 %v235_v35, %v235_v35 }
  0xe9   :  { %305 = vst.msk [vmem:[%s558_s3] sm:$0xf] %vm304_vm1, %v361_v36  ;;  %313 = vst.msk [vmem:[%s558_s3 + $0x20] sm:$0xf] %vm304_vm1, %v369_v37  ;;  %v362_v42 = vpack.c.bf16 %v225_v38, %v225_v38  ;;  %v370_v43 = vpack.c.bf16 %v233_v39, %v233_v39  ;;  %v400_v44 = vpop.f32.mrb[4].mxu0  ;;  %v408_v45 = vpop.f32.mrb[4].mxu1 }
  0xea   :  { %308 = vst.msk [vmem:[%s558_s3 + $0xc] sm:$0xf] %vm304_vm1, %v364_v40  ;;  %316 = vst.msk [vmem:[%s558_s3 + $0x2c] sm:$0xf] %vm304_vm1, %v372_v41  ;;  %v186_v46 = vadd.f32 %v400_v44, %v325_v11  ;;  %v218_v47 = vadd.f32 %v408_v45, %v325_v11  ;;  %v177_v48 = vpop.f32.mrb[5].mxu0  ;;  %v209_v49 = vpop.f32.mrb[5].mxu1 }
  0xeb   :  { %306 = vst.msk [vmem:[%s558_s3 + $0x4] sm:$0xf] %vm304_vm1, %v362_v42  ;;  %314 = vst.msk [vmem:[%s558_s3 + $0x24] sm:$0xf] %vm304_vm1, %v370_v43  ;;  %v178_v50 = vadd.f32 %v325_v11, %v177_v48  ;;  %v210_v51 = vadd.f32 %v325_v11, %v209_v49  ;;  %v401_v52 = vpop.f32.mrb[6].mxu0  ;;  %v409_v53 = vpop.f32.mrb[6].mxu1 }
  0xec   :  { %v230_v54 = vmax.f32 %v186_v46, 0.0  ;;  %v238_v55 = vmax.f32 %v218_v47, 0.0  ;;  %v189_v56 = vadd.f32 %v401_v52, %v325_v11  ;;  %v221_v57 = vadd.f32 %v409_v53, %v325_v11  ;;  %v180_v58 = vpop.f32.mrb[7].mxu0  ;;  %v212_v59 = vpop.f32.mrb[7].mxu1 }
  0xed   :  { %v228_v60 = vmax.f32 %v178_v50, 0.0  ;;  %v236_v61 = vmax.f32 %v210_v51, 0.0  ;;  %v181_v62 = vadd.f32 %v325_v11, %v180_v58  ;;  %v213_v63 = vadd.f32 %v325_v11, %v212_v59 }
  0xee   :  { %v367_v0 = vpack.c.bf16 %v230_v54, %v230_v54  ;;  %v375_v1 = vpack.c.bf16 %v238_v55, %v238_v55  ;;  %v231_v2 = vmax.f32 %v189_v56, 0.0  ;;  %v239_v3 = vmax.f32 %v221_v57, 0.0 }
  0xef   :  { %v365_v4 = vpack.c.bf16 %v228_v60, %v228_v60  ;;  %v373_v5 = vpack.c.bf16 %v236_v61, %v236_v61  ;;  %v229_v6 = vmax.f32 %v181_v62, 0.0  ;;  %v237_v7 = vmax.f32 %v213_v63, 0.0 }
  0xf0   :  { %311 = vst.msk [vmem:[%s558_s3 + $0x18] sm:$0xf] %vm304_vm1, %v367_v0  ;;  %319 = vst.msk [vmem:[%s558_s3 + $0x38] sm:$0xf] %vm304_vm1, %v375_v1  ;;  %v368_v8 = vpack.c.bf16 %v231_v2, %v231_v2  ;;  %v376_v9 = vpack.c.bf16 %v239_v3, %v239_v3 }
  0xf1   :  { %309 = vst.msk [vmem:[%s558_s3 + $0x10] sm:$0xf] %vm304_vm1, %v365_v4  ;;  %317 = vst.msk [vmem:[%s558_s3 + $0x30] sm:$0xf] %vm304_vm1, %v373_v5  ;;  %v366_v10 = vpack.c.bf16 %v229_v6, %v229_v6  ;;  %v374_v11 = vpack.c.bf16 %v237_v7, %v237_v7 }
  0xf2   :  { %312 = vst.msk [vmem:[%s558_s3 + $0x1c] sm:$0xf] %vm304_vm1, %v368_v8  ;;  %320 = vst.msk [vmem:[%s558_s3 + $0x3c] sm:$0xf] %vm304_vm1, %v376_v9 }
  0xf3   :  { %310 = vst.msk [vmem:[%s558_s3 + $0x14] sm:$0xf] %vm304_vm1, %v366_v10  ;;  %318 = vst.msk [vmem:[%s558_s3 + $0x34] sm:$0xf] %vm304_vm1, %v374_v11 }

// kernel: shufflenet_forward.32
= control target key start
LH: loop header
LB: loop body
LE: loop exit
PB: predicated region body
PF: predicated region fallthrough
CT: control target
= control target key end

     0   :  { %vm102_vm0 = vcmask 392192   ;;  %vm304_vm1 = vcmask 191488   ;;  %s555_s1 = inlined_call_operand.vmem [shape: bf16[48,24], index: 1, kind: input, shape index: {}]   ;;  %s556_s0 = inlined_call_operand.vmem [shape: bf16[128,48], index: 0, kind: input, shape index: {}]   ;;  %s557_s2 = inlined_call_operand.vmem [shape: f32[1,24], index: 2, kind: input, shape index: {}]   ;;  %s558_s3 = inlined_call_operand.vmem [shape: bf16[128,24], index: 3, kind: output, shape index: {}]  }
   0x1   :  { %v416_v0 = vld [vmem:[%s555_s1] sm:$0xff]   ;;  %v417_v1 = vld [vmem:[%s555_s1 + $0x8] sm:$0xff]   ;;  %v418_v2 = vld [vmem:[%s555_s1 + $0x10] sm:$0xff]  }
   0x2   :  { %388 = vmatprep.subr.bf16.mxu0 %v416_v0  ;;  %410 = vmatprep.subr.bf16.mxu1 %v416_v0  ;;  %v419_v3 = vld [vmem:[%s556_s0] sm:$0xff]   ;;  %v421_v5 = vld [vmem:[%s556_s0 + $0x8] sm:$0xff]   ;;  %v423_v7 = vld [vmem:[%s556_s0 + $0x10] sm:$0xff]  }
   0x3   :  { %389 = vmatpush3.bf16.msra.mxu0 %v416_v0  ;;  %413 = vmatpush3.bf16.msra.mxu1 %v416_v0  ;;  %v420_v4 = vld [vmem:[%s556_s0 + $0x20] sm:$0xff]   ;;  %v422_v6 = vld [vmem:[%s556_s0 + $0x28] sm:$0xff]   ;;  %v424_v8 = vld [vmem:[%s556_s0 + $0x30] sm:$0xff]  }
   0x4   :  { %390 = vmatprep.subr.bf16.mxu0 %v417_v1  ;;  %411 = vmatprep.subr.bf16.mxu1 %v417_v1  ;;  %v425_v9 = vld [vmem:[%s556_s0 + $0x18] sm:$0xff]   ;;  %v325_v11 = vld [vmem:[%s557_s2] ss:$0 sm:$0xff] }
   0x5   :  { %394 = vmatprep.mubr.msk.bf16.mxu0 %vm102_vm0, %v419_v3  ;;  %402 = vmatprep.mubr.msk.bf16.mxu1 %vm102_vm0, %v420_v4  ;;  %v426_v10 = vld [vmem:[%s556_s0 + $0x38] sm:$0xff]  }
   0x7   :  { %391 = vmatpush3.bf16.msra.mxu0 %v417_v1  ;;  %414 = vmatpush3.bf16.msra.mxu1 %v417_v1 }
   0x8   :  { %392 = vmatprep.subr.bf16.mxu0 %v418_v2  ;;  %412 = vmatprep.subr.bf16.mxu1 %v418_v2 }
   0xb   :  { %393 = vmatpush3.bf16.msra.mxu0 %v418_v2  ;;  %415 = vmatpush3.bf16.msra.mxu1 %v418_v2 }
   0xe   :  { %395 = vmatmul.mubr.msk.bf16.vlgmr.msra.gmra.mrb[0].mxu0 %vm102_vm0, %v421_v5  ;;  %403 = vmatmul.mubr.msk.bf16.vlgmr.msra.gmra.mrb[0].mxu1 %vm102_vm0, %v422_v6 }
   0xf   :  { %398 = vmatprep.mubr.msk.bf16.mxu0 %vm102_vm0, %v423_v7  ;;  %406 = vmatprep.mubr.msk.bf16.mxu1 %vm102_vm0, %v424_v8 }
  0x16   :  { %399 = vmatmul.mubr.msk.bf16.gmra.mrb[4].mxu0 %vm102_vm0, %v425_v9  ;;  %407 = vmatmul.mubr.msk.bf16.gmra.mrb[4].mxu1 %vm102_vm0, %v426_v10 }
  0xe1   :  { %v396_v12 = vpop.f32.mrb[0].mxu0  ;;  %v404_v13 = vpop.f32.mrb[0].mxu1 }
  0xe2   :  { %v170_v14 = vadd.f32 %v396_v12, %v325_v11  ;;  %v202_v15 = vadd.f32 %v404_v13, %v325_v11  ;;  %v161_v16 = vpop.f32.mrb[1].mxu0  ;;  %v193_v17 = vpop.f32.mrb[1].mxu1 }
  0xe3   :  { %v162_v18 = vadd.f32 %v325_v11, %v161_v16  ;;  %v194_v19 = vadd.f32 %v325_v11, %v193_v17  ;;  %v397_v20 = vpop.f32.mrb[2].mxu0  ;;  %v405_v21 = vpop.f32.mrb[2].mxu1 }
  0xe4   :  { %v226_v22 = vmax.f32 %v170_v14, 0.0  ;;  %v234_v23 = vmax.f32 %v202_v15, 0.0  ;;  %v173_v24 = vadd.f32 %v397_v20, %v325_v11  ;;  %v205_v25 = vadd.f32 %v405_v21, %v325_v11  ;;  %v164_v26 = vpop.f32.mrb[3].mxu0  ;;  %v196_v27 = vpop.f32.mrb[3].mxu1 }
  0xe5   :  { %v224_v28 = vmax.f32 %v162_v18, 0.0  ;;  %v232_v29 = vmax.f32 %v194_v19, 0.0  ;;  %v165_v30 = vadd.f32 %v325_v11, %v164_v26  ;;  %v197_v31 = vadd.f32 %v325_v11, %v196_v27 }
  0xe6   :  { %v363_v32 = vpack.c.bf16 %v226_v22, %v226_v22  ;;  %v371_v33 = vpack.c.bf16 %v234_v23, %v234_v23  ;;  %v227_v34 = vmax.f32 %v173_v24, 0.0  ;;  %v235_v35 = vmax.f32 %v205_v25, 0.0 }
  0xe7   :  { %v361_v36 = vpack.c.bf16 %v224_v28, %v224_v28  ;;  %v369_v37 = vpack.c.bf16 %v232_v29, %v232_v29  ;;  %v225_v38 = vmax.f32 %v165_v30, 0.0  ;;  %v233_v39 = vmax.f32 %v197_v31, 0.0 }
  0xe8   :  { %307 = vst.msk [vmem:[%s558_s3 + $0x8] sm:$0xf] %vm304_vm1, %v363_v32  ;;  %315 = vst.msk [vmem:[%s558_s3 + $0x28] sm:$0xf] %vm304_vm1, %v371_v33  ;;  %v364_v40 = vpack.c.bf16 %v227_v34, %v227_v34  ;;  %v372_v41 = vpack.c.bf16 %v235_v35, %v235_v35 }
  0xe9   :  { %305 = vst.msk [vmem:[%s558_s3] sm:$0xf] %vm304_vm1, %v361_v36  ;;  %313 = vst.msk [vmem:[%s558_s3 + $0x20] sm:$0xf] %vm304_vm1, %v369_v37  ;;  %v362_v42 = vpack.c.bf16 %v225_v38, %v225_v38  ;;  %v370_v43 = vpack.c.bf16 %v233_v39, %v233_v39  ;;  %v400_v44 = vpop.f32.mrb[4].mxu0  ;;  %v408_v45 = vpop.f32.mrb[4].mxu1 }
  0xea   :  { %308 = vst.msk [vmem:[%s558_s3 + $0xc] sm:$0xf] %vm304_vm1, %v364_v40  ;;  %316 = vst.msk [vmem:[%s558_s3 + $0x2c] sm:$0xf] %vm304_vm1, %v372_v41  ;;  %v186_v46 = vadd.f32 %v400_v44, %v325_v11  ;;  %v218_v47 = vadd.f32 %v408_v45, %v325_v11  ;;  %v177_v48 = vpop.f32.mrb[5].mxu0  ;;  %v209_v49 = vpop.f32.mrb[5].mxu1 }
  0xeb   :  { %306 = vst.msk [vmem:[%s558_s3 + $0x4] sm:$0xf] %vm304_vm1, %v362_v42  ;;  %314 = vst.msk [vmem:[%s558_s3 + $0x24] sm:$0xf] %vm304_vm1, %v370_v43  ;;  %v178_v50 = vadd.f32 %v325_v11, %v177_v48  ;;  %v210_v51 = vadd.f32 %v325_v11, %v209_v49  ;;  %v401_v52 = vpop.f32.mrb[6].mxu0  ;;  %v409_v53 = vpop.f32.mrb[6].mxu1 }
  0xec   :  { %v230_v54 = vmax.f32 %v186_v46, 0.0  ;;  %v238_v55 = vmax.f32 %v218_v47, 0.0  ;;  %v189_v56 = vadd.f32 %v401_v52, %v325_v11  ;;  %v221_v57 = vadd.f32 %v409_v53, %v325_v11  ;;  %v180_v58 = vpop.f32.mrb[7].mxu0  ;;  %v212_v59 = vpop.f32.mrb[7].mxu1 }
  0xed   :  { %v228_v60 = vmax.f32 %v178_v50, 0.0  ;;  %v236_v61 = vmax.f32 %v210_v51, 0.0  ;;  %v181_v62 = vadd.f32 %v325_v11, %v180_v58  ;;  %v213_v63 = vadd.f32 %v325_v11, %v212_v59 }
  0xee   :  { %v367_v0 = vpack.c.bf16 %v230_v54, %v230_v54  ;;  %v375_v1 = vpack.c.bf16 %v238_v55, %v238_v55  ;;  %v231_v2 = vmax.f32 %v189_v56, 0.0  ;;  %v239_v3 = vmax.f32 %v221_v57, 0.0 }
  0xef   :  { %v365_v4 = vpack.c.bf16 %v228_v60, %v228_v60  ;;  %v373_v5 = vpack.c.bf16 %v236_v61, %v236_v61  ;;  %v229_v6 = vmax.f32 %v181_v62, 0.0  ;;  %v237_v7 = vmax.f32 %v213_v63, 0.0 }
  0xf0   :  { %311 = vst.msk [vmem:[%s558_s3 + $0x18] sm:$0xf] %vm304_vm1, %v367_v0  ;;  %319 = vst.msk [vmem:[%s558_s3 + $0x38] sm:$0xf] %vm304_vm1, %v375_v1  ;;  %v368_v8 = vpack.c.bf16 %v231_v2, %v231_v2  ;;  %v376_v9 = vpack.c.bf16 %v239_v3, %v239_v3 }
  0xf1   :  { %309 = vst.msk [vmem:[%s558_s3 + $0x10] sm:$0xf] %vm304_vm1, %v365_v4  ;;  %317 = vst.msk [vmem:[%s558_s3 + $0x30] sm:$0xf] %vm304_vm1, %v373_v5  ;;  %v366_v10 = vpack.c.bf16 %v229_v6, %v229_v6  ;;  %v374_v11 = vpack.c.bf16 %v237_v7, %v237_v7 }
  0xf2   :  { %312 = vst.msk [vmem:[%s558_s3 + $0x1c] sm:$0xf] %vm304_vm1, %v368_v8  ;;  %320 = vst.msk [vmem:[%s558_s3 + $0x3c] sm:$0xf] %vm304_vm1, %v376_v9 }
  0xf3   :  { %310 = vst.msk [vmem:[%s558_s3 + $0x14] sm:$0xf] %vm304_vm1, %v366_v10  ;;  %318 = vst.msk [vmem:[%s558_s3 + $0x34] sm:$0xf] %vm304_vm1, %v374_v11 }

// kernel: shufflenet_forward.28
= control target key start
LH: loop header
LB: loop body
LE: loop exit
PB: predicated region body
PF: predicated region fallthrough
CT: control target
= control target key end

     0   :  { %vm113_vm0 = vcmask 1045504   ;;  %vm88_vm1 = vcmask 97280   ;;  %vm342_vm2 = vcmask 388096   ;;  %s693_s1 = inlined_call_operand.vmem [shape: bf16[12,48], index: 1, kind: input, shape index: {}]   ;;  %s694_s0 = inlined_call_operand.vmem [shape: bf16[128,12], index: 0, kind: input, shape index: {}]   ;;  %s695_s3 = inlined_call_operand.vmem [shape: bf16[128,48], index: 3, kind: input, shape index: {}]   ;;  %s696_s2 = inlined_call_operand.vmem [shape: f32[1,48], index: 2, kind: input, shape index: {}]   ;;  %s697_s4 = inlined_call_operand.vmem [shape: bf16[128,48], index: 4, kind: output, shape index: {}]  }
   0x1   :  { %v483_v0 = vld [vmem:[%s693_s1] sm:$0x3f]   ;;  %v486_v4 = vld [vmem:[%s694_s0 + $0x8] sm:$0xff]   ;;  %v488_v6 = vld [vmem:[%s694_s0 + $0x10] sm:$0xff]  }
   0x2   :  { %v484_v1 = vld [vmem:[%s694_s0] sm:$0xff]   ;;  %481 = vmatprep.subr.msk.bf16.mxu0 %vm113_vm0, %v483_v0  ;;  %482 = vmatprep.subr.msk.bf16.mxu1 %vm113_vm0, %v483_v0  ;;  %v115_v2 = vsel %vm113_vm0, %v483_v0, 0  ;;  %v487_v5 = vld [vmem:[%s694_s0 + $0x28] sm:$0xff]   ;;  %v489_v7 = vld [vmem:[%s694_s0 + $0x30] sm:$0xff]  }
   0x3   :  { %v485_v3 = vld [vmem:[%s694_s0 + $0x20] sm:$0xff]   ;;  %462 = vmatpush3.bf16.msra.mxu0 %v115_v2  ;;  %480 = vmatpush3.bf16.msra.mxu1 %v115_v2  ;;  %v490_v8 = vld [vmem:[%s694_s0 + $0x18] sm:$0xff]   ;;  %v445_v10 = vld [vmem:[%s695_s3 + $0x8] sm:$0xff]  }
   0x4   :  { %463 = vmatprep.mubr.msk.bf16.mxu0 %vm88_vm1, %v484_v1  ;;  %471 = vmatprep.mubr.msk.bf16.mxu1 %vm88_vm1, %v485_v3  ;;  %v491_v9 = vld [vmem:[%s694_s0 + $0x38] sm:$0xff]   ;;  %v449_v11 = vld [vmem:[%s695_s3 + $0x28] sm:$0xff]   ;;  %v414_v12 = vld [vmem:[%s695_s3] sm:$0xff]   ;;  %v419_v15 = vunpack.c.l.bf16 %v445_v10  ;;  %v420_v23 = vunpack.c.h.bf16 %v445_v10 }
   0x5   :  { %v448_v13 = vld [vmem:[%s695_s3 + $0x20] sm:$0xff]   ;;  %v567_v14 = vld [vmem:[%s695_s3 + $0x18] sm:$0xff]   ;;  %v577_v17 = vld [vmem:[%s695_s3 + $0x10] sm:$0xff]   ;;  %v435_v20 = vunpack.c.l.bf16 %v449_v11  ;;  %v415_v21 = vunpack.c.l.bf16 %v414_v12  ;;  %v436_v24 = vunpack.c.h.bf16 %v449_v11  ;;  %v416_v25 = vunpack.c.h.bf16 %v414_v12 }
   0x6   :  { %464 = vmatmul.mubr.msk.bf16.vlgmr.msra.gmra.mrb[0].mxu0 %vm88_vm1, %v486_v4  ;;  %472 = vmatmul.mubr.msk.bf16.vlgmr.msra.gmra.mrb[0].mxu1 %vm88_vm1, %v487_v5  ;;  %v572_v16 = vld [vmem:[%s695_s3 + $0x38] sm:$0xff]   ;;  %v582_v18 = vld [vmem:[%s695_s3 + $0x30] sm:$0xff]   ;;  %v587_v19 = vld [vmem:[%s696_s2] ss:$0 sm:$0xff]  ;;  %v431_v22 = vunpack.c.l.bf16 %v448_v13  ;;  %v432_v26 = vunpack.c.h.bf16 %v448_v13  ;;  %v427_v29 = vunpack.c.l.bf16 %v567_v14  ;;  %v423_v31 = vunpack.c.l.bf16 %v577_v17 }
   0x7   :  { %467 = vmatprep.mubr.msk.bf16.mxu0 %vm88_vm1, %v488_v6  ;;  %475 = vmatprep.mubr.msk.bf16.mxu1 %vm88_vm1, %v489_v7  ;;  %v443_v30 = vunpack.c.l.bf16 %v572_v16  ;;  %v439_v32 = vunpack.c.l.bf16 %v582_v18  ;;  %v428_v37 = vunpack.c.h.bf16 %v567_v14  ;;  %v444_v38 = vunpack.c.h.bf16 %v572_v16 }
   0x8   :  { %v424_v43 = vunpack.c.h.bf16 %v577_v17  ;;  %v440_v44 = vunpack.c.h.bf16 %v582_v18 }
   0xe   :  { %468 = vmatmul.mubr.msk.bf16.gmra.mrb[4].mxu0 %vm88_vm1, %v490_v8  ;;  %476 = vmatmul.mubr.msk.bf16.gmra.mrb[4].mxu1 %vm88_vm1, %v491_v9 }
  0xd9   :  { %v465_v27 = vpop.f32.mrb[0].mxu0  ;;  %v473_v28 = vpop.f32.mrb[0].mxu1 }
  0xda   :  { %v160_v33 = vadd.f32 %v465_v27, %v587_v19  ;;  %v192_v34 = vadd.f32 %v473_v28, %v587_v19  ;;  %v151_v35 = vpop.f32.mrb[1].mxu0  ;;  %v183_v36 = vpop.f32.mrb[1].mxu1 }
  0xdb   :  { %v152_v39 = vadd.f32 %v587_v19, %v151_v35  ;;  %v184_v40 = vadd.f32 %v587_v19, %v183_v36  ;;  %v466_v41 = vpop.f32.mrb[2].mxu0  ;;  %v474_v42 = vpop.f32.mrb[2].mxu1 }
  0xdc   :  { %v216_v45 = vmax.f32 %v160_v33, 0.0  ;;  %v224_v46 = vmax.f32 %v192_v34, 0.0  ;;  %v163_v47 = vadd.f32 %v466_v41, %v587_v19  ;;  %v195_v48 = vadd.f32 %v474_v42, %v587_v19  ;;  %v154_v49 = vpop.f32.mrb[3].mxu0  ;;  %v186_v50 = vpop.f32.mrb[3].mxu1 }
  0xdd   :  { %v214_v51 = vmax.f32 %v152_v39, 0.0  ;;  %v222_v52 = vmax.f32 %v184_v40, 0.0  ;;  %v155_v53 = vadd.f32 %v587_v19, %v154_v49  ;;  %v187_v54 = vadd.f32 %v587_v19, %v186_v50 }
  0xde   :  { %v264_v55 = vadd.f32 %v419_v15, %v216_v45  ;;  %v272_v56 = vadd.f32 %v435_v20, %v224_v46  ;;  %v217_v57 = vmax.f32 %v163_v47, 0.0  ;;  %v225_v58 = vmax.f32 %v195_v48, 0.0 }
  0xdf   :  { %v262_v59 = vadd.f32 %v415_v21, %v214_v51  ;;  %v270_v60 = vadd.f32 %v431_v22, %v222_v52  ;;  %v215_v61 = vmax.f32 %v155_v53, 0.0  ;;  %v223_v62 = vmax.f32 %v187_v54, 0.0 }
  0xe0   :  { %v399_v63 = vpack.c.bf16 %v264_v55, %v264_v55  ;;  %v407_v0 = vpack.c.bf16 %v272_v56, %v272_v56  ;;  %v265_v1 = vadd.f32 %v420_v23, %v217_v57  ;;  %v273_v2 = vadd.f32 %v436_v24, %v225_v58 }
  0xe1   :  { %v397_v3 = vpack.c.bf16 %v262_v59, %v262_v59  ;;  %v405_v4 = vpack.c.bf16 %v270_v60, %v270_v60  ;;  %v263_v5 = vadd.f32 %v416_v25, %v215_v61  ;;  %v271_v6 = vadd.f32 %v432_v26, %v223_v62  ;;  %v469_v7 = vpop.f32.mrb[4].mxu0  ;;  %v477_v8 = vpop.f32.mrb[4].mxu1 }
  0xe2   :  { %345 = vst.msk [vmem:[%s697_s4 + $0x8] sm:$0xf] %vm342_vm2, %v399_v63  ;;  %353 = vst.msk [vmem:[%s697_s4 + $0x28] sm:$0xf] %vm342_vm2, %v407_v0  ;;  %v400_v9 = vpack.c.bf16 %v265_v1, %v265_v1  ;;  %v408_v10 = vpack.c.bf16 %v273_v2, %v273_v2  ;;  %v176_v11 = vadd.f32 %v469_v7, %v587_v19  ;;  %v167_v13 = vpop.f32.mrb[5].mxu0  ;;  %v199_v15 = vpop.f32.mrb[5].mxu1 }
  0xe3   :  { %v208_v12 = vadd.f32 %v477_v8, %v587_v19  ;;  %343 = vst.msk [vmem:[%s697_s4] sm:$0xf] %vm342_vm2, %v397_v3  ;;  %351 = vst.msk [vmem:[%s697_s4 + $0x20] sm:$0xf] %vm342_vm2, %v405_v4  ;;  %v398_v20 = vpack.c.bf16 %v263_v5, %v263_v5  ;;  %v406_v21 = vpack.c.bf16 %v271_v6, %v271_v6  ;;  %v470_v24 = vpop.f32.mrb[6].mxu0  ;;  %v478_v25 = vpop.f32.mrb[6].mxu1 }
  0xe4   :  { %v168_v22 = vadd.f32 %v587_v19, %v167_v13  ;;  %v200_v23 = vadd.f32 %v587_v19, %v199_v15  ;;  %346 = vst.msk [vmem:[%s697_s4 + $0xc] sm:$0xf] %vm342_vm2, %v400_v9  ;;  %354 = vst.msk [vmem:[%s697_s4 + $0x2c] sm:$0xf] %vm342_vm2, %v408_v10  ;;  %v220_v26 = vmax.f32 %v176_v11, 0.0  ;;  %v179_v28 = vadd.f32 %v470_v24, %v587_v19  ;;  %v170_v34 = vpop.f32.mrb[7].mxu0 }
  0xe5   :  { %v228_v27 = vmax.f32 %v208_v12, 0.0  ;;  %v211_v33 = vadd.f32 %v478_v25, %v587_v19  ;;  %v202_v35 = vpop.f32.mrb[7].mxu1  ;;  %344 = vst.msk [vmem:[%s697_s4 + $0x4] sm:$0xf] %vm342_vm2, %v398_v20  ;;  %352 = vst.msk [vmem:[%s697_s4 + $0x24] sm:$0xf] %vm342_vm2, %v406_v21  ;;  %v171_v40 = vadd.f32 %v587_v19, %v170_v34 }
  0xe6   :  { %v218_v36 = vmax.f32 %v168_v22, 0.0  ;;  %v226_v39 = vmax.f32 %v200_v23, 0.0  ;;  %v203_v41 = vadd.f32 %v587_v19, %v202_v35  ;;  %v268_v42 = vadd.f32 %v427_v29, %v220_v26 }
  0xe7   :  { %v276_v45 = vadd.f32 %v443_v30, %v228_v27  ;;  %v221_v46 = vmax.f32 %v179_v28, 0.0  ;;  %v229_v47 = vmax.f32 %v211_v33, 0.0  ;;  %v219_v50 = vmax.f32 %v171_v40, 0.0 }
  0xe8   :  { %v266_v48 = vadd.f32 %v423_v31, %v218_v36  ;;  %v274_v49 = vadd.f32 %v439_v32, %v226_v39  ;;  %v227_v51 = vmax.f32 %v203_v41, 0.0  ;;  %v403_v52 = vpack.c.bf16 %v268_v42, %v268_v42 }
  0xe9   :  { %v411_v53 = vpack.c.bf16 %v276_v45, %v276_v45  ;;  %v269_v19 = vadd.f32 %v428_v37, %v221_v46  ;;  %v277_v29 = vadd.f32 %v444_v38, %v229_v47  ;;  %v267_v55 = vadd.f32 %v424_v43, %v219_v50 }
  0xea   :  { %v401_v54 = vpack.c.bf16 %v266_v48, %v266_v48  ;;  %v409_v30 = vpack.c.bf16 %v274_v49, %v274_v49  ;;  %v275_v31 = vadd.f32 %v440_v44, %v227_v51  ;;  %349 = vst.msk [vmem:[%s697_s4 + $0x18] sm:$0xf] %vm342_vm2, %v403_v52 }
  0xeb   :  { %357 = vst.msk [vmem:[%s697_s4 + $0x38] sm:$0xf] %vm342_vm2, %v411_v53  ;;  %v404_v14 = vpack.c.bf16 %v269_v19, %v269_v19  ;;  %v412_v16 = vpack.c.bf16 %v277_v29, %v277_v29  ;;  %v402_v17 = vpack.c.bf16 %v267_v55, %v267_v55 }
  0xec   :  { %347 = vst.msk [vmem:[%s697_s4 + $0x10] sm:$0xf] %vm342_vm2, %v401_v54  ;;  %355 = vst.msk [vmem:[%s697_s4 + $0x30] sm:$0xf] %vm342_vm2, %v409_v30  ;;  %v410_v18 = vpack.c.bf16 %v275_v31, %v275_v31 }
  0xed   :  { %350 = vst.msk [vmem:[%s697_s4 + $0x1c] sm:$0xf] %vm342_vm2, %v404_v14  ;;  %358 = vst.msk [vmem:[%s697_s4 + $0x3c] sm:$0xf] %vm342_vm2, %v412_v16 }
  0xee   :  { %348 = vst.msk [vmem:[%s697_s4 + $0x14] sm:$0xf] %vm342_vm2, %v402_v17  ;;  %356 = vst.msk [vmem:[%s697_s4 + $0x34] sm:$0xf] %vm342_vm2, %v410_v18 }

// kernel: shufflenet_forward.26
= control target key start
LH: loop header
LB: loop body
LE: loop exit
PB: predicated region body
PF: predicated region fallthrough
CT: control target
= control target key end

     0   :  { %s813_s12 = smov 0   ;;  %s1087_s0 = inlined_call_operand.vmem [shape: bf16[2,10,10,12], index: 0, kind: input, shape index: {}]   ;;  %s1088_s1 = inlined_call_operand.vmem [shape: f32[9,12], index: 1, kind: input, shape index: {}]   ;;  %s1089_s2 = inlined_call_operand.vmem [shape: f32[1,12], index: 2, kind: input, shape index: {}]   ;;  %s1090_s3 = inlined_call_operand.vmem [shape: bf16[2,8,8,12], index: 3, kind: output, shape index: {}]  }
   0x1 LB: > { %s723_s13 = sadd.s32 4294967295, %s791_s12   ;;  %p727_p0 = scmp.ge.s32.totalorder %s791_s12, 1  ;;  %s791_s12 = sphi %s813_s12, %s13_s12  }
   0x2   : > { %p137_p1 = scmp.lt.s32.totalorder %s791_s12, 3 }
   0x4   : > { %p138_p2 = pnand %p727_p0, %p137_p1 }
   0x5   : > { %p161_p3 = scmp.lt.s32.totalorder (!%p138_p2), %s723_s13, 1  ;;  %v827_v0 = vld [vmem:[%s1088_s1] ss:$0 sm:$0xff] (!%p138_p2)  ;;  %v832_v1 = vld [vmem:[%s1088_s1 + $0x3] ss:$0 sm:$0xff] (!%p138_p2)  ;;  %vm443_vm0 = vcmask (!%p138_p2), 1046528  }
   0x6   : > { %141 = sbr.rel (%p138_p2) target bundleno = 110 (0x6e), region = 32  ;;  %v842_v2 = vld [vmem:[%s1088_s1 + $0x6] ss:$0 sm:$0xff] (!%p138_p2)  ;;  %v847_v3 = vld [vmem:[%s1088_s1 + $0x1] ss:$0 sm:$0xff] (!%p138_p2)  ;;  %vm595_vm1 = vcmask (!%p138_p2), 1045504  }
   0x7   : > { %v852_v4 = vld [vmem:[%s1088_s1 + $0x4] ss:$0 sm:$0xff] (!%p138_p2)  ;;  %v857_v5 = vld [vmem:[%s1088_s1 + $0x7] ss:$0 sm:$0xff] (!%p138_p2)  ;;  %v870_v18 = vld [vmem:[%s1088_s1 + $0x2] ss:$0 sm:$0xff] (!%p138_p2) }
   0x8   : > { %v880_v25 = vld [vmem:[%s1088_s1 + $0x5] ss:$0 sm:$0xff] (!%p138_p2)  ;;  %v889_v30 = vld [vmem:[%s1088_s1 + $0x8] ss:$0 sm:$0xff] (!%p138_p2)  ;;  %vm659_vm2 = vcmask (!%p138_p2), 93184  }
   0xd   : > { %s1092_s13 = smov (!%p161_p3, %s723_s13), 1 }
   0xe   : > { %s776_s14 = smul.u32 80, %s1092_s13  ;;  %s775_s11 = sshll.u32 %s1092_s13, 5 }
   0xf   : > { %s932_s15 = scalar_lea.vmem %s1090_s3, %s775_s11 }
  0x10   : > { %s837_s21 = scalar_lea.vmem %s1087_s0, %s776_s14 }
  0x11   : > { %v171_v6 = vld [vmem:[%s837_s21] ss:$8 sps:$4 sm:$0xff]   ;;  %v172_v7 = vld [vmem:[%s837_s21 + $0x4] sm:$0x1]  ;;  %v732_v8 = vld [vmem:[%s837_s21 + $0xc] sm:$0x1] }
  0x12   : > { %v187_v9 = vunpack.c.l.bf16 %v171_v6  ;;  %v188_v10 = vunpack.c.l.bf16 %v172_v7  ;;  %v220_v11 = vunpack.c.h.bf16 %v171_v6  ;;  %v221_v12 = vunpack.c.l.bf16 %v732_v8  ;;  %v747_v13 = vld [vmem:[%s837_s21 + $0x8] ss:$8 sps:$4 sm:$0xff]   ;;  %v748_v14 = vld [vmem:[%s837_s21 + $0x14] sm:$0x1]  ;;  %v865_v15 = vld [vmem:[%s837_s21 + $0xc] sm:$0x1] }
  0x13   : > { %v253_v16 = vunpack.c.h.bf16 %v747_v13  ;;  %v254_v17 = vunpack.c.l.bf16 %v748_v14  ;;  %v189_v19 = vunpack.c.l.bf16 %v747_v13  ;;  %v190_v20 = vunpack.c.l.bf16 %v865_v15  ;;  %v733_v31 = vld [vmem:[%s837_s21 + $0x10] ss:$8 sps:$4 sm:$0xff]   ;;  %v734_v40 = vld [vmem:[%s837_s21 + $0x14] sm:$0x1]  ;;  %v750_v41 = vld [vmem:[%s837_s21 + $0x1c] sm:$0x1] }
  0x14   : > { %v274_v21 = vmul.f32 %v827_v0, %v187_v9  ;;  %v287_v22 = vmul.f32 %v832_v1, %v220_v11  ;;  %v337_v23 = vmul.f32 %v847_v3, %v187_v9  ;;  %v338_v24 = vmul.f32 %v847_v3, %v188_v10  ;;  %v914_v13 = vld [vmem:[%s1089_s2] ss:$0 sm:$0xff] }
  0x15   : > { %v308_v26 = vmul.f32 %v842_v2, %v253_v16  ;;  %v358_v27 = vmul.f32 %v852_v4, %v220_v11  ;;  %v359_v28 = vmul.f32 %v852_v4, %v221_v12  ;;  %v395_v29 = vmul.f32 %v857_v5, %v253_v16 }
  0x16   : > { %v295_v32 = vadd.f32 %v287_v22, %v274_v21  ;;  %v396_v33 = vmul.f32 %v857_v5, %v254_v17  ;;  %v489_v34 = vmul.f32 %v870_v18, %v187_v9  ;;  %v490_v35 = vmul.f32 %v870_v18, %v188_v10 }
  0x17   : > { %v374_v36 = vadd.f32 %v358_v27, %v337_v23  ;;  %v375_v37 = vadd.f32 %v359_v28, %v338_v24  ;;  %v510_v38 = vmul.f32 %v880_v25, %v220_v11  ;;  %v511_v39 = vmul.f32 %v880_v25, %v221_v12 }
  0x18   : > { %v316_v42 = vadd.f32 %v308_v26, %v295_v32  ;;  %v547_v43 = vmul.f32 %v889_v30, %v253_v16  ;;  %v548_v44 = vmul.f32 %v889_v30, %v254_v17  ;;  %v222_v45 = vunpack.c.l.bf16 %v733_v31  ;;  %v175_v17 = vld [vmem:[%s837_s21 + $0x10] ss:$8 sps:$4 sm:$0xff]   ;;  %v176_v26 = vld [vmem:[%s837_s21 + $0x14] sm:$0x1]  ;;  %v736_v32 = vld [vmem:[%s837_s21 + $0x1c] sm:$0x1] }
  0x19   : > { %v411_v46 = vadd.f32 %v395_v29, %v374_v36  ;;  %v412_v47 = vadd.f32 %v396_v33, %v375_v37  ;;  %v526_v48 = vadd.f32 %v510_v38, %v489_v34  ;;  %v527_v49 = vadd.f32 %v511_v39, %v490_v35  ;;  %v752_v36 = vld [vmem:[%s837_s21 + $0x24] sm:$0x1] }
  0x1a   : > { %v223_v50 = vunpack.c.l.bf16 %v734_v40  ;;  %v255_v51 = vunpack.c.h.bf16 %v733_v31  ;;  %v256_v52 = vunpack.c.l.bf16 %v750_v41  ;;  %v275_v53 = vmul.f32 %v827_v0, %v189_v19 }
  0x1b   : > { %v444_v54 = vrot.slane %v411_v46, 1  ;;  %v445_v55 = vrot.slane %v412_v47, 1  ;;  %v563_v56 = vadd.f32 %v547_v43, %v526_v48  ;;  %v564_v57 = vadd.f32 %v548_v44, %v527_v49  ;;  %v751_v44 = vld [vmem:[%s837_s21 + $0x18] ss:$8 sps:$4 sm:$0xff]  }
  0x1c   : > { %v288_v58 = vmul.f32 %v832_v1, %v222_v45  ;;  %v309_v59 = vmul.f32 %v842_v2, %v255_v51  ;;  %v339_v60 = vmul.f32 %v847_v3, %v189_v19  ;;  %v340_v61 = vmul.f32 %v847_v3, %v190_v20 }
  0x1d   : > { %v446_v62 = vsel %vm443_vm0, %v444_v54, %v445_v55  ;;  %v596_v63 = vrot.slane %v563_v56, 2  ;;  %v597_v6 = vrot.slane %v564_v57, 2  ;;  %v360_v7 = vmul.f32 %v852_v4, %v222_v45 }
  0x1e   : > { %v476_v8 = vadd.f32 %v446_v62, %v316_v42  ;;  %v296_v9 = vadd.f32 %v288_v58, %v275_v53  ;;  %v361_v10 = vmul.f32 %v852_v4, %v223_v50  ;;  %v397_v11 = vmul.f32 %v857_v5, %v255_v51 }
  0x1f   : > { %v598_v12 = vsel %vm595_vm1, %v596_v63, %v597_v6  ;;  %v376_v14 = vadd.f32 %v360_v7, %v339_v60  ;;  %v398_v15 = vmul.f32 %v857_v5, %v256_v52  ;;  %v491_v16 = vmul.f32 %v870_v18, %v189_v19 }
  0x20   : > { %v628_v21 = vadd.f32 %v598_v12, %v476_v8  ;;  %v317_v22 = vadd.f32 %v309_v59, %v296_v9  ;;  %v377_v23 = vadd.f32 %v361_v10, %v340_v61  ;;  %v492_v24 = vmul.f32 %v870_v18, %v190_v20 }
  0x21   : > { %v413_v27 = vadd.f32 %v397_v11, %v376_v14  ;;  %v512_v28 = vmul.f32 %v880_v25, %v222_v45  ;;  %v513_v29 = vmul.f32 %v880_v25, %v223_v50  ;;  %v549_v31 = vmul.f32 %v889_v30, %v255_v51  ;;  %v178_v11 = vld [vmem:[%s837_s21 + $0x1c] sm:$0x1] }
  0x22   : > { %v643_v19 = vadd.f32 %v914_v13, %v628_v21  ;;  %v414_v33 = vadd.f32 %v398_v15, %v377_v23  ;;  %v550_v34 = vmul.f32 %v889_v30, %v256_v52  ;;  %v191_v35 = vunpack.c.l.bf16 %v175_v17 }
  0x23   : > { %v447_v20 = vrot.slane %v413_v27, 1  ;;  %v528_v37 = vadd.f32 %v512_v28, %v491_v16  ;;  %v529_v38 = vadd.f32 %v513_v29, %v492_v24  ;;  %v192_v39 = vunpack.c.l.bf16 %v176_v26  ;;  %v738_v26 = vld [vmem:[%s837_s21 + $0x24] sm:$0x1] }
  0x24   : > { %v651_v40 = vpack.c.bf16 %v643_v19, %v643_v19  ;;  %v448_v41 = vrot.slane %v414_v33, 1  ;;  %v224_v42 = vunpack.c.h.bf16 %v175_v17  ;;  %v225_v43 = vunpack.c.l.bf16 %v736_v32  ;;  %v737_v17 = vld [vmem:[%s837_s21 + $0x20] ss:$8 sps:$4 sm:$0xff]   ;;  %v754_v32 = vld [vmem:[%s837_s21 + $0x2c] sm:$0x1] }
  0x25   : > { %v565_v45 = vadd.f32 %v549_v31, %v528_v37  ;;  %v566_v46 = vadd.f32 %v550_v34, %v529_v38  ;;  %v257_v47 = vunpack.c.h.bf16 %v751_v44  ;;  %v258_v48 = vunpack.c.l.bf16 %v752_v36 }
  0x26   : > { %660 = vst.msk [vmem:[%s932_s15] sm:$0xf] %vm659_vm2, %v651_v40  ;;  %v449_v49 = vsel %vm443_vm0, %v447_v20, %v448_v41  ;;  %v276_v50 = vmul.f32 %v827_v0, %v191_v35  ;;  %v289_v51 = vmul.f32 %v832_v1, %v224_v42  ;;  %v341_v52 = vmul.f32 %v847_v3, %v191_v35 }
  0x27   : > { %v477_v53 = vadd.f32 %v449_v49, %v317_v22  ;;  %v599_v54 = vrot.slane %v565_v45, 2  ;;  %v600_v55 = vrot.slane %v566_v46, 2  ;;  %v310_v56 = vmul.f32 %v842_v2, %v257_v47 }
  0x28   : > { %v297_v57 = vadd.f32 %v289_v51, %v276_v50  ;;  %v342_v58 = vmul.f32 %v847_v3, %v192_v39  ;;  %v362_v59 = vmul.f32 %v852_v4, %v224_v42  ;;  %v363_v60 = vmul.f32 %v852_v4, %v225_v43 }
  0x29   : > { %v601_v61 = vsel %vm595_vm1, %v599_v54, %v600_v55  ;;  %v399_v62 = vmul.f32 %v857_v5, %v257_v47  ;;  %v400_v63 = vmul.f32 %v857_v5, %v258_v48  ;;  %v493_v6 = vmul.f32 %v870_v18, %v191_v35 }
  0x2a   : > { %v629_v7 = vadd.f32 %v601_v61, %v477_v53  ;;  %v318_v8 = vadd.f32 %v310_v56, %v297_v57  ;;  %v378_v9 = vadd.f32 %v362_v59, %v341_v52  ;;  %v379_v10 = vadd.f32 %v363_v60, %v342_v58  ;;  %v179_v59 = vld [vmem:[%s837_s21 + $0x20] ss:$8 sps:$4 sm:$0xff]  }
  0x2b   : > { %v494_v12 = vmul.f32 %v870_v18, %v192_v39  ;;  %v514_v14 = vmul.f32 %v880_v25, %v224_v42  ;;  %v515_v15 = vmul.f32 %v880_v25, %v225_v43  ;;  %v551_v16 = vmul.f32 %v889_v30, %v257_v47 }
  0x2c   : > { %v644_v21 = vadd.f32 %v914_v13, %v629_v7  ;;  %v415_v22 = vadd.f32 %v399_v62, %v378_v9  ;;  %v416_v23 = vadd.f32 %v400_v63, %v379_v10  ;;  %v552_v24 = vmul.f32 %v889_v30, %v258_v48 }
  0x2d   : > { %v530_v27 = vadd.f32 %v514_v14, %v493_v6  ;;  %v531_v28 = vadd.f32 %v515_v15, %v494_v12  ;;  %v193_v29 = vunpack.c.l.bf16 %v751_v44  ;;  %v194_v31 = vunpack.c.l.bf16 %v178_v11  ;;  %v180_v6 = vld [vmem:[%s837_s21 + $0x24] sm:$0x1]  ;;  %v740_v11 = vld [vmem:[%s837_s21 + $0x2c] sm:$0x1] }
  0x2e   : > { %v652_v19 = vpack.c.bf16 %v644_v21, %v644_v21  ;;  %v450_v33 = vrot.slane %v415_v22, 1  ;;  %v451_v34 = vrot.slane %v416_v23, 1  ;;  %v226_v35 = vunpack.c.l.bf16 %v737_v17 }
  0x2f   : > { %v567_v36 = vadd.f32 %v551_v16, %v530_v27  ;;  %v568_v20 = vadd.f32 %v552_v24, %v531_v28  ;;  %v227_v37 = vunpack.c.l.bf16 %v738_v26  ;;  %v259_v38 = vunpack.c.h.bf16 %v737_v17  ;;  %v756_v17 = vld [vmem:[%s837_s21 + $0x34] sm:$0x1] }
  0x30   : > { %661 = vst.msk [vmem:[%s932_s15 + $0x4] sm:$0xf] %vm659_vm2, %v652_v19  ;;  %v452_v39 = vsel %vm443_vm0, %v450_v33, %v451_v34  ;;  %v260_v40 = vunpack.c.l.bf16 %v754_v32  ;;  %v277_v41 = vmul.f32 %v827_v0, %v193_v29  ;;  %v290_v42 = vmul.f32 %v832_v1, %v226_v35 }
  0x31   : > { %v478_v43 = vadd.f32 %v452_v39, %v318_v8  ;;  %v602_v44 = vrot.slane %v567_v36, 2  ;;  %v603_v45 = vrot.slane %v568_v20, 2  ;;  %v311_v46 = vmul.f32 %v842_v2, %v259_v38 }
  0x32   : > { %v298_v47 = vadd.f32 %v290_v42, %v277_v41  ;;  %v343_v48 = vmul.f32 %v847_v3, %v193_v29  ;;  %v344_v49 = vmul.f32 %v847_v3, %v194_v31  ;;  %v364_v50 = vmul.f32 %v852_v4, %v226_v35 }
  0x33   : > { %v604_v51 = vsel %vm595_vm1, %v602_v44, %v603_v45  ;;  %v365_v52 = vmul.f32 %v852_v4, %v227_v37  ;;  %v401_v53 = vmul.f32 %v857_v5, %v259_v38  ;;  %v402_v54 = vmul.f32 %v857_v5, %v260_v40 }
  0x34   : > { %v630_v55 = vadd.f32 %v604_v51, %v478_v43  ;;  %v319_v56 = vadd.f32 %v311_v46, %v298_v47  ;;  %v380_v57 = vadd.f32 %v364_v50, %v343_v48  ;;  %v495_v58 = vmul.f32 %v870_v18, %v193_v29 }
  0x35   : > { %v381_v60 = vadd.f32 %v365_v52, %v344_v49  ;;  %v496_v61 = vmul.f32 %v870_v18, %v194_v31  ;;  %v516_v62 = vmul.f32 %v880_v25, %v226_v35  ;;  %v517_v63 = vmul.f32 %v880_v25, %v227_v37  ;;  %v755_v31 = vld [vmem:[%s837_s21 + $0x28] ss:$8 sps:$4 sm:$0xff]  }
  0x36   : > { %v645_v7 = vadd.f32 %v914_v13, %v630_v55  ;;  %v417_v8 = vadd.f32 %v401_v53, %v380_v57  ;;  %v553_v9 = vmul.f32 %v889_v30, %v259_v38  ;;  %v554_v10 = vmul.f32 %v889_v30, %v260_v40  ;;  %v741_v55 = vld [vmem:[%s837_s21 + $0x30] ss:$8 sps:$4 sm:$0xff]  }
  0x37   : > { %v418_v12 = vadd.f32 %v402_v54, %v381_v60  ;;  %v532_v14 = vadd.f32 %v516_v62, %v495_v58  ;;  %v533_v15 = vadd.f32 %v517_v63, %v496_v61  ;;  %v195_v16 = vunpack.c.l.bf16 %v179_v59  ;;  %v182_v54 = vld [vmem:[%s837_s21 + $0x2c] sm:$0x1]  ;;  %v742_v60 = vld [vmem:[%s837_s21 + $0x34] sm:$0x1] }
  0x38   : > { %v653_v21 = vpack.c.bf16 %v645_v7, %v645_v7  ;;  %v453_v22 = vrot.slane %v417_v8, 1  ;;  %v196_v23 = vunpack.c.l.bf16 %v180_v6  ;;  %v228_v24 = vunpack.c.h.bf16 %v179_v59  ;;  %v758_v7 = vld [vmem:[%s837_s21 + $0x3c] sm:$0x1] }
  0x39   : > { %v454_v26 = vrot.slane %v418_v12, 1  ;;  %v569_v27 = vadd.f32 %v553_v9, %v532_v14  ;;  %v570_v28 = vadd.f32 %v554_v10, %v533_v15  ;;  %v229_v29 = vunpack.c.l.bf16 %v740_v11 }
  0x3a   : > { %662 = vst.msk [vmem:[%s932_s15 + $0x8] sm:$0xf] %vm659_vm2, %v653_v21  ;;  %v261_v32 = vunpack.c.h.bf16 %v755_v31  ;;  %v262_v19 = vunpack.c.l.bf16 %v756_v17  ;;  %v278_v33 = vmul.f32 %v827_v0, %v195_v16  ;;  %v291_v34 = vmul.f32 %v832_v1, %v228_v24 }
  0x3b   : > { %v455_v35 = vsel %vm443_vm0, %v453_v22, %v454_v26  ;;  %v605_v36 = vrot.slane %v569_v27, 2  ;;  %v606_v20 = vrot.slane %v570_v28, 2  ;;  %v345_v37 = vmul.f32 %v847_v3, %v195_v16 }
  0x3c   : > { %v479_v38 = vadd.f32 %v455_v35, %v319_v56  ;;  %v299_v39 = vadd.f32 %v291_v34, %v278_v33  ;;  %v312_v40 = vmul.f32 %v842_v2, %v261_v32  ;;  %v346_v41 = vmul.f32 %v847_v3, %v196_v23 }
  0x3d   : > { %v607_v42 = vsel %vm595_vm1, %v605_v36, %v606_v20  ;;  %v366_v43 = vmul.f32 %v852_v4, %v228_v24  ;;  %v367_v44 = vmul.f32 %v852_v4, %v229_v29  ;;  %v403_v45 = vmul.f32 %v857_v5, %v261_v32 }
  0x3e   : > { %v631_v46 = vadd.f32 %v607_v42, %v479_v38  ;;  %v320_v47 = vadd.f32 %v312_v40, %v299_v39  ;;  %v404_v48 = vmul.f32 %v857_v5, %v262_v19  ;;  %v497_v49 = vmul.f32 %v870_v18, %v195_v16  ;;  %v183_v40 = vld [vmem:[%s837_s21 + $0x30] ss:$8 sps:$4 sm:$0xff]  }
  0x3f   : > { %v382_v50 = vadd.f32 %v366_v43, %v345_v37  ;;  %v383_v51 = vadd.f32 %v367_v44, %v346_v41  ;;  %v498_v52 = vmul.f32 %v870_v18, %v196_v23  ;;  %v518_v53 = vmul.f32 %v880_v25, %v228_v24 }
  0x40   : > { %v646_v56 = vadd.f32 %v914_v13, %v631_v46  ;;  %v519_v57 = vmul.f32 %v880_v25, %v229_v29  ;;  %v555_v58 = vmul.f32 %v889_v30, %v261_v32  ;;  %v556_v59 = vmul.f32 %v889_v30, %v262_v19 }
  0x41   : > { %v419_v61 = vadd.f32 %v403_v45, %v382_v50  ;;  %v420_v62 = vadd.f32 %v404_v48, %v383_v51  ;;  %v534_v63 = vadd.f32 %v518_v53, %v497_v49  ;;  %v197_v6 = vunpack.c.l.bf16 %v755_v31  ;;  %v184_v45 = vld [vmem:[%s837_s21 + $0x34] sm:$0x1]  ;;  %v744_v50 = vld [vmem:[%s837_s21 + $0x3c] sm:$0x1] }
  0x42   : > { %v654_v8 = vpack.c.bf16 %v646_v56, %v646_v56  ;;  %v535_v9 = vadd.f32 %v519_v57, %v498_v52  ;;  %v198_v10 = vunpack.c.l.bf16 %v182_v54  ;;  %v230_v11 = vunpack.c.l.bf16 %v741_v55 }
  0x43   : > { %v456_v12 = vrot.slane %v419_v61, 1  ;;  %v457_v14 = vrot.slane %v420_v62, 1  ;;  %v571_v15 = vadd.f32 %v555_v58, %v534_v63  ;;  %v231_v16 = vunpack.c.l.bf16 %v742_v60 }
  0x44   : > { %663 = vst.msk [vmem:[%s932_s15 + $0xc] sm:$0xf] %vm659_vm2, %v654_v8  ;;  %v572_v17 = vadd.f32 %v556_v59, %v535_v9  ;;  %v263_v21 = vunpack.c.h.bf16 %v741_v55  ;;  %v264_v22 = vunpack.c.l.bf16 %v758_v7  ;;  %v279_v23 = vmul.f32 %v827_v0, %v197_v6  ;;  %v760_v55 = vld [vmem:[%s837_s21 + $0x44] sm:$0x1] }
  0x45   : > { %v458_v24 = vsel %vm443_vm0, %v456_v12, %v457_v14  ;;  %v608_v26 = vrot.slane %v571_v15, 2  ;;  %v292_v27 = vmul.f32 %v832_v1, %v230_v11  ;;  %v347_v28 = vmul.f32 %v847_v3, %v197_v6 }
  0x46   : > { %v480_v29 = vadd.f32 %v458_v24, %v320_v47  ;;  %v609_v31 = vrot.slane %v572_v17, 2  ;;  %v313_v32 = vmul.f32 %v842_v2, %v263_v21  ;;  %v348_v19 = vmul.f32 %v847_v3, %v198_v10 }
  0x47   : > { %v300_v33 = vadd.f32 %v292_v27, %v279_v23  ;;  %v368_v34 = vmul.f32 %v852_v4, %v230_v11  ;;  %v369_v35 = vmul.f32 %v852_v4, %v231_v16  ;;  %v405_v36 = vmul.f32 %v857_v5, %v263_v21 }
  0x48   : > { %v610_v20 = vsel %vm595_vm1, %v608_v26, %v609_v31  ;;  %v406_v37 = vmul.f32 %v857_v5, %v264_v22  ;;  %v499_v38 = vmul.f32 %v870_v18, %v197_v6  ;;  %v500_v39 = vmul.f32 %v870_v18, %v198_v10  ;;  %v759_v6 = vld [vmem:[%s837_s21 + $0x38] ss:$8 sps:$4 sm:$0xff]  }
  0x49   : > { %v632_v41 = vadd.f32 %v610_v20, %v480_v29  ;;  %v321_v42 = vadd.f32 %v313_v32, %v300_v33  ;;  %v384_v43 = vadd.f32 %v368_v34, %v347_v28  ;;  %v385_v44 = vadd.f32 %v369_v35, %v348_v19 }
  0x4a   : > { %v520_v46 = vmul.f32 %v880_v25, %v230_v11  ;;  %v521_v47 = vmul.f32 %v880_v25, %v231_v16  ;;  %v557_v48 = vmul.f32 %v889_v30, %v263_v21  ;;  %v558_v49 = vmul.f32 %v889_v30, %v264_v22 }
  0x4b   : > { %v647_v51 = vadd.f32 %v914_v13, %v632_v41  ;;  %v421_v52 = vadd.f32 %v405_v36, %v384_v43  ;;  %v422_v53 = vadd.f32 %v406_v37, %v385_v44  ;;  %v199_v54 = vunpack.c.l.bf16 %v183_v40  ;;  %v186_v36 = vld [vmem:[%s837_s21 + $0x3c] sm:$0x1] }
  0x4c   : > { %v536_v56 = vadd.f32 %v520_v46, %v499_v38  ;;  %v537_v57 = vadd.f32 %v521_v47, %v500_v39  ;;  %v200_v58 = vunpack.c.l.bf16 %v184_v45  ;;  %v232_v59 = vunpack.c.h.bf16 %v183_v40  ;;  %v745_v40 = vld [vmem:[%s837_s21 + $0x40] ss:$8 sps:$4 sm:$0xff]   ;;  %v746_v45 = vld [vmem:[%s837_s21 + $0x44] sm:$0x1] }
  0x4d   : > { %v655_v60 = vpack.c.bf16 %v647_v51, %v647_v51  ;;  %v459_v61 = vrot.slane %v421_v52, 1  ;;  %v460_v62 = vrot.slane %v422_v53, 1  ;;  %v233_v63 = vunpack.c.l.bf16 %v744_v50  ;;  %v762_v50 = vld [vmem:[%s837_s21 + $0x4c] sm:$0x1] }
  0x4e   : > { %v573_v7 = vadd.f32 %v557_v48, %v536_v56  ;;  %v574_v8 = vadd.f32 %v558_v49, %v537_v57  ;;  %v265_v9 = vunpack.c.h.bf16 %v759_v6  ;;  %v266_v10 = vunpack.c.l.bf16 %v760_v55 }
  0x4f   : > { %664 = vst.msk [vmem:[%s932_s15 + $0x10] sm:$0xf] %vm659_vm2, %v655_v60  ;;  %v461_v11 = vsel %vm443_vm0, %v459_v61, %v460_v62  ;;  %v280_v12 = vmul.f32 %v827_v0, %v199_v54  ;;  %v293_v14 = vmul.f32 %v832_v1, %v232_v59  ;;  %v349_v15 = vmul.f32 %v847_v3, %v199_v54 }
  0x50   : > { %v481_v16 = vadd.f32 %v461_v11, %v321_v42  ;;  %v611_v17 = vrot.slane %v573_v7, 2  ;;  %v612_v21 = vrot.slane %v574_v8, 2  ;;  %v314_v22 = vmul.f32 %v842_v2, %v265_v9 }
  0x51   : > { %v301_v23 = vadd.f32 %v293_v14, %v280_v12  ;;  %v350_v24 = vmul.f32 %v847_v3, %v200_v58  ;;  %v370_v26 = vmul.f32 %v852_v4, %v232_v59  ;;  %v371_v27 = vmul.f32 %v852_v4, %v233_v63 }
  0x52   : > { %v613_v28 = vsel %vm595_vm1, %v611_v17, %v612_v21  ;;  %v407_v29 = vmul.f32 %v857_v5, %v265_v9  ;;  %v408_v31 = vmul.f32 %v857_v5, %v266_v10  ;;  %v501_v32 = vmul.f32 %v870_v18, %v199_v54 }
  0x53   : > { %v633_v19 = vadd.f32 %v613_v28, %v481_v16  ;;  %v322_v33 = vadd.f32 %v314_v22, %v301_v23  ;;  %v386_v34 = vadd.f32 %v370_v26, %v349_v15  ;;  %v387_v35 = vadd.f32 %v371_v27, %v350_v24 }
  0x54   : > { %v502_v20 = vmul.f32 %v870_v18, %v200_v58  ;;  %v522_v37 = vmul.f32 %v880_v25, %v232_v59  ;;  %v523_v38 = vmul.f32 %v880_v25, %v233_v63  ;;  %v559_v39 = vmul.f32 %v889_v30, %v265_v9 }
  0x55   : > { %v648_v41 = vadd.f32 %v914_v13, %v633_v19  ;;  %v423_v42 = vadd.f32 %v407_v29, %v386_v34  ;;  %v424_v43 = vadd.f32 %v408_v31, %v387_v35  ;;  %v560_v44 = vmul.f32 %v889_v30, %v266_v10 }
  0x56   : > { %v538_v46 = vadd.f32 %v522_v37, %v501_v32  ;;  %v539_v47 = vadd.f32 %v523_v38, %v502_v20  ;;  %v201_v48 = vunpack.c.l.bf16 %v759_v6  ;;  %v202_v49 = vunpack.c.l.bf16 %v186_v36 }
  0x57   : > { %v656_v51 = vpack.c.bf16 %v648_v41, %v648_v41  ;;  %v462_v52 = vrot.slane %v423_v42, 1  ;;  %v463_v53 = vrot.slane %v424_v43, 1  ;;  %v234_v54 = vunpack.c.l.bf16 %v745_v40 }
  0x58   : > { %v575_v55 = vadd.f32 %v559_v39, %v538_v46  ;;  %v576_v56 = vadd.f32 %v560_v44, %v539_v47  ;;  %v235_v57 = vunpack.c.l.bf16 %v746_v45  ;;  %v267_v58 = vunpack.c.h.bf16 %v745_v40 }
  0x59   : > { %665 = vst.msk [vmem:[%s932_s15 + $0x14] sm:$0xf] %vm659_vm2, %v656_v51  ;;  %v464_v59 = vsel %vm443_vm0, %v462_v52, %v463_v53  ;;  %v268_v60 = vunpack.c.l.bf16 %v762_v50  ;;  %v281_v61 = vmul.f32 %v827_v0, %v201_v48  ;;  %v294_v62 = vmul.f32 %v832_v1, %v234_v54 }
  0x5a   : > { %v482_v63 = vadd.f32 %v464_v59, %v322_v33  ;;  %v614_v6 = vrot.slane %v575_v55, 2  ;;  %v615_v7 = vrot.slane %v576_v56, 2  ;;  %v315_v8 = vmul.f32 %v842_v2, %v267_v58 }
  0x5b   : > { %v351_v9 = vmul.f32 %v847_v3, %v201_v48  ;;  %v352_v10 = vmul.f32 %v847_v3, %v202_v49  ;;  %v372_v11 = vmul.f32 %v852_v4, %v234_v54  ;;  %v373_v14 = vmul.f32 %v852_v4, %v235_v57 }
  0x5c   : > { %v616_v12 = vsel %vm595_vm1, %v614_v6, %v615_v7  ;;  %v409_v15 = vmul.f32 %v857_v5, %v267_v58  ;;  %v410_v0 = vmul.f32 %v857_v5, %v268_v60  ;;  %v302_v16 = vadd.f32 %v294_v62, %v281_v61 }
  0x5d   : > { %v634_v1 = vadd.f32 %v616_v12, %v482_v63  ;;  %v388_v17 = vadd.f32 %v372_v11, %v351_v9  ;;  %v503_v21 = vmul.f32 %v870_v18, %v201_v48  ;;  %v389_v2 = vadd.f32 %v373_v14, %v352_v10 }
  0x5e   : > { %v504_v22 = vmul.f32 %v870_v18, %v202_v49  ;;  %v524_v3 = vmul.f32 %v880_v25, %v234_v54  ;;  %v525_v23 = vmul.f32 %v880_v25, %v235_v57  ;;  %v561_v26 = vmul.f32 %v889_v30, %v267_v58 }
  0x5f   : > { %v649_v24 = vadd.f32 %v914_v13, %v634_v1  ;;  %v425_v4 = vadd.f32 %v409_v15, %v388_v17  ;;  %v562_v5 = vmul.f32 %v889_v30, %v268_v60  ;;  %v426_v27 = vadd.f32 %v410_v0, %v389_v2 }
  0x60   : > { %v540_v28 = vadd.f32 %v524_v3, %v503_v21  ;;  %v541_v29 = vadd.f32 %v525_v23, %v504_v22  ;;  %v323_v32 = vadd.f32 %v315_v8, %v302_v16 }
  0x61   : > { %v657_v31 = vpack.c.bf16 %v649_v24, %v649_v24  ;;  %v465_v19 = vrot.slane %v425_v4, 1  ;;  %v466_v18 = vrot.slane %v426_v27, 1 }
  0x62   : > { %v577_v33 = vadd.f32 %v561_v26, %v540_v28  ;;  %v578_v34 = vadd.f32 %v562_v5, %v541_v29 }
  0x63   : > { %666 = vst.msk [vmem:[%s932_s15 + $0x18] sm:$0xf] %vm659_vm2, %v657_v31  ;;  %v467_v25 = vsel %vm443_vm0, %v465_v19, %v466_v18 }
  0x64   : > { %v617_v35 = vrot.slane %v577_v33, 2  ;;  %v618_v36 = vrot.slane %v578_v34, 2  ;;  %v483_v20 = vadd.f32 %v467_v25, %v323_v32 }
  0x66   : > { %v619_v37 = vsel %vm595_vm1, %v617_v35, %v618_v36 }
  0x67   : > { %v635_v30 = vadd.f32 %v619_v37, %v483_v20 }
  0x69   : > { %v650_v38 = vadd.f32 %v914_v13, %v635_v30 }
  0x6b   : > { %v658_v39 = vpack.c.bf16 %v650_v38, %v650_v38 }
  0x6d   : > { %667 = vst.msk [vmem:[%s932_s15 + $0x1c] sm:$0xf] %vm659_vm2, %v658_v39 }
  0x6e PF: > { %s13_s12 = sadd.s32 1, %s791_s12  }
  0x6f   : > { %p10_p4 = scmp.ge.s32.totalorder %s13_s12, 4  }
  0x71   :  { %12 = sbr.rel (!%p10_p4) target bundleno = 1 (0x1), region = 64 }

// kernel: shufflenet_forward.34
= control target key start
LH: loop header
LB: loop body
LE: loop exit
PB: predicated region body
PF: predicated region fallthrough
CT: control target
= control target key end

     0   :  { %vm102_vm0 = vcmask 392192   ;;  %vm288_vm1 = vcmask 781312   ;;  %s539_s1 = inlined_call_operand.vmem [shape: bf16[48,96], index: 1, kind: input, shape index: {}]   ;;  %s540_s0 = inlined_call_operand.vmem [shape: bf16[128,48], index: 0, kind: input, shape index: {}]   ;;  %s541_s2 = inlined_call_operand.vmem [shape: f32[1,96], index: 2, kind: input, shape index: {}]   ;;  %s542_s3 = inlined_call_operand.vmem [shape: bf16[128,96], index: 3, kind: output, shape index: {}]  }
   0x1   :  { %v400_v0 = vld [vmem:[%s539_s1] sm:$0xff]   ;;  %v401_v1 = vld [vmem:[%s539_s1 + $0x8] sm:$0xff]   ;;  %v402_v2 = vld [vmem:[%s539_s1 + $0x10] sm:$0xff]  }
   0x2   :  { %372 = vmatprep.subr.bf16.mxu0 %v400_v0  ;;  %394 = vmatprep.subr.bf16.mxu1 %v400_v0  ;;  %v403_v3 = vld [vmem:[%s540_s0] sm:$0xff]   ;;  %v405_v5 = vld [vmem:[%s540_s0 + $0x8] sm:$0xff]   ;;  %v407_v7 = vld [vmem:[%s540_s0 + $0x10] sm:$0xff]  }
   0x3   :  { %373 = vmatpush3.bf16.msra.mxu0 %v400_v0  ;;  %397 = vmatpush3.bf16.msra.mxu1 %v400_v0  ;;  %v404_v4 = vld [vmem:[%s540_s0 + $0x20] sm:$0xff]   ;;  %v406_v6 = vld [vmem:[%s540_s0 + $0x28] sm:$0xff]   ;;  %v408_v8 = vld [vmem:[%s540_s0 + $0x30] sm:$0xff]  }
   0x4   :  { %374 = vmatprep.subr.bf16.mxu0 %v401_v1  ;;  %395 = vmatprep.subr.bf16.mxu1 %v401_v1  ;;  %v409_v9 = vld [vmem:[%s540_s0 + $0x18] sm:$0xff]   ;;  %v309_v11 = vld [vmem:[%s541_s2] ss:$0 sm:$0xff] }
   0x5   :  { %378 = vmatprep.mubr.msk.bf16.mxu0 %vm102_vm0, %v403_v3  ;;  %386 = vmatprep.mubr.msk.bf16.mxu1 %vm102_vm0, %v404_v4  ;;  %v410_v10 = vld [vmem:[%s540_s0 + $0x38] sm:$0xff]  }
   0x7   :  { %375 = vmatpush3.bf16.msra.mxu0 %v401_v1  ;;  %398 = vmatpush3.bf16.msra.mxu1 %v401_v1 }
   0x8   :  { %376 = vmatprep.subr.bf16.mxu0 %v402_v2  ;;  %396 = vmatprep.subr.bf16.mxu1 %v402_v2 }
   0xb   :  { %377 = vmatpush3.bf16.msra.mxu0 %v402_v2  ;;  %399 = vmatpush3.bf16.msra.mxu1 %v402_v2 }
   0xe   :  { %379 = vmatmul.mubr.msk.bf16.vlgmr.msra.gmra.mrb[0].mxu0 %vm102_vm0, %v405_v5  ;;  %387 = vmatmul.mubr.msk.bf16.vlgmr.msra.gmra.mrb[0].mxu1 %vm102_vm0, %v406_v6 }
   0xf   :  { %382 = vmatprep.mubr.msk.bf16.mxu0 %vm102_vm0, %v407_v7  ;;  %390 = vmatprep.mubr.msk.bf16.mxu1 %vm102_vm0, %v408_v8 }
  0x16   :  { %383 = vmatmul.mubr.msk.bf16.gmra.mrb[4].mxu0 %vm102_vm0, %v409_v9  ;;  %391 = vmatmul.mubr.msk.bf16.gmra.mrb[4].mxu1 %vm102_vm0, %v410_v10 }
  0xe1   :  { %v380_v12 = vpop.f32.mrb[0].mxu0  ;;  %v388_v13 = vpop.f32.mrb[0].mxu1 }
  0xe2   :  { %v170_v14 = vadd.f32 %v380_v12, %v309_v11  ;;  %v202_v15 = vadd.f32 %v388_v13, %v309_v11  ;;  %v161_v16 = vpop.f32.mrb[1].mxu0  ;;  %v193_v17 = vpop.f32.mrb[1].mxu1 }
  0xe3   :  { %v162_v18 = vadd.f32 %v309_v11, %v161_v16  ;;  %v194_v19 = vadd.f32 %v309_v11, %v193_v17  ;;  %v381_v20 = vpop.f32.mrb[2].mxu0  ;;  %v389_v21 = vpop.f32.mrb[2].mxu1 }
  0xe4   :  { %v347_v22 = vpack.c.bf16 %v170_v14, %v170_v14  ;;  %v355_v23 = vpack.c.bf16 %v202_v15, %v202_v15  ;;  %v173_v24 = vadd.f32 %v381_v20, %v309_v11  ;;  %v205_v25 = vadd.f32 %v389_v21, %v309_v11  ;;  %v164_v26 = vpop.f32.mrb[3].mxu0  ;;  %v196_v27 = vpop.f32.mrb[3].mxu1 }
  0xe5   :  { %v345_v28 = vpack.c.bf16 %v162_v18, %v162_v18  ;;  %v353_v29 = vpack.c.bf16 %v194_v19, %v194_v19  ;;  %v165_v30 = vadd.f32 %v309_v11, %v164_v26  ;;  %v197_v31 = vadd.f32 %v309_v11, %v196_v27 }
  0xe6   :  { %291 = vst.msk [vmem:[%s542_s3 + $0x8] sm:$0xf] %vm288_vm1, %v347_v22  ;;  %299 = vst.msk [vmem:[%s542_s3 + $0x28] sm:$0xf] %vm288_vm1, %v355_v23  ;;  %v348_v32 = vpack.c.bf16 %v173_v24, %v173_v24  ;;  %v356_v33 = vpack.c.bf16 %v205_v25, %v205_v25 }
  0xe7   :  { %289 = vst.msk [vmem:[%s542_s3] sm:$0xf] %vm288_vm1, %v345_v28  ;;  %297 = vst.msk [vmem:[%s542_s3 + $0x20] sm:$0xf] %vm288_vm1, %v353_v29  ;;  %v346_v34 = vpack.c.bf16 %v165_v30, %v165_v30  ;;  %v354_v35 = vpack.c.bf16 %v197_v31, %v197_v31 }
  0xe8   :  { %292 = vst.msk [vmem:[%s542_s3 + $0xc] sm:$0xf] %vm288_vm1, %v348_v32  ;;  %300 = vst.msk [vmem:[%s542_s3 + $0x2c] sm:$0xf] %vm288_vm1, %v356_v33 }
  0xe9   :  { %290 = vst.msk [vmem:[%s542_s3 + $0x4] sm:$0xf] %vm288_vm1, %v346_v34  ;;  %298 = vst.msk [vmem:[%s542_s3 + $0x24] sm:$0xf] %vm288_vm1, %v354_v35  ;;  %v384_v36 = vpop.f32.mrb[4].mxu0  ;;  %v392_v37 = vpop.f32.mrb[4].mxu1 }
  0xea   :  { %v186_v38 = vadd.f32 %v384_v36, %v309_v11  ;;  %v218_v39 = vadd.f32 %v392_v37, %v309_v11  ;;  %v177_v40 = vpop.f32.mrb[5].mxu0  ;;  %v209_v41 = vpop.f32.mrb[5].mxu1 }
  0xeb   :  { %v178_v42 = vadd.f32 %v309_v11, %v177_v40  ;;  %v210_v43 = vadd.f32 %v309_v11, %v209_v41  ;;  %v385_v44 = vpop.f32.mrb[6].mxu0  ;;  %v393_v45 = vpop.f32.mrb[6].mxu1 }
  0xec   :  { %v351_v46 = vpack.c.bf16 %v186_v38, %v186_v38  ;;  %v359_v47 = vpack.c.bf16 %v218_v39, %v218_v39  ;;  %v189_v48 = vadd.f32 %v385_v44, %v309_v11  ;;  %v221_v49 = vadd.f32 %v393_v45, %v309_v11  ;;  %v180_v50 = vpop.f32.mrb[7].mxu0  ;;  %v212_v51 = vpop.f32.mrb[7].mxu1 }
  0xed   :  { %v349_v52 = vpack.c.bf16 %v178_v42, %v178_v42  ;;  %v357_v53 = vpack.c.bf16 %v210_v43, %v210_v43  ;;  %v181_v54 = vadd.f32 %v309_v11, %v180_v50  ;;  %v213_v55 = vadd.f32 %v309_v11, %v212_v51 }
  0xee   :  { %295 = vst.msk [vmem:[%s542_s3 + $0x18] sm:$0xf] %vm288_vm1, %v351_v46  ;;  %303 = vst.msk [vmem:[%s542_s3 + $0x38] sm:$0xf] %vm288_vm1, %v359_v47  ;;  %v352_v56 = vpack.c.bf16 %v189_v48, %v189_v48  ;;  %v360_v57 = vpack.c.bf16 %v221_v49, %v221_v49 }
  0xef   :  { %293 = vst.msk [vmem:[%s542_s3 + $0x10] sm:$0xf] %vm288_vm1, %v349_v52  ;;  %301 = vst.msk [vmem:[%s542_s3 + $0x30] sm:$0xf] %vm288_vm1, %v357_v53  ;;  %v350_v58 = vpack.c.bf16 %v181_v54, %v181_v54  ;;  %v358_v59 = vpack.c.bf16 %v213_v55, %v213_v55 }
  0xf0   :  { %296 = vst.msk [vmem:[%s542_s3 + $0x1c] sm:$0xf] %vm288_vm1, %v352_v56  ;;  %304 = vst.msk [vmem:[%s542_s3 + $0x3c] sm:$0xf] %vm288_vm1, %v360_v57 }
  0xf1   :  { %294 = vst.msk [vmem:[%s542_s3 + $0x14] sm:$0xf] %vm288_vm1, %v350_v58  ;;  %302 = vst.msk [vmem:[%s542_s3 + $0x34] sm:$0xf] %vm288_vm1, %v358_v59 }

// kernel: shufflenet_forward.33
= control target key start
LH: loop header
LB: loop body
LE: loop exit
PB: predicated region body
PF: predicated region fallthrough
CT: control target
= control target key end

     0   :  { %s813_s12 = smov 0   ;;  %s1087_s0 = inlined_call_operand.vmem [shape: bf16[2,10,10,24], index: 0, kind: input, shape index: {}]   ;;  %s1088_s1 = inlined_call_operand.vmem [shape: f32[9,24], index: 1, kind: input, shape index: {}]   ;;  %s1089_s2 = inlined_call_operand.vmem [shape: f32[1,24], index: 2, kind: input, shape index: {}]   ;;  %s1090_s3 = inlined_call_operand.vmem [shape: bf16[2,8,8,24], index: 3, kind: output, shape index: {}]  }
   0x1 LB: > { %s723_s13 = sadd.s32 4294967295, %s791_s12   ;;  %p727_p0 = scmp.ge.s32.totalorder %s791_s12, 1  ;;  %s791_s12 = sphi %s813_s12, %s13_s12  }
   0x2   : > { %p137_p1 = scmp.lt.s32.totalorder %s791_s12, 3 }
   0x4   : > { %p138_p2 = pnand %p727_p0, %p137_p1 }
   0x5   : > { %p161_p3 = scmp.lt.s32.totalorder (!%p138_p2), %s723_s13, 1  ;;  %v827_v0 = vld [vmem:[%s1088_s1] ss:$0 sm:$0xff] (!%p138_p2)  ;;  %v832_v1 = vld [vmem:[%s1088_s1 + $0x3] ss:$0 sm:$0xff] (!%p138_p2)  ;;  %vm443_vm0 = vcmask (!%p138_p2), 1046528  }
   0x6   : > { %141 = sbr.rel (%p138_p2) target bundleno = 110 (0x6e), region = 32  ;;  %v842_v2 = vld [vmem:[%s1088_s1 + $0x6] ss:$0 sm:$0xff] (!%p138_p2)  ;;  %v847_v3 = vld [vmem:[%s1088_s1 + $0x1] ss:$0 sm:$0xff] (!%p138_p2)  ;;  %vm595_vm1 = vcmask (!%p138_p2), 1045504  }
   0x7   : > { %v852_v4 = vld [vmem:[%s1088_s1 + $0x4] ss:$0 sm:$0xff] (!%p138_p2)  ;;  %v857_v5 = vld [vmem:[%s1088_s1 + $0x7] ss:$0 sm:$0xff] (!%p138_p2)  ;;  %v870_v18 = vld [vmem:[%s1088_s1 + $0x2] ss:$0 sm:$0xff] (!%p138_p2) }
   0x8   : > { %v880_v25 = vld [vmem:[%s1088_s1 + $0x5] ss:$0 sm:$0xff] (!%p138_p2)  ;;  %v889_v30 = vld [vmem:[%s1088_s1 + $0x8] ss:$0 sm:$0xff] (!%p138_p2)  ;;  %vm659_vm2 = vcmask (!%p138_p2), 191488  }
   0xd   : > { %s1092_s13 = smov (!%p161_p3, %s723_s13), 1 }
   0xe   : > { %s776_s14 = smul.u32 80, %s1092_s13  ;;  %s775_s11 = sshll.u32 %s1092_s13, 5 }
   0xf   : > { %s932_s15 = scalar_lea.vmem %s1090_s3, %s775_s11 }
  0x10   : > { %s837_s21 = scalar_lea.vmem %s1087_s0, %s776_s14 }
  0x11   : > { %v171_v6 = vld [vmem:[%s837_s21] ss:$8 sps:$4 sm:$0xff]   ;;  %v172_v7 = vld [vmem:[%s837_s21 + $0x4] sm:$0x1]  ;;  %v732_v8 = vld [vmem:[%s837_s21 + $0xc] sm:$0x1] }
  0x12   : > { %v187_v9 = vunpack.c.l.bf16 %v171_v6  ;;  %v188_v10 = vunpack.c.l.bf16 %v172_v7  ;;  %v220_v11 = vunpack.c.h.bf16 %v171_v6  ;;  %v221_v12 = vunpack.c.l.bf16 %v732_v8  ;;  %v747_v13 = vld [vmem:[%s837_s21 + $0x8] ss:$8 sps:$4 sm:$0xff]   ;;  %v748_v14 = vld [vmem:[%s837_s21 + $0x14] sm:$0x1]  ;;  %v865_v15 = vld [vmem:[%s837_s21 + $0xc] sm:$0x1] }
  0x13   : > { %v253_v16 = vunpack.c.h.bf16 %v747_v13  ;;  %v254_v17 = vunpack.c.l.bf16 %v748_v14  ;;  %v189_v19 = vunpack.c.l.bf16 %v747_v13  ;;  %v190_v20 = vunpack.c.l.bf16 %v865_v15  ;;  %v733_v31 = vld [vmem:[%s837_s21 + $0x10] ss:$8 sps:$4 sm:$0xff]   ;;  %v734_v40 = vld [vmem:[%s837_s21 + $0x14] sm:$0x1]  ;;  %v750_v41 = vld [vmem:[%s837_s21 + $0x1c] sm:$0x1] }
  0x14   : > { %v274_v21 = vmul.f32 %v827_v0, %v187_v9  ;;  %v287_v22 = vmul.f32 %v832_v1, %v220_v11  ;;  %v337_v23 = vmul.f32 %v847_v3, %v187_v9  ;;  %v338_v24 = vmul.f32 %v847_v3, %v188_v10  ;;  %v914_v13 = vld [vmem:[%s1089_s2] ss:$0 sm:$0xff] }
  0x15   : > { %v308_v26 = vmul.f32 %v842_v2, %v253_v16  ;;  %v358_v27 = vmul.f32 %v852_v4, %v220_v11  ;;  %v359_v28 = vmul.f32 %v852_v4, %v221_v12  ;;  %v395_v29 = vmul.f32 %v857_v5, %v253_v16 }
  0x16   : > { %v295_v32 = vadd.f32 %v287_v22, %v274_v21  ;;  %v396_v33 = vmul.f32 %v857_v5, %v254_v17  ;;  %v489_v34 = vmul.f32 %v870_v18, %v187_v9  ;;  %v490_v35 = vmul.f32 %v870_v18, %v188_v10 }
  0x17   : > { %v374_v36 = vadd.f32 %v358_v27, %v337_v23  ;;  %v375_v37 = vadd.f32 %v359_v28, %v338_v24  ;;  %v510_v38 = vmul.f32 %v880_v25, %v220_v11  ;;  %v511_v39 = vmul.f32 %v880_v25, %v221_v12 }
  0x18   : > { %v316_v42 = vadd.f32 %v308_v26, %v295_v32  ;;  %v547_v43 = vmul.f32 %v889_v30, %v253_v16  ;;  %v548_v44 = vmul.f32 %v889_v30, %v254_v17  ;;  %v222_v45 = vunpack.c.l.bf16 %v733_v31  ;;  %v175_v17 = vld [vmem:[%s837_s21 + $0x10] ss:$8 sps:$4 sm:$0xff]   ;;  %v176_v26 = vld [vmem:[%s837_s21 + $0x14] sm:$0x1]  ;;  %v736_v32 = vld [vmem:[%s837_s21 + $0x1c] sm:$0x1] }
  0x19   : > { %v411_v46 = vadd.f32 %v395_v29, %v374_v36  ;;  %v412_v47 = vadd.f32 %v396_v33, %v375_v37  ;;  %v526_v48 = vadd.f32 %v510_v38, %v489_v34  ;;  %v527_v49 = vadd.f32 %v511_v39, %v490_v35  ;;  %v752_v36 = vld [vmem:[%s837_s21 + $0x24] sm:$0x1] }
  0x1a   : > { %v223_v50 = vunpack.c.l.bf16 %v734_v40  ;;  %v255_v51 = vunpack.c.h.bf16 %v733_v31  ;;  %v256_v52 = vunpack.c.l.bf16 %v750_v41  ;;  %v275_v53 = vmul.f32 %v827_v0, %v189_v19 }
  0x1b   : > { %v444_v54 = vrot.slane %v411_v46, 1  ;;  %v445_v55 = vrot.slane %v412_v47, 1  ;;  %v563_v56 = vadd.f32 %v547_v43, %v526_v48  ;;  %v564_v57 = vadd.f32 %v548_v44, %v527_v49  ;;  %v751_v44 = vld [vmem:[%s837_s21 + $0x18] ss:$8 sps:$4 sm:$0xff]  }
  0x1c   : > { %v288_v58 = vmul.f32 %v832_v1, %v222_v45  ;;  %v309_v59 = vmul.f32 %v842_v2, %v255_v51  ;;  %v339_v60 = vmul.f32 %v847_v3, %v189_v19  ;;  %v340_v61 = vmul.f32 %v847_v3, %v190_v20 }
  0x1d   : > { %v446_v62 = vsel %vm443_vm0, %v444_v54, %v445_v55  ;;  %v596_v63 = vrot.slane %v563_v56, 2  ;;  %v597_v6 = vrot.slane %v564_v57, 2  ;;  %v360_v7 = vmul.f32 %v852_v4, %v222_v45 }
  0x1e   : > { %v476_v8 = vadd.f32 %v446_v62, %v316_v42  ;;  %v296_v9 = vadd.f32 %v288_v58, %v275_v53  ;;  %v361_v10 = vmul.f32 %v852_v4, %v223_v50  ;;  %v397_v11 = vmul.f32 %v857_v5, %v255_v51 }
  0x1f   : > { %v598_v12 = vsel %vm595_vm1, %v596_v63, %v597_v6  ;;  %v376_v14 = vadd.f32 %v360_v7, %v339_v60  ;;  %v398_v15 = vmul.f32 %v857_v5, %v256_v52  ;;  %v491_v16 = vmul.f32 %v870_v18, %v189_v19 }
  0x20   : > { %v628_v21 = vadd.f32 %v598_v12, %v476_v8  ;;  %v317_v22 = vadd.f32 %v309_v59, %v296_v9  ;;  %v377_v23 = vadd.f32 %v361_v10, %v340_v61  ;;  %v492_v24 = vmul.f32 %v870_v18, %v190_v20 }
  0x21   : > { %v413_v27 = vadd.f32 %v397_v11, %v376_v14  ;;  %v512_v28 = vmul.f32 %v880_v25, %v222_v45  ;;  %v513_v29 = vmul.f32 %v880_v25, %v223_v50  ;;  %v549_v31 = vmul.f32 %v889_v30, %v255_v51  ;;  %v178_v11 = vld [vmem:[%s837_s21 + $0x1c] sm:$0x1] }
  0x22   : > { %v643_v19 = vadd.f32 %v914_v13, %v628_v21  ;;  %v414_v33 = vadd.f32 %v398_v15, %v377_v23  ;;  %v550_v34 = vmul.f32 %v889_v30, %v256_v52  ;;  %v191_v35 = vunpack.c.l.bf16 %v175_v17 }
  0x23   : > { %v447_v20 = vrot.slane %v413_v27, 1  ;;  %v528_v37 = vadd.f32 %v512_v28, %v491_v16  ;;  %v529_v38 = vadd.f32 %v513_v29, %v492_v24  ;;  %v192_v39 = vunpack.c.l.bf16 %v176_v26  ;;  %v738_v26 = vld [vmem:[%s837_s21 + $0x24] sm:$0x1] }
  0x24   : > { %v651_v40 = vpack.c.bf16 %v643_v19, %v643_v19  ;;  %v448_v41 = vrot.slane %v414_v33, 1  ;;  %v224_v42 = vunpack.c.h.bf16 %v175_v17  ;;  %v225_v43 = vunpack.c.l.bf16 %v736_v32  ;;  %v737_v17 = vld [vmem:[%s837_s21 + $0x20] ss:$8 sps:$4 sm:$0xff]   ;;  %v754_v32 = vld [vmem:[%s837_s21 + $0x2c] sm:$0x1] }
  0x25   : > { %v565_v45 = vadd.f32 %v549_v31, %v528_v37  ;;  %v566_v46 = vadd.f32 %v550_v34, %v529_v38  ;;  %v257_v47 = vunpack.c.h.bf16 %v751_v44  ;;  %v258_v48 = vunpack.c.l.bf16 %v752_v36 }
  0x26   : > { %660 = vst.msk [vmem:[%s932_s15] sm:$0xf] %vm659_vm2, %v651_v40  ;;  %v449_v49 = vsel %vm443_vm0, %v447_v20, %v448_v41  ;;  %v276_v50 = vmul.f32 %v827_v0, %v191_v35  ;;  %v289_v51 = vmul.f32 %v832_v1, %v224_v42  ;;  %v341_v52 = vmul.f32 %v847_v3, %v191_v35 }
  0x27   : > { %v477_v53 = vadd.f32 %v449_v49, %v317_v22  ;;  %v599_v54 = vrot.slane %v565_v45, 2  ;;  %v600_v55 = vrot.slane %v566_v46, 2  ;;  %v310_v56 = vmul.f32 %v842_v2, %v257_v47 }
  0x28   : > { %v297_v57 = vadd.f32 %v289_v51, %v276_v50  ;;  %v342_v58 = vmul.f32 %v847_v3, %v192_v39  ;;  %v362_v59 = vmul.f32 %v852_v4, %v224_v42  ;;  %v363_v60 = vmul.f32 %v852_v4, %v225_v43 }
  0x29   : > { %v601_v61 = vsel %vm595_vm1, %v599_v54, %v600_v55  ;;  %v399_v62 = vmul.f32 %v857_v5, %v257_v47  ;;  %v400_v63 = vmul.f32 %v857_v5, %v258_v48  ;;  %v493_v6 = vmul.f32 %v870_v18, %v191_v35 }
  0x2a   : > { %v629_v7 = vadd.f32 %v601_v61, %v477_v53  ;;  %v318_v8 = vadd.f32 %v310_v56, %v297_v57  ;;  %v378_v9 = vadd.f32 %v362_v59, %v341_v52  ;;  %v379_v10 = vadd.f32 %v363_v60, %v342_v58  ;;  %v179_v59 = vld [vmem:[%s837_s21 + $0x20] ss:$8 sps:$4 sm:$0xff]  }
  0x2b   : > { %v494_v12 = vmul.f32 %v870_v18, %v192_v39  ;;  %v514_v14 = vmul.f32 %v880_v25, %v224_v42  ;;  %v515_v15 = vmul.f32 %v880_v25, %v225_v43  ;;  %v551_v16 = vmul.f32 %v889_v30, %v257_v47 }
  0x2c   : > { %v644_v21 = vadd.f32 %v914_v13, %v629_v7  ;;  %v415_v22 = vadd.f32 %v399_v62, %v378_v9  ;;  %v416_v23 = vadd.f32 %v400_v63, %v379_v10  ;;  %v552_v24 = vmul.f32 %v889_v30, %v258_v48 }
  0x2d   : > { %v530_v27 = vadd.f32 %v514_v14, %v493_v6  ;;  %v531_v28 = vadd.f32 %v515_v15, %v494_v12  ;;  %v193_v29 = vunpack.c.l.bf16 %v751_v44  ;;  %v194_v31 = vunpack.c.l.bf16 %v178_v11  ;;  %v180_v6 = vld [vmem:[%s837_s21 + $0x24] sm:$0x1]  ;;  %v740_v11 = vld [vmem:[%s837_s21 + $0x2c] sm:$0x1] }
  0x2e   : > { %v652_v19 = vpack.c.bf16 %v644_v21, %v644_v21  ;;  %v450_v33 = vrot.slane %v415_v22, 1  ;;  %v451_v34 = vrot.slane %v416_v23, 1  ;;  %v226_v35 = vunpack.c.l.bf16 %v737_v17 }
  0x2f   : > { %v567_v36 = vadd.f32 %v551_v16, %v530_v27  ;;  %v568_v20 = vadd.f32 %v552_v24, %v531_v28  ;;  %v227_v37 = vunpack.c.l.bf16 %v738_v26  ;;  %v259_v38 = vunpack.c.h.bf16 %v737_v17  ;;  %v756_v17 = vld [vmem:[%s837_s21 + $0x34] sm:$0x1] }
  0x30   : > { %661 = vst.msk [vmem:[%s932_s15 + $0x4] sm:$0xf] %vm659_vm2, %v652_v19  ;;  %v452_v39 = vsel %vm443_vm0, %v450_v33, %v451_v34  ;;  %v260_v40 = vunpack.c.l.bf16 %v754_v32  ;;  %v277_v41 = vmul.f32 %v827_v0, %v193_v29  ;;  %v290_v42 = vmul.f32 %v832_v1, %v226_v35 }
  0x31   : > { %v478_v43 = vadd.f32 %v452_v39, %v318_v8  ;;  %v602_v44 = vrot.slane %v567_v36, 2  ;;  %v603_v45 = vrot.slane %v568_v20, 2  ;;  %v311_v46 = vmul.f32 %v842_v2, %v259_v38 }
  0x32   : > { %v298_v47 = vadd.f32 %v290_v42, %v277_v41  ;;  %v343_v48 = vmul.f32 %v847_v3, %v193_v29  ;;  %v344_v49 = vmul.f32 %v847_v3, %v194_v31  ;;  %v364_v50 = vmul.f32 %v852_v4, %v226_v35 }
  0x33   : > { %v604_v51 = vsel %vm595_vm1, %v602_v44, %v603_v45  ;;  %v365_v52 = vmul.f32 %v852_v4, %v227_v37  ;;  %v401_v53 = vmul.f32 %v857_v5, %v259_v38  ;;  %v402_v54 = vmul.f32 %v857_v5, %v260_v40 }
  0x34   : > { %v630_v55 = vadd.f32 %v604_v51, %v478_v43  ;;  %v319_v56 = vadd.f32 %v311_v46, %v298_v47  ;;  %v380_v57 = vadd.f32 %v364_v50, %v343_v48  ;;  %v495_v58 = vmul.f32 %v870_v18, %v193_v29 }
  0x35   : > { %v381_v60 = vadd.f32 %v365_v52, %v344_v49  ;;  %v496_v61 = vmul.f32 %v870_v18, %v194_v31  ;;  %v516_v62 = vmul.f32 %v880_v25, %v226_v35  ;;  %v517_v63 = vmul.f32 %v880_v25, %v227_v37  ;;  %v755_v31 = vld [vmem:[%s837_s21 + $0x28] ss:$8 sps:$4 sm:$0xff]  }
  0x36   : > { %v645_v7 = vadd.f32 %v914_v13, %v630_v55  ;;  %v417_v8 = vadd.f32 %v401_v53, %v380_v57  ;;  %v553_v9 = vmul.f32 %v889_v30, %v259_v38  ;;  %v554_v10 = vmul.f32 %v889_v30, %v260_v40  ;;  %v741_v55 = vld [vmem:[%s837_s21 + $0x30] ss:$8 sps:$4 sm:$0xff]  }
  0x37   : > { %v418_v12 = vadd.f32 %v402_v54, %v381_v60  ;;  %v532_v14 = vadd.f32 %v516_v62, %v495_v58  ;;  %v533_v15 = vadd.f32 %v517_v63, %v496_v61  ;;  %v195_v16 = vunpack.c.l.bf16 %v179_v59  ;;  %v182_v54 = vld [vmem:[%s837_s21 + $0x2c] sm:$0x1]  ;;  %v742_v60 = vld [vmem:[%s837_s21 + $0x34] sm:$0x1] }
  0x38   : > { %v653_v21 = vpack.c.bf16 %v645_v7, %v645_v7  ;;  %v453_v22 = vrot.slane %v417_v8, 1  ;;  %v196_v23 = vunpack.c.l.bf16 %v180_v6  ;;  %v228_v24 = vunpack.c.h.bf16 %v179_v59  ;;  %v758_v7 = vld [vmem:[%s837_s21 + $0x3c] sm:$0x1] }
  0x39   : > { %v454_v26 = vrot.slane %v418_v12, 1  ;;  %v569_v27 = vadd.f32 %v553_v9, %v532_v14  ;;  %v570_v28 = vadd.f32 %v554_v10, %v533_v15  ;;  %v229_v29 = vunpack.c.l.bf16 %v740_v11 }
  0x3a   : > { %662 = vst.msk [vmem:[%s932_s15 + $0x8] sm:$0xf] %vm659_vm2, %v653_v21  ;;  %v261_v32 = vunpack.c.h.bf16 %v755_v31  ;;  %v262_v19 = vunpack.c.l.bf16 %v756_v17  ;;  %v278_v33 = vmul.f32 %v827_v0, %v195_v16  ;;  %v291_v34 = vmul.f32 %v832_v1, %v228_v24 }
  0x3b   : > { %v455_v35 = vsel %vm443_vm0, %v453_v22, %v454_v26  ;;  %v605_v36 = vrot.slane %v569_v27, 2  ;;  %v606_v20 = vrot.slane %v570_v28, 2  ;;  %v345_v37 = vmul.f32 %v847_v3, %v195_v16 }
  0x3c   : > { %v479_v38 = vadd.f32 %v455_v35, %v319_v56  ;;  %v299_v39 = vadd.f32 %v291_v34, %v278_v33  ;;  %v312_v40 = vmul.f32 %v842_v2, %v261_v32  ;;  %v346_v41 = vmul.f32 %v847_v3, %v196_v23 }
  0x3d   : > { %v607_v42 = vsel %vm595_vm1, %v605_v36, %v606_v20  ;;  %v366_v43 = vmul.f32 %v852_v4, %v228_v24  ;;  %v367_v44 = vmul.f32 %v852_v4, %v229_v29  ;;  %v403_v45 = vmul.f32 %v857_v5, %v261_v32 }
  0x3e   : > { %v631_v46 = vadd.f32 %v607_v42, %v479_v38  ;;  %v320_v47 = vadd.f32 %v312_v40, %v299_v39  ;;  %v404_v48 = vmul.f32 %v857_v5, %v262_v19  ;;  %v497_v49 = vmul.f32 %v870_v18, %v195_v16  ;;  %v183_v40 = vld [vmem:[%s837_s21 + $0x30] ss:$8 sps:$4 sm:$0xff]  }
  0x3f   : > { %v382_v50 = vadd.f32 %v366_v43, %v345_v37  ;;  %v383_v51 = vadd.f32 %v367_v44, %v346_v41  ;;  %v498_v52 = vmul.f32 %v870_v18, %v196_v23  ;;  %v518_v53 = vmul.f32 %v880_v25, %v228_v24 }
  0x40   : > { %v646_v56 = vadd.f32 %v914_v13, %v631_v46  ;;  %v519_v57 = vmul.f32 %v880_v25, %v229_v29  ;;  %v555_v58 = vmul.f32 %v889_v30, %v261_v32  ;;  %v556_v59 = vmul.f32 %v889_v30, %v262_v19 }
  0x41   : > { %v419_v61 = vadd.f32 %v403_v45, %v382_v50  ;;  %v420_v62 = vadd.f32 %v404_v48, %v383_v51  ;;  %v534_v63 = vadd.f32 %v518_v53, %v497_v49  ;;  %v197_v6 = vunpack.c.l.bf16 %v755_v31  ;;  %v184_v45 = vld [vmem:[%s837_s21 + $0x34] sm:$0x1]  ;;  %v744_v50 = vld [vmem:[%s837_s21 + $0x3c] sm:$0x1] }
  0x42   : > { %v654_v8 = vpack.c.bf16 %v646_v56, %v646_v56  ;;  %v535_v9 = vadd.f32 %v519_v57, %v498_v52  ;;  %v198_v10 = vunpack.c.l.bf16 %v182_v54  ;;  %v230_v11 = vunpack.c.l.bf16 %v741_v55 }
  0x43   : > { %v456_v12 = vrot.slane %v419_v61, 1  ;;  %v457_v14 = vrot.slane %v420_v62, 1  ;;  %v571_v15 = vadd.f32 %v555_v58, %v534_v63  ;;  %v231_v16 = vunpack.c.l.bf16 %v742_v60 }
  0x44   : > { %663 = vst.msk [vmem:[%s932_s15 + $0xc] sm:$0xf] %vm659_vm2, %v654_v8  ;;  %v572_v17 = vadd.f32 %v556_v59, %v535_v9  ;;  %v263_v21 = vunpack.c.h.bf16 %v741_v55  ;;  %v264_v22 = vunpack.c.l.bf16 %v758_v7  ;;  %v279_v23 = vmul.f32 %v827_v0, %v197_v6  ;;  %v760_v55 = vld [vmem:[%s837_s21 + $0x44] sm:$0x1] }
  0x45   : > { %v458_v24 = vsel %vm443_vm0, %v456_v12, %v457_v14  ;;  %v608_v26 = vrot.slane %v571_v15, 2  ;;  %v292_v27 = vmul.f32 %v832_v1, %v230_v11  ;;  %v347_v28 = vmul.f32 %v847_v3, %v197_v6 }
  0x46   : > { %v480_v29 = vadd.f32 %v458_v24, %v320_v47  ;;  %v609_v31 = vrot.slane %v572_v17, 2  ;;  %v313_v32 = vmul.f32 %v842_v2, %v263_v21  ;;  %v348_v19 = vmul.f32 %v847_v3, %v198_v10 }
  0x47   : > { %v300_v33 = vadd.f32 %v292_v27, %v279_v23  ;;  %v368_v34 = vmul.f32 %v852_v4, %v230_v11  ;;  %v369_v35 = vmul.f32 %v852_v4, %v231_v16  ;;  %v405_v36 = vmul.f32 %v857_v5, %v263_v21 }
  0x48   : > { %v610_v20 = vsel %vm595_vm1, %v608_v26, %v609_v31  ;;  %v406_v37 = vmul.f32 %v857_v5, %v264_v22  ;;  %v499_v38 = vmul.f32 %v870_v18, %v197_v6  ;;  %v500_v39 = vmul.f32 %v870_v18, %v198_v10  ;;  %v759_v6 = vld [vmem:[%s837_s21 + $0x38] ss:$8 sps:$4 sm:$0xff]  }
  0x49   : > { %v632_v41 = vadd.f32 %v610_v20, %v480_v29  ;;  %v321_v42 = vadd.f32 %v313_v32, %v300_v33  ;;  %v384_v43 = vadd.f32 %v368_v34, %v347_v28  ;;  %v385_v44 = vadd.f32 %v369_v35, %v348_v19 }
  0x4a   : > { %v520_v46 = vmul.f32 %v880_v25, %v230_v11  ;;  %v521_v47 = vmul.f32 %v880_v25, %v231_v16  ;;  %v557_v48 = vmul.f32 %v889_v30, %v263_v21  ;;  %v558_v49 = vmul.f32 %v889_v30, %v264_v22 }
  0x4b   : > { %v647_v51 = vadd.f32 %v914_v13, %v632_v41  ;;  %v421_v52 = vadd.f32 %v405_v36, %v384_v43  ;;  %v422_v53 = vadd.f32 %v406_v37, %v385_v44  ;;  %v199_v54 = vunpack.c.l.bf16 %v183_v40  ;;  %v186_v36 = vld [vmem:[%s837_s21 + $0x3c] sm:$0x1] }
  0x4c   : > { %v536_v56 = vadd.f32 %v520_v46, %v499_v38  ;;  %v537_v57 = vadd.f32 %v521_v47, %v500_v39  ;;  %v200_v58 = vunpack.c.l.bf16 %v184_v45  ;;  %v232_v59 = vunpack.c.h.bf16 %v183_v40  ;;  %v745_v40 = vld [vmem:[%s837_s21 + $0x40] ss:$8 sps:$4 sm:$0xff]   ;;  %v746_v45 = vld [vmem:[%s837_s21 + $0x44] sm:$0x1] }
  0x4d   : > { %v655_v60 = vpack.c.bf16 %v647_v51, %v647_v51  ;;  %v459_v61 = vrot.slane %v421_v52, 1  ;;  %v460_v62 = vrot.slane %v422_v53, 1  ;;  %v233_v63 = vunpack.c.l.bf16 %v744_v50  ;;  %v762_v50 = vld [vmem:[%s837_s21 + $0x4c] sm:$0x1] }
  0x4e   : > { %v573_v7 = vadd.f32 %v557_v48, %v536_v56  ;;  %v574_v8 = vadd.f32 %v558_v49, %v537_v57  ;;  %v265_v9 = vunpack.c.h.bf16 %v759_v6  ;;  %v266_v10 = vunpack.c.l.bf16 %v760_v55 }
  0x4f   : > { %664 = vst.msk [vmem:[%s932_s15 + $0x10] sm:$0xf] %vm659_vm2, %v655_v60  ;;  %v461_v11 = vsel %vm443_vm0, %v459_v61, %v460_v62  ;;  %v280_v12 = vmul.f32 %v827_v0, %v199_v54  ;;  %v293_v14 = vmul.f32 %v832_v1, %v232_v59  ;;  %v349_v15 = vmul.f32 %v847_v3, %v199_v54 }
  0x50   : > { %v481_v16 = vadd.f32 %v461_v11, %v321_v42  ;;  %v611_v17 = vrot.slane %v573_v7, 2  ;;  %v612_v21 = vrot.slane %v574_v8, 2  ;;  %v314_v22 = vmul.f32 %v842_v2, %v265_v9 }
  0x51   : > { %v301_v23 = vadd.f32 %v293_v14, %v280_v12  ;;  %v350_v24 = vmul.f32 %v847_v3, %v200_v58  ;;  %v370_v26 = vmul.f32 %v852_v4, %v232_v59  ;;  %v371_v27 = vmul.f32 %v852_v4, %v233_v63 }
  0x52   : > { %v613_v28 = vsel %vm595_vm1, %v611_v17, %v612_v21  ;;  %v407_v29 = vmul.f32 %v857_v5, %v265_v9  ;;  %v408_v31 = vmul.f32 %v857_v5, %v266_v10  ;;  %v501_v32 = vmul.f32 %v870_v18, %v199_v54 }
  0x53   : > { %v633_v19 = vadd.f32 %v613_v28, %v481_v16  ;;  %v322_v33 = vadd.f32 %v314_v22, %v301_v23  ;;  %v386_v34 = vadd.f32 %v370_v26, %v349_v15  ;;  %v387_v35 = vadd.f32 %v371_v27, %v350_v24 }
  0x54   : > { %v502_v20 = vmul.f32 %v870_v18, %v200_v58  ;;  %v522_v37 = vmul.f32 %v880_v25, %v232_v59  ;;  %v523_v38 = vmul.f32 %v880_v25, %v233_v63  ;;  %v559_v39 = vmul.f32 %v889_v30, %v265_v9 }
  0x55   : > { %v648_v41 = vadd.f32 %v914_v13, %v633_v19  ;;  %v423_v42 = vadd.f32 %v407_v29, %v386_v34  ;;  %v424_v43 = vadd.f32 %v408_v31, %v387_v35  ;;  %v560_v44 = vmul.f32 %v889_v30, %v266_v10 }
  0x56   : > { %v538_v46 = vadd.f32 %v522_v37, %v501_v32  ;;  %v539_v47 = vadd.f32 %v523_v38, %v502_v20  ;;  %v201_v48 = vunpack.c.l.bf16 %v759_v6  ;;  %v202_v49 = vunpack.c.l.bf16 %v186_v36 }
  0x57   : > { %v656_v51 = vpack.c.bf16 %v648_v41, %v648_v41  ;;  %v462_v52 = vrot.slane %v423_v42, 1  ;;  %v463_v53 = vrot.slane %v424_v43, 1  ;;  %v234_v54 = vunpack.c.l.bf16 %v745_v40 }
  0x58   : > { %v575_v55 = vadd.f32 %v559_v39, %v538_v46  ;;  %v576_v56 = vadd.f32 %v560_v44, %v539_v47  ;;  %v235_v57 = vunpack.c.l.bf16 %v746_v45  ;;  %v267_v58 = vunpack.c.h.bf16 %v745_v40 }
  0x59   : > { %665 = vst.msk [vmem:[%s932_s15 + $0x14] sm:$0xf] %vm659_vm2, %v656_v51  ;;  %v464_v59 = vsel %vm443_vm0, %v462_v52, %v463_v53  ;;  %v268_v60 = vunpack.c.l.bf16 %v762_v50  ;;  %v281_v61 = vmul.f32 %v827_v0, %v201_v48  ;;  %v294_v62 = vmul.f32 %v832_v1, %v234_v54 }
  0x5a   : > { %v482_v63 = vadd.f32 %v464_v59, %v322_v33  ;;  %v614_v6 = vrot.slane %v575_v55, 2  ;;  %v615_v7 = vrot.slane %v576_v56, 2  ;;  %v315_v8 = vmul.f32 %v842_v2, %v267_v58 }
  0x5b   : > { %v351_v9 = vmul.f32 %v847_v3, %v201_v48  ;;  %v352_v10 = vmul.f32 %v847_v3, %v202_v49  ;;  %v372_v11 = vmul.f32 %v852_v4, %v234_v54  ;;  %v373_v14 = vmul.f32 %v852_v4, %v235_v57 }
  0x5c   : > { %v616_v12 = vsel %vm595_vm1, %v614_v6, %v615_v7  ;;  %v409_v15 = vmul.f32 %v857_v5, %v267_v58  ;;  %v410_v0 = vmul.f32 %v857_v5, %v268_v60  ;;  %v302_v16 = vadd.f32 %v294_v62, %v281_v61 }
  0x5d   : > { %v634_v1 = vadd.f32 %v616_v12, %v482_v63  ;;  %v388_v17 = vadd.f32 %v372_v11, %v351_v9  ;;  %v503_v21 = vmul.f32 %v870_v18, %v201_v48  ;;  %v389_v2 = vadd.f32 %v373_v14, %v352_v10 }
  0x5e   : > { %v504_v22 = vmul.f32 %v870_v18, %v202_v49  ;;  %v524_v3 = vmul.f32 %v880_v25, %v234_v54  ;;  %v525_v23 = vmul.f32 %v880_v25, %v235_v57  ;;  %v561_v26 = vmul.f32 %v889_v30, %v267_v58 }
  0x5f   : > { %v649_v24 = vadd.f32 %v914_v13, %v634_v1  ;;  %v425_v4 = vadd.f32 %v409_v15, %v388_v17  ;;  %v562_v5 = vmul.f32 %v889_v30, %v268_v60  ;;  %v426_v27 = vadd.f32 %v410_v0, %v389_v2 }
  0x60   : > { %v540_v28 = vadd.f32 %v524_v3, %v503_v21  ;;  %v541_v29 = vadd.f32 %v525_v23, %v504_v22  ;;  %v323_v32 = vadd.f32 %v315_v8, %v302_v16 }
  0x61   : > { %v657_v31 = vpack.c.bf16 %v649_v24, %v649_v24  ;;  %v465_v19 = vrot.slane %v425_v4, 1  ;;  %v466_v18 = vrot.slane %v426_v27, 1 }
  0x62   : > { %v577_v33 = vadd.f32 %v561_v26, %v540_v28  ;;  %v578_v34 = vadd.f32 %v562_v5, %v541_v29 }
  0x63   : > { %666 = vst.msk [vmem:[%s932_s15 + $0x18] sm:$0xf] %vm659_vm2, %v657_v31  ;;  %v467_v25 = vsel %vm443_vm0, %v465_v19, %v466_v18 }
  0x64   : > { %v617_v35 = vrot.slane %v577_v33, 2  ;;  %v618_v36 = vrot.slane %v578_v34, 2  ;;  %v483_v20 = vadd.f32 %v467_v25, %v323_v32 }
  0x66   : > { %v619_v37 = vsel %vm595_vm1, %v617_v35, %v618_v36 }
  0x67   : > { %v635_v30 = vadd.f32 %v619_v37, %v483_v20 }
  0x69   : > { %v650_v38 = vadd.f32 %v914_v13, %v635_v30 }
  0x6b   : > { %v658_v39 = vpack.c.bf16 %v650_v38, %v650_v38 }
  0x6d   : > { %667 = vst.msk [vmem:[%s932_s15 + $0x1c] sm:$0xf] %vm659_vm2, %v658_v39 }
  0x6e PF: > { %s13_s12 = sadd.s32 1, %s791_s12  }
  0x6f   : > { %p10_p4 = scmp.ge.s32.totalorder %s13_s12, 4  }
  0x71   :  { %12 = sbr.rel (!%p10_p4) target bundleno = 1 (0x1), region = 64 }

// kernel: shufflenet_forward.35
= control target key start
LH: loop header
LB: loop body
LE: loop exit
PB: predicated region body
PF: predicated region fallthrough
CT: control target
= control target key end

     0   :  { %vm118_vm0 = vcmask 1043456   ;;  %vm93_vm1 = vcmask 195584   ;;  %vm347_vm2 = vcmask 781312   ;;  %s708_s1 = inlined_call_operand.vmem [shape: bf16[24,96], index: 1, kind: input, shape index: {}]   ;;  %s709_s0 = inlined_call_operand.vmem [shape: bf16[128,24], index: 0, kind: input, shape index: {}]   ;;  %s710_s3 = inlined_call_operand.vmem [shape: bf16[128,96], index: 3, kind: input, shape index: {}]   ;;  %s711_s2 = inlined_call_operand.vmem [shape: f32[1,96], index: 2, kind: input, shape index: {}]   ;;  %s712_s4 = inlined_call_operand.vmem [shape: bf16[128,96], index: 4, kind: output, shape index: {}]  }
   0x1   :  { %v494_v0 = vld [vmem:[%s708_s1] sm:$0xff]   ;;  %v495_v1 = vld [vmem:[%s708_s1 + $0x8] ss:$0 sps:$4 sm:$0xff]   ;;  %v500_v7 = vld [vmem:[%s709_s0 + $0x10] sm:$0xff]  }
   0x2   :  { %468 = vmatprep.subr.bf16.mxu0 %v494_v0  ;;  %488 = vmatprep.subr.bf16.mxu1 %v494_v0  ;;  %v496_v2 = vld [vmem:[%s709_s0] sm:$0xff]   ;;  %v120_v4 = vsel %vm118_vm0, %v495_v1, 0  ;;  %v498_v5 = vld [vmem:[%s709_s0 + $0x8] sm:$0xff]   ;;  %v501_v8 = vld [vmem:[%s709_s0 + $0x30] sm:$0xff]  }
   0x3   :  { %469 = vmatpush3.bf16.msra.mxu0 %v494_v0  ;;  %490 = vmatpush3.bf16.msra.mxu1 %v494_v0  ;;  %v497_v3 = vld [vmem:[%s709_s0 + $0x20] sm:$0xff]   ;;  %v499_v6 = vld [vmem:[%s709_s0 + $0x28] sm:$0xff]   ;;  %v502_v9 = vld [vmem:[%s709_s0 + $0x18] sm:$0xff]  }
   0x4   :  { %492 = vmatprep.subr.msk.bf16.mxu0 %vm118_vm0, %v495_v1  ;;  %493 = vmatprep.subr.msk.bf16.mxu1 %vm118_vm0, %v495_v1  ;;  %v503_v10 = vld [vmem:[%s709_s0 + $0x38] sm:$0xff]   ;;  %v451_v11 = vld [vmem:[%s710_s3 + $0x8] sm:$0xff]   ;;  %v420_v13 = vld [vmem:[%s710_s3] sm:$0xff]  }
   0x5   :  { %472 = vmatprep.mubr.msk.bf16.mxu0 %vm93_vm1, %v496_v2  ;;  %480 = vmatprep.mubr.msk.bf16.mxu1 %vm93_vm1, %v497_v3  ;;  %v455_v12 = vld [vmem:[%s710_s3 + $0x28] sm:$0xff]   ;;  %v454_v14 = vld [vmem:[%s710_s3 + $0x20] sm:$0xff]   ;;  %v582_v15 = vld [vmem:[%s710_s3 + $0x18] sm:$0xff]   ;;  %v425_v16 = vunpack.c.l.bf16 %v451_v11  ;;  %v421_v22 = vunpack.c.l.bf16 %v420_v13  ;;  %v426_v24 = vunpack.c.h.bf16 %v451_v11  ;;  %v422_v26 = vunpack.c.h.bf16 %v420_v13 }
   0x6   :  { %v587_v17 = vld [vmem:[%s710_s3 + $0x38] sm:$0xff]   ;;  %v592_v18 = vld [vmem:[%s710_s3 + $0x10] sm:$0xff]   ;;  %v602_v20 = vld [vmem:[%s711_s2] ss:$0 sm:$0xff]  ;;  %v441_v21 = vunpack.c.l.bf16 %v455_v12  ;;  %v437_v23 = vunpack.c.l.bf16 %v454_v14  ;;  %v442_v25 = vunpack.c.h.bf16 %v455_v12  ;;  %v438_v27 = vunpack.c.h.bf16 %v454_v14 }
   0x7   :  { %471 = vmatpush3.bf16.msra.mxu0 %v120_v4  ;;  %491 = vmatpush3.bf16.msra.mxu1 %v120_v4  ;;  %v597_v19 = vld [vmem:[%s710_s3 + $0x30] sm:$0xff]   ;;  %v433_v30 = vunpack.c.l.bf16 %v582_v15  ;;  %v449_v31 = vunpack.c.l.bf16 %v587_v17  ;;  %v429_v32 = vunpack.c.l.bf16 %v592_v18  ;;  %v434_v38 = vunpack.c.h.bf16 %v582_v15 }
   0x8   :  { %v445_v33 = vunpack.c.l.bf16 %v597_v19  ;;  %v450_v39 = vunpack.c.h.bf16 %v587_v17  ;;  %v430_v44 = vunpack.c.h.bf16 %v592_v18  ;;  %v446_v45 = vunpack.c.h.bf16 %v597_v19 }
   0xa   :  { %473 = vmatmul.mubr.msk.bf16.vlgmr.msra.gmra.mrb[0].mxu0 %vm93_vm1, %v498_v5  ;;  %481 = vmatmul.mubr.msk.bf16.vlgmr.msra.gmra.mrb[0].mxu1 %vm93_vm1, %v499_v6 }
   0xb   :  { %476 = vmatprep.mubr.msk.bf16.mxu0 %vm93_vm1, %v500_v7  ;;  %484 = vmatprep.mubr.msk.bf16.mxu1 %vm93_vm1, %v501_v8 }
  0x12   :  { %477 = vmatmul.mubr.msk.bf16.gmra.mrb[4].mxu0 %vm93_vm1, %v502_v9  ;;  %485 = vmatmul.mubr.msk.bf16.gmra.mrb[4].mxu1 %vm93_vm1, %v503_v10 }
  0xdd   :  { %v474_v28 = vpop.f32.mrb[0].mxu0  ;;  %v482_v29 = vpop.f32.mrb[0].mxu1 }
  0xde   :  { %v165_v34 = vadd.f32 %v474_v28, %v602_v20  ;;  %v197_v35 = vadd.f32 %v482_v29, %v602_v20  ;;  %v156_v36 = vpop.f32.mrb[1].mxu0  ;;  %v188_v37 = vpop.f32.mrb[1].mxu1 }
  0xdf   :  { %v157_v40 = vadd.f32 %v602_v20, %v156_v36  ;;  %v189_v41 = vadd.f32 %v602_v20, %v188_v37  ;;  %v475_v42 = vpop.f32.mrb[2].mxu0  ;;  %v483_v43 = vpop.f32.mrb[2].mxu1 }
  0xe0   :  { %v221_v46 = vmax.f32 %v165_v34, 0.0  ;;  %v229_v47 = vmax.f32 %v197_v35, 0.0  ;;  %v168_v48 = vadd.f32 %v475_v42, %v602_v20  ;;  %v200_v49 = vadd.f32 %v483_v43, %v602_v20  ;;  %v159_v50 = vpop.f32.mrb[3].mxu0  ;;  %v191_v51 = vpop.f32.mrb[3].mxu1 }
  0xe1   :  { %v219_v52 = vmax.f32 %v157_v40, 0.0  ;;  %v227_v53 = vmax.f32 %v189_v41, 0.0  ;;  %v160_v54 = vadd.f32 %v602_v20, %v159_v50  ;;  %v192_v55 = vadd.f32 %v602_v20, %v191_v51 }
  0xe2   :  { %v269_v56 = vadd.f32 %v425_v16, %v221_v46  ;;  %v277_v57 = vadd.f32 %v441_v21, %v229_v47  ;;  %v222_v58 = vmax.f32 %v168_v48, 0.0  ;;  %v230_v59 = vmax.f32 %v200_v49, 0.0 }
  0xe3   :  { %v267_v60 = vadd.f32 %v421_v22, %v219_v52  ;;  %v275_v61 = vadd.f32 %v437_v23, %v227_v53  ;;  %v220_v62 = vmax.f32 %v160_v54, 0.0  ;;  %v228_v63 = vmax.f32 %v192_v55, 0.0 }
  0xe4   :  { %v405_v0 = vpack.c.bf16 %v269_v56, %v269_v56  ;;  %v413_v1 = vpack.c.bf16 %v277_v57, %v277_v57  ;;  %v270_v2 = vadd.f32 %v426_v24, %v222_v58  ;;  %v278_v3 = vadd.f32 %v442_v25, %v230_v59 }
  0xe5   :  { %v403_v4 = vpack.c.bf16 %v267_v60, %v267_v60  ;;  %v411_v5 = vpack.c.bf16 %v275_v61, %v275_v61  ;;  %v268_v6 = vadd.f32 %v422_v26, %v220_v62  ;;  %v276_v7 = vadd.f32 %v438_v27, %v228_v63  ;;  %v478_v8 = vpop.f32.mrb[4].mxu0  ;;  %v486_v9 = vpop.f32.mrb[4].mxu1 }
  0xe6   :  { %350 = vst.msk [vmem:[%s712_s4 + $0x8] sm:$0xf] %vm347_vm2, %v405_v0  ;;  %358 = vst.msk [vmem:[%s712_s4 + $0x28] sm:$0xf] %vm347_vm2, %v413_v1  ;;  %v406_v10 = vpack.c.bf16 %v270_v2, %v270_v2  ;;  %v414_v11 = vpack.c.bf16 %v278_v3, %v278_v3  ;;  %v181_v12 = vadd.f32 %v478_v8, %v602_v20  ;;  %v172_v14 = vpop.f32.mrb[5].mxu0  ;;  %v204_v16 = vpop.f32.mrb[5].mxu1 }
  0xe7   :  { %v213_v13 = vadd.f32 %v486_v9, %v602_v20  ;;  %348 = vst.msk [vmem:[%s712_s4] sm:$0xf] %vm347_vm2, %v403_v4  ;;  %356 = vst.msk [vmem:[%s712_s4 + $0x20] sm:$0xf] %vm347_vm2, %v411_v5  ;;  %v404_v21 = vpack.c.bf16 %v268_v6, %v268_v6  ;;  %v412_v22 = vpack.c.bf16 %v276_v7, %v276_v7  ;;  %v479_v25 = vpop.f32.mrb[6].mxu0  ;;  %v487_v26 = vpop.f32.mrb[6].mxu1 }
  0xe8   :  { %v173_v23 = vadd.f32 %v602_v20, %v172_v14  ;;  %v205_v24 = vadd.f32 %v602_v20, %v204_v16  ;;  %351 = vst.msk [vmem:[%s712_s4 + $0xc] sm:$0xf] %vm347_vm2, %v406_v10  ;;  %359 = vst.msk [vmem:[%s712_s4 + $0x2c] sm:$0xf] %vm347_vm2, %v414_v11  ;;  %v225_v27 = vmax.f32 %v181_v12, 0.0  ;;  %v184_v29 = vadd.f32 %v479_v25, %v602_v20  ;;  %v175_v35 = vpop.f32.mrb[7].mxu0 }
  0xe9   :  { %v233_v28 = vmax.f32 %v213_v13, 0.0  ;;  %v216_v34 = vadd.f32 %v487_v26, %v602_v20  ;;  %v207_v36 = vpop.f32.mrb[7].mxu1  ;;  %349 = vst.msk [vmem:[%s712_s4 + $0x4] sm:$0xf] %vm347_vm2, %v404_v21  ;;  %357 = vst.msk [vmem:[%s712_s4 + $0x24] sm:$0xf] %vm347_vm2, %v412_v22  ;;  %v176_v41 = vadd.f32 %v602_v20, %v175_v35 }
  0xea   :  { %v223_v37 = vmax.f32 %v173_v23, 0.0  ;;  %v231_v40 = vmax.f32 %v205_v24, 0.0  ;;  %v208_v42 = vadd.f32 %v602_v20, %v207_v36  ;;  %v273_v43 = vadd.f32 %v433_v30, %v225_v27 }
  0xeb   :  { %v281_v46 = vadd.f32 %v449_v31, %v233_v28  ;;  %v226_v47 = vmax.f32 %v184_v29, 0.0  ;;  %v234_v48 = vmax.f32 %v216_v34, 0.0  ;;  %v224_v51 = vmax.f32 %v176_v41, 0.0 }
  0xec   :  { %v271_v49 = vadd.f32 %v429_v32, %v223_v37  ;;  %v279_v50 = vadd.f32 %v445_v33, %v231_v40  ;;  %v232_v52 = vmax.f32 %v208_v42, 0.0  ;;  %v409_v53 = vpack.c.bf16 %v273_v43, %v273_v43 }
  0xed   :  { %v417_v54 = vpack.c.bf16 %v281_v46, %v281_v46  ;;  %v274_v20 = vadd.f32 %v434_v38, %v226_v47  ;;  %v282_v30 = vadd.f32 %v450_v39, %v234_v48  ;;  %v272_v56 = vadd.f32 %v430_v44, %v224_v51 }
  0xee   :  { %v407_v55 = vpack.c.bf16 %v271_v49, %v271_v49  ;;  %v415_v31 = vpack.c.bf16 %v279_v50, %v279_v50  ;;  %v280_v32 = vadd.f32 %v446_v45, %v232_v52  ;;  %354 = vst.msk [vmem:[%s712_s4 + $0x18] sm:$0xf] %vm347_vm2, %v409_v53 }
  0xef   :  { %362 = vst.msk [vmem:[%s712_s4 + $0x38] sm:$0xf] %vm347_vm2, %v417_v54  ;;  %v410_v15 = vpack.c.bf16 %v274_v20, %v274_v20  ;;  %v418_v17 = vpack.c.bf16 %v282_v30, %v282_v30  ;;  %v408_v18 = vpack.c.bf16 %v272_v56, %v272_v56 }
  0xf0   :  { %352 = vst.msk [vmem:[%s712_s4 + $0x10] sm:$0xf] %vm347_vm2, %v407_v55  ;;  %360 = vst.msk [vmem:[%s712_s4 + $0x30] sm:$0xf] %vm347_vm2, %v415_v31  ;;  %v416_v19 = vpack.c.bf16 %v280_v32, %v280_v32 }
  0xf1   :  { %355 = vst.msk [vmem:[%s712_s4 + $0x1c] sm:$0xf] %vm347_vm2, %v410_v15  ;;  %363 = vst.msk [vmem:[%s712_s4 + $0x3c] sm:$0xf] %vm347_vm2, %v418_v17 }
  0xf2   :  { %353 = vst.msk [vmem:[%s712_s4 + $0x14] sm:$0xf] %vm347_vm2, %v408_v18  ;;  %361 = vst.msk [vmem:[%s712_s4 + $0x34] sm:$0xf] %vm347_vm2, %v416_v19 }

// kernel: shufflenet_forward.36
= control target key start
LH: loop header
LB: loop body
LE: loop exit
PB: predicated region body
PF: predicated region fallthrough
CT: control target
= control target key end

     0   :  { %vm126_vm0 = vcmask 785408   ;;  %vm328_vm1 = vcmask 191488   ;;  %s609_s1 = inlined_call_operand.vmem [shape: bf16[96,24], index: 1, kind: input, shape index: {}]   ;;  %s610_s0 = inlined_call_operand.vmem [shape: bf16[128,96], index: 0, kind: input, shape index: {}]   ;;  %s611_s2 = inlined_call_operand.vmem [shape: f32[1,24], index: 2, kind: input, shape index: {}]   ;;  %s612_s3 = inlined_call_operand.vmem [shape: bf16[128,24], index: 3, kind: output, shape index: {}]  }
   0x1   :  { %v458_v0 = vld [vmem:[%s609_s1] sm:$0xff]   ;;  %v459_v1 = vld [vmem:[%s609_s1 + $0x8] sm:$0xff]   ;;  %v460_v2 = vld [vmem:[%s609_s1 + $0x10] sm:$0xff]  }
   0x2   :  { %418 = vmatprep.subr.bf16.mxu0 %v458_v0  ;;  %446 = vmatprep.subr.bf16.mxu1 %v458_v0  ;;  %v464_v3 = vld [vmem:[%s610_s0] sm:$0xff]   ;;  %v461_v5 = vld [vmem:[%s609_s1 + $0x18] sm:$0xff]   ;;  %v463_v7 = vld [vmem:[%s609_s1 + $0x28] sm:$0xff]  }
   0x3   :  { %419 = vmatpush3.bf16.msra.mxu0 %v458_v0  ;;  %452 = vmatpush3.bf16.msra.mxu1 %v458_v0  ;;  %v465_v4 = vld [vmem:[%s610_s0 + $0x20] sm:$0xff]   ;;  %v466_v8 = vld [vmem:[%s610_s0 + $0x8] sm:$0xff]   ;;  %v468_v10 = vld [vmem:[%s610_s0 + $0x10] sm:$0xff]  }
   0x4   :  { %420 = vmatprep.subr.bf16.mxu0 %v459_v1  ;;  %447 = vmatprep.subr.bf16.mxu1 %v459_v1  ;;  %v462_v6 = vld [vmem:[%s609_s1 + $0x20] sm:$0xff]   ;;  %v467_v9 = vld [vmem:[%s610_s0 + $0x28] sm:$0xff]   ;;  %v469_v11 = vld [vmem:[%s610_s0 + $0x30] sm:$0xff]  }
   0x5   :  { %430 = vmatprep.mubr.msk.bf16.mxu0 %vm126_vm0, %v464_v3  ;;  %438 = vmatprep.mubr.msk.bf16.mxu1 %vm126_vm0, %v465_v4  ;;  %v470_v12 = vld [vmem:[%s610_s0 + $0x18] sm:$0xff]   ;;  %v349_v14 = vld [vmem:[%s611_s2] ss:$0 sm:$0xff] }
   0x6   :  { %v471_v13 = vld [vmem:[%s610_s0 + $0x38] sm:$0xff]  }
   0x7   :  { %421 = vmatpush3.bf16.msra.mxu0 %v459_v1  ;;  %453 = vmatpush3.bf16.msra.mxu1 %v459_v1 }
   0x8   :  { %422 = vmatprep.subr.bf16.mxu0 %v460_v2  ;;  %448 = vmatprep.subr.bf16.mxu1 %v460_v2 }
   0xb   :  { %423 = vmatpush3.bf16.msra.mxu0 %v460_v2  ;;  %454 = vmatpush3.bf16.msra.mxu1 %v460_v2 }
   0xc   :  { %424 = vmatprep.subr.bf16.mxu0 %v461_v5  ;;  %449 = vmatprep.subr.bf16.mxu1 %v461_v5 }
   0xf   :  { %425 = vmatpush3.bf16.msra.mxu0 %v461_v5  ;;  %455 = vmatpush3.bf16.msra.mxu1 %v461_v5 }
  0x10   :  { %426 = vmatprep.subr.bf16.mxu0 %v462_v6  ;;  %450 = vmatprep.subr.bf16.mxu1 %v462_v6 }
  0x13   :  { %427 = vmatpush3.bf16.msra.mxu0 %v462_v6  ;;  %456 = vmatpush3.bf16.msra.mxu1 %v462_v6 }
  0x14   :  { %428 = vmatprep.subr.bf16.mxu0 %v463_v7  ;;  %451 = vmatprep.subr.bf16.mxu1 %v463_v7 }
  0x17   :  { %429 = vmatpush3.bf16.msra.mxu0 %v463_v7  ;;  %457 = vmatpush3.bf16.msra.mxu1 %v463_v7 }
  0x1a   :  { %431 = vmatmul.mubr.msk.bf16.vlgmr.msra.gmra.mrb[0].mxu0 %vm126_vm0, %v466_v8  ;;  %439 = vmatmul.mubr.msk.bf16.vlgmr.msra.gmra.mrb[0].mxu1 %vm126_vm0, %v467_v9 }
  0x1b   :  { %434 = vmatprep.mubr.msk.bf16.mxu0 %vm126_vm0, %v468_v10  ;;  %442 = vmatprep.mubr.msk.bf16.mxu1 %vm126_vm0, %v469_v11 }
  0x22   :  { %435 = vmatmul.mubr.msk.bf16.gmra.mrb[4].mxu0 %vm126_vm0, %v470_v12  ;;  %443 = vmatmul.mubr.msk.bf16.gmra.mrb[4].mxu1 %vm126_vm0, %v471_v13 }
  0xed   :  { %v432_v15 = vpop.f32.mrb[0].mxu0  ;;  %v440_v16 = vpop.f32.mrb[0].mxu1 }
  0xee   :  { %v194_v17 = vadd.f32 %v432_v15, %v349_v14  ;;  %v226_v18 = vadd.f32 %v440_v16, %v349_v14  ;;  %v185_v19 = vpop.f32.mrb[1].mxu0  ;;  %v217_v20 = vpop.f32.mrb[1].mxu1 }
  0xef   :  { %v186_v21 = vadd.f32 %v349_v14, %v185_v19  ;;  %v218_v22 = vadd.f32 %v349_v14, %v217_v20  ;;  %v433_v23 = vpop.f32.mrb[2].mxu0  ;;  %v441_v24 = vpop.f32.mrb[2].mxu1 }
  0xf0   :  { %v250_v25 = vmax.f32 %v194_v17, 0.0  ;;  %v258_v26 = vmax.f32 %v226_v18, 0.0  ;;  %v197_v27 = vadd.f32 %v433_v23, %v349_v14  ;;  %v229_v28 = vadd.f32 %v441_v24, %v349_v14  ;;  %v188_v29 = vpop.f32.mrb[3].mxu0  ;;  %v220_v30 = vpop.f32.mrb[3].mxu1 }
  0xf1   :  { %v248_v31 = vmax.f32 %v186_v21, 0.0  ;;  %v256_v32 = vmax.f32 %v218_v22, 0.0  ;;  %v189_v33 = vadd.f32 %v349_v14, %v188_v29  ;;  %v221_v34 = vadd.f32 %v349_v14, %v220_v30 }
  0xf2   :  { %v390_v35 = vpack.c.bf16 %v250_v25, %v250_v25  ;;  %v398_v36 = vpack.c.bf16 %v258_v26, %v258_v26  ;;  %v251_v37 = vmax.f32 %v197_v27, 0.0  ;;  %v259_v38 = vmax.f32 %v229_v28, 0.0 }
  0xf3   :  { %v388_v39 = vpack.c.bf16 %v248_v31, %v248_v31  ;;  %v396_v40 = vpack.c.bf16 %v256_v32, %v256_v32  ;;  %v249_v41 = vmax.f32 %v189_v33, 0.0  ;;  %v257_v42 = vmax.f32 %v221_v34, 0.0 }
  0xf4   :  { %331 = vst.msk [vmem:[%s612_s3 + $0x8] sm:$0xf] %vm328_vm1, %v390_v35  ;;  %339 = vst.msk [vmem:[%s612_s3 + $0x28] sm:$0xf] %vm328_vm1, %v398_v36  ;;  %v391_v43 = vpack.c.bf16 %v251_v37, %v251_v37  ;;  %v399_v44 = vpack.c.bf16 %v259_v38, %v259_v38 }
  0xf5   :  { %329 = vst.msk [vmem:[%s612_s3] sm:$0xf] %vm328_vm1, %v388_v39  ;;  %337 = vst.msk [vmem:[%s612_s3 + $0x20] sm:$0xf] %vm328_vm1, %v396_v40  ;;  %v389_v45 = vpack.c.bf16 %v249_v41, %v249_v41  ;;  %v397_v46 = vpack.c.bf16 %v257_v42, %v257_v42  ;;  %v436_v47 = vpop.f32.mrb[4].mxu0  ;;  %v444_v48 = vpop.f32.mrb[4].mxu1 }
  0xf6   :  { %332 = vst.msk [vmem:[%s612_s3 + $0xc] sm:$0xf] %vm328_vm1, %v391_v43  ;;  %340 = vst.msk [vmem:[%s612_s3 + $0x2c] sm:$0xf] %vm328_vm1, %v399_v44  ;;  %v210_v49 = vadd.f32 %v436_v47, %v349_v14  ;;  %v242_v50 = vadd.f32 %v444_v48, %v349_v14  ;;  %v201_v51 = vpop.f32.mrb[5].mxu0  ;;  %v233_v52 = vpop.f32.mrb[5].mxu1 }
  0xf7   :  { %330 = vst.msk [vmem:[%s612_s3 + $0x4] sm:$0xf] %vm328_vm1, %v389_v45  ;;  %338 = vst.msk [vmem:[%s612_s3 + $0x24] sm:$0xf] %vm328_vm1, %v397_v46  ;;  %v202_v53 = vadd.f32 %v349_v14, %v201_v51  ;;  %v234_v54 = vadd.f32 %v349_v14, %v233_v52  ;;  %v437_v55 = vpop.f32.mrb[6].mxu0  ;;  %v445_v56 = vpop.f32.mrb[6].mxu1 }
  0xf8   :  { %v254_v57 = vmax.f32 %v210_v49, 0.0  ;;  %v262_v58 = vmax.f32 %v242_v50, 0.0  ;;  %v213_v59 = vadd.f32 %v437_v55, %v349_v14  ;;  %v245_v60 = vadd.f32 %v445_v56, %v349_v14  ;;  %v204_v61 = vpop.f32.mrb[7].mxu0  ;;  %v236_v62 = vpop.f32.mrb[7].mxu1 }
  0xf9   :  { %v252_v63 = vmax.f32 %v202_v53, 0.0  ;;  %v260_v0 = vmax.f32 %v234_v54, 0.0  ;;  %v205_v1 = vadd.f32 %v349_v14, %v204_v61  ;;  %v237_v2 = vadd.f32 %v349_v14, %v236_v62 }
  0xfa   :  { %v394_v3 = vpack.c.bf16 %v254_v57, %v254_v57  ;;  %v402_v4 = vpack.c.bf16 %v262_v58, %v262_v58  ;;  %v255_v5 = vmax.f32 %v213_v59, 0.0  ;;  %v263_v6 = vmax.f32 %v245_v60, 0.0 }
  0xfb   :  { %v392_v7 = vpack.c.bf16 %v252_v63, %v252_v63  ;;  %v400_v8 = vpack.c.bf16 %v260_v0, %v260_v0  ;;  %v253_v9 = vmax.f32 %v205_v1, 0.0  ;;  %v261_v10 = vmax.f32 %v237_v2, 0.0 }
  0xfc   :  { %335 = vst.msk [vmem:[%s612_s3 + $0x18] sm:$0xf] %vm328_vm1, %v394_v3  ;;  %343 = vst.msk [vmem:[%s612_s3 + $0x38] sm:$0xf] %vm328_vm1, %v402_v4  ;;  %v395_v11 = vpack.c.bf16 %v255_v5, %v255_v5  ;;  %v403_v12 = vpack.c.bf16 %v263_v6, %v263_v6 }
  0xfd   :  { %333 = vst.msk [vmem:[%s612_s3 + $0x10] sm:$0xf] %vm328_vm1, %v392_v7  ;;  %341 = vst.msk [vmem:[%s612_s3 + $0x30] sm:$0xf] %vm328_vm1, %v400_v8  ;;  %v393_v13 = vpack.c.bf16 %v253_v9, %v253_v9  ;;  %v401_v14 = vpack.c.bf16 %v261_v10, %v261_v10 }
  0xfe   :  { %336 = vst.msk [vmem:[%s612_s3 + $0x1c] sm:$0xf] %vm328_vm1, %v395_v11  ;;  %344 = vst.msk [vmem:[%s612_s3 + $0x3c] sm:$0xf] %vm328_vm1, %v403_v12 }
  0xff   :  { %334 = vst.msk [vmem:[%s612_s3 + $0x14] sm:$0xf] %vm328_vm1, %v393_v13  ;;  %342 = vst.msk [vmem:[%s612_s3 + $0x34] sm:$0xf] %vm328_vm1, %v401_v14 }

// kernel: shufflenet_forward.39
= control target key start
LH: loop header
LB: loop body
LE: loop exit
PB: predicated region body
PF: predicated region fallthrough
CT: control target
= control target key end

     0   :  { %vm126_vm0 = vcmask 785408   ;;  %vm328_vm1 = vcmask 388096   ;;  %s609_s1 = inlined_call_operand.vmem [shape: bf16[96,48], index: 1, kind: input, shape index: {}]   ;;  %s610_s0 = inlined_call_operand.vmem [shape: bf16[128,96], index: 0, kind: input, shape index: {}]   ;;  %s611_s2 = inlined_call_operand.vmem [shape: f32[1,48], index: 2, kind: input, shape index: {}]   ;;  %s612_s3 = inlined_call_operand.vmem [shape: bf16[128,48], index: 3, kind: output, shape index: {}]  }
   0x1   :  { %v458_v0 = vld [vmem:[%s609_s1] sm:$0xff]   ;;  %v459_v1 = vld [vmem:[%s609_s1 + $0x8] sm:$0xff]   ;;  %v460_v2 = vld [vmem:[%s609_s1 + $0x10] sm:$0xff]  }
   0x2   :  { %418 = vmatprep.subr.bf16.mxu0 %v458_v0  ;;  %446 = vmatprep.subr.bf16.mxu1 %v458_v0  ;;  %v464_v3 = vld [vmem:[%s610_s0] sm:$0xff]   ;;  %v461_v5 = vld [vmem:[%s609_s1 + $0x18] sm:$0xff]   ;;  %v463_v7 = vld [vmem:[%s609_s1 + $0x28] sm:$0xff]  }
   0x3   :  { %419 = vmatpush3.bf16.msra.mxu0 %v458_v0  ;;  %452 = vmatpush3.bf16.msra.mxu1 %v458_v0  ;;  %v465_v4 = vld [vmem:[%s610_s0 + $0x20] sm:$0xff]   ;;  %v466_v8 = vld [vmem:[%s610_s0 + $0x8] sm:$0xff]   ;;  %v468_v10 = vld [vmem:[%s610_s0 + $0x10] sm:$0xff]  }
   0x4   :  { %420 = vmatprep.subr.bf16.mxu0 %v459_v1  ;;  %447 = vmatprep.subr.bf16.mxu1 %v459_v1  ;;  %v462_v6 = vld [vmem:[%s609_s1 + $0x20] sm:$0xff]   ;;  %v467_v9 = vld [vmem:[%s610_s0 + $0x28] sm:$0xff]   ;;  %v469_v11 = vld [vmem:[%s610_s0 + $0x30] sm:$0xff]  }
   0x5   :  { %430 = vmatprep.mubr.msk.bf16.mxu0 %vm126_vm0, %v464_v3  ;;  %438 = vmatprep.mubr.msk.bf16.mxu1 %vm126_vm0, %v465_v4  ;;  %v470_v12 = vld [vmem:[%s610_s0 + $0x18] sm:$0xff]   ;;  %v349_v14 = vld [vmem:[%s611_s2] ss:$0 sm:$0xff] }
   0x6   :  { %v471_v13 = vld [vmem:[%s610_s0 + $0x38] sm:$0xff]  }
   0x7   :  { %421 = vmatpush3.bf16.msra.mxu0 %v459_v1  ;;  %453 = vmatpush3.bf16.msra.mxu1 %v459_v1 }
   0x8   :  { %422 = vmatprep.subr.bf16.mxu0 %v460_v2  ;;  %448 = vmatprep.subr.bf16.mxu1 %v460_v2 }
   0xb   :  { %423 = vmatpush3.bf16.msra.mxu0 %v460_v2  ;;  %454 = vmatpush3.bf16.msra.mxu1 %v460_v2 }
   0xc   :  { %424 = vmatprep.subr.bf16.mxu0 %v461_v5  ;;  %449 = vmatprep.subr.bf16.mxu1 %v461_v5 }
   0xf   :  { %425 = vmatpush3.bf16.msra.mxu0 %v461_v5  ;;  %455 = vmatpush3.bf16.msra.mxu1 %v461_v5 }
  0x10   :  { %426 = vmatprep.subr.bf16.mxu0 %v462_v6  ;;  %450 = vmatprep.subr.bf16.mxu1 %v462_v6 }
  0x13   :  { %427 = vmatpush3.bf16.msra.mxu0 %v462_v6  ;;  %456 = vmatpush3.bf16.msra.mxu1 %v462_v6 }
  0x14   :  { %428 = vmatprep.subr.bf16.mxu0 %v463_v7  ;;  %451 = vmatprep.subr.bf16.mxu1 %v463_v7 }
  0x17   :  { %429 = vmatpush3.bf16.msra.mxu0 %v463_v7  ;;  %457 = vmatpush3.bf16.msra.mxu1 %v463_v7 }
  0x1a   :  { %431 = vmatmul.mubr.msk.bf16.vlgmr.msra.gmra.mrb[0].mxu0 %vm126_vm0, %v466_v8  ;;  %439 = vmatmul.mubr.msk.bf16.vlgmr.msra.gmra.mrb[0].mxu1 %vm126_vm0, %v467_v9 }
  0x1b   :  { %434 = vmatprep.mubr.msk.bf16.mxu0 %vm126_vm0, %v468_v10  ;;  %442 = vmatprep.mubr.msk.bf16.mxu1 %vm126_vm0, %v469_v11 }
  0x22   :  { %435 = vmatmul.mubr.msk.bf16.gmra.mrb[4].mxu0 %vm126_vm0, %v470_v12  ;;  %443 = vmatmul.mubr.msk.bf16.gmra.mrb[4].mxu1 %vm126_vm0, %v471_v13 }
  0xed   :  { %v432_v15 = vpop.f32.mrb[0].mxu0  ;;  %v440_v16 = vpop.f32.mrb[0].mxu1 }
  0xee   :  { %v194_v17 = vadd.f32 %v432_v15, %v349_v14  ;;  %v226_v18 = vadd.f32 %v440_v16, %v349_v14  ;;  %v185_v19 = vpop.f32.mrb[1].mxu0  ;;  %v217_v20 = vpop.f32.mrb[1].mxu1 }
  0xef   :  { %v186_v21 = vadd.f32 %v349_v14, %v185_v19  ;;  %v218_v22 = vadd.f32 %v349_v14, %v217_v20  ;;  %v433_v23 = vpop.f32.mrb[2].mxu0  ;;  %v441_v24 = vpop.f32.mrb[2].mxu1 }
  0xf0   :  { %v250_v25 = vmax.f32 %v194_v17, 0.0  ;;  %v258_v26 = vmax.f32 %v226_v18, 0.0  ;;  %v197_v27 = vadd.f32 %v433_v23, %v349_v14  ;;  %v229_v28 = vadd.f32 %v441_v24, %v349_v14  ;;  %v188_v29 = vpop.f32.mrb[3].mxu0  ;;  %v220_v30 = vpop.f32.mrb[3].mxu1 }
  0xf1   :  { %v248_v31 = vmax.f32 %v186_v21, 0.0  ;;  %v256_v32 = vmax.f32 %v218_v22, 0.0  ;;  %v189_v33 = vadd.f32 %v349_v14, %v188_v29  ;;  %v221_v34 = vadd.f32 %v349_v14, %v220_v30 }
  0xf2   :  { %v390_v35 = vpack.c.bf16 %v250_v25, %v250_v25  ;;  %v398_v36 = vpack.c.bf16 %v258_v26, %v258_v26  ;;  %v251_v37 = vmax.f32 %v197_v27, 0.0  ;;  %v259_v38 = vmax.f32 %v229_v28, 0.0 }
  0xf3   :  { %v388_v39 = vpack.c.bf16 %v248_v31, %v248_v31  ;;  %v396_v40 = vpack.c.bf16 %v256_v32, %v256_v32  ;;  %v249_v41 = vmax.f32 %v189_v33, 0.0  ;;  %v257_v42 = vmax.f32 %v221_v34, 0.0 }
  0xf4   :  { %331 = vst.msk [vmem:[%s612_s3 + $0x8] sm:$0xf] %vm328_vm1, %v390_v35  ;;  %339 = vst.msk [vmem:[%s612_s3 + $0x28] sm:$0xf] %vm328_vm1, %v398_v36  ;;  %v391_v43 = vpack.c.bf16 %v251_v37, %v251_v37  ;;  %v399_v44 = vpack.c.bf16 %v259_v38, %v259_v38 }
  0xf5   :  { %329 = vst.msk [vmem:[%s612_s3] sm:$0xf] %vm328_vm1, %v388_v39  ;;  %337 = vst.msk [vmem:[%s612_s3 + $0x20] sm:$0xf] %vm328_vm1, %v396_v40  ;;  %v389_v45 = vpack.c.bf16 %v249_v41, %v249_v41  ;;  %v397_v46 = vpack.c.bf16 %v257_v42, %v257_v42  ;;  %v436_v47 = vpop.f32.mrb[4].mxu0  ;;  %v444_v48 = vpop.f32.mrb[4].mxu1 }
  0xf6   :  { %332 = vst.msk [vmem:[%s612_s3 + $0xc] sm:$0xf] %vm328_vm1, %v391_v43  ;;  %340 = vst.msk [vmem:[%s612_s3 + $0x2c] sm:$0xf] %vm328_vm1, %v399_v44  ;;  %v210_v49 = vadd.f32 %v436_v47, %v349_v14  ;;  %v242_v50 = vadd.f32 %v444_v48, %v349_v14  ;;  %v201_v51 = vpop.f32.mrb[5].mxu0  ;;  %v233_v52 = vpop.f32.mrb[5].mxu1 }
  0xf7   :  { %330 = vst.msk [vmem:[%s612_s3 + $0x4] sm:$0xf] %vm328_vm1, %v389_v45  ;;  %338 = vst.msk [vmem:[%s612_s3 + $0x24] sm:$0xf] %vm328_vm1, %v397_v46  ;;  %v202_v53 = vadd.f32 %v349_v14, %v201_v51  ;;  %v234_v54 = vadd.f32 %v349_v14, %v233_v52  ;;  %v437_v55 = vpop.f32.mrb[6].mxu0  ;;  %v445_v56 = vpop.f32.mrb[6].mxu1 }
  0xf8   :  { %v254_v57 = vmax.f32 %v210_v49, 0.0  ;;  %v262_v58 = vmax.f32 %v242_v50, 0.0  ;;  %v213_v59 = vadd.f32 %v437_v55, %v349_v14  ;;  %v245_v60 = vadd.f32 %v445_v56, %v349_v14  ;;  %v204_v61 = vpop.f32.mrb[7].mxu0  ;;  %v236_v62 = vpop.f32.mrb[7].mxu1 }
  0xf9   :  { %v252_v63 = vmax.f32 %v202_v53, 0.0  ;;  %v260_v0 = vmax.f32 %v234_v54, 0.0  ;;  %v205_v1 = vadd.f32 %v349_v14, %v204_v61  ;;  %v237_v2 = vadd.f32 %v349_v14, %v236_v62 }
  0xfa   :  { %v394_v3 = vpack.c.bf16 %v254_v57, %v254_v57  ;;  %v402_v4 = vpack.c.bf16 %v262_v58, %v262_v58  ;;  %v255_v5 = vmax.f32 %v213_v59, 0.0  ;;  %v263_v6 = vmax.f32 %v245_v60, 0.0 }
  0xfb   :  { %v392_v7 = vpack.c.bf16 %v252_v63, %v252_v63  ;;  %v400_v8 = vpack.c.bf16 %v260_v0, %v260_v0  ;;  %v253_v9 = vmax.f32 %v205_v1, 0.0  ;;  %v261_v10 = vmax.f32 %v237_v2, 0.0 }
  0xfc   :  { %335 = vst.msk [vmem:[%s612_s3 + $0x18] sm:$0xf] %vm328_vm1, %v394_v3  ;;  %343 = vst.msk [vmem:[%s612_s3 + $0x38] sm:$0xf] %vm328_vm1, %v402_v4  ;;  %v395_v11 = vpack.c.bf16 %v255_v5, %v255_v5  ;;  %v403_v12 = vpack.c.bf16 %v263_v6, %v263_v6 }
  0xfd   :  { %333 = vst.msk [vmem:[%s612_s3 + $0x10] sm:$0xf] %vm328_vm1, %v392_v7  ;;  %341 = vst.msk [vmem:[%s612_s3 + $0x30] sm:$0xf] %vm328_vm1, %v400_v8  ;;  %v393_v13 = vpack.c.bf16 %v253_v9, %v253_v9  ;;  %v401_v14 = vpack.c.bf16 %v261_v10, %v261_v10 }
  0xfe   :  { %336 = vst.msk [vmem:[%s612_s3 + $0x1c] sm:$0xf] %vm328_vm1, %v395_v11  ;;  %344 = vst.msk [vmem:[%s612_s3 + $0x3c] sm:$0xf] %vm328_vm1, %v403_v12 }
  0xff   :  { %334 = vst.msk [vmem:[%s612_s3 + $0x14] sm:$0xf] %vm328_vm1, %v393_v13  ;;  %342 = vst.msk [vmem:[%s612_s3 + $0x34] sm:$0xf] %vm328_vm1, %v401_v14 }

// kernel: shufflenet_forward.41
= control target key start
LH: loop header
LB: loop body
LE: loop exit
PB: predicated region body
PF: predicated region fallthrough
CT: control target
= control target key end

     0   :  { %v511_v1 = vmov 0   ;;  %vm155_vm0 = vcmask 785408   ;;  %v45_v21 = vlaneseq  ;;  %vm389_vm1 = vcmask 1043456   ;;  %s723_s1 = inlined_call_operand.vmem [shape: bf16[96,192], index: 1, kind: input, shape index: {}]   ;;  %s724_s0 = inlined_call_operand.vmem [shape: bf16[128,96], index: 0, kind: input, shape index: {}]   ;;  %s725_s2 = inlined_call_operand.vmem [shape: f32[1,192], index: 2, kind: input, shape index: {}]   ;;  %s726_s3 = inlined_call_operand.vmem [shape: bf16[128,192], index: 3, kind: output, shape index: {}]  }
   0x1   :  { %v485_v0 = vld [vmem:[%s723_s1 + $0x4] ss:$8 sps:$4 sm:$0xff]   ;;  %212 = vmatprep.mubr.bf16.mxu0 %v511_v1  ;;  %252 = vmatprep.mubr.bf16.mxu1 %v511_v1  ;;  %v487_v2 = vld [vmem:[%s723_s1] ss:$8 sps:$4 sm:$0xff]   ;;  %v488_v3 = vld [vmem:[%s723_s1 + $0x14] ss:$8 sps:$4 sm:$0xff]  }
   0x2   :  { %180 = vmatprep.subr.bf16.mxu0 %v485_v0  ;;  %472 = vmatprep.subr.bf16.mxu1 %v485_v0  ;;  %v490_v4 = vld [vmem:[%s723_s1 + $0x10] ss:$8 sps:$4 sm:$0xff]   ;;  %v491_v5 = vld [vmem:[%s723_s1 + $0x24] ss:$8 sps:$4 sm:$0xff]   ;;  %v493_v6 = vld [vmem:[%s723_s1 + $0x20] ss:$8 sps:$4 sm:$0xff]  }
   0x3   :  { %181 = vmatpush1.bf16.msra.mxu0 %v487_v2  ;;  %478 = vmatpush1.bf16.msra.mxu1 %v487_v2  ;;  %v494_v7 = vld [vmem:[%s723_s1 + $0x34] ss:$8 sps:$4 sm:$0xff]   ;;  %v496_v8 = vld [vmem:[%s723_s1 + $0x30] ss:$8 sps:$4 sm:$0xff]   ;;  %v497_v9 = vld [vmem:[%s723_s1 + $0x44] ss:$8 sps:$4 sm:$0xff]  }
   0x4   :  { %182 = vmatprep.subr.bf16.mxu0 %v488_v3  ;;  %473 = vmatprep.subr.bf16.mxu1 %v488_v3  ;;  %v499_v10 = vld [vmem:[%s723_s1 + $0x40] ss:$8 sps:$4 sm:$0xff]   ;;  %v500_v11 = vld [vmem:[%s723_s1 + $0x54] ss:$8 sps:$4 sm:$0xff]   ;;  %v502_v12 = vld [vmem:[%s723_s1 + $0x50] ss:$8 sps:$4 sm:$0xff]  }
   0x5   :  { %v503_v13 = vld [vmem:[%s724_s0] sm:$0xff]   ;;  %v505_v15 = vld [vmem:[%s724_s0 + $0x8] sm:$0xff]   ;;  %v507_v17 = vld [vmem:[%s724_s0 + $0x10] sm:$0xff]   ;;  %v46_v22 = vshrl.u32 %v45_v21, 7  ;;  %vm390_vm2 = vcmask 523268  }
   0x6   :  { %v504_v14 = vld [vmem:[%s724_s0 + $0x20] sm:$0xff]   ;;  %v506_v16 = vld [vmem:[%s724_s0 + $0x28] sm:$0xff]   ;;  %v508_v18 = vld [vmem:[%s724_s0 + $0x30] sm:$0xff]  }
   0x7   :  { %183 = vmatpush1.bf16.msra.mxu0 %v490_v4  ;;  %479 = vmatpush1.bf16.msra.mxu1 %v490_v4  ;;  %v509_v19 = vld [vmem:[%s724_s0 + $0x18] sm:$0xff]   ;;  %v47_v23 = vsub.s32 0, %v46_v22  ;;  %v43_v24 = vld [vmem:[%s725_s2] sm:$0x3]  ;;  %v51_v25 = vsub.s32 1, %v46_v22  ;;  %vm611_vm3 = vmor %vm390_vm2, %vm389_vm1 }
   0x8   :  { %184 = vmatprep.subr.bf16.mxu0 %v491_v5  ;;  %474 = vmatprep.subr.bf16.mxu1 %v491_v5  ;;  %v510_v20 = vld [vmem:[%s724_s0 + $0x38] sm:$0xff]  }
   0x9   :  { %v603_v26 = vrot.slane %v43_v24, %v47_v23  ;;  %v605_v27 = vrot.slane %v43_v24, %v51_v25 }
   0xb   :  { %185 = vmatpush1.bf16.msra.mxu0 %v493_v6  ;;  %480 = vmatpush1.bf16.msra.mxu1 %v493_v6 }
   0xc   :  { %186 = vmatprep.subr.bf16.mxu0 %v494_v7  ;;  %475 = vmatprep.subr.bf16.mxu1 %v494_v7 }
   0xf   :  { %187 = vmatpush1.bf16.msra.mxu0 %v496_v8  ;;  %481 = vmatpush1.bf16.msra.mxu1 %v496_v8 }
  0x10   :  { %188 = vmatprep.subr.bf16.mxu0 %v497_v9  ;;  %476 = vmatprep.subr.bf16.mxu1 %v497_v9 }
  0x13   :  { %189 = vmatpush1.bf16.msra.mxu0 %v499_v10  ;;  %482 = vmatpush1.bf16.msra.mxu1 %v499_v10 }
  0x14   :  { %190 = vmatprep.subr.bf16.mxu0 %v500_v11  ;;  %477 = vmatprep.subr.bf16.mxu1 %v500_v11 }
  0x17   :  { %191 = vmatpush1.bf16.msra.mxu0 %v502_v12  ;;  %483 = vmatpush1.bf16.msra.mxu1 %v502_v12 }
  0x1a   :  { %432 = vmatmul.mubr.msk.bf16.vlgmr.msra.gmra.mrb[0].mxu0 %vm155_vm0, %v503_v13  ;;  %436 = vmatmul.mubr.msk.bf16.vlgmr.msra.gmra.mrb[0].mxu1 %vm155_vm0, %v504_v14 }
  0x1b   :  { %222 = vmatprep.mubr.bf16.mxu0 %v511_v1  ;;  %262 = vmatprep.mubr.bf16.mxu1 %v511_v1 }
  0x22   :  { %433 = vmatmul.mubr.msk.bf16.gmra.mrb[4].mxu0 %vm155_vm0, %v505_v15  ;;  %437 = vmatmul.mubr.msk.bf16.gmra.mrb[4].mxu1 %vm155_vm0, %v506_v16 }
  0x23   :  { %232 = vmatprep.mubr.bf16.mxu0 %v511_v1  ;;  %272 = vmatprep.mubr.bf16.mxu1 %v511_v1 }
  0x2a   :  { %434 = vmatmul.mubr.msk.bf16.gmra.mrb[8].mxu0 %vm155_vm0, %v507_v17  ;;  %438 = vmatmul.mubr.msk.bf16.gmra.mrb[8].mxu1 %vm155_vm0, %v508_v18 }
  0x2b   :  { %242 = vmatprep.mubr.bf16.mxu0 %v511_v1  ;;  %282 = vmatprep.mubr.bf16.mxu1 %v511_v1 }
  0x32   :  { %435 = vmatmul.mubr.msk.bf16.gmra.mrb[12].mxu0 %vm155_vm0, %v509_v19  ;;  %439 = vmatmul.mubr.msk.bf16.gmra.mrb[12].mxu1 %vm155_vm0, %v510_v20 }
  0xed   :  { %v214_v28 = vpop.f32.mrb[0].mxu0  ;;  %v254_v29 = vpop.f32.mrb[0].mxu1 }
  0xee   :  { %v215_v30 = vadd.f32 %v214_v28, %v603_v26  ;;  %v255_v31 = vadd.f32 %v254_v29, %v603_v26  ;;  %v216_v32 = vpop.f32.mrb[1].mxu0  ;;  %v256_v33 = vpop.f32.mrb[1].mxu1 }
  0xef   :  { %v217_v34 = vadd.f32 %v216_v32, %v605_v27  ;;  %v257_v35 = vadd.f32 %v256_v33, %v605_v27  ;;  %v218_v36 = vpop.f32.mrb[2].mxu0  ;;  %v258_v37 = vpop.f32.mrb[2].mxu1 }
  0xf0   :  { %v219_v39 = vadd.f32 %v218_v36, %v603_v26  ;;  %v259_v40 = vadd.f32 %v258_v37, %v603_v26  ;;  %v220_v41 = vpop.f32.mrb[3].mxu0  ;;  %v260_v42 = vpop.f32.mrb[3].mxu1 }
  0xf1   :  { %v456_v43 = vpack.c.bf16 %v217_v34, %v215_v30  ;;  %v464_v44 = vpack.c.bf16 %v257_v35, %v255_v31  ;;  %v221_v45 = vadd.f32 %v220_v41, %v605_v27  ;;  %v261_v46 = vadd.f32 %v260_v42, %v605_v27 }
  0xf3   :  { %392 = vst.msk [vmem:[%s726_s3] sm:$0xff] %vm611_vm3, %v456_v43  ;;  %400 = vst.msk [vmem:[%s726_s3 + $0x40] sm:$0xff] %vm611_vm3, %v464_v44  ;;  %v457_v47 = vpack.c.bf16 %v221_v45, %v219_v39  ;;  %v465_v48 = vpack.c.bf16 %v261_v46, %v259_v40 }
  0xf5   :  { %393 = vst.msk [vmem:[%s726_s3 + $0x8] sm:$0xff] %vm611_vm3, %v457_v47  ;;  %401 = vst.msk [vmem:[%s726_s3 + $0x48] sm:$0xff] %vm611_vm3, %v465_v48  ;;  %v224_v49 = vpop.f32.mrb[4].mxu0  ;;  %v264_v50 = vpop.f32.mrb[4].mxu1 }
  0xf6   :  { %v225_v51 = vadd.f32 %v224_v49, %v603_v26  ;;  %v265_v52 = vadd.f32 %v264_v50, %v603_v26  ;;  %v226_v53 = vpop.f32.mrb[5].mxu0  ;;  %v266_v54 = vpop.f32.mrb[5].mxu1 }
  0xf7   :  { %v227_v55 = vadd.f32 %v226_v53, %v605_v27  ;;  %v267_v56 = vadd.f32 %v266_v54, %v605_v27  ;;  %v228_v57 = vpop.f32.mrb[6].mxu0  ;;  %v268_v58 = vpop.f32.mrb[6].mxu1 }
  0xf8   :  { %v229_v59 = vadd.f32 %v228_v57, %v603_v26  ;;  %v269_v60 = vadd.f32 %v268_v58, %v603_v26  ;;  %v230_v61 = vpop.f32.mrb[7].mxu0  ;;  %v270_v62 = vpop.f32.mrb[7].mxu1 }
  0xf9   :  { %v458_v63 = vpack.c.bf16 %v227_v55, %v225_v51  ;;  %v466_v0 = vpack.c.bf16 %v267_v56, %v265_v52  ;;  %v231_v1 = vadd.f32 %v230_v61, %v605_v27  ;;  %v271_v2 = vadd.f32 %v270_v62, %v605_v27 }
  0xfb   :  { %394 = vst.msk [vmem:[%s726_s3 + $0x10] sm:$0xff] %vm611_vm3, %v458_v63  ;;  %402 = vst.msk [vmem:[%s726_s3 + $0x50] sm:$0xff] %vm611_vm3, %v466_v0  ;;  %v459_v3 = vpack.c.bf16 %v231_v1, %v229_v59  ;;  %v467_v4 = vpack.c.bf16 %v271_v2, %v269_v60 }
  0xfd   :  { %395 = vst.msk [vmem:[%s726_s3 + $0x18] sm:$0xff] %vm611_vm3, %v459_v3  ;;  %403 = vst.msk [vmem:[%s726_s3 + $0x58] sm:$0xff] %vm611_vm3, %v467_v4  ;;  %v234_v5 = vpop.f32.mrb[8].mxu0  ;;  %v274_v6 = vpop.f32.mrb[8].mxu1 }
  0xfe   :  { %v235_v7 = vadd.f32 %v234_v5, %v603_v26  ;;  %v275_v8 = vadd.f32 %v274_v6, %v603_v26  ;;  %v236_v9 = vpop.f32.mrb[9].mxu0  ;;  %v276_v10 = vpop.f32.mrb[9].mxu1 }
  0xff   :  { %v237_v11 = vadd.f32 %v236_v9, %v605_v27  ;;  %v277_v12 = vadd.f32 %v276_v10, %v605_v27  ;;  %v238_v13 = vpop.f32.mrb[10].mxu0  ;;  %v278_v14 = vpop.f32.mrb[10].mxu1 }
 0x100   :  { %v239_v15 = vadd.f32 %v238_v13, %v603_v26  ;;  %v279_v16 = vadd.f32 %v278_v14, %v603_v26  ;;  %v240_v17 = vpop.f32.mrb[11].mxu0  ;;  %v280_v18 = vpop.f32.mrb[11].mxu1 }
 0x101   :  { %v460_v19 = vpack.c.bf16 %v237_v11, %v235_v7  ;;  %v468_v20 = vpack.c.bf16 %v277_v12, %v275_v8  ;;  %v241_v21 = vadd.f32 %v240_v17, %v605_v27  ;;  %v281_v22 = vadd.f32 %v280_v18, %v605_v27 }
 0x103   :  { %396 = vst.msk [vmem:[%s726_s3 + $0x20] sm:$0xff] %vm611_vm3, %v460_v19  ;;  %404 = vst.msk [vmem:[%s726_s3 + $0x60] sm:$0xff] %vm611_vm3, %v468_v20  ;;  %v461_v23 = vpack.c.bf16 %v241_v21, %v239_v15  ;;  %v469_v24 = vpack.c.bf16 %v281_v22, %v279_v16 }
 0x105   :  { %397 = vst.msk [vmem:[%s726_s3 + $0x28] sm:$0xff] %vm611_vm3, %v461_v23  ;;  %405 = vst.msk [vmem:[%s726_s3 + $0x68] sm:$0xff] %vm611_vm3, %v469_v24  ;;  %v244_v25 = vpop.f32.mrb[12].mxu0  ;;  %v284_v28 = vpop.f32.mrb[12].mxu1 }
 0x106   :  { %v245_v29 = vadd.f32 %v244_v25, %v603_v26  ;;  %v285_v30 = vadd.f32 %v284_v28, %v603_v26  ;;  %v246_v31 = vpop.f32.mrb[13].mxu0  ;;  %v286_v32 = vpop.f32.mrb[13].mxu1 }
 0x107   :  { %v247_v33 = vadd.f32 %v246_v31, %v605_v27  ;;  %v287_v34 = vadd.f32 %v286_v32, %v605_v27  ;;  %v248_v35 = vpop.f32.mrb[14].mxu0  ;;  %v288_v36 = vpop.f32.mrb[14].mxu1 }
 0x108   :  { %v249_v37 = vadd.f32 %v248_v35, %v603_v26  ;;  %v289_v39 = vadd.f32 %v288_v36, %v603_v26  ;;  %v250_v40 = vpop.f32.mrb[15].mxu0  ;;  %v290_v41 = vpop.f32.mrb[15].mxu1 }
 0x109   :  { %v462_v42 = vpack.c.bf16 %v247_v33, %v245_v29  ;;  %v470_v43 = vpack.c.bf16 %v287_v34, %v285_v30  ;;  %v251_v44 = vadd.f32 %v250_v40, %v605_v27  ;;  %v291_v45 = vadd.f32 %v290_v41, %v605_v27 }
 0x10b   :  { %398 = vst.msk [vmem:[%s726_s3 + $0x30] sm:$0xff] %vm611_vm3, %v462_v42  ;;  %406 = vst.msk [vmem:[%s726_s3 + $0x70] sm:$0xff] %vm611_vm3, %v470_v43  ;;  %v463_v26 = vpack.c.bf16 %v251_v44, %v249_v37  ;;  %v471_v46 = vpack.c.bf16 %v291_v45, %v289_v39 }
 0x10d   :  { %399 = vst.msk [vmem:[%s726_s3 + $0x38] sm:$0xff] %vm611_vm3, %v463_v26  ;;  %407 = vst.msk [vmem:[%s726_s3 + $0x78] sm:$0xff] %vm611_vm3, %v471_v46 }

// kernel: shufflenet_forward.42
= control target key start
LH: loop header
LB: loop body
LE: loop exit
PB: predicated region body
PF: predicated region fallthrough
CT: control target
= control target key end

     0   :  { %v569_v1 = vmov 0   ;;  %vm122_vm0 = vcmask 392192   ;;  %v42_v15 = vlaneseq  ;;  %vm468_vm1 = vcmask 1043456   ;;  %s906_s1 = inlined_call_operand.vmem [shape: bf16[48,192], index: 1, kind: input, shape index: {}]   ;;  %s907_s0 = inlined_call_operand.vmem [shape: bf16[128,48], index: 0, kind: input, shape index: {}]   ;;  %s908_s2 = inlined_call_operand.vmem [shape: f32[1,192], index: 2, kind: input, shape index: {}]   ;;  %s909_s3 = inlined_call_operand.vmem [shape: bf16[128,192], index: 3, kind: input, shape index: {}]   ;;  %s910_s4 = inlined_call_operand.vmem [shape: bf16[128,192], index: 4, kind: output, shape index: {}]  }
   0x1   :  { %v552_v0 = vld [vmem:[%s906_s1 + $0x4] ss:$8 sps:$4 sm:$0xff]   ;;  %179 = vmatprep.mubr.bf16.mxu0 %v569_v1  ;;  %219 = vmatprep.mubr.bf16.mxu1 %v569_v1  ;;  %v554_v2 = vld [vmem:[%s906_s1] ss:$8 sps:$4 sm:$0xff]   ;;  %v555_v3 = vld [vmem:[%s906_s1 + $0x14] ss:$8 sps:$4 sm:$0xff]  }
   0x2   :  { %147 = vmatprep.subr.bf16.mxu0 %v552_v0  ;;  %545 = vmatprep.subr.bf16.mxu1 %v552_v0  ;;  %v557_v4 = vld [vmem:[%s906_s1 + $0x10] ss:$8 sps:$4 sm:$0xff]   ;;  %v558_v5 = vld [vmem:[%s906_s1 + $0x24] ss:$8 sps:$4 sm:$0xff]   ;;  %v560_v6 = vld [vmem:[%s906_s1 + $0x20] ss:$8 sps:$4 sm:$0xff]  }
   0x3   :  { %148 = vmatpush1.bf16.msra.mxu0 %v554_v2  ;;  %548 = vmatpush1.bf16.msra.mxu1 %v554_v2  ;;  %v561_v7 = vld [vmem:[%s907_s0] sm:$0xff]   ;;  %v563_v9 = vld [vmem:[%s907_s0 + $0x8] sm:$0xff]   ;;  %v565_v11 = vld [vmem:[%s907_s0 + $0x10] sm:$0xff]   ;;  %v43_v16 = vshrl.u32 %v42_v15, 7  ;;  %vm469_vm2 = vcmask 523268  }
   0x4   :  { %149 = vmatprep.subr.bf16.mxu0 %v555_v3  ;;  %546 = vmatprep.subr.bf16.mxu1 %v555_v3  ;;  %v562_v8 = vld [vmem:[%s907_s0 + $0x20] sm:$0xff]   ;;  %v564_v10 = vld [vmem:[%s907_s0 + $0x28] sm:$0xff]   ;;  %v566_v12 = vld [vmem:[%s907_s0 + $0x30] sm:$0xff]  }
   0x5   :  { %v567_v13 = vld [vmem:[%s907_s0 + $0x18] sm:$0xff]   ;;  %v44_v17 = vsub.s32 0, %v43_v16  ;;  %v48_v18 = vsub.s32 1, %v43_v16  ;;  %v40_v19 = vld [vmem:[%s908_s2] sm:$0x3]  ;;  %v657_v22 = vld [vmem:[%s909_s3 + $0x8] sm:$0xff] }
   0x6   :  { %v568_v14 = vld [vmem:[%s907_s0 + $0x38] sm:$0xff]   ;;  %v292_v20 = vld [vmem:[%s909_s3] sm:$0xff]  ;;  %v662_v23 = vld [vmem:[%s909_s3 + $0x48] sm:$0xff]  ;;  %v310_v32 = vunpack.c.l.bf16 %v657_v22  ;;  %v311_v36 = vunpack.c.h.bf16 %v657_v22 }
   0x7   :  { %150 = vmatpush1.bf16.msra.mxu0 %v557_v4  ;;  %549 = vmatpush1.bf16.msra.mxu1 %v557_v4  ;;  %v300_v21 = vld [vmem:[%s909_s3 + $0x40] sm:$0xff]  ;;  %v664_v24 = vrot.slane %v40_v19, %v44_v17  ;;  %v308_v25 = vunpack.c.l.bf16 %v292_v20  ;;  %v666_v27 = vrot.slane %v40_v19, %v48_v18  ;;  %v671_v28 = vld [vmem:[%s909_s3 + $0x10] sm:$0xff]  ;;  %v309_v30 = vunpack.c.h.bf16 %v292_v20  ;;  %v683_v34 = vld [vmem:[%s909_s3 + $0x18] sm:$0xff] }
   0x8   :  { %151 = vmatprep.subr.bf16.mxu0 %v558_v5  ;;  %547 = vmatprep.subr.bf16.mxu1 %v558_v5  ;;  %v324_v26 = vunpack.c.l.bf16 %v300_v21  ;;  %v676_v29 = vld [vmem:[%s909_s3 + $0x50] sm:$0xff]  ;;  %v325_v31 = vunpack.c.h.bf16 %v300_v21  ;;  %v326_v33 = vunpack.c.l.bf16 %v662_v23  ;;  %v688_v35 = vld [vmem:[%s909_s3 + $0x58] sm:$0xff]  ;;  %v327_v37 = vunpack.c.h.bf16 %v662_v23  ;;  %v695_v38 = vld [vmem:[%s909_s3 + $0x20] sm:$0xff] }
   0x9   :  { %v700_v39 = vld [vmem:[%s909_s3 + $0x60] sm:$0xff]  ;;  %v312_v40 = vunpack.c.l.bf16 %v671_v28  ;;  %v328_v41 = vunpack.c.l.bf16 %v676_v29  ;;  %v313_v42 = vunpack.c.h.bf16 %v671_v28  ;;  %v329_v43 = vunpack.c.h.bf16 %v676_v29  ;;  %vm734_vm3 = vmor %vm469_vm2, %vm468_vm1 }
   0xa   :  { %v314_v46 = vunpack.c.l.bf16 %v683_v34  ;;  %v330_v47 = vunpack.c.l.bf16 %v688_v35  ;;  %v315_v48 = vunpack.c.h.bf16 %v683_v34  ;;  %v331_v49 = vunpack.c.h.bf16 %v688_v35 }
   0xb   :  { %152 = vmatpush1.bf16.msra.mxu0 %v560_v6  ;;  %550 = vmatpush1.bf16.msra.mxu1 %v560_v6  ;;  %v316_v54 = vunpack.c.l.bf16 %v695_v38  ;;  %v332_v55 = vunpack.c.l.bf16 %v700_v39  ;;  %v317_v60 = vunpack.c.h.bf16 %v695_v38  ;;  %v333_v61 = vunpack.c.h.bf16 %v700_v39 }
   0xe   :  { %505 = vmatmul.mubr.msk.bf16.vlgmr.msra.gmra.mrb[0].mxu0 %vm122_vm0, %v561_v7  ;;  %509 = vmatmul.mubr.msk.bf16.vlgmr.msra.gmra.mrb[0].mxu1 %vm122_vm0, %v562_v8  ;;  %v725_v8 = vld [vmem:[%s909_s3 + $0x28] sm:$0xff] }
   0xf   :  { %189 = vmatprep.mubr.bf16.mxu0 %v569_v1  ;;  %229 = vmatprep.mubr.bf16.mxu1 %v569_v1  ;;  %v318_v21 = vunpack.c.l.bf16 %v725_v8 }
  0x16   :  { %506 = vmatmul.mubr.msk.bf16.gmra.mrb[4].mxu0 %vm122_vm0, %v563_v9  ;;  %510 = vmatmul.mubr.msk.bf16.gmra.mrb[4].mxu1 %vm122_vm0, %v564_v10  ;;  %v730_v9 = vld [vmem:[%s909_s3 + $0x68] sm:$0xff] }
  0x17   :  { %199 = vmatprep.mubr.bf16.mxu0 %v569_v1  ;;  %239 = vmatprep.mubr.bf16.mxu1 %v569_v1  ;;  %v334_v22 = vunpack.c.l.bf16 %v730_v9 }
  0x1e   :  { %507 = vmatmul.mubr.msk.bf16.gmra.mrb[8].mxu0 %vm122_vm0, %v565_v11  ;;  %511 = vmatmul.mubr.msk.bf16.gmra.mrb[8].mxu1 %vm122_vm0, %v566_v12 }
  0x1f   :  { %209 = vmatprep.mubr.bf16.mxu0 %v569_v1  ;;  %249 = vmatprep.mubr.bf16.mxu1 %v569_v1 }
  0x26   :  { %508 = vmatmul.mubr.msk.bf16.gmra.mrb[12].mxu0 %vm122_vm0, %v567_v13  ;;  %512 = vmatmul.mubr.msk.bf16.gmra.mrb[12].mxu1 %vm122_vm0, %v568_v14 }
  0xe1   :  { %v181_v44 = vpop.f32.mrb[0].mxu0  ;;  %v221_v45 = vpop.f32.mrb[0].mxu1 }
  0xe2   :  { %v182_v50 = vadd.f32 %v181_v44, %v664_v24  ;;  %v222_v51 = vadd.f32 %v221_v45, %v664_v24  ;;  %v183_v52 = vpop.f32.mrb[1].mxu0  ;;  %v223_v53 = vpop.f32.mrb[1].mxu1 }
  0xe3   :  { %v184_v56 = vadd.f32 %v183_v52, %v666_v27  ;;  %v224_v57 = vadd.f32 %v223_v53, %v666_v27  ;;  %v185_v58 = vpop.f32.mrb[2].mxu0  ;;  %v225_v59 = vpop.f32.mrb[2].mxu1  ;;  %v319_v53 = vunpack.c.h.bf16 %v725_v8 }
  0xe4   :  { %v260_v62 = vmax.f32 %v182_v50, 0.0  ;;  %v276_v63 = vmax.f32 %v222_v51, 0.0  ;;  %v186_v0 = vadd.f32 %v185_v58, %v664_v24  ;;  %v226_v1 = vadd.f32 %v225_v59, %v664_v24  ;;  %v187_v2 = vpop.f32.mrb[3].mxu0  ;;  %v227_v3 = vpop.f32.mrb[3].mxu1 }
  0xe5   :  { %v261_v4 = vmax.f32 %v184_v56, 0.0  ;;  %v277_v5 = vmax.f32 %v224_v57, 0.0  ;;  %v188_v6 = vadd.f32 %v187_v2, %v666_v27  ;;  %v228_v7 = vadd.f32 %v227_v3, %v666_v27 }
  0xe6   :  { %v340_v10 = vadd.f32 %v308_v25, %v260_v62  ;;  %v356_v11 = vadd.f32 %v324_v26, %v276_v63  ;;  %v262_v12 = vmax.f32 %v186_v0, 0.0  ;;  %v278_v13 = vmax.f32 %v226_v1, 0.0 }
  0xe7   :  { %v341_v14 = vadd.f32 %v309_v30, %v261_v4  ;;  %v357_v15 = vadd.f32 %v325_v31, %v277_v5  ;;  %v263_v16 = vmax.f32 %v188_v6, 0.0  ;;  %v279_v17 = vmax.f32 %v228_v7, 0.0  ;;  %v773_v7 = vld [vmem:[%s909_s3 + $0x30] sm:$0xff] }
  0xe8   :  { %v342_v19 = vadd.f32 %v310_v32, %v262_v12  ;;  %v358_v20 = vadd.f32 %v326_v33, %v278_v13  ;;  %v335_v32 = vunpack.c.h.bf16 %v730_v9 }
  0xe9   :  { %v529_v23 = vpack.c.bf16 %v341_v14, %v340_v10  ;;  %v537_v25 = vpack.c.bf16 %v357_v15, %v356_v11  ;;  %v343_v26 = vadd.f32 %v311_v36, %v263_v16  ;;  %v359_v44 = vadd.f32 %v327_v37, %v279_v17  ;;  %v191_v30 = vpop.f32.mrb[4].mxu0  ;;  %v231_v31 = vpop.f32.mrb[4].mxu1  ;;  %v778_v10 = vld [vmem:[%s909_s3 + $0x70] sm:$0xff] }
  0xea   :  { %v192_v45 = vadd.f32 %v191_v30, %v664_v24  ;;  %v232_v50 = vadd.f32 %v231_v31, %v664_v24  ;;  %v193_v51 = vpop.f32.mrb[5].mxu0  ;;  %v233_v52 = vpop.f32.mrb[5].mxu1  ;;  %v321_v31 = vunpack.c.h.bf16 %v773_v7 }
  0xeb   :  { %471 = vst.msk [vmem:[%s910_s4] sm:$0xff] %vm734_vm3, %v529_v23  ;;  %479 = vst.msk [vmem:[%s910_s4 + $0x40] sm:$0xff] %vm734_vm3, %v537_v25  ;;  %v530_v33 = vpack.c.bf16 %v343_v26, %v342_v19  ;;  %v538_v36 = vpack.c.bf16 %v359_v44, %v358_v20  ;;  %v194_v37 = vadd.f32 %v193_v51, %v666_v27  ;;  %v195_v57 = vpop.f32.mrb[6].mxu0  ;;  %v235_v58 = vpop.f32.mrb[6].mxu1 }
  0xec   :  { %v234_v56 = vadd.f32 %v233_v52, %v666_v27  ;;  %v264_v59 = vmax.f32 %v192_v45, 0.0  ;;  %v280_v62 = vmax.f32 %v232_v50, 0.0  ;;  %v196_v63 = vadd.f32 %v195_v57, %v664_v24  ;;  %v197_v1 = vpop.f32.mrb[7].mxu0  ;;  %v237_v2 = vpop.f32.mrb[7].mxu1 }
  0xed   :  { %v236_v0 = vadd.f32 %v235_v58, %v664_v24  ;;  %472 = vst.msk [vmem:[%s910_s4 + $0x8] sm:$0xff] %vm734_vm3, %v530_v33  ;;  %480 = vst.msk [vmem:[%s910_s4 + $0x48] sm:$0xff] %vm734_vm3, %v538_v36  ;;  %v265_v3 = vmax.f32 %v194_v37, 0.0  ;;  %v198_v5 = vadd.f32 %v197_v1, %v666_v27  ;;  %v238_v6 = vadd.f32 %v237_v2, %v666_v27  ;;  %v307_v1 = vld [vmem:[%s909_s3 + $0x78] sm:$0xff] }
  0xee   :  { %v281_v4 = vmax.f32 %v234_v56, 0.0  ;;  %v344_v11 = vadd.f32 %v312_v40, %v264_v59  ;;  %v360_v12 = vadd.f32 %v328_v41, %v280_v62  ;;  %v266_v13 = vmax.f32 %v196_v63, 0.0 }
  0xef   :  { %v282_v14 = vmax.f32 %v236_v0, 0.0  ;;  %v345_v15 = vadd.f32 %v313_v42, %v265_v3  ;;  %v267_v17 = vmax.f32 %v198_v5, 0.0  ;;  %v283_v19 = vmax.f32 %v238_v6, 0.0  ;;  %v299_v0 = vld [vmem:[%s909_s3 + $0x38] sm:$0xff] }
  0xf0   :  { %v361_v16 = vadd.f32 %v329_v43, %v281_v4  ;;  %v346_v20 = vadd.f32 %v314_v46, %v266_v13  ;;  %v320_v40 = vunpack.c.l.bf16 %v773_v7  ;;  %v336_v41 = vunpack.c.l.bf16 %v778_v10 }
  0xf1   :  { %v362_v23 = vadd.f32 %v330_v47, %v282_v14  ;;  %v531_v25 = vpack.c.bf16 %v345_v15, %v344_v11  ;;  %v347_v28 = vadd.f32 %v315_v48, %v267_v17  ;;  %v363_v29 = vadd.f32 %v331_v49, %v283_v19  ;;  %v201_v42 = vpop.f32.mrb[8].mxu0  ;;  %v241_v43 = vpop.f32.mrb[8].mxu1 }
  0xf2   :  { %v539_v26 = vpack.c.bf16 %v361_v16, %v360_v12  ;;  %v202_v44 = vadd.f32 %v201_v42, %v664_v24  ;;  %v242_v46 = vadd.f32 %v241_v43, %v664_v24  ;;  %v203_v30 = vpop.f32.mrb[9].mxu0  ;;  %v243_v47 = vpop.f32.mrb[9].mxu1  ;;  %v337_v45 = vunpack.c.h.bf16 %v778_v10 }
  0xf3   :  { %473 = vst.msk [vmem:[%s910_s4 + $0x10] sm:$0xff] %vm734_vm3, %v531_v25  ;;  %v532_v34 = vpack.c.bf16 %v347_v28, %v346_v20  ;;  %v540_v35 = vpack.c.bf16 %v363_v29, %v362_v23  ;;  %v204_v48 = vadd.f32 %v203_v30, %v666_v27  ;;  %v244_v49 = vadd.f32 %v243_v47, %v666_v27  ;;  %v205_v50 = vpop.f32.mrb[10].mxu0  ;;  %v245_v51 = vpop.f32.mrb[10].mxu1 }
  0xf4   :  { %481 = vst.msk [vmem:[%s910_s4 + $0x50] sm:$0xff] %vm734_vm3, %v539_v26  ;;  %v268_v52 = vmax.f32 %v202_v44, 0.0  ;;  %v284_v33 = vmax.f32 %v242_v46, 0.0  ;;  %v206_v36 = vadd.f32 %v205_v50, %v664_v24  ;;  %v246_v37 = vadd.f32 %v245_v51, %v664_v24  ;;  %v207_v56 = vpop.f32.mrb[11].mxu0  ;;  %v247_v57 = vpop.f32.mrb[11].mxu1 }
  0xf5   :  { %474 = vst.msk [vmem:[%s910_s4 + $0x18] sm:$0xff] %vm734_vm3, %v532_v34  ;;  %482 = vst.msk [vmem:[%s910_s4 + $0x58] sm:$0xff] %vm734_vm3, %v540_v35  ;;  %v269_v58 = vmax.f32 %v204_v48, 0.0  ;;  %v285_v59 = vmax.f32 %v244_v49, 0.0  ;;  %v208_v62 = vadd.f32 %v207_v56, %v666_v27  ;;  %v248_v63 = vadd.f32 %v247_v57, %v666_v27 }
  0xf6   :  { %v348_v2 = vadd.f32 %v316_v54, %v268_v52  ;;  %v364_v3 = vadd.f32 %v332_v55, %v284_v33  ;;  %v270_v4 = vmax.f32 %v206_v36, 0.0  ;;  %v286_v5 = vmax.f32 %v246_v37, 0.0 }
  0xf7   :  { %v349_v6 = vadd.f32 %v317_v60, %v269_v58  ;;  %v365_v11 = vadd.f32 %v333_v61, %v285_v59  ;;  %v271_v12 = vmax.f32 %v208_v62, 0.0  ;;  %v287_v13 = vmax.f32 %v248_v63, 0.0 }
  0xf8   :  { %v350_v14 = vadd.f32 %v318_v21, %v270_v4  ;;  %v366_v15 = vadd.f32 %v334_v22, %v286_v5  ;;  %v322_v54 = vunpack.c.l.bf16 %v299_v0  ;;  %v338_v16 = vunpack.c.l.bf16 %v307_v1 }
  0xf9   :  { %v533_v17 = vpack.c.bf16 %v349_v6, %v348_v2  ;;  %v541_v55 = vpack.c.bf16 %v365_v11, %v364_v3  ;;  %v351_v19 = vadd.f32 %v319_v53, %v271_v12  ;;  %v367_v38 = vadd.f32 %v335_v32, %v287_v13  ;;  %v211_v39 = vpop.f32.mrb[12].mxu0  ;;  %v251_v60 = vpop.f32.mrb[12].mxu1 }
  0xfa   :  { %v212_v61 = vadd.f32 %v211_v39, %v664_v24  ;;  %v252_v20 = vadd.f32 %v251_v60, %v664_v24  ;;  %v213_v21 = vpop.f32.mrb[13].mxu0  ;;  %v253_v23 = vpop.f32.mrb[13].mxu1  ;;  %v323_v25 = vunpack.c.h.bf16 %v299_v0  ;;  %v339_v22 = vunpack.c.h.bf16 %v307_v1 }
  0xfb   :  { %475 = vst.msk [vmem:[%s910_s4 + $0x20] sm:$0xff] %vm734_vm3, %v533_v17  ;;  %483 = vst.msk [vmem:[%s910_s4 + $0x60] sm:$0xff] %vm734_vm3, %v541_v55  ;;  %v534_v8 = vpack.c.bf16 %v351_v19, %v350_v14  ;;  %v542_v9 = vpack.c.bf16 %v367_v38, %v366_v15  ;;  %v214_v53 = vadd.f32 %v213_v21, %v666_v27  ;;  %v215_v26 = vpop.f32.mrb[14].mxu0  ;;  %v255_v28 = vpop.f32.mrb[14].mxu1 }
  0xfc   :  { %v254_v32 = vadd.f32 %v253_v23, %v666_v27  ;;  %v272_v29 = vmax.f32 %v212_v61, 0.0  ;;  %v288_v42 = vmax.f32 %v252_v20, 0.0  ;;  %v216_v43 = vadd.f32 %v215_v26, %v664_v24  ;;  %v217_v46 = vpop.f32.mrb[15].mxu0  ;;  %v257_v30 = vpop.f32.mrb[15].mxu1 }
  0xfd   :  { %v256_v44 = vadd.f32 %v255_v28, %v664_v24  ;;  %476 = vst.msk [vmem:[%s910_s4 + $0x28] sm:$0xff] %vm734_vm3, %v534_v8  ;;  %484 = vst.msk [vmem:[%s910_s4 + $0x68] sm:$0xff] %vm734_vm3, %v542_v9  ;;  %v273_v47 = vmax.f32 %v214_v53, 0.0  ;;  %v218_v35 = vadd.f32 %v217_v46, %v666_v27  ;;  %v258_v24 = vadd.f32 %v257_v30, %v666_v27 }
  0xfe   :  { %v289_v34 = vmax.f32 %v254_v32, 0.0  ;;  %v352_v48 = vadd.f32 %v320_v40, %v272_v29  ;;  %v368_v49 = vadd.f32 %v336_v41, %v288_v42  ;;  %v274_v50 = vmax.f32 %v216_v43, 0.0 }
  0xff   :  { %v290_v51 = vmax.f32 %v256_v44, 0.0  ;;  %v353_v52 = vadd.f32 %v321_v31, %v273_v47  ;;  %v275_v36 = vmax.f32 %v218_v35, 0.0  ;;  %v291_v37 = vmax.f32 %v258_v24, 0.0 }
 0x100   :  { %v369_v33 = vadd.f32 %v337_v45, %v289_v34  ;;  %v354_v56 = vadd.f32 %v322_v54, %v274_v50 }
 0x101   :  { %v370_v57 = vadd.f32 %v338_v16, %v290_v51  ;;  %v535_v58 = vpack.c.bf16 %v353_v52, %v352_v48  ;;  %v355_v59 = vadd.f32 %v323_v25, %v275_v36  ;;  %v371_v62 = vadd.f32 %v339_v22, %v291_v37 }
 0x102   :  { %v543_v27 = vpack.c.bf16 %v369_v33, %v368_v49 }
 0x103   :  { %477 = vst.msk [vmem:[%s910_s4 + $0x30] sm:$0xff] %vm734_vm3, %v535_v58  ;;  %v536_v7 = vpack.c.bf16 %v355_v59, %v354_v56  ;;  %v544_v10 = vpack.c.bf16 %v371_v62, %v370_v57 }
 0x104   :  { %485 = vst.msk [vmem:[%s910_s4 + $0x70] sm:$0xff] %vm734_vm3, %v543_v27 }
 0x105   :  { %478 = vst.msk [vmem:[%s910_s4 + $0x38] sm:$0xff] %vm734_vm3, %v536_v7  ;;  %486 = vst.msk [vmem:[%s910_s4 + $0x78] sm:$0xff] %vm734_vm3, %v544_v10 }

// kernel: shufflenet_forward.40
= control target key start
LH: loop header
LB: loop body
LE: loop exit
PB: predicated region body
PF: predicated region fallthrough
CT: control target
= control target key end

     0   :  { %s813_s12 = smov 0   ;;  %s1087_s0 = inlined_call_operand.vmem [shape: bf16[2,10,10,48], index: 0, kind: input, shape index: {}]   ;;  %s1088_s1 = inlined_call_operand.vmem [shape: f32[9,48], index: 1, kind: input, shape index: {}]   ;;  %s1089_s2 = inlined_call_operand.vmem [shape: f32[1,48], index: 2, kind: input, shape index: {}]   ;;  %s1090_s3 = inlined_call_operand.vmem [shape: bf16[2,8,8,48], index: 3, kind: output, shape index: {}]  }
   0x1 LB: > { %s723_s13 = sadd.s32 4294967295, %s791_s12   ;;  %p727_p0 = scmp.ge.s32.totalorder %s791_s12, 1  ;;  %s791_s12 = sphi %s813_s12, %s13_s12  }
   0x2   : > { %p137_p1 = scmp.lt.s32.totalorder %s791_s12, 3 }
   0x4   : > { %p138_p2 = pnand %p727_p0, %p137_p1 }
   0x5   : > { %p161_p3 = scmp.lt.s32.totalorder (!%p138_p2), %s723_s13, 1  ;;  %v827_v0 = vld [vmem:[%s1088_s1] ss:$0 sm:$0xff] (!%p138_p2)  ;;  %v832_v1 = vld [vmem:[%s1088_s1 + $0x3] ss:$0 sm:$0xff] (!%p138_p2)  ;;  %vm443_vm0 = vcmask (!%p138_p2), 1046528  }
   0x6   : > { %141 = sbr.rel (%p138_p2) target bundleno = 110 (0x6e), region = 32  ;;  %v842_v2 = vld [vmem:[%s1088_s1 + $0x6] ss:$0 sm:$0xff] (!%p138_p2)  ;;  %v847_v3 = vld [vmem:[%s1088_s1 + $0x1] ss:$0 sm:$0xff] (!%p138_p2)  ;;  %vm595_vm1 = vcmask (!%p138_p2), 1045504  }
   0x7   : > { %v852_v4 = vld [vmem:[%s1088_s1 + $0x4] ss:$0 sm:$0xff] (!%p138_p2)  ;;  %v857_v5 = vld [vmem:[%s1088_s1 + $0x7] ss:$0 sm:$0xff] (!%p138_p2)  ;;  %v870_v18 = vld [vmem:[%s1088_s1 + $0x2] ss:$0 sm:$0xff] (!%p138_p2) }
   0x8   : > { %v880_v25 = vld [vmem:[%s1088_s1 + $0x5] ss:$0 sm:$0xff] (!%p138_p2)  ;;  %v889_v30 = vld [vmem:[%s1088_s1 + $0x8] ss:$0 sm:$0xff] (!%p138_p2)  ;;  %vm659_vm2 = vcmask (!%p138_p2), 388096  }
   0xd   : > { %s1092_s13 = smov (!%p161_p3, %s723_s13), 1 }
   0xe   : > { %s776_s14 = smul.u32 80, %s1092_s13  ;;  %s775_s11 = sshll.u32 %s1092_s13, 5 }
   0xf   : > { %s932_s15 = scalar_lea.vmem %s1090_s3, %s775_s11 }
  0x10   : > { %s837_s21 = scalar_lea.vmem %s1087_s0, %s776_s14 }
  0x11   : > { %v171_v6 = vld [vmem:[%s837_s21] ss:$8 sps:$4 sm:$0xff]   ;;  %v172_v7 = vld [vmem:[%s837_s21 + $0x4] sm:$0x1]  ;;  %v732_v8 = vld [vmem:[%s837_s21 + $0xc] sm:$0x1] }
  0x12   : > { %v187_v9 = vunpack.c.l.bf16 %v171_v6  ;;  %v188_v10 = vunpack.c.l.bf16 %v172_v7  ;;  %v220_v11 = vunpack.c.h.bf16 %v171_v6  ;;  %v221_v12 = vunpack.c.l.bf16 %v732_v8  ;;  %v747_v13 = vld [vmem:[%s837_s21 + $0x8] ss:$8 sps:$4 sm:$0xff]   ;;  %v748_v14 = vld [vmem:[%s837_s21 + $0x14] sm:$0x1]  ;;  %v865_v15 = vld [vmem:[%s837_s21 + $0xc] sm:$0x1] }
  0x13   : > { %v253_v16 = vunpack.c.h.bf16 %v747_v13  ;;  %v254_v17 = vunpack.c.l.bf16 %v748_v14  ;;  %v189_v19 = vunpack.c.l.bf16 %v747_v13  ;;  %v190_v20 = vunpack.c.l.bf16 %v865_v15  ;;  %v733_v31 = vld [vmem:[%s837_s21 + $0x10] ss:$8 sps:$4 sm:$0xff]   ;;  %v734_v40 = vld [vmem:[%s837_s21 + $0x14] sm:$0x1]  ;;  %v750_v41 = vld [vmem:[%s837_s21 + $0x1c] sm:$0x1] }
  0x14   : > { %v274_v21 = vmul.f32 %v827_v0, %v187_v9  ;;  %v287_v22 = vmul.f32 %v832_v1, %v220_v11  ;;  %v337_v23 = vmul.f32 %v847_v3, %v187_v9  ;;  %v338_v24 = vmul.f32 %v847_v3, %v188_v10  ;;  %v914_v13 = vld [vmem:[%s1089_s2] ss:$0 sm:$0xff] }
  0x15   : > { %v308_v26 = vmul.f32 %v842_v2, %v253_v16  ;;  %v358_v27 = vmul.f32 %v852_v4, %v220_v11  ;;  %v359_v28 = vmul.f32 %v852_v4, %v221_v12  ;;  %v395_v29 = vmul.f32 %v857_v5, %v253_v16 }
  0x16   : > { %v295_v32 = vadd.f32 %v287_v22, %v274_v21  ;;  %v396_v33 = vmul.f32 %v857_v5, %v254_v17  ;;  %v489_v34 = vmul.f32 %v870_v18, %v187_v9  ;;  %v490_v35 = vmul.f32 %v870_v18, %v188_v10 }
  0x17   : > { %v374_v36 = vadd.f32 %v358_v27, %v337_v23  ;;  %v375_v37 = vadd.f32 %v359_v28, %v338_v24  ;;  %v510_v38 = vmul.f32 %v880_v25, %v220_v11  ;;  %v511_v39 = vmul.f32 %v880_v25, %v221_v12 }
  0x18   : > { %v316_v42 = vadd.f32 %v308_v26, %v295_v32  ;;  %v547_v43 = vmul.f32 %v889_v30, %v253_v16  ;;  %v548_v44 = vmul.f32 %v889_v30, %v254_v17  ;;  %v222_v45 = vunpack.c.l.bf16 %v733_v31  ;;  %v175_v17 = vld [vmem:[%s837_s21 + $0x10] ss:$8 sps:$4 sm:$0xff]   ;;  %v176_v26 = vld [vmem:[%s837_s21 + $0x14] sm:$0x1]  ;;  %v736_v32 = vld [vmem:[%s837_s21 + $0x1c] sm:$0x1] }
  0x19   : > { %v411_v46 = vadd.f32 %v395_v29, %v374_v36  ;;  %v412_v47 = vadd.f32 %v396_v33, %v375_v37  ;;  %v526_v48 = vadd.f32 %v510_v38, %v489_v34  ;;  %v527_v49 = vadd.f32 %v511_v39, %v490_v35  ;;  %v752_v36 = vld [vmem:[%s837_s21 + $0x24] sm:$0x1] }
  0x1a   : > { %v223_v50 = vunpack.c.l.bf16 %v734_v40  ;;  %v255_v51 = vunpack.c.h.bf16 %v733_v31  ;;  %v256_v52 = vunpack.c.l.bf16 %v750_v41  ;;  %v275_v53 = vmul.f32 %v827_v0, %v189_v19 }
  0x1b   : > { %v444_v54 = vrot.slane %v411_v46, 1  ;;  %v445_v55 = vrot.slane %v412_v47, 1  ;;  %v563_v56 = vadd.f32 %v547_v43, %v526_v48  ;;  %v564_v57 = vadd.f32 %v548_v44, %v527_v49  ;;  %v751_v44 = vld [vmem:[%s837_s21 + $0x18] ss:$8 sps:$4 sm:$0xff]  }
  0x1c   : > { %v288_v58 = vmul.f32 %v832_v1, %v222_v45  ;;  %v309_v59 = vmul.f32 %v842_v2, %v255_v51  ;;  %v339_v60 = vmul.f32 %v847_v3, %v189_v19  ;;  %v340_v61 = vmul.f32 %v847_v3, %v190_v20 }
  0x1d   : > { %v446_v62 = vsel %vm443_vm0, %v444_v54, %v445_v55  ;;  %v596_v63 = vrot.slane %v563_v56, 2  ;;  %v597_v6 = vrot.slane %v564_v57, 2  ;;  %v360_v7 = vmul.f32 %v852_v4, %v222_v45 }
  0x1e   : > { %v476_v8 = vadd.f32 %v446_v62, %v316_v42  ;;  %v296_v9 = vadd.f32 %v288_v58, %v275_v53  ;;  %v361_v10 = vmul.f32 %v852_v4, %v223_v50  ;;  %v397_v11 = vmul.f32 %v857_v5, %v255_v51 }
  0x1f   : > { %v598_v12 = vsel %vm595_vm1, %v596_v63, %v597_v6  ;;  %v376_v14 = vadd.f32 %v360_v7, %v339_v60  ;;  %v398_v15 = vmul.f32 %v857_v5, %v256_v52  ;;  %v491_v16 = vmul.f32 %v870_v18, %v189_v19 }
  0x20   : > { %v628_v21 = vadd.f32 %v598_v12, %v476_v8  ;;  %v317_v22 = vadd.f32 %v309_v59, %v296_v9  ;;  %v377_v23 = vadd.f32 %v361_v10, %v340_v61  ;;  %v492_v24 = vmul.f32 %v870_v18, %v190_v20 }
  0x21   : > { %v413_v27 = vadd.f32 %v397_v11, %v376_v14  ;;  %v512_v28 = vmul.f32 %v880_v25, %v222_v45  ;;  %v513_v29 = vmul.f32 %v880_v25, %v223_v50  ;;  %v549_v31 = vmul.f32 %v889_v30, %v255_v51  ;;  %v178_v11 = vld [vmem:[%s837_s21 + $0x1c] sm:$0x1] }
  0x22   : > { %v643_v19 = vadd.f32 %v914_v13, %v628_v21  ;;  %v414_v33 = vadd.f32 %v398_v15, %v377_v23  ;;  %v550_v34 = vmul.f32 %v889_v30, %v256_v52  ;;  %v191_v35 = vunpack.c.l.bf16 %v175_v17 }
  0x23   : > { %v447_v20 = vrot.slane %v413_v27, 1  ;;  %v528_v37 = vadd.f32 %v512_v28, %v491_v16  ;;  %v529_v38 = vadd.f32 %v513_v29, %v492_v24  ;;  %v192_v39 = vunpack.c.l.bf16 %v176_v26  ;;  %v738_v26 = vld [vmem:[%s837_s21 + $0x24] sm:$0x1] }
  0x24   : > { %v651_v40 = vpack.c.bf16 %v643_v19, %v643_v19  ;;  %v448_v41 = vrot.slane %v414_v33, 1  ;;  %v224_v42 = vunpack.c.h.bf16 %v175_v17  ;;  %v225_v43 = vunpack.c.l.bf16 %v736_v32  ;;  %v737_v17 = vld [vmem:[%s837_s21 + $0x20] ss:$8 sps:$4 sm:$0xff]   ;;  %v754_v32 = vld [vmem:[%s837_s21 + $0x2c] sm:$0x1] }
  0x25   : > { %v565_v45 = vadd.f32 %v549_v31, %v528_v37  ;;  %v566_v46 = vadd.f32 %v550_v34, %v529_v38  ;;  %v257_v47 = vunpack.c.h.bf16 %v751_v44  ;;  %v258_v48 = vunpack.c.l.bf16 %v752_v36 }
  0x26   : > { %660 = vst.msk [vmem:[%s932_s15] sm:$0xf] %vm659_vm2, %v651_v40  ;;  %v449_v49 = vsel %vm443_vm0, %v447_v20, %v448_v41  ;;  %v276_v50 = vmul.f32 %v827_v0, %v191_v35  ;;  %v289_v51 = vmul.f32 %v832_v1, %v224_v42  ;;  %v341_v52 = vmul.f32 %v847_v3, %v191_v35 }
  0x27   : > { %v477_v53 = vadd.f32 %v449_v49, %v317_v22  ;;  %v599_v54 = vrot.slane %v565_v45, 2  ;;  %v600_v55 = vrot.slane %v566_v46, 2  ;;  %v310_v56 = vmul.f32 %v842_v2, %v257_v47 }
  0x28   : > { %v297_v57 = vadd.f32 %v289_v51, %v276_v50  ;;  %v342_v58 = vmul.f32 %v847_v3, %v192_v39  ;;  %v362_v59 = vmul.f32 %v852_v4, %v224_v42  ;;  %v363_v60 = vmul.f32 %v852_v4, %v225_v43 }
  0x29   : > { %v601_v61 = vsel %vm595_vm1, %v599_v54, %v600_v55  ;;  %v399_v62 = vmul.f32 %v857_v5, %v257_v47  ;;  %v400_v63 = vmul.f32 %v857_v5, %v258_v48  ;;  %v493_v6 = vmul.f32 %v870_v18, %v191_v35 }
  0x2a   : > { %v629_v7 = vadd.f32 %v601_v61, %v477_v53  ;;  %v318_v8 = vadd.f32 %v310_v56, %v297_v57  ;;  %v378_v9 = vadd.f32 %v362_v59, %v341_v52  ;;  %v379_v10 = vadd.f32 %v363_v60, %v342_v58  ;;  %v179_v59 = vld [vmem:[%s837_s21 + $0x20] ss:$8 sps:$4 sm:$0xff]  }
  0x2b   : > { %v494_v12 = vmul.f32 %v870_v18, %v192_v39  ;;  %v514_v14 = vmul.f32 %v880_v25, %v224_v42  ;;  %v515_v15 = vmul.f32 %v880_v25, %v225_v43  ;;  %v551_v16 = vmul.f32 %v889_v30, %v257_v47 }
  0x2c   : > { %v644_v21 = vadd.f32 %v914_v13, %v629_v7  ;;  %v415_v22 = vadd.f32 %v399_v62, %v378_v9  ;;  %v416_v23 = vadd.f32 %v400_v63, %v379_v10  ;;  %v552_v24 = vmul.f32 %v889_v30, %v258_v48 }
  0x2d   : > { %v530_v27 = vadd.f32 %v514_v14, %v493_v6  ;;  %v531_v28 = vadd.f32 %v515_v15, %v494_v12  ;;  %v193_v29 = vunpack.c.l.bf16 %v751_v44  ;;  %v194_v31 = vunpack.c.l.bf16 %v178_v11  ;;  %v180_v6 = vld [vmem:[%s837_s21 + $0x24] sm:$0x1]  ;;  %v740_v11 = vld [vmem:[%s837_s21 + $0x2c] sm:$0x1] }
  0x2e   : > { %v652_v19 = vpack.c.bf16 %v644_v21, %v644_v21  ;;  %v450_v33 = vrot.slane %v415_v22, 1  ;;  %v451_v34 = vrot.slane %v416_v23, 1  ;;  %v226_v35 = vunpack.c.l.bf16 %v737_v17 }
  0x2f   : > { %v567_v36 = vadd.f32 %v551_v16, %v530_v27  ;;  %v568_v20 = vadd.f32 %v552_v24, %v531_v28  ;;  %v227_v37 = vunpack.c.l.bf16 %v738_v26  ;;  %v259_v38 = vunpack.c.h.bf16 %v737_v17  ;;  %v756_v17 = vld [vmem:[%s837_s21 + $0x34] sm:$0x1] }
  0x30   : > { %661 = vst.msk [vmem:[%s932_s15 + $0x4] sm:$0xf] %vm659_vm2, %v652_v19  ;;  %v452_v39 = vsel %vm443_vm0, %v450_v33, %v451_v34  ;;  %v260_v40 = vunpack.c.l.bf16 %v754_v32  ;;  %v277_v41 = vmul.f32 %v827_v0, %v193_v29  ;;  %v290_v42 = vmul.f32 %v832_v1, %v226_v35 }
  0x31   : > { %v478_v43 = vadd.f32 %v452_v39, %v318_v8  ;;  %v602_v44 = vrot.slane %v567_v36, 2  ;;  %v603_v45 = vrot.slane %v568_v20, 2  ;;  %v311_v46 = vmul.f32 %v842_v2, %v259_v38 }
  0x32   : > { %v298_v47 = vadd.f32 %v290_v42, %v277_v41  ;;  %v343_v48 = vmul.f32 %v847_v3, %v193_v29  ;;  %v344_v49 = vmul.f32 %v847_v3, %v194_v31  ;;  %v364_v50 = vmul.f32 %v852_v4, %v226_v35 }
  0x33   : > { %v604_v51 = vsel %vm595_vm1, %v602_v44, %v603_v45  ;;  %v365_v52 = vmul.f32 %v852_v4, %v227_v37  ;;  %v401_v53 = vmul.f32 %v857_v5, %v259_v38  ;;  %v402_v54 = vmul.f32 %v857_v5, %v260_v40 }
  0x34   : > { %v630_v55 = vadd.f32 %v604_v51, %v478_v43  ;;  %v319_v56 = vadd.f32 %v311_v46, %v298_v47  ;;  %v380_v57 = vadd.f32 %v364_v50, %v343_v48  ;;  %v495_v58 = vmul.f32 %v870_v18, %v193_v29 }
  0x35   : > { %v381_v60 = vadd.f32 %v365_v52, %v344_v49  ;;  %v496_v61 = vmul.f32 %v870_v18, %v194_v31  ;;  %v516_v62 = vmul.f32 %v880_v25, %v226_v35  ;;  %v517_v63 = vmul.f32 %v880_v25, %v227_v37  ;;  %v755_v31 = vld [vmem:[%s837_s21 + $0x28] ss:$8 sps:$4 sm:$0xff]  }
  0x36   : > { %v645_v7 = vadd.f32 %v914_v13, %v630_v55  ;;  %v417_v8 = vadd.f32 %v401_v53, %v380_v57  ;;  %v553_v9 = vmul.f32 %v889_v30, %v259_v38  ;;  %v554_v10 = vmul.f32 %v889_v30, %v260_v40  ;;  %v741_v55 = vld [vmem:[%s837_s21 + $0x30] ss:$8 sps:$4 sm:$0xff]  }
  0x37   : > { %v418_v12 = vadd.f32 %v402_v54, %v381_v60  ;;  %v532_v14 = vadd.f32 %v516_v62, %v495_v58  ;;  %v533_v15 = vadd.f32 %v517_v63, %v496_v61  ;;  %v195_v16 = vunpack.c.l.bf16 %v179_v59  ;;  %v182_v54 = vld [vmem:[%s837_s21 + $0x2c] sm:$0x1]  ;;  %v742_v60 = vld [vmem:[%s837_s21 + $0x34] sm:$0x1] }
  0x38   : > { %v653_v21 = vpack.c.bf16 %v645_v7, %v645_v7  ;;  %v453_v22 = vrot.slane %v417_v8, 1  ;;  %v196_v23 = vunpack.c.l.bf16 %v180_v6  ;;  %v228_v24 = vunpack.c.h.bf16 %v179_v59  ;;  %v758_v7 = vld [vmem:[%s837_s21 + $0x3c] sm:$0x1] }
  0x39   : > { %v454_v26 = vrot.slane %v418_v12, 1  ;;  %v569_v27 = vadd.f32 %v553_v9, %v532_v14  ;;  %v570_v28 = vadd.f32 %v554_v10, %v533_v15  ;;  %v229_v29 = vunpack.c.l.bf16 %v740_v11 }
  0x3a   : > { %662 = vst.msk [vmem:[%s932_s15 + $0x8] sm:$0xf] %vm659_vm2, %v653_v21  ;;  %v261_v32 = vunpack.c.h.bf16 %v755_v31  ;;  %v262_v19 = vunpack.c.l.bf16 %v756_v17  ;;  %v278_v33 = vmul.f32 %v827_v0, %v195_v16  ;;  %v291_v34 = vmul.f32 %v832_v1, %v228_v24 }
  0x3b   : > { %v455_v35 = vsel %vm443_vm0, %v453_v22, %v454_v26  ;;  %v605_v36 = vrot.slane %v569_v27, 2  ;;  %v606_v20 = vrot.slane %v570_v28, 2  ;;  %v345_v37 = vmul.f32 %v847_v3, %v195_v16 }
  0x3c   : > { %v479_v38 = vadd.f32 %v455_v35, %v319_v56  ;;  %v299_v39 = vadd.f32 %v291_v34, %v278_v33  ;;  %v312_v40 = vmul.f32 %v842_v2, %v261_v32  ;;  %v346_v41 = vmul.f32 %v847_v3, %v196_v23 }
  0x3d   : > { %v607_v42 = vsel %vm595_vm1, %v605_v36, %v606_v20  ;;  %v366_v43 = vmul.f32 %v852_v4, %v228_v24  ;;  %v367_v44 = vmul.f32 %v852_v4, %v229_v29  ;;  %v403_v45 = vmul.f32 %v857_v5, %v261_v32 }
  0x3e   : > { %v631_v46 = vadd.f32 %v607_v42, %v479_v38  ;;  %v320_v47 = vadd.f32 %v312_v40, %v299_v39  ;;  %v404_v48 = vmul.f32 %v857_v5, %v262_v19  ;;  %v497_v49 = vmul.f32 %v870_v18, %v195_v16  ;;  %v183_v40 = vld [vmem:[%s837_s21 + $0x30] ss:$8 sps:$4 sm:$0xff]  }
  0x3f   : > { %v382_v50 = vadd.f32 %v366_v43, %v345_v37  ;;  %v383_v51 = vadd.f32 %v367_v44, %v346_v41  ;;  %v498_v52 = vmul.f32 %v870_v18, %v196_v23  ;;  %v518_v53 = vmul.f32 %v880_v25, %v228_v24 }
  0x40   : > { %v646_v56 = vadd.f32 %v914_v13, %v631_v46  ;;  %v519_v57 = vmul.f32 %v880_v25, %v229_v29  ;;  %v555_v58 = vmul.f32 %v889_v30, %v261_v32  ;;  %v556_v59 = vmul.f32 %v889_v30, %v262_v19 }
  0x41   : > { %v419_v61 = vadd.f32 %v403_v45, %v382_v50  ;;  %v420_v62 = vadd.f32 %v404_v48, %v383_v51  ;;  %v534_v63 = vadd.f32 %v518_v53, %v497_v49  ;;  %v197_v6 = vunpack.c.l.bf16 %v755_v31  ;;  %v184_v45 = vld [vmem:[%s837_s21 + $0x34] sm:$0x1]  ;;  %v744_v50 = vld [vmem:[%s837_s21 + $0x3c] sm:$0x1] }
  0x42   : > { %v654_v8 = vpack.c.bf16 %v646_v56, %v646_v56  ;;  %v535_v9 = vadd.f32 %v519_v57, %v498_v52  ;;  %v198_v10 = vunpack.c.l.bf16 %v182_v54  ;;  %v230_v11 = vunpack.c.l.bf16 %v741_v55 }
  0x43   : > { %v456_v12 = vrot.slane %v419_v61, 1  ;;  %v457_v14 = vrot.slane %v420_v62, 1  ;;  %v571_v15 = vadd.f32 %v555_v58, %v534_v63  ;;  %v231_v16 = vunpack.c.l.bf16 %v742_v60 }
  0x44   : > { %663 = vst.msk [vmem:[%s932_s15 + $0xc] sm:$0xf] %vm659_vm2, %v654_v8  ;;  %v572_v17 = vadd.f32 %v556_v59, %v535_v9  ;;  %v263_v21 = vunpack.c.h.bf16 %v741_v55  ;;  %v264_v22 = vunpack.c.l.bf16 %v758_v7  ;;  %v279_v23 = vmul.f32 %v827_v0, %v197_v6  ;;  %v760_v55 = vld [vmem:[%s837_s21 + $0x44] sm:$0x1] }
  0x45   : > { %v458_v24 = vsel %vm443_vm0, %v456_v12, %v457_v14  ;;  %v608_v26 = vrot.slane %v571_v15, 2  ;;  %v292_v27 = vmul.f32 %v832_v1, %v230_v11  ;;  %v347_v28 = vmul.f32 %v847_v3, %v197_v6 }
  0x46   : > { %v480_v29 = vadd.f32 %v458_v24, %v320_v47  ;;  %v609_v31 = vrot.slane %v572_v17, 2  ;;  %v313_v32 = vmul.f32 %v842_v2, %v263_v21  ;;  %v348_v19 = vmul.f32 %v847_v3, %v198_v10 }
  0x47   : > { %v300_v33 = vadd.f32 %v292_v27, %v279_v23  ;;  %v368_v34 = vmul.f32 %v852_v4, %v230_v11  ;;  %v369_v35 = vmul.f32 %v852_v4, %v231_v16  ;;  %v405_v36 = vmul.f32 %v857_v5, %v263_v21 }
  0x48   : > { %v610_v20 = vsel %vm595_vm1, %v608_v26, %v609_v31  ;;  %v406_v37 = vmul.f32 %v857_v5, %v264_v22  ;;  %v499_v38 = vmul.f32 %v870_v18, %v197_v6  ;;  %v500_v39 = vmul.f32 %v870_v18, %v198_v10  ;;  %v759_v6 = vld [vmem:[%s837_s21 + $0x38] ss:$8 sps:$4 sm:$0xff]  }
  0x49   : > { %v632_v41 = vadd.f32 %v610_v20, %v480_v29  ;;  %v321_v42 = vadd.f32 %v313_v32, %v300_v33  ;;  %v384_v43 = vadd.f32 %v368_v34, %v347_v28  ;;  %v385_v44 = vadd.f32 %v369_v35, %v348_v19 }
  0x4a   : > { %v520_v46 = vmul.f32 %v880_v25, %v230_v11  ;;  %v521_v47 = vmul.f32 %v880_v25, %v231_v16  ;;  %v557_v48 = vmul.f32 %v889_v30, %v263_v21  ;;  %v558_v49 = vmul.f32 %v889_v30, %v264_v22 }
  0x4b   : > { %v647_v51 = vadd.f32 %v914_v13, %v632_v41  ;;  %v421_v52 = vadd.f32 %v405_v36, %v384_v43  ;;  %v422_v53 = vadd.f32 %v406_v37, %v385_v44  ;;  %v199_v54 = vunpack.c.l.bf16 %v183_v40  ;;  %v186_v36 = vld [vmem:[%s837_s21 + $0x3c] sm:$0x1] }
  0x4c   : > { %v536_v56 = vadd.f32 %v520_v46, %v499_v38  ;;  %v537_v57 = vadd.f32 %v521_v47, %v500_v39  ;;  %v200_v58 = vunpack.c.l.bf16 %v184_v45  ;;  %v232_v59 = vunpack.c.h.bf16 %v183_v40  ;;  %v745_v40 = vld [vmem:[%s837_s21 + $0x40] ss:$8 sps:$4 sm:$0xff]   ;;  %v746_v45 = vld [vmem:[%s837_s21 + $0x44] sm:$0x1] }
  0x4d   : > { %v655_v60 = vpack.c.bf16 %v647_v51, %v647_v51  ;;  %v459_v61 = vrot.slane %v421_v52, 1  ;;  %v460_v62 = vrot.slane %v422_v53, 1  ;;  %v233_v63 = vunpack.c.l.bf16 %v744_v50  ;;  %v762_v50 = vld [vmem:[%s837_s21 + $0x4c] sm:$0x1] }
  0x4e   : > { %v573_v7 = vadd.f32 %v557_v48, %v536_v56  ;;  %v574_v8 = vadd.f32 %v558_v49, %v537_v57  ;;  %v265_v9 = vunpack.c.h.bf16 %v759_v6  ;;  %v266_v10 = vunpack.c.l.bf16 %v760_v55 }
  0x4f   : > { %664 = vst.msk [vmem:[%s932_s15 + $0x10] sm:$0xf] %vm659_vm2, %v655_v60  ;;  %v461_v11 = vsel %vm443_vm0, %v459_v61, %v460_v62  ;;  %v280_v12 = vmul.f32 %v827_v0, %v199_v54  ;;  %v293_v14 = vmul.f32 %v832_v1, %v232_v59  ;;  %v349_v15 = vmul.f32 %v847_v3, %v199_v54 }
  0x50   : > { %v481_v16 = vadd.f32 %v461_v11, %v321_v42  ;;  %v611_v17 = vrot.slane %v573_v7, 2  ;;  %v612_v21 = vrot.slane %v574_v8, 2  ;;  %v314_v22 = vmul.f32 %v842_v2, %v265_v9 }
  0x51   : > { %v301_v23 = vadd.f32 %v293_v14, %v280_v12  ;;  %v350_v24 = vmul.f32 %v847_v3, %v200_v58  ;;  %v370_v26 = vmul.f32 %v852_v4, %v232_v59  ;;  %v371_v27 = vmul.f32 %v852_v4, %v233_v63 }
  0x52   : > { %v613_v28 = vsel %vm595_vm1, %v611_v17, %v612_v21  ;;  %v407_v29 = vmul.f32 %v857_v5, %v265_v9  ;;  %v408_v31 = vmul.f32 %v857_v5, %v266_v10  ;;  %v501_v32 = vmul.f32 %v870_v18, %v199_v54 }
  0x53   : > { %v633_v19 = vadd.f32 %v613_v28, %v481_v16  ;;  %v322_v33 = vadd.f32 %v314_v22, %v301_v23  ;;  %v386_v34 = vadd.f32 %v370_v26, %v349_v15  ;;  %v387_v35 = vadd.f32 %v371_v27, %v350_v24 }
  0x54   : > { %v502_v20 = vmul.f32 %v870_v18, %v200_v58  ;;  %v522_v37 = vmul.f32 %v880_v25, %v232_v59  ;;  %v523_v38 = vmul.f32 %v880_v25, %v233_v63  ;;  %v559_v39 = vmul.f32 %v889_v30, %v265_v9 }
  0x55   : > { %v648_v41 = vadd.f32 %v914_v13, %v633_v19  ;;  %v423_v42 = vadd.f32 %v407_v29, %v386_v34  ;;  %v424_v43 = vadd.f32 %v408_v31, %v387_v35  ;;  %v560_v44 = vmul.f32 %v889_v30, %v266_v10 }
  0x56   : > { %v538_v46 = vadd.f32 %v522_v37, %v501_v32  ;;  %v539_v47 = vadd.f32 %v523_v38, %v502_v20  ;;  %v201_v48 = vunpack.c.l.bf16 %v759_v6  ;;  %v202_v49 = vunpack.c.l.bf16 %v186_v36 }
  0x57   : > { %v656_v51 = vpack.c.bf16 %v648_v41, %v648_v41  ;;  %v462_v52 = vrot.slane %v423_v42, 1  ;;  %v463_v53 = vrot.slane %v424_v43, 1  ;;  %v234_v54 = vunpack.c.l.bf16 %v745_v40 }
  0x58   : > { %v575_v55 = vadd.f32 %v559_v39, %v538_v46  ;;  %v576_v56 = vadd.f32 %v560_v44, %v539_v47  ;;  %v235_v57 = vunpack.c.l.bf16 %v746_v45  ;;  %v267_v58 = vunpack.c.h.bf16 %v745_v40 }
  0x59   : > { %665 = vst.msk [vmem:[%s932_s15 + $0x14] sm:$0xf] %vm659_vm2, %v656_v51  ;;  %v464_v59 = vsel %vm443_vm0, %v462_v52, %v463_v53  ;;  %v268_v60 = vunpack.c.l.bf16 %v762_v50  ;;  %v281_v61 = vmul.f32 %v827_v0, %v201_v48  ;;  %v294_v62 = vmul.f32 %v832_v1, %v234_v54 }
  0x5a   : > { %v482_v63 = vadd.f32 %v464_v59, %v322_v33  ;;  %v614_v6 = vrot.slane %v575_v55, 2  ;;  %v615_v7 = vrot.slane %v576_v56, 2  ;;  %v315_v8 = vmul.f32 %v842_v2, %v267_v58 }
  0x5b   : > { %v351_v9 = vmul.f32 %v847_v3, %v201_v48  ;;  %v352_v10 = vmul.f32 %v847_v3, %v202_v49  ;;  %v372_v11 = vmul.f32 %v852_v4, %v234_v54  ;;  %v373_v14 = vmul.f32 %v852_v4, %v235_v57 }
  0x5c   : > { %v616_v12 = vsel %vm595_vm1, %v614_v6, %v615_v7  ;;  %v409_v15 = vmul.f32 %v857_v5, %v267_v58  ;;  %v410_v0 = vmul.f32 %v857_v5, %v268_v60  ;;  %v302_v16 = vadd.f32 %v294_v62, %v281_v61 }
  0x5d   : > { %v634_v1 = vadd.f32 %v616_v12, %v482_v63  ;;  %v388_v17 = vadd.f32 %v372_v11, %v351_v9  ;;  %v503_v21 = vmul.f32 %v870_v18, %v201_v48  ;;  %v389_v2 = vadd.f32 %v373_v14, %v352_v10 }
  0x5e   : > { %v504_v22 = vmul.f32 %v870_v18, %v202_v49  ;;  %v524_v3 = vmul.f32 %v880_v25, %v234_v54  ;;  %v525_v23 = vmul.f32 %v880_v25, %v235_v57  ;;  %v561_v26 = vmul.f32 %v889_v30, %v267_v58 }
  0x5f   : > { %v649_v24 = vadd.f32 %v914_v13, %v634_v1  ;;  %v425_v4 = vadd.f32 %v409_v15, %v388_v17  ;;  %v562_v5 = vmul.f32 %v889_v30, %v268_v60  ;;  %v426_v27 = vadd.f32 %v410_v0, %v389_v2 }
  0x60   : > { %v540_v28 = vadd.f32 %v524_v3, %v503_v21  ;;  %v541_v29 = vadd.f32 %v525_v23, %v504_v22  ;;  %v323_v32 = vadd.f32 %v315_v8, %v302_v16 }
  0x61   : > { %v657_v31 = vpack.c.bf16 %v649_v24, %v649_v24  ;;  %v465_v19 = vrot.slane %v425_v4, 1  ;;  %v466_v18 = vrot.slane %v426_v27, 1 }
  0x62   : > { %v577_v33 = vadd.f32 %v561_v26, %v540_v28  ;;  %v578_v34 = vadd.f32 %v562_v5, %v541_v29 }
  0x63   : > { %666 = vst.msk [vmem:[%s932_s15 + $0x18] sm:$0xf] %vm659_vm2, %v657_v31  ;;  %v467_v25 = vsel %vm443_vm0, %v465_v19, %v466_v18 }
  0x64   : > { %v617_v35 = vrot.slane %v577_v33, 2  ;;  %v618_v36 = vrot.slane %v578_v34, 2  ;;  %v483_v20 = vadd.f32 %v467_v25, %v323_v32 }
  0x66   : > { %v619_v37 = vsel %vm595_vm1, %v617_v35, %v618_v36 }
  0x67   : > { %v635_v30 = vadd.f32 %v619_v37, %v483_v20 }
  0x69   : > { %v650_v38 = vadd.f32 %v914_v13, %v635_v30 }
  0x6b   : > { %v658_v39 = vpack.c.bf16 %v650_v38, %v650_v38 }
  0x6d   : > { %667 = vst.msk [vmem:[%s932_s15 + $0x1c] sm:$0xf] %vm659_vm2, %v658_v39 }
  0x6e PF: > { %s13_s12 = sadd.s32 1, %s791_s12  }
  0x6f   : > { %p10_p4 = scmp.ge.s32.totalorder %s13_s12, 4  }
  0x71   :  { %12 = sbr.rel (!%p10_p4) target bundleno = 1 (0x1), region = 64 }

// kernel: shufflenet_forward.43
= control target key start
LH: loop header
LB: loop body
LE: loop exit
PB: predicated region body
PF: predicated region fallthrough
CT: control target
= control target key end

     0   :  { %v559_v0 = vmov 0   ;;  %vm206_vm0 = vcmask 523264   ;;  %vm408_vm1 = vcmask 388096   ;;  %s781_s1 = inlined_call_operand.vmem [shape: bf16[192,48], index: 1, kind: input, shape index: {}]   ;;  %s782_s0 = inlined_call_operand.vmem [shape: bf16[128,192], index: 0, kind: input, shape index: {}]   ;;  %s783_s2 = inlined_call_operand.vmem [shape: f32[1,48], index: 2, kind: input, shape index: {}]   ;;  %s784_s3 = inlined_call_operand.vmem [shape: bf16[128,48], index: 3, kind: output, shape index: {}]  }
   0x1   :  { %231 = vmatprep.subr.bf16.mxu0 %v559_v0  ;;  %498 = vmatprep.subr.bf16.mxu1 %v559_v0  ;;  %v523_v1 = vld [vmem:[%s781_s1] sm:$0xff]   ;;  %v524_v2 = vld [vmem:[%s781_s1 + $0x8] sm:$0xff]   ;;  %v525_v3 = vld [vmem:[%s781_s1 + $0x10] sm:$0xff]  }
   0x2   :  { %232 = vmatpush1.bf16.msra.mxu0 %v523_v1  ;;  %510 = vmatpush1.bf16.msra.mxu1 %v523_v1  ;;  %v526_v4 = vld [vmem:[%s781_s1 + $0x18] sm:$0xff]   ;;  %v537_v5 = vld [vmem:[%s782_s0 + $0x4] ss:$8 sps:$4 sm:$0xff]   ;;  %v529_v9 = vld [vmem:[%s781_s1 + $0x30] sm:$0xff]  }
   0x3   :  { %233 = vmatprep.subr.bf16.mxu0 %v559_v0  ;;  %499 = vmatprep.subr.bf16.mxu1 %v559_v0  ;;  %v527_v6 = vld [vmem:[%s781_s1 + $0x20] sm:$0xff]   ;;  %v528_v8 = vld [vmem:[%s781_s1 + $0x28] sm:$0xff]   ;;  %v530_v10 = vld [vmem:[%s781_s1 + $0x38] sm:$0xff]  }
   0x4   :  { %v540_v7 = vld [vmem:[%s782_s0 + $0x44] ss:$8 sps:$4 sm:$0xff]   ;;  %458 = vmatprep.mubr.msk.bf16.mxu0 %vm206_vm0, %v537_v5  ;;  %v533_v13 = vld [vmem:[%s781_s1 + $0x50] sm:$0xff]   ;;  %v534_v14 = vld [vmem:[%s781_s1 + $0x58] sm:$0xff]  }
   0x5   :  { %462 = vmatprep.mubr.msk.bf16.mxu1 %vm206_vm0, %v540_v7  ;;  %v531_v11 = vld [vmem:[%s781_s1 + $0x40] sm:$0xff]   ;;  %v532_v12 = vld [vmem:[%s781_s1 + $0x48] sm:$0xff]   ;;  %v541_v17 = vld [vmem:[%s782_s0 + $0x14] ss:$8 sps:$4 sm:$0xff]  }
   0x6   :  { %234 = vmatpush1.bf16.msra.mxu0 %v524_v2  ;;  %511 = vmatpush1.bf16.msra.mxu1 %v524_v2  ;;  %v535_v15 = vld [vmem:[%s782_s0] ss:$8 sps:$4 sm:$0xff]   ;;  %v543_v18 = vld [vmem:[%s782_s0 + $0x54] ss:$8 sps:$4 sm:$0xff]   ;;  %v545_v19 = vld [vmem:[%s782_s0 + $0x10] ss:$8 sps:$4 sm:$0xff]  }
   0x7   :  { %235 = vmatprep.subr.bf16.mxu0 %v559_v0  ;;  %500 = vmatprep.subr.bf16.mxu1 %v559_v0  ;;  %v538_v16 = vld [vmem:[%s782_s0 + $0x40] ss:$8 sps:$4 sm:$0xff]   ;;  %v546_v20 = vld [vmem:[%s782_s0 + $0x50] ss:$8 sps:$4 sm:$0xff]   ;;  %v547_v21 = vld [vmem:[%s782_s0 + $0x24] ss:$8 sps:$4 sm:$0xff]  }
   0x8   :  { %v549_v22 = vld [vmem:[%s782_s0 + $0x64] ss:$8 sps:$4 sm:$0xff]   ;;  %v551_v23 = vld [vmem:[%s782_s0 + $0x20] ss:$8 sps:$4 sm:$0xff]   ;;  %v553_v25 = vld [vmem:[%s782_s0 + $0x34] ss:$8 sps:$4 sm:$0xff]  }
   0x9   :  { %v552_v24 = vld [vmem:[%s782_s0 + $0x60] ss:$8 sps:$4 sm:$0xff]   ;;  %v555_v26 = vld [vmem:[%s782_s0 + $0x74] ss:$8 sps:$4 sm:$0xff]   ;;  %v557_v27 = vld [vmem:[%s782_s0 + $0x30] ss:$8 sps:$4 sm:$0xff]  }
   0xa   :  { %236 = vmatpush1.bf16.msra.mxu0 %v525_v3  ;;  %512 = vmatpush1.bf16.msra.mxu1 %v525_v3  ;;  %v558_v28 = vld [vmem:[%s782_s0 + $0x70] ss:$8 sps:$4 sm:$0xff]   ;;  %v699_v29 = vld [vmem:[%s783_s2] ss:$0 sm:$0xff] }
   0xb   :  { %237 = vmatprep.subr.bf16.mxu0 %v559_v0  ;;  %501 = vmatprep.subr.bf16.mxu1 %v559_v0 }
   0xe   :  { %238 = vmatpush1.bf16.msra.mxu0 %v526_v4  ;;  %513 = vmatpush1.bf16.msra.mxu1 %v526_v4 }
   0xf   :  { %239 = vmatprep.subr.bf16.mxu0 %v559_v0  ;;  %502 = vmatprep.subr.bf16.mxu1 %v559_v0 }
  0x12   :  { %240 = vmatpush1.bf16.msra.mxu0 %v527_v6  ;;  %514 = vmatpush1.bf16.msra.mxu1 %v527_v6 }
  0x13   :  { %241 = vmatprep.subr.bf16.mxu0 %v559_v0  ;;  %503 = vmatprep.subr.bf16.mxu1 %v559_v0 }
  0x16   :  { %242 = vmatpush1.bf16.msra.mxu0 %v528_v8  ;;  %515 = vmatpush1.bf16.msra.mxu1 %v528_v8 }
  0x17   :  { %243 = vmatprep.subr.bf16.mxu0 %v559_v0  ;;  %504 = vmatprep.subr.bf16.mxu1 %v559_v0 }
  0x1a   :  { %244 = vmatpush1.bf16.msra.mxu0 %v529_v9  ;;  %516 = vmatpush1.bf16.msra.mxu1 %v529_v9 }
  0x1b   :  { %245 = vmatprep.subr.bf16.mxu0 %v559_v0  ;;  %505 = vmatprep.subr.bf16.mxu1 %v559_v0 }
  0x1e   :  { %246 = vmatpush1.bf16.msra.mxu0 %v530_v10  ;;  %517 = vmatpush1.bf16.msra.mxu1 %v530_v10 }
  0x1f   :  { %247 = vmatprep.subr.bf16.mxu0 %v559_v0  ;;  %506 = vmatprep.subr.bf16.mxu1 %v559_v0 }
  0x22   :  { %248 = vmatpush1.bf16.msra.mxu0 %v531_v11  ;;  %518 = vmatpush1.bf16.msra.mxu1 %v531_v11 }
  0x23   :  { %249 = vmatprep.subr.bf16.mxu0 %v559_v0  ;;  %507 = vmatprep.subr.bf16.mxu1 %v559_v0 }
  0x26   :  { %250 = vmatpush1.bf16.msra.mxu0 %v532_v12  ;;  %519 = vmatpush1.bf16.msra.mxu1 %v532_v12 }
  0x27   :  { %251 = vmatprep.subr.bf16.mxu0 %v559_v0  ;;  %508 = vmatprep.subr.bf16.mxu1 %v559_v0 }
  0x2a   :  { %252 = vmatpush1.bf16.msra.mxu0 %v533_v13  ;;  %520 = vmatpush1.bf16.msra.mxu1 %v533_v13 }
  0x2b   :  { %253 = vmatprep.subr.bf16.mxu0 %v559_v0  ;;  %509 = vmatprep.subr.bf16.mxu1 %v559_v0 }
  0x2e   :  { %254 = vmatpush1.bf16.msra.mxu0 %v534_v14  ;;  %521 = vmatpush1.bf16.msra.mxu1 %v534_v14 }
  0x31   :  { %264 = vmatmul.mubr.bf16.vlgmr.msra.gmra.mrb[0].mxu0 %v535_v15  ;;  %296 = vmatmul.mubr.bf16.vlgmr.msra.gmra.mrb[0].mxu1 %v538_v16 }
  0x32   :  { %459 = vmatprep.mubr.msk.bf16.mxu0 %vm206_vm0, %v541_v17  ;;  %463 = vmatprep.mubr.msk.bf16.mxu1 %vm206_vm0, %v543_v18 }
  0x39   :  { %272 = vmatmul.mubr.bf16.gmra.mrb[4].mxu0 %v545_v19  ;;  %304 = vmatmul.mubr.bf16.gmra.mrb[4].mxu1 %v546_v20 }
  0x3a   :  { %460 = vmatprep.mubr.msk.bf16.mxu0 %vm206_vm0, %v547_v21  ;;  %464 = vmatprep.mubr.msk.bf16.mxu1 %vm206_vm0, %v549_v22 }
  0x41   :  { %280 = vmatmul.mubr.bf16.gmra.mrb[8].mxu0 %v551_v23  ;;  %312 = vmatmul.mubr.bf16.gmra.mrb[8].mxu1 %v552_v24 }
  0x42   :  { %461 = vmatprep.mubr.msk.bf16.mxu0 %vm206_vm0, %v553_v25  ;;  %465 = vmatprep.mubr.msk.bf16.mxu1 %vm206_vm0, %v555_v26 }
  0x49   :  { %288 = vmatmul.mubr.bf16.gmra.mrb[12].mxu0 %v557_v27  ;;  %320 = vmatmul.mubr.bf16.gmra.mrb[12].mxu1 %v558_v28 }
 0x104   :  { %v265_v30 = vpop.f32.mrb[0].mxu0  ;;  %v297_v31 = vpop.f32.mrb[0].mxu1 }
 0x105   :  { %v266_v32 = vadd.f32 %v699_v29, %v265_v30  ;;  %v298_v33 = vadd.f32 %v699_v29, %v297_v31  ;;  %v267_v34 = vpop.f32.mrb[1].mxu0  ;;  %v299_v35 = vpop.f32.mrb[1].mxu1 }
 0x106   :  { %v268_v36 = vpop.f32.mrb[2].mxu0  ;;  %v300_v37 = vpop.f32.mrb[2].mxu1 }
 0x107   :  { %v328_v38 = vmax.f32 %v266_v32, 0.0  ;;  %v336_v39 = vmax.f32 %v298_v33, 0.0  ;;  %v269_v40 = vadd.f32 %v699_v29, %v268_v36  ;;  %v301_v41 = vadd.f32 %v699_v29, %v300_v37  ;;  %v270_v42 = vpop.f32.mrb[3].mxu0  ;;  %v302_v43 = vpop.f32.mrb[3].mxu1 }
 0x109   :  { %v482_v44 = vpack.c.bf16 %v328_v38, %v328_v38  ;;  %v490_v45 = vpack.c.bf16 %v336_v39, %v336_v39  ;;  %v329_v46 = vmax.f32 %v269_v40, 0.0  ;;  %v337_v47 = vmax.f32 %v301_v41, 0.0 }
 0x10b   :  { %409 = vst.msk [vmem:[%s784_s3] sm:$0xf] %vm408_vm1, %v482_v44  ;;  %417 = vst.msk [vmem:[%s784_s3 + $0x20] sm:$0xf] %vm408_vm1, %v490_v45  ;;  %v483_v48 = vpack.c.bf16 %v329_v46, %v329_v46  ;;  %v491_v49 = vpack.c.bf16 %v337_v47, %v337_v47 }
 0x10c   :  { %v273_v50 = vpop.f32.mrb[4].mxu0  ;;  %v305_v51 = vpop.f32.mrb[4].mxu1 }
 0x10d   :  { %410 = vst.msk [vmem:[%s784_s3 + $0x4] sm:$0xf] %vm408_vm1, %v483_v48  ;;  %418 = vst.msk [vmem:[%s784_s3 + $0x24] sm:$0xf] %vm408_vm1, %v491_v49  ;;  %v274_v52 = vadd.f32 %v699_v29, %v273_v50  ;;  %v306_v53 = vadd.f32 %v699_v29, %v305_v51  ;;  %v275_v54 = vpop.f32.mrb[5].mxu0  ;;  %v307_v55 = vpop.f32.mrb[5].mxu1 }
 0x10e   :  { %v276_v56 = vpop.f32.mrb[6].mxu0  ;;  %v308_v57 = vpop.f32.mrb[6].mxu1 }
 0x10f   :  { %v330_v58 = vmax.f32 %v274_v52, 0.0  ;;  %v338_v59 = vmax.f32 %v306_v53, 0.0  ;;  %v277_v60 = vadd.f32 %v699_v29, %v276_v56  ;;  %v309_v61 = vadd.f32 %v699_v29, %v308_v57  ;;  %v278_v62 = vpop.f32.mrb[7].mxu0  ;;  %v310_v63 = vpop.f32.mrb[7].mxu1 }
 0x111   :  { %v484_v0 = vpack.c.bf16 %v330_v58, %v330_v58  ;;  %v492_v1 = vpack.c.bf16 %v338_v59, %v338_v59  ;;  %v331_v2 = vmax.f32 %v277_v60, 0.0  ;;  %v339_v3 = vmax.f32 %v309_v61, 0.0 }
 0x113   :  { %411 = vst.msk [vmem:[%s784_s3 + $0x8] sm:$0xf] %vm408_vm1, %v484_v0  ;;  %419 = vst.msk [vmem:[%s784_s3 + $0x28] sm:$0xf] %vm408_vm1, %v492_v1  ;;  %v485_v4 = vpack.c.bf16 %v331_v2, %v331_v2  ;;  %v493_v5 = vpack.c.bf16 %v339_v3, %v339_v3 }
 0x114   :  { %v281_v6 = vpop.f32.mrb[8].mxu0  ;;  %v313_v7 = vpop.f32.mrb[8].mxu1 }
 0x115   :  { %412 = vst.msk [vmem:[%s784_s3 + $0xc] sm:$0xf] %vm408_vm1, %v485_v4  ;;  %420 = vst.msk [vmem:[%s784_s3 + $0x2c] sm:$0xf] %vm408_vm1, %v493_v5  ;;  %v282_v8 = vadd.f32 %v699_v29, %v281_v6  ;;  %v314_v9 = vadd.f32 %v699_v29, %v313_v7  ;;  %v283_v10 = vpop.f32.mrb[9].mxu0  ;;  %v315_v11 = vpop.f32.mrb[9].mxu1 }
 0x116   :  { %v284_v12 = vpop.f32.mrb[10].mxu0  ;;  %v316_v13 = vpop.f32.mrb[10].mxu1 }
 0x117   :  { %v332_v14 = vmax.f32 %v282_v8, 0.0  ;;  %v340_v15 = vmax.f32 %v314_v9, 0.0  ;;  %v285_v16 = vadd.f32 %v699_v29, %v284_v12  ;;  %v317_v17 = vadd.f32 %v699_v29, %v316_v13  ;;  %v286_v18 = vpop.f32.mrb[11].mxu0  ;;  %v318_v19 = vpop.f32.mrb[11].mxu1 }
 0x119   :  { %v486_v20 = vpack.c.bf16 %v332_v14, %v332_v14  ;;  %v494_v21 = vpack.c.bf16 %v340_v15, %v340_v15  ;;  %v333_v22 = vmax.f32 %v285_v16, 0.0  ;;  %v341_v23 = vmax.f32 %v317_v17, 0.0 }
 0x11b   :  { %413 = vst.msk [vmem:[%s784_s3 + $0x10] sm:$0xf] %vm408_vm1, %v486_v20  ;;  %421 = vst.msk [vmem:[%s784_s3 + $0x30] sm:$0xf] %vm408_vm1, %v494_v21  ;;  %v487_v24 = vpack.c.bf16 %v333_v22, %v333_v22  ;;  %v495_v25 = vpack.c.bf16 %v341_v23, %v341_v23 }
 0x11c   :  { %v289_v26 = vpop.f32.mrb[12].mxu0  ;;  %v321_v27 = vpop.f32.mrb[12].mxu1 }
 0x11d   :  { %414 = vst.msk [vmem:[%s784_s3 + $0x14] sm:$0xf] %vm408_vm1, %v487_v24  ;;  %422 = vst.msk [vmem:[%s784_s3 + $0x34] sm:$0xf] %vm408_vm1, %v495_v25  ;;  %v290_v28 = vadd.f32 %v699_v29, %v289_v26  ;;  %v322_v30 = vadd.f32 %v699_v29, %v321_v27  ;;  %v291_v31 = vpop.f32.mrb[13].mxu0  ;;  %v323_v32 = vpop.f32.mrb[13].mxu1 }
 0x11e   :  { %v292_v33 = vpop.f32.mrb[14].mxu0  ;;  %v324_v34 = vpop.f32.mrb[14].mxu1 }
 0x11f   :  { %v334_v35 = vmax.f32 %v290_v28, 0.0  ;;  %v342_v36 = vmax.f32 %v322_v30, 0.0  ;;  %v293_v37 = vadd.f32 %v699_v29, %v292_v33  ;;  %v325_v38 = vadd.f32 %v699_v29, %v324_v34  ;;  %v294_v39 = vpop.f32.mrb[15].mxu0  ;;  %v326_v40 = vpop.f32.mrb[15].mxu1 }
 0x121   :  { %v488_v41 = vpack.c.bf16 %v334_v35, %v334_v35  ;;  %v496_v42 = vpack.c.bf16 %v342_v36, %v342_v36  ;;  %v335_v43 = vmax.f32 %v293_v37, 0.0  ;;  %v343_v44 = vmax.f32 %v325_v38, 0.0 }
 0x123   :  { %415 = vst.msk [vmem:[%s784_s3 + $0x18] sm:$0xf] %vm408_vm1, %v488_v41  ;;  %423 = vst.msk [vmem:[%s784_s3 + $0x38] sm:$0xf] %vm408_vm1, %v496_v42  ;;  %v489_v45 = vpack.c.bf16 %v335_v43, %v335_v43  ;;  %v497_v46 = vpack.c.bf16 %v343_v44, %v343_v44 }
 0x125   :  { %416 = vst.msk [vmem:[%s784_s3 + $0x1c] sm:$0xf] %vm408_vm1, %v489_v45  ;;  %424 = vst.msk [vmem:[%s784_s3 + $0x3c] sm:$0xf] %vm408_vm1, %v497_v46 }

// kernel: shufflenet_forward.46
= control target key start
LH: loop header
LB: loop body
LE: loop exit
PB: predicated region body
PF: predicated region fallthrough
CT: control target
= control target key end

     0   :  { %vm721_vm0 = vcmask 523264   ;;  %s2887_s1 = inlined_call_operand.vmem [shape: bf16[192,1024], index: 1, kind: input, shape index: {}]   ;;  %s2888_s0 = inlined_call_operand.vmem [shape: bf16[128,192], index: 0, kind: input, shape index: {}]   ;;  %s2889_s2 = inlined_call_operand.vmem [shape: f32[1,1024], index: 2, kind: input, shape index: {}]   ;;  %s2890_s3 = inlined_call_operand.vmem [shape: bf16[128,1024], index: 3, kind: output, shape index: {}]  }
   0x1   :  { %v31_v0 = vld [vmem:[%s2887_s1] sm:$0xff]  ;;  %v32_v2 = vld [vmem:[%s2887_s1 + $0x8] sm:$0xff] }
   0x2   :  { %v35_v1 = vld [vmem:[%s2887_s1 + $0x20] sm:$0xff]  ;;  %v36_v4 = vld [vmem:[%s2887_s1 + $0x28] sm:$0xff] }
   0x3   :  { %v1795_v3 = vcombine.high %v31_v0, %v35_v1  ;;  %v1794_v5 = vcombine.low %v31_v0, %v35_v1  ;;  %v39_v6 = vld [vmem:[%s2887_s1 + $0x40] sm:$0xff]  ;;  %v1797_v8 = vcombine.high %v32_v2, %v36_v4  ;;  %v1796_v9 = vcombine.low %v32_v2, %v36_v4  ;;  %v40_v11 = vld [vmem:[%s2887_s1 + $0x48] sm:$0xff] }
   0x4   :  { %v43_v7 = vld [vmem:[%s2887_s1 + $0x60] sm:$0xff]  ;;  %v44_v12 = vld [vmem:[%s2887_s1 + $0x68] sm:$0xff] }
   0x5   :  { %v1803_v10 = vcombine.high %v39_v6, %v43_v7  ;;  %v47_v13 = vld [vmem:[%s2887_s1 + $0x80] sm:$0xff]  ;;  %746 = vmatprep.subr.bf16.mxu0 %v1795_v3  ;;  %v1805_v14 = vcombine.high %v40_v11, %v44_v12  ;;  %v48_v16 = vld [vmem:[%s2887_s1 + $0x88] sm:$0xff]  ;;  %859 = vmatprep.subr.bf16.mxu1 %v1797_v8  ;;  %v1802_v18 = vcombine.low %v39_v6, %v43_v7 }
   0x6   :  { %v51_v15 = vld [vmem:[%s2887_s1 + $0xa0] sm:$0xff]  ;;  %v52_v17 = vld [vmem:[%s2887_s1 + $0xa8] sm:$0xff]  ;;  %747 = vmatpush1.bf16.msra.mxu0 %v1794_v5  ;;  %860 = vmatpush1.bf16.msra.mxu1 %v1796_v9  ;;  %v1804_v19 = vcombine.low %v40_v11, %v44_v12 }
   0x7   :  { %748 = vmatprep.subr.bf16.mxu0 %v1803_v10  ;;  %v1811_v20 = vcombine.high %v47_v13, %v51_v15  ;;  %861 = vmatprep.subr.bf16.mxu1 %v1805_v14  ;;  %v1813_v21 = vcombine.high %v48_v16, %v52_v17  ;;  %v55_v22 = vld [vmem:[%s2887_s1 + $0xc0] sm:$0xff]  ;;  %v56_v24 = vld [vmem:[%s2887_s1 + $0xc8] sm:$0xff]  ;;  %v1810_v26 = vcombine.low %v47_v13, %v51_v15 }
   0x8   :  { %v59_v23 = vld [vmem:[%s2887_s1 + $0xe0] sm:$0xff]  ;;  %v60_v25 = vld [vmem:[%s2887_s1 + $0xe8] sm:$0xff]  ;;  %v1812_v27 = vcombine.low %v48_v16, %v52_v17 }
   0x9   :  { %v1819_v28 = vcombine.high %v55_v22, %v59_v23  ;;  %v1821_v29 = vcombine.high %v56_v24, %v60_v25  ;;  %v63_v30 = vld [vmem:[%s2887_s1 + $0x100] sm:$0xff]  ;;  %v64_v32 = vld [vmem:[%s2887_s1 + $0x108] sm:$0xff]  ;;  %v1818_v34 = vcombine.low %v55_v22, %v59_v23  ;;  %v1820_v35 = vcombine.low %v56_v24, %v60_v25 }
   0xa   :  { %749 = vmatpush1.bf16.msra.mxu0 %v1802_v18  ;;  %862 = vmatpush1.bf16.msra.mxu1 %v1804_v19  ;;  %v67_v31 = vld [vmem:[%s2887_s1 + $0x120] sm:$0xff]  ;;  %v68_v33 = vld [vmem:[%s2887_s1 + $0x128] sm:$0xff] }
   0xb   :  { %750 = vmatprep.subr.bf16.mxu0 %v1811_v20  ;;  %863 = vmatprep.subr.bf16.mxu1 %v1813_v21  ;;  %v1827_v36 = vcombine.high %v63_v30, %v67_v31  ;;  %v1829_v37 = vcombine.high %v64_v32, %v68_v33  ;;  %v71_v38 = vld [vmem:[%s2887_s1 + $0x140] sm:$0xff]  ;;  %v72_v40 = vld [vmem:[%s2887_s1 + $0x148] sm:$0xff]  ;;  %v1826_v42 = vcombine.low %v63_v30, %v67_v31  ;;  %v33_v31 = vld [vmem:[%s2887_s1 + $0x10] sm:$0xff] }
   0xc   :  { %v75_v39 = vld [vmem:[%s2887_s1 + $0x160] sm:$0xff]  ;;  %v76_v41 = vld [vmem:[%s2887_s1 + $0x168] sm:$0xff]  ;;  %v1828_v44 = vcombine.low %v64_v32, %v68_v33  ;;  %v37_v32 = vld [vmem:[%s2887_s1 + $0x30] sm:$0xff] }
   0xd   :  { %v2169_v43 = vld [vmem:[%s2888_s0 + $0x4] ss:$8 sps:$4 sm:$0xff]   ;;  %v1835_v45 = vcombine.high %v71_v38, %v75_v39  ;;  %v1837_v46 = vcombine.high %v72_v40, %v76_v41  ;;  %v1834_v51 = vcombine.low %v71_v38, %v75_v39  ;;  %v1836_v52 = vcombine.low %v72_v40, %v76_v41  ;;  %v34_v33 = vld [vmem:[%s2887_s1 + $0x18] sm:$0xff]  ;;  %v41_v39 = vld [vmem:[%s2887_s1 + $0x50] sm:$0xff] }
   0xe   :  { %751 = vmatpush1.bf16.msra.mxu0 %v1810_v26  ;;  %864 = vmatpush1.bf16.msra.mxu1 %v1812_v27  ;;  %v79_v47 = vld [vmem:[%s2887_s1 + $0x180] sm:$0xff]  ;;  %v80_v49 = vld [vmem:[%s2887_s1 + $0x188] sm:$0xff]  ;;  %v45_v40 = vld [vmem:[%s2887_s1 + $0x70] sm:$0xff] }
   0xf   :  { %752 = vmatprep.subr.bf16.mxu0 %v1819_v28  ;;  %865 = vmatprep.subr.bf16.mxu1 %v1821_v29  ;;  %v83_v48 = vld [vmem:[%s2887_s1 + $0x1a0] sm:$0xff]  ;;  %v84_v50 = vld [vmem:[%s2887_s1 + $0x1a8] sm:$0xff] }
  0x10   :  { %1890 = vmatprep.mubr.msk.bf16.mxu0 %vm721_vm0, %v2169_v43  ;;  %1898 = vmatprep.mubr.msk.bf16.mxu1 %vm721_vm0, %v2169_v43  ;;  %v1843_v53 = vcombine.high %v79_v47, %v83_v48  ;;  %v1845_v54 = vcombine.high %v80_v49, %v84_v50  ;;  %v87_v55 = vld [vmem:[%s2887_s1 + $0x1c0] sm:$0xff]  ;;  %v88_v57 = vld [vmem:[%s2887_s1 + $0x1c8] sm:$0xff]  ;;  %v1842_v59 = vcombine.low %v79_v47, %v83_v48 }
  0x11   :  { %v91_v56 = vld [vmem:[%s2887_s1 + $0x1e0] sm:$0xff]  ;;  %v92_v58 = vld [vmem:[%s2887_s1 + $0x1e8] sm:$0xff]  ;;  %v1844_v60 = vcombine.low %v80_v49, %v84_v50  ;;  %v1807_v47 = vcombine.high %v41_v39, %v45_v40  ;;  %v2279_v49 = vld [vmem:[%s2888_s0 + $0x14] ss:$8 sps:$4 sm:$0xff]  }
  0x12   :  { %753 = vmatpush1.bf16.msra.mxu0 %v1818_v34  ;;  %866 = vmatpush1.bf16.msra.mxu1 %v1820_v35  ;;  %v1851_v61 = vcombine.high %v87_v55, %v91_v56  ;;  %v1853_v62 = vcombine.high %v88_v57, %v92_v58  ;;  %v95_v63 = vld [vmem:[%s2887_s1 + $0x200] sm:$0xff]  ;;  %v96_v1 = vld [vmem:[%s2887_s1 + $0x208] sm:$0xff]  ;;  %v1850_v3 = vcombine.low %v87_v55, %v91_v56  ;;  %v38_v34 = vld [vmem:[%s2887_s1 + $0x38] sm:$0xff] }
  0x13   :  { %754 = vmatprep.subr.bf16.mxu0 %v1827_v36  ;;  %867 = vmatprep.subr.bf16.mxu1 %v1829_v37  ;;  %v99_v0 = vld [vmem:[%s2887_s1 + $0x220] sm:$0xff]  ;;  %v100_v2 = vld [vmem:[%s2887_s1 + $0x228] sm:$0xff]  ;;  %v1852_v4 = vcombine.low %v88_v57, %v92_v58  ;;  %v1799_v37 = vcombine.high %v33_v31, %v37_v32  ;;  %v1801_v38 = vcombine.high %v34_v33, %v38_v34  ;;  %v49_v50 = vld [vmem:[%s2887_s1 + $0x90] sm:$0xff] }
  0x14   :  { %v1859_v5 = vcombine.high %v95_v63, %v99_v0  ;;  %v1861_v6 = vcombine.high %v96_v1, %v100_v2  ;;  %v103_v7 = vld [vmem:[%s2887_s1 + $0x240] sm:$0xff]  ;;  %v104_v9 = vld [vmem:[%s2887_s1 + $0x248] sm:$0xff]  ;;  %v1858_v11 = vcombine.low %v95_v63, %v99_v0  ;;  %v1860_v12 = vcombine.low %v96_v1, %v100_v2  ;;  %v2302_v58 = vld [vmem:[%s2888_s0 + $0x10] ss:$8 sps:$4 sm:$0xff]  }
  0x15   :  { %v107_v8 = vld [vmem:[%s2887_s1 + $0x260] sm:$0xff]  ;;  %v108_v10 = vld [vmem:[%s2887_s1 + $0x268] sm:$0xff]  ;;  %v62_v63 = vld [vmem:[%s2887_s1 + $0xf8] sm:$0xff] }
  0x16   :  { %755 = vmatpush1.bf16.msra.mxu0 %v1826_v42  ;;  %868 = vmatpush1.bf16.msra.mxu1 %v1828_v44  ;;  %v1867_v13 = vcombine.high %v103_v7, %v107_v8  ;;  %v1869_v14 = vcombine.high %v104_v9, %v108_v10  ;;  %v111_v15 = vld [vmem:[%s2887_s1 + $0x280] sm:$0xff]  ;;  %v112_v17 = vld [vmem:[%s2887_s1 + $0x288] sm:$0xff]  ;;  %v1866_v19 = vcombine.low %v103_v7, %v107_v8  ;;  %v42_v42 = vld [vmem:[%s2887_s1 + $0x58] sm:$0xff] }
  0x17   :  { %756 = vmatprep.subr.bf16.mxu0 %v1835_v45  ;;  %869 = vmatprep.subr.bf16.mxu1 %v1837_v46  ;;  %v115_v16 = vld [vmem:[%s2887_s1 + $0x2a0] sm:$0xff]  ;;  %v116_v18 = vld [vmem:[%s2887_s1 + $0x2a8] sm:$0xff]  ;;  %v1868_v20 = vcombine.low %v104_v9, %v108_v10  ;;  %v46_v44 = vld [vmem:[%s2887_s1 + $0x78] sm:$0xff]  ;;  %v1798_v45 = vcombine.low %v33_v31, %v37_v32  ;;  %v1800_v46 = vcombine.low %v34_v33, %v38_v34 }
  0x18   :  { %v1875_v21 = vcombine.high %v111_v15, %v115_v16  ;;  %v1877_v22 = vcombine.high %v112_v17, %v116_v18  ;;  %v119_v23 = vld [vmem:[%s2887_s1 + $0x2c0] sm:$0xff]  ;;  %v120_v25 = vld [vmem:[%s2887_s1 + $0x2c8] sm:$0xff]  ;;  %v1874_v27 = vcombine.low %v111_v15, %v115_v16  ;;  %v1876_v28 = vcombine.low %v112_v17, %v116_v18  ;;  %v70_v7 = vld [vmem:[%s2887_s1 + $0x138] sm:$0xff] }
  0x19   :  { %v123_v24 = vld [vmem:[%s2887_s1 + $0x2e0] sm:$0xff]  ;;  %v124_v26 = vld [vmem:[%s2887_s1 + $0x2e8] sm:$0xff]  ;;  %v1809_v48 = vcombine.high %v42_v42, %v46_v44  ;;  %v1808_v55 = vcombine.low %v42_v42, %v46_v44  ;;  %v2353_v15 = vld [vmem:[%s2888_s0 + $0x34] ss:$8 sps:$4 sm:$0xff]  }
  0x1a   :  { %757 = vmatpush1.bf16.msra.mxu0 %v1834_v51  ;;  %870 = vmatpush1.bf16.msra.mxu1 %v1836_v52  ;;  %v1883_v29 = vcombine.high %v119_v23, %v123_v24  ;;  %v1885_v30 = vcombine.high %v120_v25, %v124_v26  ;;  %v1882_v35 = vcombine.low %v119_v23, %v123_v24  ;;  %v2268_v41 = vld [vmem:[%s2888_s0] ss:$8 sps:$4 sm:$0xff]   ;;  %v53_v51 = vld [vmem:[%s2887_s1 + $0xb0] sm:$0xff]  ;;  %v50_v52 = vld [vmem:[%s2887_s1 + $0x98] sm:$0xff] }
  0x1b   :  { %758 = vmatprep.subr.bf16.mxu0 %v1843_v53  ;;  %871 = vmatprep.subr.bf16.mxu1 %v1845_v54  ;;  %v1884_v36 = vcombine.low %v120_v25, %v124_v26  ;;  %v54_v53 = vld [vmem:[%s2887_s1 + $0xb8] sm:$0xff]  ;;  %v1806_v54 = vcombine.low %v41_v39, %v45_v40  ;;  %v1815_v56 = vcombine.high %v49_v50, %v53_v51  ;;  %v2319_v1 = vld [vmem:[%s2888_s0 + $0x24] ss:$8 sps:$4 sm:$0xff]   ;;  %v85_v23 = vld [vmem:[%s2887_s1 + $0x1b0] sm:$0xff] }
  0x1c   :  { %v1817_v57 = vcombine.high %v50_v52, %v54_v53  ;;  %v1816_v0 = vcombine.low %v50_v52, %v54_v53  ;;  %v74_v16 = vld [vmem:[%s2887_s1 + $0x158] sm:$0xff]  ;;  %v89_v31 = vld [vmem:[%s2887_s1 + $0x1d0] sm:$0xff]  ;;  %v2393_v33 = vld [vmem:[%s2888_s0 + $0x44] ss:$8 sps:$4 sm:$0xff]  }
  0x1d   :  { %v78_v17 = vld [vmem:[%s2887_s1 + $0x178] sm:$0xff]  ;;  %v93_v32 = vld [vmem:[%s2887_s1 + $0x1f0] sm:$0xff] }
  0x1e   :  { %759 = vmatpush1.bf16.msra.mxu0 %v1842_v59  ;;  %872 = vmatpush1.bf16.msra.mxu1 %v1844_v60  ;;  %v57_v59 = vld [vmem:[%s2887_s1 + $0xd0] sm:$0xff]  ;;  %v82_v24 = vld [vmem:[%s2887_s1 + $0x198] sm:$0xff] }
  0x1f   :  { %760 = vmatprep.subr.bf16.mxu0 %v1851_v61  ;;  %873 = vmatprep.subr.bf16.mxu1 %v1853_v62  ;;  %v61_v60 = vld [vmem:[%s2887_s1 + $0xf0] sm:$0xff]  ;;  %v1814_v61 = vcombine.low %v49_v50, %v53_v51  ;;  %v58_v62 = vld [vmem:[%s2887_s1 + $0xd8] sm:$0xff]  ;;  %v2422_v50 = vld [vmem:[%s2888_s0 + $0x40] ss:$8 sps:$4 sm:$0xff]  }
  0x20   :  { %v1823_v2 = vcombine.high %v57_v59, %v61_v60  ;;  %v1822_v8 = vcombine.low %v57_v59, %v61_v60  ;;  %v1824_v9 = vcombine.low %v58_v62, %v62_v63  ;;  %v86_v25 = vld [vmem:[%s2887_s1 + $0x1b8] sm:$0xff]  ;;  %v97_v40 = vld [vmem:[%s2887_s1 + $0x210] sm:$0xff] }
  0x21   :  { %v90_v34 = vld [vmem:[%s2887_s1 + $0x1d8] sm:$0xff]  ;;  %v101_v42 = vld [vmem:[%s2887_s1 + $0x230] sm:$0xff] }
  0x22   :  { %761 = vmatpush1.bf16.msra.mxu0 %v1850_v3  ;;  %874 = vmatpush1.bf16.msra.mxu1 %v1852_v4  ;;  %v65_v3 = vld [vmem:[%s2887_s1 + $0x110] sm:$0xff]  ;;  %v98_v44 = vld [vmem:[%s2887_s1 + $0x218] sm:$0xff] }
  0x23   :  { %762 = vmatprep.subr.bf16.mxu0 %v1859_v5  ;;  %875 = vmatprep.subr.bf16.mxu1 %v1861_v6  ;;  %v69_v4 = vld [vmem:[%s2887_s1 + $0x130] sm:$0xff]  ;;  %v1825_v5 = vcombine.high %v58_v62, %v62_v63  ;;  %v66_v6 = vld [vmem:[%s2887_s1 + $0x118] sm:$0xff] }
  0x24   :  { %v1831_v10 = vcombine.high %v65_v3, %v69_v4  ;;  %v1830_v18 = vcombine.low %v65_v3, %v69_v4  ;;  %v105_v52 = vld [vmem:[%s2887_s1 + $0x250] sm:$0xff] }
  0x25   :  { %v109_v53 = vld [vmem:[%s2887_s1 + $0x270] sm:$0xff] }
  0x26   :  { %763 = vmatpush1.bf16.msra.mxu0 %v1858_v11  ;;  %876 = vmatpush1.bf16.msra.mxu1 %v1860_v12  ;;  %v1833_v11 = vcombine.high %v66_v6, %v70_v7  ;;  %v2342_v12 = vld [vmem:[%s2888_s0 + $0x20] ss:$8 sps:$4 sm:$0xff]   ;;  %v1871_v60 = vcombine.high %v105_v52, %v109_v53  ;;  %v113_v62 = vld [vmem:[%s2887_s1 + $0x290] sm:$0xff]  ;;  %v1870_v3 = vcombine.low %v105_v52, %v109_v53 }
  0x27   :  { %764 = vmatprep.subr.bf16.mxu0 %v1867_v13  ;;  %877 = vmatprep.subr.bf16.mxu1 %v1869_v14  ;;  %v73_v13 = vld [vmem:[%s2887_s1 + $0x150] sm:$0xff] }
  0x28   :  { %v77_v14 = vld [vmem:[%s2887_s1 + $0x170] sm:$0xff] }
  0x29   :  { %v1838_v26 = vcombine.low %v73_v13, %v77_v14  ;;  %v117_v63 = vld [vmem:[%s2887_s1 + $0x2b0] sm:$0xff] }
  0x2a   :  { %765 = vmatpush1.bf16.msra.mxu0 %v1866_v19  ;;  %878 = vmatpush1.bf16.msra.mxu1 %v1868_v20  ;;  %v1832_v19 = vcombine.low %v66_v6, %v70_v7  ;;  %v1839_v20 = vcombine.high %v73_v13, %v77_v14  ;;  %v2067_v6 = vld [vmem:[%s2888_s0 + $0x50] ss:$8 sps:$4 sm:$0xff]   ;;  %v1878_v14 = vcombine.low %v113_v62, %v117_v63 }
  0x2b   :  { %766 = vmatprep.subr.bf16.mxu0 %v1875_v21  ;;  %879 = vmatprep.subr.bf16.mxu1 %v1877_v22  ;;  %v1841_v21 = vcombine.high %v74_v16, %v78_v17  ;;  %v81_v22 = vld [vmem:[%s2887_s1 + $0x190] sm:$0xff]  ;;  %v126_v13 = vld [vmem:[%s2887_s1 + $0x2f8] sm:$0xff] }
  0x2e   :  { %767 = vmatpush1.bf16.msra.mxu0 %v1874_v27  ;;  %880 = vmatpush1.bf16.msra.mxu1 %v1876_v28  ;;  %v1840_v27 = vcombine.low %v74_v16, %v78_v17  ;;  %v1847_v28 = vcombine.high %v81_v22, %v85_v23 }
  0x2f   :  { %768 = vmatprep.subr.bf16.mxu0 %v1883_v29  ;;  %881 = vmatprep.subr.bf16.mxu1 %v1885_v30  ;;  %v2382_v29 = vld [vmem:[%s2888_s0 + $0x30] ss:$8 sps:$4 sm:$0xff]   ;;  %v1849_v30 = vcombine.high %v82_v24, %v86_v25 }
  0x32   :  { %769 = vmatpush1.bf16.msra.mxu0 %v1882_v35  ;;  %882 = vmatpush1.bf16.msra.mxu1 %v1884_v36  ;;  %v94_v35 = vld [vmem:[%s2887_s1 + $0x1f8] sm:$0xff]  ;;  %v1846_v36 = vcombine.low %v81_v22, %v85_v23 }
  0x33   :  { %972 = vmatprep.subr.bf16.mxu0 %v1799_v37  ;;  %1085 = vmatprep.subr.bf16.mxu1 %v1801_v38  ;;  %v1848_v37 = vcombine.low %v82_v24, %v86_v25  ;;  %v1855_v38 = vcombine.high %v89_v31, %v93_v32  ;;  %v1857_v39 = vcombine.high %v90_v34, %v94_v35  ;;  %v2071_v22 = vld [vmem:[%s2888_s0 + $0x74] ss:$8 sps:$4 sm:$0xff]   ;;  %v2073_v23 = vld [vmem:[%s2888_s0 + $0x70] ss:$8 sps:$4 sm:$0xff]  }
  0x35   :  { %779 = vmatmul.mubr.bf16.vlgmr.msra.gmra.mrb[0].mxu0 %v2268_v41  ;;  %892 = vmatmul.mubr.bf16.vlgmr.msra.gmra.mrb[0].mxu1 %v2268_v41 }
  0x36   :  { %973 = vmatpush1.bf16.msra.mxu0 %v1798_v45  ;;  %1086 = vmatpush1.bf16.msra.mxu1 %v1800_v46  ;;  %v102_v45 = vld [vmem:[%s2887_s1 + $0x238] sm:$0xff]  ;;  %v1854_v46 = vcombine.low %v89_v31, %v93_v32 }
  0x37   :  { %974 = vmatprep.subr.bf16.mxu0 %v1807_v47  ;;  %1087 = vmatprep.subr.bf16.mxu1 %v1809_v48  ;;  %v1856_v47 = vcombine.low %v90_v34, %v94_v35  ;;  %v1863_v48 = vcombine.high %v97_v40, %v101_v42  ;;  %v1865_v51 = vcombine.high %v98_v44, %v102_v45 }
  0x38   :  { %1891 = vmatprep.mubr.msk.bf16.mxu0 %vm721_vm0, %v2279_v49  ;;  %1899 = vmatprep.mubr.msk.bf16.mxu1 %vm721_vm0, %v2279_v49  ;;  %v1864_v59 = vcombine.low %v98_v44, %v102_v45 }
  0x3a   :  { %975 = vmatpush1.bf16.msra.mxu0 %v1806_v54  ;;  %1088 = vmatpush1.bf16.msra.mxu1 %v1808_v55  ;;  %v2433_v54 = vld [vmem:[%s2888_s0 + $0x54] ss:$8 sps:$4 sm:$0xff]  }
  0x3b   :  { %976 = vmatprep.subr.bf16.mxu0 %v1815_v56  ;;  %1089 = vmatprep.subr.bf16.mxu1 %v1817_v57  ;;  %v106_v55 = vld [vmem:[%s2887_s1 + $0x258] sm:$0xff]  ;;  %v1862_v57 = vcombine.low %v97_v40, %v101_v42 }
  0x3c   :  { %v110_v56 = vld [vmem:[%s2887_s1 + $0x278] sm:$0xff] }
  0x3d   :  { %789 = vmatmul.mubr.bf16.gmra.mrb[4].mxu0 %v2302_v58  ;;  %902 = vmatmul.mubr.bf16.gmra.mrb[4].mxu1 %v2302_v58  ;;  %v1872_v4 = vcombine.low %v106_v55, %v110_v56 }
  0x3e   :  { %977 = vmatpush1.bf16.msra.mxu0 %v1814_v61  ;;  %1090 = vmatpush1.bf16.msra.mxu1 %v1816_v0  ;;  %v1873_v61 = vcombine.high %v106_v55, %v110_v56  ;;  %v114_v0 = vld [vmem:[%s2887_s1 + $0x298] sm:$0xff] }
  0x3f   :  { %1892 = vmatprep.mubr.msk.bf16.mxu0 %vm721_vm0, %v2319_v1  ;;  %1900 = vmatprep.mubr.msk.bf16.mxu1 %vm721_vm0, %v2319_v1 }
  0x40   :  { %978 = vmatprep.subr.bf16.mxu0 %v1823_v2  ;;  %1091 = vmatprep.subr.bf16.mxu1 %v1825_v5  ;;  %v118_v2 = vld [vmem:[%s2887_s1 + $0x2b8] sm:$0xff]  ;;  %v1879_v5 = vcombine.high %v113_v62, %v117_v63 }
  0x41   :  { %v1881_v7 = vcombine.high %v114_v0, %v118_v2  ;;  %v1880_v16 = vcombine.low %v114_v0, %v118_v2 }
  0x42   :  { %979 = vmatpush1.bf16.msra.mxu0 %v1822_v8  ;;  %1092 = vmatpush1.bf16.msra.mxu1 %v1824_v9  ;;  %v121_v8 = vld [vmem:[%s2887_s1 + $0x2d0] sm:$0xff] }
  0x43   :  { %980 = vmatprep.subr.bf16.mxu0 %v1831_v10  ;;  %1093 = vmatprep.subr.bf16.mxu1 %v1833_v11  ;;  %v125_v9 = vld [vmem:[%s2887_s1 + $0x2f0] sm:$0xff]  ;;  %v2068_v10 = vld [vmem:[%s2888_s0 + $0x64] ss:$8 sps:$4 sm:$0xff]   ;;  %v122_v11 = vld [vmem:[%s2887_s1 + $0x2d8] sm:$0xff] }
  0x44   :  { %v1887_v17 = vcombine.high %v121_v8, %v125_v9 }
  0x45   :  { %799 = vmatmul.mubr.bf16.gmra.mrb[8].mxu0 %v2342_v12  ;;  %912 = vmatmul.mubr.bf16.gmra.mrb[8].mxu1 %v2342_v12 }
  0x46   :  { %1893 = vmatprep.mubr.msk.bf16.mxu0 %vm721_vm0, %v2353_v15  ;;  %1901 = vmatprep.mubr.msk.bf16.mxu1 %vm721_vm0, %v2353_v15 }
  0x47   :  { %981 = vmatpush1.bf16.msra.mxu0 %v1830_v18  ;;  %1094 = vmatpush1.bf16.msra.mxu1 %v1832_v19  ;;  %v1889_v18 = vcombine.high %v122_v11, %v126_v13  ;;  %v1886_v19 = vcombine.low %v121_v8, %v125_v9 }
  0x48   :  { %982 = vmatprep.subr.bf16.mxu0 %v1839_v20  ;;  %1095 = vmatprep.subr.bf16.mxu1 %v1841_v21  ;;  %v1888_v20 = vcombine.low %v122_v11, %v126_v13  ;;  %v2070_v21 = vld [vmem:[%s2888_s0 + $0x60] ss:$8 sps:$4 sm:$0xff]  }
  0x4b   :  { %983 = vmatpush1.bf16.msra.mxu0 %v1838_v26  ;;  %1096 = vmatpush1.bf16.msra.mxu1 %v1840_v27 }
  0x4c   :  { %984 = vmatprep.subr.bf16.mxu0 %v1847_v28  ;;  %1097 = vmatprep.subr.bf16.mxu1 %v1849_v30 }
  0x4d   :  { %809 = vmatmul.mubr.bf16.gmra.mrb[12].mxu0 %v2382_v29  ;;  %922 = vmatmul.mubr.bf16.gmra.mrb[12].mxu1 %v2382_v29 }
  0x4e   :  { %1894 = vmatprep.mubr.msk.bf16.mxu0 %vm721_vm0, %v2393_v33  ;;  %1902 = vmatprep.mubr.msk.bf16.mxu1 %vm721_vm0, %v2393_v33 }
  0x4f   :  { %985 = vmatpush1.bf16.msra.mxu0 %v1846_v36  ;;  %1098 = vmatpush1.bf16.msra.mxu1 %v1848_v37 }
  0x50   :  { %986 = vmatprep.subr.bf16.mxu0 %v1855_v38  ;;  %1099 = vmatprep.subr.bf16.mxu1 %v1857_v39 }
  0x53   :  { %987 = vmatpush1.bf16.msra.mxu0 %v1854_v46  ;;  %1100 = vmatpush1.bf16.msra.mxu1 %v1856_v47 }
  0x54   :  { %988 = vmatprep.subr.bf16.mxu0 %v1863_v48  ;;  %1101 = vmatprep.subr.bf16.mxu1 %v1865_v51 }
  0x55   :  { %819 = vmatmul.mubr.bf16.gmra.mrb[16].mxu0 %v2422_v50  ;;  %932 = vmatmul.mubr.bf16.gmra.mrb[16].mxu1 %v2422_v50 }
  0x56   :  { %1895 = vmatprep.mubr.msk.bf16.mxu0 %vm721_vm0, %v2433_v54  ;;  %1903 = vmatprep.mubr.msk.bf16.mxu1 %vm721_vm0, %v2433_v54 }
  0x57   :  { %989 = vmatpush1.bf16.msra.mxu0 %v1862_v57  ;;  %1102 = vmatpush1.bf16.msra.mxu1 %v1864_v59 }
  0x58   :  { %990 = vmatprep.subr.bf16.mxu0 %v1871_v60  ;;  %1103 = vmatprep.subr.bf16.mxu1 %v1873_v61 }
  0x5b   :  { %991 = vmatpush1.bf16.msra.mxu0 %v1870_v3  ;;  %1104 = vmatpush1.bf16.msra.mxu1 %v1872_v4 }
  0x5c   :  { %992 = vmatprep.subr.bf16.mxu0 %v1879_v5  ;;  %1105 = vmatprep.subr.bf16.mxu1 %v1881_v7 }
  0x5d   :  { %829 = vmatmul.mubr.bf16.gmra.mrb[20].mxu0 %v2067_v6  ;;  %942 = vmatmul.mubr.bf16.gmra.mrb[20].mxu1 %v2067_v6 }
  0x5e   :  { %1896 = vmatprep.mubr.msk.bf16.mxu0 %vm721_vm0, %v2068_v10  ;;  %1904 = vmatprep.mubr.msk.bf16.mxu1 %vm721_vm0, %v2068_v10 }
  0x5f   :  { %993 = vmatpush1.bf16.msra.mxu0 %v1878_v14  ;;  %1106 = vmatpush1.bf16.msra.mxu1 %v1880_v16 }
  0x60   :  { %994 = vmatprep.subr.bf16.mxu0 %v1887_v17  ;;  %1107 = vmatprep.subr.bf16.mxu1 %v1889_v18 }
  0x63   :  { %995 = vmatpush1.bf16.msra.mxu0 %v1886_v19  ;;  %1108 = vmatpush1.bf16.msra.mxu1 %v1888_v20 }
  0x65   :  { %839 = vmatmul.mubr.bf16.gmra.mrb[24].mxu0 %v2070_v21  ;;  %952 = vmatmul.mubr.bf16.gmra.mrb[24].mxu1 %v2070_v21 }
  0x66   :  { %1897 = vmatprep.mubr.msk.bf16.mxu0 %vm721_vm0, %v2071_v22  ;;  %1905 = vmatprep.mubr.msk.bf16.mxu1 %vm721_vm0, %v2071_v22 }
  0x6d   :  { %849 = vmatmul.mubr.bf16.gmra.mrb[28].mxu0 %v2073_v23  ;;  %962 = vmatmul.mubr.bf16.gmra.mrb[28].mxu1 %v2073_v23 }
  0x6e   :  { %1906 = vmatprep.mubr.msk.bf16.mxu0 %vm721_vm0, %v2169_v43  ;;  %1914 = vmatprep.mubr.msk.bf16.mxu1 %vm721_vm0, %v2169_v43  ;;  %v129_v43 = vlaneseq }
  0x75   :  { %1005 = vmatmul.mubr.bf16.vlgmr.msra.gmra.mrb[32].mxu0 %v2268_v41  ;;  %1118 = vmatmul.mubr.bf16.vlgmr.msra.gmra.mrb[32].mxu1 %v2268_v41  ;;  %v2528_v41 = vshrl.u32 %v129_v43, 7 }
  0x76   :  { %1907 = vmatprep.mubr.msk.bf16.mxu0 %vm721_vm0, %v2279_v49  ;;  %1915 = vmatprep.mubr.msk.bf16.mxu1 %vm721_vm0, %v2279_v49 }
  0x77   :  { %v131_v49 = vsub.s32 0, %v2528_v41 }
  0x7d   :  { %1015 = vmatmul.mubr.bf16.gmra.mrb[36].mxu0 %v2302_v58  ;;  %1128 = vmatmul.mubr.bf16.gmra.mrb[36].mxu1 %v2302_v58  ;;  %v2534_v58 = vld [vmem:[%s2889_s2] sm:$0xff] }
  0x7e   :  { %1908 = vmatprep.mubr.msk.bf16.mxu0 %vm721_vm0, %v2319_v1  ;;  %1916 = vmatprep.mubr.msk.bf16.mxu1 %vm721_vm0, %v2319_v1  ;;  %v139_v1 = vsub.s32 2, %v2528_v41  ;;  %v2540_v24 = vrot.slane %v2534_v58, %v131_v49 }
  0x80   :  { %v2543_v25 = vrot.slane %v2534_v58, %v139_v1 }
  0x85   :  { %1025 = vmatmul.mubr.bf16.gmra.mrb[40].mxu0 %v2342_v12  ;;  %1138 = vmatmul.mubr.bf16.gmra.mrb[40].mxu1 %v2342_v12  ;;  %v135_v12 = vsub.s32 1, %v2528_v41 }
  0x86   :  { %1909 = vmatprep.mubr.msk.bf16.mxu0 %vm721_vm0, %v2353_v15  ;;  %1917 = vmatprep.mubr.msk.bf16.mxu1 %vm721_vm0, %v2353_v15  ;;  %v143_v15 = vsub.s32 3, %v2528_v41 }
  0x87   :  { %v2546_v26 = vrot.slane %v2534_v58, %v135_v12 }
  0x88   :  { %v2549_v27 = vrot.slane %v2534_v58, %v143_v15 }
  0x8d   :  { %1035 = vmatmul.mubr.bf16.gmra.mrb[44].mxu0 %v2382_v29  ;;  %1148 = vmatmul.mubr.bf16.gmra.mrb[44].mxu1 %v2382_v29 }
  0x8e   :  { %1910 = vmatprep.mubr.msk.bf16.mxu0 %vm721_vm0, %v2393_v33  ;;  %1918 = vmatprep.mubr.msk.bf16.mxu1 %vm721_vm0, %v2393_v33 }
  0x95   :  { %1045 = vmatmul.mubr.bf16.gmra.mrb[48].mxu0 %v2422_v50  ;;  %1158 = vmatmul.mubr.bf16.gmra.mrb[48].mxu1 %v2422_v50 }
  0x96   :  { %1911 = vmatprep.mubr.msk.bf16.mxu0 %vm721_vm0, %v2433_v54  ;;  %1919 = vmatprep.mubr.msk.bf16.mxu1 %vm721_vm0, %v2433_v54 }
  0x9d   :  { %1055 = vmatmul.mubr.bf16.gmra.mrb[52].mxu0 %v2067_v6  ;;  %1168 = vmatmul.mubr.bf16.gmra.mrb[52].mxu1 %v2067_v6 }
  0x9e   :  { %1912 = vmatprep.mubr.msk.bf16.mxu0 %vm721_vm0, %v2068_v10  ;;  %1920 = vmatprep.mubr.msk.bf16.mxu1 %vm721_vm0, %v2068_v10 }
  0xa5   :  { %1065 = vmatmul.mubr.bf16.gmra.mrb[56].mxu0 %v2070_v21  ;;  %1178 = vmatmul.mubr.bf16.gmra.mrb[56].mxu1 %v2070_v21 }
  0xa6   :  { %1913 = vmatprep.mubr.msk.bf16.mxu0 %vm721_vm0, %v2071_v22  ;;  %1921 = vmatprep.mubr.msk.bf16.mxu1 %vm721_vm0, %v2071_v22 }
  0xad   :  { %1075 = vmatmul.mubr.bf16.gmra.mrb[60].mxu0 %v2073_v23  ;;  %1188 = vmatmul.mubr.bf16.gmra.mrb[60].mxu1 %v2073_v23 }
 0x108   :  { %v780_v28 = vpop.f32.mrb[0].mxu0  ;;  %v893_v30 = vpop.f32.mrb[0].mxu1 }
 0x109   :  { %v781_v29 = vadd.f32 %v780_v28, %v2540_v24  ;;  %v782_v31 = vpop.f32.mrb[1].mxu0  ;;  %v894_v32 = vadd.f32 %v893_v30, %v2543_v25  ;;  %v895_v34 = vpop.f32.mrb[1].mxu1 }
 0x10a   :  { %v783_v33 = vadd.f32 %v782_v31, %v2546_v26  ;;  %v784_v35 = vpop.f32.mrb[2].mxu0  ;;  %v896_v37 = vadd.f32 %v895_v34, %v2549_v27  ;;  %v897_v39 = vpop.f32.mrb[2].mxu1 }
 0x10b   :  { %v1198_v36 = vmax.f32 %v781_v29, 0.0  ;;  %v785_v38 = vadd.f32 %v784_v35, %v2540_v24  ;;  %v786_v40 = vpop.f32.mrb[3].mxu0  ;;  %v1200_v42 = vmax.f32 %v894_v32, 0.0  ;;  %v898_v45 = vadd.f32 %v897_v39, %v2543_v25  ;;  %v899_v47 = vpop.f32.mrb[3].mxu1 }
 0x10c   :  { %v1199_v44 = vmax.f32 %v783_v33, 0.0  ;;  %v787_v46 = vadd.f32 %v786_v40, %v2546_v26  ;;  %v1201_v48 = vmax.f32 %v896_v37, 0.0  ;;  %v900_v51 = vadd.f32 %v899_v47, %v2549_v27 }
 0x10d   :  { %v1206_v50 = vmax.f32 %v785_v38, 0.0  ;;  %v1208_v53 = vmax.f32 %v898_v45, 0.0 }
 0x10e   :  { %v1986_v52 = vpack.c.bf16 %v1199_v44, %v1198_v36  ;;  %v1207_v54 = vmax.f32 %v787_v46, 0.0  ;;  %v1987_v55 = vpack.c.bf16 %v1201_v48, %v1200_v42  ;;  %v1209_v56 = vmax.f32 %v900_v51, 0.0 }
 0x110   :  { %1710 = vst [vmem:[%s2890_s3] sm:$0xff] %v1986_v52  ;;  %v1990_v57 = vpack.c.bf16 %v1207_v54, %v1206_v50  ;;  %v790_v59 = vpop.f32.mrb[4].mxu0  ;;  %1711 = vst [vmem:[%s2890_s3 + $0x8] sm:$0xff] %v1987_v55  ;;  %v1991_v60 = vpack.c.bf16 %v1209_v56, %v1208_v53  ;;  %v903_v62 = vpop.f32.mrb[4].mxu1 }
 0x111   :  { %v791_v61 = vadd.f32 %v790_v59, %v2540_v24  ;;  %v792_v63 = vpop.f32.mrb[5].mxu0  ;;  %v904_v0 = vadd.f32 %v903_v62, %v2543_v25  ;;  %v905_v3 = vpop.f32.mrb[5].mxu1 }
 0x112   :  { %1714 = vst [vmem:[%s2890_s3 + $0x20] sm:$0xff] %v1990_v57  ;;  %v793_v2 = vadd.f32 %v792_v63, %v2546_v26  ;;  %v794_v4 = vpop.f32.mrb[6].mxu0  ;;  %1715 = vst [vmem:[%s2890_s3 + $0x28] sm:$0xff] %v1991_v60  ;;  %v906_v6 = vadd.f32 %v905_v3, %v2549_v27  ;;  %v907_v8 = vpop.f32.mrb[6].mxu1 }
 0x113   :  { %v1214_v5 = vmax.f32 %v791_v61, 0.0  ;;  %v795_v7 = vadd.f32 %v794_v4, %v2540_v24  ;;  %v796_v9 = vpop.f32.mrb[7].mxu0  ;;  %v1216_v10 = vmax.f32 %v904_v0, 0.0  ;;  %v908_v13 = vadd.f32 %v907_v8, %v2543_v25  ;;  %v909_v16 = vpop.f32.mrb[7].mxu1 }
 0x114   :  { %v1215_v11 = vmax.f32 %v793_v2, 0.0  ;;  %v797_v14 = vadd.f32 %v796_v9, %v2546_v26  ;;  %v1217_v17 = vmax.f32 %v906_v6, 0.0  ;;  %v910_v19 = vadd.f32 %v909_v16, %v2549_v27 }
 0x115   :  { %v1222_v18 = vmax.f32 %v795_v7, 0.0  ;;  %v1224_v21 = vmax.f32 %v908_v13, 0.0 }
 0x116   :  { %v1994_v20 = vpack.c.bf16 %v1215_v11, %v1214_v5  ;;  %v1223_v22 = vmax.f32 %v797_v14, 0.0  ;;  %v1995_v23 = vpack.c.bf16 %v1217_v17, %v1216_v10  ;;  %v1225_v43 = vmax.f32 %v910_v19, 0.0 }
 0x118   :  { %1718 = vst [vmem:[%s2890_s3 + $0x40] sm:$0xff] %v1994_v20  ;;  %v1998_v49 = vpack.c.bf16 %v1223_v22, %v1222_v18  ;;  %v800_v1 = vpop.f32.mrb[8].mxu0  ;;  %1719 = vst [vmem:[%s2890_s3 + $0x48] sm:$0xff] %v1995_v23  ;;  %v1999_v12 = vpack.c.bf16 %v1225_v43, %v1224_v21  ;;  %v913_v28 = vpop.f32.mrb[8].mxu1 }
 0x119   :  { %v801_v15 = vadd.f32 %v800_v1, %v2540_v24  ;;  %v802_v29 = vpop.f32.mrb[9].mxu0  ;;  %v914_v30 = vadd.f32 %v913_v28, %v2543_v25  ;;  %v915_v32 = vpop.f32.mrb[9].mxu1 }
 0x11a   :  { %1722 = vst [vmem:[%s2890_s3 + $0x60] sm:$0xff] %v1998_v49  ;;  %v803_v31 = vadd.f32 %v802_v29, %v2546_v26  ;;  %v804_v33 = vpop.f32.mrb[10].mxu0  ;;  %1723 = vst [vmem:[%s2890_s3 + $0x68] sm:$0xff] %v1999_v12  ;;  %v916_v35 = vadd.f32 %v915_v32, %v2549_v27  ;;  %v917_v37 = vpop.f32.mrb[10].mxu1 }
 0x11b   :  { %v1230_v34 = vmax.f32 %v801_v15, 0.0  ;;  %v805_v36 = vadd.f32 %v804_v33, %v2540_v24  ;;  %v806_v38 = vpop.f32.mrb[11].mxu0  ;;  %v1232_v39 = vmax.f32 %v914_v30, 0.0  ;;  %v918_v42 = vadd.f32 %v917_v37, %v2543_v25  ;;  %v919_v45 = vpop.f32.mrb[11].mxu1 }
 0x11c   :  { %v1231_v40 = vmax.f32 %v803_v31, 0.0  ;;  %v807_v44 = vadd.f32 %v806_v38, %v2546_v26  ;;  %v1233_v46 = vmax.f32 %v916_v35, 0.0  ;;  %v920_v48 = vadd.f32 %v919_v45, %v2549_v27 }
 0x11d   :  { %v1238_v47 = vmax.f32 %v805_v36, 0.0  ;;  %v1240_v51 = vmax.f32 %v918_v42, 0.0 }
 0x11e   :  { %v2002_v50 = vpack.c.bf16 %v1231_v40, %v1230_v34  ;;  %v1239_v52 = vmax.f32 %v807_v44, 0.0  ;;  %v2003_v53 = vpack.c.bf16 %v1233_v46, %v1232_v39  ;;  %v1241_v54 = vmax.f32 %v920_v48, 0.0 }
 0x120   :  { %1726 = vst [vmem:[%s2890_s3 + $0x80] sm:$0xff] %v2002_v50  ;;  %v2006_v55 = vpack.c.bf16 %v1239_v52, %v1238_v47  ;;  %v810_v56 = vpop.f32.mrb[12].mxu0  ;;  %1727 = vst [vmem:[%s2890_s3 + $0x88] sm:$0xff] %v2003_v53  ;;  %v2007_v57 = vpack.c.bf16 %v1241_v54, %v1240_v51  ;;  %v923_v60 = vpop.f32.mrb[12].mxu1 }
 0x121   :  { %v811_v59 = vadd.f32 %v810_v56, %v2540_v24  ;;  %v812_v61 = vpop.f32.mrb[13].mxu0  ;;  %v924_v62 = vadd.f32 %v923_v60, %v2543_v25  ;;  %v925_v0 = vpop.f32.mrb[13].mxu1 }
 0x122   :  { %1730 = vst [vmem:[%s2890_s3 + $0xa0] sm:$0xff] %v2006_v55  ;;  %v813_v63 = vadd.f32 %v812_v61, %v2546_v26  ;;  %v814_v2 = vpop.f32.mrb[14].mxu0  ;;  %1731 = vst [vmem:[%s2890_s3 + $0xa8] sm:$0xff] %v2007_v57  ;;  %v926_v4 = vadd.f32 %v925_v0, %v2549_v27  ;;  %v927_v6 = vpop.f32.mrb[14].mxu1 }
 0x123   :  { %v1246_v3 = vmax.f32 %v811_v59, 0.0  ;;  %v815_v5 = vadd.f32 %v814_v2, %v2540_v24  ;;  %v816_v7 = vpop.f32.mrb[15].mxu0  ;;  %v1248_v8 = vmax.f32 %v924_v62, 0.0  ;;  %v928_v10 = vadd.f32 %v927_v6, %v2543_v25  ;;  %v929_v13 = vpop.f32.mrb[15].mxu1 }
 0x124   :  { %v1247_v9 = vmax.f32 %v813_v63, 0.0  ;;  %v817_v11 = vadd.f32 %v816_v7, %v2546_v26  ;;  %v1249_v14 = vmax.f32 %v926_v4, 0.0  ;;  %v930_v17 = vadd.f32 %v929_v13, %v2549_v27 }
 0x125   :  { %v1254_v16 = vmax.f32 %v815_v5, 0.0  ;;  %v1256_v19 = vmax.f32 %v928_v10, 0.0 }
 0x126   :  { %v2010_v18 = vpack.c.bf16 %v1247_v9, %v1246_v3  ;;  %v1255_v20 = vmax.f32 %v817_v11, 0.0  ;;  %v2011_v21 = vpack.c.bf16 %v1249_v14, %v1248_v8  ;;  %v1257_v22 = vmax.f32 %v930_v17, 0.0 }
 0x128   :  { %1734 = vst [vmem:[%s2890_s3 + $0xc0] sm:$0xff] %v2010_v18  ;;  %v2014_v23 = vpack.c.bf16 %v1255_v20, %v1254_v16  ;;  %v820_v43 = vpop.f32.mrb[16].mxu0  ;;  %1735 = vst [vmem:[%s2890_s3 + $0xc8] sm:$0xff] %v2011_v21  ;;  %v2015_v49 = vpack.c.bf16 %v1257_v22, %v1256_v19  ;;  %v933_v12 = vpop.f32.mrb[16].mxu1 }
 0x129   :  { %v821_v1 = vadd.f32 %v820_v43, %v2540_v24  ;;  %v822_v15 = vpop.f32.mrb[17].mxu0  ;;  %v934_v28 = vadd.f32 %v933_v12, %v2543_v25  ;;  %v935_v30 = vpop.f32.mrb[17].mxu1 }
 0x12a   :  { %1738 = vst [vmem:[%s2890_s3 + $0xe0] sm:$0xff] %v2014_v23  ;;  %v823_v29 = vadd.f32 %v822_v15, %v2546_v26  ;;  %v824_v31 = vpop.f32.mrb[18].mxu0  ;;  %1739 = vst [vmem:[%s2890_s3 + $0xe8] sm:$0xff] %v2015_v49  ;;  %v936_v33 = vadd.f32 %v935_v30, %v2549_v27  ;;  %v937_v35 = vpop.f32.mrb[18].mxu1 }
 0x12b   :  { %v1262_v32 = vmax.f32 %v821_v1, 0.0  ;;  %v825_v34 = vadd.f32 %v824_v31, %v2540_v24  ;;  %v826_v36 = vpop.f32.mrb[19].mxu0  ;;  %v1264_v37 = vmax.f32 %v934_v28, 0.0  ;;  %v938_v39 = vadd.f32 %v937_v35, %v2543_v25  ;;  %v939_v42 = vpop.f32.mrb[19].mxu1 }
 0x12c   :  { %v1263_v38 = vmax.f32 %v823_v29, 0.0  ;;  %v827_v40 = vadd.f32 %v826_v36, %v2546_v26  ;;  %v1265_v44 = vmax.f32 %v936_v33, 0.0  ;;  %v940_v46 = vadd.f32 %v939_v42, %v2549_v27 }
 0x12d   :  { %v1270_v45 = vmax.f32 %v825_v34, 0.0  ;;  %v1272_v48 = vmax.f32 %v938_v39, 0.0 }
 0x12e   :  { %v2018_v47 = vpack.c.bf16 %v1263_v38, %v1262_v32  ;;  %v1271_v50 = vmax.f32 %v827_v40, 0.0  ;;  %v2019_v51 = vpack.c.bf16 %v1265_v44, %v1264_v37  ;;  %v1273_v52 = vmax.f32 %v940_v46, 0.0 }
 0x130   :  { %1742 = vst [vmem:[%s2890_s3 + $0x100] sm:$0xff] %v2018_v47  ;;  %v2022_v53 = vpack.c.bf16 %v1271_v50, %v1270_v45  ;;  %v830_v54 = vpop.f32.mrb[20].mxu0  ;;  %1743 = vst [vmem:[%s2890_s3 + $0x108] sm:$0xff] %v2019_v51  ;;  %v2023_v55 = vpack.c.bf16 %v1273_v52, %v1272_v48  ;;  %v943_v57 = vpop.f32.mrb[20].mxu1  ;;  %v147_v51 = vsub.s32 4, %v2528_v41 }
 0x131   :  { %v831_v56 = vadd.f32 %v830_v54, %v2540_v24  ;;  %v832_v59 = vpop.f32.mrb[21].mxu0  ;;  %v944_v60 = vadd.f32 %v943_v57, %v2543_v25  ;;  %v945_v62 = vpop.f32.mrb[21].mxu1 }
 0x132   :  { %1746 = vst [vmem:[%s2890_s3 + $0x120] sm:$0xff] %v2022_v53  ;;  %v833_v61 = vadd.f32 %v832_v59, %v2546_v26  ;;  %v834_v63 = vpop.f32.mrb[22].mxu0  ;;  %1747 = vst [vmem:[%s2890_s3 + $0x128] sm:$0xff] %v2023_v55  ;;  %v946_v2 = vadd.f32 %v945_v62, %v2549_v27  ;;  %v947_v4 = vpop.f32.mrb[22].mxu1  ;;  %v155_v59 = vsub.s32 6, %v2528_v41 }
 0x133   :  { %v1278_v0 = vmax.f32 %v831_v56, 0.0  ;;  %v835_v3 = vadd.f32 %v834_v63, %v2540_v24  ;;  %v836_v5 = vpop.f32.mrb[23].mxu0  ;;  %v1280_v6 = vmax.f32 %v944_v60, 0.0  ;;  %v948_v8 = vadd.f32 %v947_v4, %v2543_v25  ;;  %v949_v10 = vpop.f32.mrb[23].mxu1 }
 0x134   :  { %v1279_v7 = vmax.f32 %v833_v61, 0.0  ;;  %v837_v9 = vadd.f32 %v836_v5, %v2546_v26  ;;  %v1281_v11 = vmax.f32 %v946_v2, 0.0  ;;  %v950_v14 = vadd.f32 %v949_v10, %v2549_v27 }
 0x135   :  { %v1286_v13 = vmax.f32 %v835_v3, 0.0  ;;  %v1288_v17 = vmax.f32 %v948_v8, 0.0  ;;  %v159_v2 = vsub.s32 7, %v2528_v41  ;;  %v2701_v8 = vrot.slane %v2534_v58, %v147_v51 }
 0x136   :  { %v2026_v16 = vpack.c.bf16 %v1279_v7, %v1278_v0  ;;  %v1287_v18 = vmax.f32 %v837_v9, 0.0  ;;  %v2027_v19 = vpack.c.bf16 %v1281_v11, %v1280_v6  ;;  %v1289_v20 = vmax.f32 %v950_v14, 0.0 }
 0x137   :  { %v151_v0 = vsub.s32 5, %v2528_v41 }
 0x138   :  { %1750 = vst [vmem:[%s2890_s3 + $0x140] sm:$0xff] %v2026_v16  ;;  %v2030_v21 = vpack.c.bf16 %v1287_v18, %v1286_v13  ;;  %v840_v22 = vpop.f32.mrb[24].mxu0  ;;  %1751 = vst [vmem:[%s2890_s3 + $0x148] sm:$0xff] %v2027_v19  ;;  %v2031_v23 = vpack.c.bf16 %v1289_v20, %v1288_v17  ;;  %v953_v49 = vpop.f32.mrb[24].mxu1  ;;  %v2707_v18 = vrot.slane %v2534_v58, %v155_v59 }
 0x139   :  { %v841_v43 = vadd.f32 %v840_v22, %v2540_v24  ;;  %v842_v1 = vpop.f32.mrb[25].mxu0  ;;  %v954_v12 = vadd.f32 %v953_v49, %v2543_v25  ;;  %v955_v28 = vpop.f32.mrb[25].mxu1 }
 0x13a   :  { %1754 = vst [vmem:[%s2890_s3 + $0x160] sm:$0xff] %v2030_v21  ;;  %v843_v15 = vadd.f32 %v842_v1, %v2546_v26  ;;  %v844_v29 = vpop.f32.mrb[26].mxu0  ;;  %1755 = vst [vmem:[%s2890_s3 + $0x168] sm:$0xff] %v2031_v23  ;;  %v956_v31 = vadd.f32 %v955_v28, %v2549_v27  ;;  %v957_v33 = vpop.f32.mrb[26].mxu1  ;;  %v2710_v21 = vrot.slane %v2534_v58, %v151_v0 }
 0x13b   :  { %v1294_v30 = vmax.f32 %v841_v43, 0.0  ;;  %v845_v32 = vadd.f32 %v844_v29, %v2540_v24  ;;  %v846_v34 = vpop.f32.mrb[27].mxu0  ;;  %v1296_v35 = vmax.f32 %v954_v12, 0.0  ;;  %v958_v37 = vadd.f32 %v957_v33, %v2543_v25  ;;  %v959_v39 = vpop.f32.mrb[27].mxu1 }
 0x13c   :  { %v1295_v36 = vmax.f32 %v843_v15, 0.0  ;;  %v847_v38 = vadd.f32 %v846_v34, %v2546_v26  ;;  %v1297_v40 = vmax.f32 %v956_v31, 0.0  ;;  %v960_v44 = vadd.f32 %v959_v39, %v2549_v27 }
 0x13d   :  { %v1302_v42 = vmax.f32 %v845_v32, 0.0  ;;  %v1304_v46 = vmax.f32 %v958_v37, 0.0 }
 0x13e   :  { %v2034_v45 = vpack.c.bf16 %v1295_v36, %v1294_v30  ;;  %v1303_v47 = vmax.f32 %v847_v38, 0.0  ;;  %v2035_v48 = vpack.c.bf16 %v1297_v40, %v1296_v35  ;;  %v1305_v50 = vmax.f32 %v960_v44, 0.0 }
 0x140   :  { %1758 = vst [vmem:[%s2890_s3 + $0x180] sm:$0xff] %v2034_v45  ;;  %v2038_v52 = vpack.c.bf16 %v1303_v47, %v1302_v42  ;;  %v850_v53 = vpop.f32.mrb[28].mxu0  ;;  %1759 = vst [vmem:[%s2890_s3 + $0x188] sm:$0xff] %v2035_v48  ;;  %v2039_v54 = vpack.c.bf16 %v1305_v50, %v1304_v46  ;;  %v963_v56 = vpop.f32.mrb[28].mxu1 }
 0x141   :  { %v851_v55 = vadd.f32 %v850_v53, %v2540_v24  ;;  %v852_v57 = vpop.f32.mrb[29].mxu0  ;;  %v964_v60 = vadd.f32 %v963_v56, %v2543_v25  ;;  %v965_v62 = vpop.f32.mrb[29].mxu1 }
 0x142   :  { %1762 = vst [vmem:[%s2890_s3 + $0x1a0] sm:$0xff] %v2038_v52  ;;  %v853_v61 = vadd.f32 %v852_v57, %v2546_v26  ;;  %v854_v63 = vpop.f32.mrb[30].mxu0  ;;  %1763 = vst [vmem:[%s2890_s3 + $0x1a8] sm:$0xff] %v2039_v54  ;;  %v966_v4 = vadd.f32 %v965_v62, %v2549_v27  ;;  %v967_v6 = vpop.f32.mrb[30].mxu1 }
 0x143   :  { %v1310_v3 = vmax.f32 %v851_v55, 0.0  ;;  %v855_v5 = vadd.f32 %v854_v63, %v2540_v24  ;;  %v856_v7 = vpop.f32.mrb[31].mxu0  ;;  %v1312_v9 = vmax.f32 %v964_v60, 0.0  ;;  %v968_v11 = vadd.f32 %v967_v6, %v2543_v25  ;;  %v969_v13 = vpop.f32.mrb[31].mxu1 }
 0x144   :  { %v1311_v10 = vmax.f32 %v853_v61, 0.0  ;;  %v857_v41 = vadd.f32 %v856_v7, %v2546_v26  ;;  %v1313_v14 = vmax.f32 %v966_v4, 0.0  ;;  %v970_v17 = vadd.f32 %v969_v13, %v2549_v27 }
 0x145   :  { %v1318_v16 = vmax.f32 %v855_v5, 0.0  ;;  %v1320_v19 = vmax.f32 %v968_v11, 0.0  ;;  %v2713_v25 = vrot.slane %v2534_v58, %v159_v2 }
 0x146   :  { %v2042_v24 = vpack.c.bf16 %v1311_v10, %v1310_v3  ;;  %v1319_v20 = vmax.f32 %v857_v41, 0.0  ;;  %v2043_v22 = vpack.c.bf16 %v1313_v14, %v1312_v9  ;;  %v1321_v23 = vmax.f32 %v970_v17, 0.0 }
 0x148   :  { %1766 = vst [vmem:[%s2890_s3 + $0x1c0] sm:$0xff] %v2042_v24  ;;  %v2046_v26 = vpack.c.bf16 %v1319_v20, %v1318_v16  ;;  %v1006_v27 = vpop.f32.mrb[32].mxu0  ;;  %1767 = vst [vmem:[%s2890_s3 + $0x1c8] sm:$0xff] %v2043_v22  ;;  %v2047_v43 = vpack.c.bf16 %v1321_v23, %v1320_v19  ;;  %v1119_v1 = vpop.f32.mrb[32].mxu1 }
 0x149   :  { %v1007_v49 = vadd.f32 %v1006_v27, %v2701_v8  ;;  %v1008_v12 = vpop.f32.mrb[33].mxu0  ;;  %v1120_v58 = vadd.f32 %v1119_v1, %v2707_v18  ;;  %v1121_v28 = vpop.f32.mrb[33].mxu1 }
 0x14a   :  { %1770 = vst [vmem:[%s2890_s3 + $0x1e0] sm:$0xff] %v2046_v26  ;;  %v1009_v15 = vadd.f32 %v1008_v12, %v2710_v21  ;;  %v1010_v29 = vpop.f32.mrb[34].mxu0  ;;  %1771 = vst [vmem:[%s2890_s3 + $0x1e8] sm:$0xff] %v2047_v43  ;;  %v1122_v31 = vadd.f32 %v1121_v28, %v2713_v25  ;;  %v1123_v33 = vpop.f32.mrb[34].mxu1 }
 0x14b   :  { %v1202_v30 = vmax.f32 %v1007_v49, 0.0  ;;  %v1011_v32 = vadd.f32 %v1010_v29, %v2701_v8  ;;  %v1012_v34 = vpop.f32.mrb[35].mxu0  ;;  %v1204_v35 = vmax.f32 %v1120_v58, 0.0  ;;  %v1124_v37 = vadd.f32 %v1123_v33, %v2707_v18  ;;  %v1125_v39 = vpop.f32.mrb[35].mxu1 }
 0x14c   :  { %v1203_v36 = vmax.f32 %v1009_v15, 0.0  ;;  %v1013_v38 = vadd.f32 %v1012_v34, %v2710_v21  ;;  %v1205_v40 = vmax.f32 %v1122_v31, 0.0  ;;  %v1126_v44 = vadd.f32 %v1125_v39, %v2713_v25 }
 0x14d   :  { %v1210_v42 = vmax.f32 %v1011_v32, 0.0  ;;  %v1212_v46 = vmax.f32 %v1124_v37, 0.0 }
 0x14e   :  { %v1988_v45 = vpack.c.bf16 %v1203_v36, %v1202_v30  ;;  %v1211_v47 = vmax.f32 %v1013_v38, 0.0  ;;  %v1989_v48 = vpack.c.bf16 %v1205_v40, %v1204_v35  ;;  %v1213_v50 = vmax.f32 %v1126_v44, 0.0 }
 0x150   :  { %1712 = vst [vmem:[%s2890_s3 + $0x10] sm:$0xff] %v1988_v45  ;;  %v1992_v51 = vpack.c.bf16 %v1211_v47, %v1210_v42  ;;  %v1016_v52 = vpop.f32.mrb[36].mxu0  ;;  %1713 = vst [vmem:[%s2890_s3 + $0x18] sm:$0xff] %v1989_v48  ;;  %v1993_v53 = vpack.c.bf16 %v1213_v50, %v1212_v46  ;;  %v1129_v55 = vpop.f32.mrb[36].mxu1 }
 0x151   :  { %v1017_v54 = vadd.f32 %v1016_v52, %v2701_v8  ;;  %v1018_v56 = vpop.f32.mrb[37].mxu0  ;;  %v1130_v57 = vadd.f32 %v1129_v55, %v2707_v18  ;;  %v1131_v60 = vpop.f32.mrb[37].mxu1 }
 0x152   :  { %1716 = vst [vmem:[%s2890_s3 + $0x30] sm:$0xff] %v1992_v51  ;;  %v1019_v59 = vadd.f32 %v1018_v56, %v2710_v21  ;;  %v1020_v61 = vpop.f32.mrb[38].mxu0  ;;  %1717 = vst [vmem:[%s2890_s3 + $0x38] sm:$0xff] %v1993_v53  ;;  %v1132_v63 = vadd.f32 %v1131_v60, %v2713_v25  ;;  %v1133_v2 = vpop.f32.mrb[38].mxu1 }
 0x153   :  { %v1218_v62 = vmax.f32 %v1017_v54, 0.0  ;;  %v1021_v0 = vadd.f32 %v1020_v61, %v2701_v8  ;;  %v1022_v3 = vpop.f32.mrb[39].mxu0  ;;  %v1220_v4 = vmax.f32 %v1130_v57, 0.0  ;;  %v1134_v6 = vadd.f32 %v1133_v2, %v2707_v18  ;;  %v1135_v9 = vpop.f32.mrb[39].mxu1 }
 0x154   :  { %v1219_v5 = vmax.f32 %v1019_v59, 0.0  ;;  %v1023_v7 = vadd.f32 %v1022_v3, %v2710_v21  ;;  %v1221_v10 = vmax.f32 %v1132_v63, 0.0  ;;  %v1136_v41 = vadd.f32 %v1135_v9, %v2713_v25 }
 0x155   :  { %v1226_v11 = vmax.f32 %v1021_v0, 0.0  ;;  %v1228_v14 = vmax.f32 %v1134_v6, 0.0 }
 0x156   :  { %v1996_v13 = vpack.c.bf16 %v1219_v5, %v1218_v62  ;;  %v1227_v16 = vmax.f32 %v1023_v7, 0.0  ;;  %v1997_v17 = vpack.c.bf16 %v1221_v10, %v1220_v4  ;;  %v1229_v24 = vmax.f32 %v1136_v41, 0.0 }
 0x158   :  { %1720 = vst [vmem:[%s2890_s3 + $0x50] sm:$0xff] %v1996_v13  ;;  %v2000_v19 = vpack.c.bf16 %v1227_v16, %v1226_v11  ;;  %v1026_v20 = vpop.f32.mrb[40].mxu0  ;;  %1721 = vst [vmem:[%s2890_s3 + $0x58] sm:$0xff] %v1997_v17  ;;  %v2001_v22 = vpack.c.bf16 %v1229_v24, %v1228_v14  ;;  %v1139_v26 = vpop.f32.mrb[40].mxu1 }
 0x159   :  { %v1027_v23 = vadd.f32 %v1026_v20, %v2701_v8  ;;  %v1028_v27 = vpop.f32.mrb[41].mxu0  ;;  %v1140_v43 = vadd.f32 %v1139_v26, %v2707_v18  ;;  %v1141_v1 = vpop.f32.mrb[41].mxu1 }
 0x15a   :  { %1724 = vst [vmem:[%s2890_s3 + $0x70] sm:$0xff] %v2000_v19  ;;  %v1029_v49 = vadd.f32 %v1028_v27, %v2710_v21  ;;  %v1030_v12 = vpop.f32.mrb[42].mxu0  ;;  %1725 = vst [vmem:[%s2890_s3 + $0x78] sm:$0xff] %v2001_v22  ;;  %v1142_v15 = vadd.f32 %v1141_v1, %v2713_v25  ;;  %v1143_v29 = vpop.f32.mrb[42].mxu1 }
 0x15b   :  { %v1234_v58 = vmax.f32 %v1027_v23, 0.0  ;;  %v1031_v28 = vadd.f32 %v1030_v12, %v2701_v8  ;;  %v1032_v30 = vpop.f32.mrb[43].mxu0  ;;  %v1236_v31 = vmax.f32 %v1140_v43, 0.0  ;;  %v1144_v33 = vadd.f32 %v1143_v29, %v2707_v18  ;;  %v1145_v35 = vpop.f32.mrb[43].mxu1 }
 0x15c   :  { %v1235_v32 = vmax.f32 %v1029_v49, 0.0  ;;  %v1033_v34 = vadd.f32 %v1032_v30, %v2710_v21  ;;  %v1237_v36 = vmax.f32 %v1142_v15, 0.0  ;;  %v1146_v38 = vadd.f32 %v1145_v35, %v2713_v25 }
 0x15d   :  { %v1242_v37 = vmax.f32 %v1031_v28, 0.0  ;;  %v1244_v40 = vmax.f32 %v1144_v33, 0.0 }
 0x15e   :  { %v2004_v39 = vpack.c.bf16 %v1235_v32, %v1234_v58  ;;  %v1243_v42 = vmax.f32 %v1033_v34, 0.0  ;;  %v2005_v44 = vpack.c.bf16 %v1237_v36, %v1236_v31  ;;  %v1245_v45 = vmax.f32 %v1146_v38, 0.0 }
 0x160   :  { %1728 = vst [vmem:[%s2890_s3 + $0x90] sm:$0xff] %v2004_v39  ;;  %v2008_v46 = vpack.c.bf16 %v1243_v42, %v1242_v37  ;;  %v1036_v47 = vpop.f32.mrb[44].mxu0  ;;  %1729 = vst [vmem:[%s2890_s3 + $0x98] sm:$0xff] %v2005_v44  ;;  %v2009_v48 = vpack.c.bf16 %v1245_v45, %v1244_v40  ;;  %v1149_v51 = vpop.f32.mrb[44].mxu1 }
 0x161   :  { %v1037_v50 = vadd.f32 %v1036_v47, %v2701_v8  ;;  %v1038_v52 = vpop.f32.mrb[45].mxu0  ;;  %v1150_v53 = vadd.f32 %v1149_v51, %v2707_v18  ;;  %v1151_v55 = vpop.f32.mrb[45].mxu1 }
 0x162   :  { %1732 = vst [vmem:[%s2890_s3 + $0xb0] sm:$0xff] %v2008_v46  ;;  %v1039_v54 = vadd.f32 %v1038_v52, %v2710_v21  ;;  %v1040_v56 = vpop.f32.mrb[46].mxu0  ;;  %1733 = vst [vmem:[%s2890_s3 + $0xb8] sm:$0xff] %v2009_v48  ;;  %v1152_v59 = vadd.f32 %v1151_v55, %v2713_v25  ;;  %v1153_v61 = vpop.f32.mrb[46].mxu1 }
 0x163   :  { %v1250_v57 = vmax.f32 %v1037_v50, 0.0  ;;  %v1041_v60 = vadd.f32 %v1040_v56, %v2701_v8  ;;  %v1042_v62 = vpop.f32.mrb[47].mxu0  ;;  %v1252_v63 = vmax.f32 %v1150_v53, 0.0  ;;  %v1154_v2 = vadd.f32 %v1153_v61, %v2707_v18  ;;  %v1155_v4 = vpop.f32.mrb[47].mxu1 }
 0x164   :  { %v1251_v0 = vmax.f32 %v1039_v54, 0.0  ;;  %v1043_v3 = vadd.f32 %v1042_v62, %v2710_v21  ;;  %v1253_v5 = vmax.f32 %v1152_v59, 0.0  ;;  %v1156_v7 = vadd.f32 %v1155_v4, %v2713_v25 }
 0x165   :  { %v1258_v6 = vmax.f32 %v1041_v60, 0.0  ;;  %v1260_v10 = vmax.f32 %v1154_v2, 0.0 }
 0x166   :  { %v2012_v9 = vpack.c.bf16 %v1251_v0, %v1250_v57  ;;  %v1259_v11 = vmax.f32 %v1043_v3, 0.0  ;;  %v2013_v41 = vpack.c.bf16 %v1253_v5, %v1252_v63  ;;  %v1261_v13 = vmax.f32 %v1156_v7, 0.0 }
 0x168   :  { %1736 = vst [vmem:[%s2890_s3 + $0xd0] sm:$0xff] %v2012_v9  ;;  %v2016_v14 = vpack.c.bf16 %v1259_v11, %v1258_v6  ;;  %v1046_v16 = vpop.f32.mrb[48].mxu0  ;;  %1737 = vst [vmem:[%s2890_s3 + $0xd8] sm:$0xff] %v2013_v41  ;;  %v2017_v17 = vpack.c.bf16 %v1261_v13, %v1260_v10  ;;  %v1159_v19 = vpop.f32.mrb[48].mxu1 }
 0x169   :  { %v1047_v24 = vadd.f32 %v1046_v16, %v2701_v8  ;;  %v1048_v20 = vpop.f32.mrb[49].mxu0  ;;  %v1160_v22 = vadd.f32 %v1159_v19, %v2707_v18  ;;  %v1161_v26 = vpop.f32.mrb[49].mxu1 }
 0x16a   :  { %1740 = vst [vmem:[%s2890_s3 + $0xf0] sm:$0xff] %v2016_v14  ;;  %v1049_v23 = vadd.f32 %v1048_v20, %v2710_v21  ;;  %v1050_v27 = vpop.f32.mrb[50].mxu0  ;;  %1741 = vst [vmem:[%s2890_s3 + $0xf8] sm:$0xff] %v2017_v17  ;;  %v1162_v49 = vadd.f32 %v1161_v26, %v2713_v25  ;;  %v1163_v12 = vpop.f32.mrb[50].mxu1 }
 0x16b   :  { %v1266_v43 = vmax.f32 %v1047_v24, 0.0  ;;  %v1051_v1 = vadd.f32 %v1050_v27, %v2701_v8  ;;  %v1052_v58 = vpop.f32.mrb[51].mxu0  ;;  %v1268_v15 = vmax.f32 %v1160_v22, 0.0  ;;  %v1164_v29 = vadd.f32 %v1163_v12, %v2707_v18  ;;  %v1165_v31 = vpop.f32.mrb[51].mxu1 }
 0x16c   :  { %v1267_v28 = vmax.f32 %v1049_v23, 0.0  ;;  %v1053_v30 = vadd.f32 %v1052_v58, %v2710_v21  ;;  %v1269_v32 = vmax.f32 %v1162_v49, 0.0  ;;  %v1166_v34 = vadd.f32 %v1165_v31, %v2713_v25 }
 0x16d   :  { %v1274_v33 = vmax.f32 %v1051_v1, 0.0  ;;  %v1276_v36 = vmax.f32 %v1164_v29, 0.0 }
 0x16e   :  { %v2020_v35 = vpack.c.bf16 %v1267_v28, %v1266_v43  ;;  %v1275_v37 = vmax.f32 %v1053_v30, 0.0  ;;  %v2021_v38 = vpack.c.bf16 %v1269_v32, %v1268_v15  ;;  %v1277_v39 = vmax.f32 %v1166_v34, 0.0 }
 0x170   :  { %1744 = vst [vmem:[%s2890_s3 + $0x110] sm:$0xff] %v2020_v35  ;;  %v2024_v40 = vpack.c.bf16 %v1275_v37, %v1274_v33  ;;  %v1056_v42 = vpop.f32.mrb[52].mxu0  ;;  %1745 = vst [vmem:[%s2890_s3 + $0x118] sm:$0xff] %v2021_v38  ;;  %v2025_v44 = vpack.c.bf16 %v1277_v39, %v1276_v36  ;;  %v1169_v46 = vpop.f32.mrb[52].mxu1 }
 0x171   :  { %v1057_v45 = vadd.f32 %v1056_v42, %v2701_v8  ;;  %v1058_v47 = vpop.f32.mrb[53].mxu0  ;;  %v1170_v48 = vadd.f32 %v1169_v46, %v2707_v18  ;;  %v1171_v51 = vpop.f32.mrb[53].mxu1 }
 0x172   :  { %1748 = vst [vmem:[%s2890_s3 + $0x130] sm:$0xff] %v2024_v40  ;;  %v1059_v50 = vadd.f32 %v1058_v47, %v2710_v21  ;;  %v1060_v52 = vpop.f32.mrb[54].mxu0  ;;  %1749 = vst [vmem:[%s2890_s3 + $0x138] sm:$0xff] %v2025_v44  ;;  %v1172_v54 = vadd.f32 %v1171_v51, %v2713_v25  ;;  %v1173_v56 = vpop.f32.mrb[54].mxu1 }
 0x173   :  { %v1282_v53 = vmax.f32 %v1057_v45, 0.0  ;;  %v1061_v55 = vadd.f32 %v1060_v52, %v2701_v8  ;;  %v1062_v57 = vpop.f32.mrb[55].mxu0  ;;  %v1284_v59 = vmax.f32 %v1170_v48, 0.0  ;;  %v1174_v61 = vadd.f32 %v1173_v56, %v2707_v18  ;;  %v1175_v63 = vpop.f32.mrb[55].mxu1 }
 0x174   :  { %v1283_v60 = vmax.f32 %v1059_v50, 0.0  ;;  %v1063_v62 = vadd.f32 %v1062_v57, %v2710_v21  ;;  %v1285_v0 = vmax.f32 %v1172_v54, 0.0  ;;  %v1176_v3 = vadd.f32 %v1175_v63, %v2713_v25 }
 0x175   :  { %v1290_v2 = vmax.f32 %v1061_v55, 0.0  ;;  %v1292_v5 = vmax.f32 %v1174_v61, 0.0 }
 0x176   :  { %v2028_v4 = vpack.c.bf16 %v1283_v60, %v1282_v53  ;;  %v1291_v6 = vmax.f32 %v1063_v62, 0.0  ;;  %v2029_v7 = vpack.c.bf16 %v1285_v0, %v1284_v59  ;;  %v1293_v9 = vmax.f32 %v1176_v3, 0.0 }
 0x178   :  { %1752 = vst [vmem:[%s2890_s3 + $0x150] sm:$0xff] %v2028_v4  ;;  %v2032_v10 = vpack.c.bf16 %v1291_v6, %v1290_v2  ;;  %v1066_v11 = vpop.f32.mrb[56].mxu0  ;;  %1753 = vst [vmem:[%s2890_s3 + $0x158] sm:$0xff] %v2029_v7  ;;  %v2033_v41 = vpack.c.bf16 %v1293_v9, %v1292_v5  ;;  %v1179_v14 = vpop.f32.mrb[56].mxu1 }
 0x179   :  { %v1067_v13 = vadd.f32 %v1066_v11, %v2701_v8  ;;  %v1068_v16 = vpop.f32.mrb[57].mxu0  ;;  %v1180_v17 = vadd.f32 %v1179_v14, %v2707_v18  ;;  %v1181_v19 = vpop.f32.mrb[57].mxu1 }
 0x17a   :  { %1756 = vst [vmem:[%s2890_s3 + $0x170] sm:$0xff] %v2032_v10  ;;  %v1069_v24 = vadd.f32 %v1068_v16, %v2710_v21  ;;  %v1070_v20 = vpop.f32.mrb[58].mxu0  ;;  %1757 = vst [vmem:[%s2890_s3 + $0x178] sm:$0xff] %v2033_v41  ;;  %v1182_v23 = vadd.f32 %v1181_v19, %v2713_v25  ;;  %v1183_v27 = vpop.f32.mrb[58].mxu1 }
 0x17b   :  { %v1298_v22 = vmax.f32 %v1067_v13, 0.0  ;;  %v1071_v26 = vadd.f32 %v1070_v20, %v2701_v8  ;;  %v1072_v43 = vpop.f32.mrb[59].mxu0  ;;  %v1300_v49 = vmax.f32 %v1180_v17, 0.0  ;;  %v1184_v12 = vadd.f32 %v1183_v27, %v2707_v18  ;;  %v1185_v15 = vpop.f32.mrb[59].mxu1 }
 0x17c   :  { %v1299_v1 = vmax.f32 %v1069_v24, 0.0  ;;  %v1073_v58 = vadd.f32 %v1072_v43, %v2710_v21  ;;  %v1301_v28 = vmax.f32 %v1182_v23, 0.0  ;;  %v1186_v30 = vadd.f32 %v1185_v15, %v2713_v25 }
 0x17d   :  { %v1306_v29 = vmax.f32 %v1071_v26, 0.0  ;;  %v1308_v32 = vmax.f32 %v1184_v12, 0.0 }
 0x17e   :  { %v2036_v31 = vpack.c.bf16 %v1299_v1, %v1298_v22  ;;  %v1307_v33 = vmax.f32 %v1073_v58, 0.0  ;;  %v2037_v34 = vpack.c.bf16 %v1301_v28, %v1300_v49  ;;  %v1309_v35 = vmax.f32 %v1186_v30, 0.0 }
 0x180   :  { %1760 = vst [vmem:[%s2890_s3 + $0x190] sm:$0xff] %v2036_v31  ;;  %v2040_v36 = vpack.c.bf16 %v1307_v33, %v1306_v29  ;;  %v1076_v37 = vpop.f32.mrb[60].mxu0  ;;  %1761 = vst [vmem:[%s2890_s3 + $0x198] sm:$0xff] %v2037_v34  ;;  %v2041_v38 = vpack.c.bf16 %v1309_v35, %v1308_v32  ;;  %v1189_v40 = vpop.f32.mrb[60].mxu1 }
 0x181   :  { %v1077_v39 = vadd.f32 %v1076_v37, %v2701_v8  ;;  %v1078_v42 = vpop.f32.mrb[61].mxu0  ;;  %v1190_v44 = vadd.f32 %v1189_v40, %v2707_v18  ;;  %v1191_v46 = vpop.f32.mrb[61].mxu1 }
 0x182   :  { %1764 = vst [vmem:[%s2890_s3 + $0x1b0] sm:$0xff] %v2040_v36  ;;  %v1079_v45 = vadd.f32 %v1078_v42, %v2710_v21  ;;  %v1080_v47 = vpop.f32.mrb[62].mxu0  ;;  %1765 = vst [vmem:[%s2890_s3 + $0x1b8] sm:$0xff] %v2041_v38  ;;  %v1192_v50 = vadd.f32 %v1191_v46, %v2713_v25  ;;  %v1193_v52 = vpop.f32.mrb[62].mxu1 }
 0x183   :  { %v1314_v48 = vmax.f32 %v1077_v39, 0.0  ;;  %v1081_v51 = vadd.f32 %v1080_v47, %v2701_v8  ;;  %v1082_v53 = vpop.f32.mrb[63].mxu0  ;;  %v1316_v54 = vmax.f32 %v1190_v44, 0.0  ;;  %v1194_v56 = vadd.f32 %v1193_v52, %v2707_v18  ;;  %v1195_v59 = vpop.f32.mrb[63].mxu1 }
 0x184   :  { %v1315_v55 = vmax.f32 %v1079_v45, 0.0  ;;  %v1083_v57 = vadd.f32 %v1082_v53, %v2710_v21  ;;  %v1317_v60 = vmax.f32 %v1192_v50, 0.0  ;;  %v1196_v62 = vadd.f32 %v1195_v59, %v2713_v25 }
 0x185   :  { %v1322_v61 = vmax.f32 %v1081_v51, 0.0  ;;  %v1324_v0 = vmax.f32 %v1194_v56, 0.0 }
 0x186   :  { %v2044_v63 = vpack.c.bf16 %v1315_v55, %v1314_v48  ;;  %v1323_v2 = vmax.f32 %v1083_v57, 0.0  ;;  %v2045_v3 = vpack.c.bf16 %v1317_v60, %v1316_v54  ;;  %v1325_v4 = vmax.f32 %v1196_v62, 0.0 }
 0x188   :  { %1768 = vst [vmem:[%s2890_s3 + $0x1d0] sm:$0xff] %v2044_v63  ;;  %v2048_v8 = vpack.c.bf16 %v1323_v2, %v1322_v61  ;;  %1769 = vst [vmem:[%s2890_s3 + $0x1d8] sm:$0xff] %v2045_v3  ;;  %v2049_v18 = vpack.c.bf16 %v1325_v4, %v1324_v0 }
 0x18a   :  { %1772 = vst [vmem:[%s2890_s3 + $0x1f0] sm:$0xff] %v2048_v8  ;;  %1773 = vst [vmem:[%s2890_s3 + $0x1f8] sm:$0xff] %v2049_v18 }

// kernel: shufflenet_forward.47
= control target key start
LH: loop header
LB: loop body
LE: loop exit
PB: predicated region body
PF: predicated region fallthrough
CT: control target
= control target key end

     0   :  { %vm726_vm0 = vcmask 130048   ;;  %s1195_s1 = inlined_call_operand.vmem [shape: bf16[1024,16], index: 1, kind: input, shape index: {}]   ;;  %s1196_s0 = inlined_call_operand.vmem [shape: bf16[8,1024], index: 0, kind: input, shape index: {}]   ;;  %s1197_s2 = inlined_call_operand.vmem [shape: f32[1,16], index: 2, kind: input, shape index: {}]   ;;  %s1198_s3 = inlined_call_operand.vmem [shape: f32[8,16], index: 3, kind: output, shape index: {}]  }
   0x1   :  { %v893_v0 = vld [vmem:[%s1195_s1 + $0x40] sm:$0xff]   ;;  %v897_v4 = vld [vmem:[%s1195_s1 + $0x48] sm:$0xff]   ;;  %v901_v8 = vld [vmem:[%s1195_s1 + $0x50] sm:$0xff]  }
   0x2   :  { %v894_v1 = vld [vmem:[%s1195_s1 + $0xc0] sm:$0xff]   ;;  %805 = vmatprep.subr.bf16.mxu0 %v893_v0  ;;  %v898_v5 = vld [vmem:[%s1195_s1 + $0xc8] sm:$0xff]   ;;  %v902_v9 = vld [vmem:[%s1195_s1 + $0xd0] sm:$0xff]  }
   0x3   :  { %v895_v2 = vld [vmem:[%s1195_s1] sm:$0xff]   ;;  %827 = vmatprep.subr.bf16.mxu1 %v894_v1  ;;  %v899_v6 = vld [vmem:[%s1195_s1 + $0x8] sm:$0xff]   ;;  %v903_v10 = vld [vmem:[%s1195_s1 + $0x10] sm:$0xff]  }
   0x4   :  { %v896_v3 = vld [vmem:[%s1195_s1 + $0x80] sm:$0xff]   ;;  %806 = vmatpush3.bf16.msra.mxu0 %v895_v2  ;;  %v900_v7 = vld [vmem:[%s1195_s1 + $0x88] sm:$0xff]   ;;  %v904_v11 = vld [vmem:[%s1195_s1 + $0x90] sm:$0xff]  }
   0x5   :  { %828 = vmatpush3.bf16.msra.mxu1 %v896_v3  ;;  %807 = vmatprep.subr.bf16.mxu0 %v897_v4  ;;  %v905_v12 = vld [vmem:[%s1195_s1 + $0x58] sm:$0xff]   ;;  %v909_v16 = vld [vmem:[%s1195_s1 + $0x60] sm:$0xff]   ;;  %v913_v20 = vld [vmem:[%s1195_s1 + $0x68] sm:$0xff]  }
   0x6   :  { %829 = vmatprep.subr.bf16.mxu1 %v898_v5  ;;  %v906_v13 = vld [vmem:[%s1195_s1 + $0xd8] sm:$0xff]   ;;  %v910_v17 = vld [vmem:[%s1195_s1 + $0xe0] sm:$0xff]   ;;  %v914_v21 = vld [vmem:[%s1195_s1 + $0xe8] sm:$0xff]  }
   0x7   :  { %v907_v14 = vld [vmem:[%s1195_s1 + $0x18] sm:$0xff]   ;;  %v911_v18 = vld [vmem:[%s1195_s1 + $0x20] sm:$0xff]   ;;  %v915_v22 = vld [vmem:[%s1195_s1 + $0x28] sm:$0xff]  }
   0x8   :  { %808 = vmatpush3.bf16.msra.mxu0 %v899_v6  ;;  %v908_v15 = vld [vmem:[%s1195_s1 + $0x98] sm:$0xff]   ;;  %v912_v19 = vld [vmem:[%s1195_s1 + $0xa0] sm:$0xff]   ;;  %v916_v23 = vld [vmem:[%s1195_s1 + $0xa8] sm:$0xff]  }
   0x9   :  { %830 = vmatpush3.bf16.msra.mxu1 %v900_v7  ;;  %809 = vmatprep.subr.bf16.mxu0 %v901_v8  ;;  %v917_v24 = vld [vmem:[%s1195_s1 + $0x70] sm:$0xff]   ;;  %v921_v28 = vld [vmem:[%s1195_s1 + $0x78] sm:$0xff]   ;;  %v15_v32 = vld [vmem:[%s1196_s0] sm:$0xff] }
   0xa   :  { %831 = vmatprep.subr.bf16.mxu1 %v902_v9  ;;  %v918_v25 = vld [vmem:[%s1195_s1 + $0xf0] sm:$0xff]   ;;  %v922_v29 = vld [vmem:[%s1195_s1 + $0xf8] sm:$0xff]   ;;  %v16_v33 = vld [vmem:[%s1196_s0 + $0x8] sm:$0xff]  ;;  %v733_v34 = vcombine.low %v15_v32, %v15_v32  ;;  %v734_v35 = vcombine.high %v15_v32, %v15_v32 }
   0xb   :  { %v919_v26 = vld [vmem:[%s1195_s1 + $0x30] sm:$0xff]   ;;  %v923_v30 = vld [vmem:[%s1195_s1 + $0x38] sm:$0xff]   ;;  %v735_v36 = vcombine.low %v16_v33, %v16_v33  ;;  %v736_v37 = vcombine.high %v16_v33, %v16_v33  ;;  %v929_v38 = vld [vmem:[%s1195_s1 + $0x140] sm:$0xff]  }
   0xc   :  { %810 = vmatpush3.bf16.msra.mxu0 %v903_v10  ;;  %v920_v27 = vld [vmem:[%s1195_s1 + $0xb0] sm:$0xff]   ;;  %v924_v31 = vld [vmem:[%s1195_s1 + $0xb8] sm:$0xff]   ;;  %v930_v39 = vld [vmem:[%s1195_s1 + $0x1c0] sm:$0xff]   ;;  %598 = vmatprep.mubr.bf16.mxu0 %v734_v35 }
   0xd   :  { %832 = vmatpush3.bf16.msra.mxu1 %v904_v11  ;;  %811 = vmatprep.subr.bf16.mxu0 %v905_v12  ;;  %v931_v40 = vld [vmem:[%s1195_s1 + $0x100] sm:$0xff]   ;;  %v933_v42 = vld [vmem:[%s1195_s1 + $0x148] sm:$0xff]   ;;  %v937_v46 = vld [vmem:[%s1195_s1 + $0x150] sm:$0xff]  }
   0xe   :  { %833 = vmatprep.subr.bf16.mxu1 %v906_v13  ;;  %638 = vmatprep.mubr.bf16.mxu1 %v736_v37  ;;  %v932_v41 = vld [vmem:[%s1195_s1 + $0x180] sm:$0xff]   ;;  %v934_v43 = vld [vmem:[%s1195_s1 + $0x1c8] sm:$0xff]   ;;  %v938_v47 = vld [vmem:[%s1195_s1 + $0x1d0] sm:$0xff]  }
   0xf   :  { %v935_v44 = vld [vmem:[%s1195_s1 + $0x108] sm:$0xff]   ;;  %v939_v48 = vld [vmem:[%s1195_s1 + $0x110] sm:$0xff]   ;;  %v941_v50 = vld [vmem:[%s1195_s1 + $0x158] sm:$0xff]  }
  0x10   :  { %812 = vmatpush3.bf16.msra.mxu0 %v907_v14  ;;  %v936_v45 = vld [vmem:[%s1195_s1 + $0x188] sm:$0xff]   ;;  %v940_v49 = vld [vmem:[%s1195_s1 + $0x190] sm:$0xff]   ;;  %v942_v51 = vld [vmem:[%s1195_s1 + $0x1d8] sm:$0xff]  }
  0x11   :  { %834 = vmatpush3.bf16.msra.mxu1 %v908_v15  ;;  %813 = vmatprep.subr.bf16.mxu0 %v909_v16  ;;  %v943_v52 = vld [vmem:[%s1195_s1 + $0x118] sm:$0xff]   ;;  %v945_v54 = vld [vmem:[%s1195_s1 + $0x160] sm:$0xff]   ;;  %v949_v58 = vld [vmem:[%s1195_s1 + $0x168] sm:$0xff]  }
  0x12   :  { %835 = vmatprep.subr.bf16.mxu1 %v910_v17  ;;  %v944_v53 = vld [vmem:[%s1195_s1 + $0x198] sm:$0xff]   ;;  %v946_v55 = vld [vmem:[%s1195_s1 + $0x1e0] sm:$0xff]   ;;  %v950_v59 = vld [vmem:[%s1195_s1 + $0x1e8] sm:$0xff]  }
  0x13   :  { %v947_v56 = vld [vmem:[%s1195_s1 + $0x120] sm:$0xff]   ;;  %v951_v60 = vld [vmem:[%s1195_s1 + $0x128] sm:$0xff]   ;;  %v953_v62 = vld [vmem:[%s1195_s1 + $0x170] sm:$0xff]  }
  0x14   :  { %814 = vmatpush3.bf16.msra.mxu0 %v911_v18  ;;  %v948_v57 = vld [vmem:[%s1195_s1 + $0x1a0] sm:$0xff]   ;;  %v952_v61 = vld [vmem:[%s1195_s1 + $0x1a8] sm:$0xff]   ;;  %v954_v63 = vld [vmem:[%s1195_s1 + $0x1f0] sm:$0xff]  }
  0x15   :  { %836 = vmatpush3.bf16.msra.mxu1 %v912_v19  ;;  %815 = vmatprep.subr.bf16.mxu0 %v913_v20  ;;  %v955_v0 = vld [vmem:[%s1195_s1 + $0x130] sm:$0xff]   ;;  %v957_v2 = vld [vmem:[%s1195_s1 + $0x178] sm:$0xff]   ;;  %v732_v14 = vld [vmem:[%s1197_s2] ss:$0 sm:$0xff] }
  0x16   :  { %837 = vmatprep.subr.bf16.mxu1 %v914_v21  ;;  %v956_v1 = vld [vmem:[%s1195_s1 + $0x1b0] sm:$0xff]   ;;  %v958_v3 = vld [vmem:[%s1195_s1 + $0x1f8] sm:$0xff]  }
  0x17   :  { %v959_v4 = vld [vmem:[%s1195_s1 + $0x138] sm:$0xff]   ;;  %v17_v6 = vld [vmem:[%s1196_s0 + $0x10] sm:$0xff] }
  0x18   :  { %816 = vmatpush3.bf16.msra.mxu0 %v915_v22  ;;  %v960_v5 = vld [vmem:[%s1195_s1 + $0x1b8] sm:$0xff]   ;;  %v737_v7 = vcombine.low %v17_v6, %v17_v6  ;;  %v738_v8 = vcombine.high %v17_v6, %v17_v6 }
  0x19   :  { %838 = vmatpush3.bf16.msra.mxu1 %v916_v23  ;;  %817 = vmatprep.subr.bf16.mxu0 %v917_v24  ;;  %v18_v9 = vld [vmem:[%s1196_s0 + $0x18] sm:$0xff] }
  0x1a   :  { %839 = vmatprep.subr.bf16.mxu1 %v918_v25  ;;  %v739_v10 = vcombine.low %v18_v9, %v18_v9  ;;  %v740_v11 = vcombine.high %v18_v9, %v18_v9 }
  0x1c   :  { %818 = vmatpush3.bf16.msra.mxu0 %v919_v26 }
  0x1d   :  { %840 = vmatpush3.bf16.msra.mxu1 %v920_v27  ;;  %819 = vmatprep.subr.bf16.mxu0 %v921_v28 }
  0x1e   :  { %841 = vmatprep.subr.bf16.mxu1 %v922_v29 }
  0x20   :  { %820 = vmatpush3.bf16.msra.mxu0 %v923_v30 }
  0x21   :  { %842 = vmatpush3.bf16.msra.mxu1 %v924_v31  ;;  %849 = vmatprep.subr.bf16.mxu0 %v929_v38 }
  0x22   :  { %871 = vmatprep.subr.bf16.mxu1 %v930_v39 }
  0x23   :  { %599 = vmatmul.mubr.bf16.vlgmr.msra.gmra.mrb[0].mxu0 %v733_v34 }
  0x24   :  { %639 = vmatmul.mubr.bf16.vlgmr.msra.gmra.mrb[0].mxu1 %v735_v36  ;;  %850 = vmatpush3.bf16.msra.mxu0 %v931_v40 }
  0x25   :  { %872 = vmatpush3.bf16.msra.mxu1 %v932_v41  ;;  %851 = vmatprep.subr.bf16.mxu0 %v933_v42 }
  0x26   :  { %873 = vmatprep.subr.bf16.mxu1 %v934_v43  ;;  %678 = vmatprep.mubr.bf16.mxu0 %v738_v8 }
  0x27   :  { %718 = vmatprep.mubr.bf16.mxu1 %v740_v11 }
  0x28   :  { %852 = vmatpush3.bf16.msra.mxu0 %v935_v44 }
  0x29   :  { %874 = vmatpush3.bf16.msra.mxu1 %v936_v45  ;;  %853 = vmatprep.subr.bf16.mxu0 %v937_v46 }
  0x2a   :  { %875 = vmatprep.subr.bf16.mxu1 %v938_v47 }
  0x2c   :  { %854 = vmatpush3.bf16.msra.mxu0 %v939_v48 }
  0x2d   :  { %876 = vmatpush3.bf16.msra.mxu1 %v940_v49  ;;  %855 = vmatprep.subr.bf16.mxu0 %v941_v50 }
  0x2e   :  { %877 = vmatprep.subr.bf16.mxu1 %v942_v51 }
  0x30   :  { %856 = vmatpush3.bf16.msra.mxu0 %v943_v52 }
  0x31   :  { %878 = vmatpush3.bf16.msra.mxu1 %v944_v53  ;;  %857 = vmatprep.subr.bf16.mxu0 %v945_v54 }
  0x32   :  { %879 = vmatprep.subr.bf16.mxu1 %v946_v55 }
  0x34   :  { %858 = vmatpush3.bf16.msra.mxu0 %v947_v56 }
  0x35   :  { %880 = vmatpush3.bf16.msra.mxu1 %v948_v57  ;;  %859 = vmatprep.subr.bf16.mxu0 %v949_v58 }
  0x36   :  { %881 = vmatprep.subr.bf16.mxu1 %v950_v59 }
  0x38   :  { %860 = vmatpush3.bf16.msra.mxu0 %v951_v60 }
  0x39   :  { %882 = vmatpush3.bf16.msra.mxu1 %v952_v61  ;;  %861 = vmatprep.subr.bf16.mxu0 %v953_v62 }
  0x3a   :  { %883 = vmatprep.subr.bf16.mxu1 %v954_v63 }
  0x3c   :  { %862 = vmatpush3.bf16.msra.mxu0 %v955_v0 }
  0x3d   :  { %884 = vmatpush3.bf16.msra.mxu1 %v956_v1  ;;  %863 = vmatprep.subr.bf16.mxu0 %v957_v2 }
  0x3e   :  { %885 = vmatprep.subr.bf16.mxu1 %v958_v3 }
  0x40   :  { %864 = vmatpush3.bf16.msra.mxu0 %v959_v4 }
  0x41   :  { %886 = vmatpush3.bf16.msra.mxu1 %v960_v5 }
  0x43   :  { %679 = vmatmul.mubr.bf16.vlgmr.msra.gmra.mrb[4].mxu0 %v737_v7 }
  0x44   :  { %719 = vmatmul.mubr.bf16.vlgmr.msra.gmra.mrb[4].mxu1 %v739_v10 }
  0xf6   :  { %v821_v12 = vpop.f32.mrb[0].mxu0 }
  0xf7   :  { %v843_v13 = vpop.f32.mrb[0].mxu1  ;;  %v822_v15 = vpop.f32.mrb[1].mxu0 }
  0xf8   :  { %v844_v16 = vpop.f32.mrb[1].mxu1  ;;  %v823_v17 = vadd.f32 %v822_v15, %v821_v12  ;;  %v824_v19 = vpop.f32.mrb[2].mxu0 }
  0xf9   :  { %v845_v18 = vadd.f32 %v844_v16, %v843_v13  ;;  %v846_v20 = vpop.f32.mrb[2].mxu1  ;;  %v825_v21 = vpop.f32.mrb[3].mxu0 }
  0xfa   :  { %v847_v22 = vpop.f32.mrb[3].mxu1  ;;  %v601_v23 = vadd.f32 %v823_v17, %v732_v14 }
  0xfc   :  { %v641_v24 = vadd.f32 %v845_v18, %v601_v23 }
 0x116   :  { %v865_v25 = vpop.f32.mrb[4].mxu0 }
 0x117   :  { %v887_v26 = vpop.f32.mrb[4].mxu1  ;;  %v866_v27 = vpop.f32.mrb[5].mxu0 }
 0x118   :  { %v888_v28 = vpop.f32.mrb[5].mxu1  ;;  %v867_v29 = vadd.f32 %v866_v27, %v865_v25  ;;  %v868_v31 = vpop.f32.mrb[6].mxu0 }
 0x119   :  { %v889_v30 = vadd.f32 %v888_v28, %v887_v26  ;;  %v890_v32 = vpop.f32.mrb[6].mxu1  ;;  %v869_v33 = vpop.f32.mrb[7].mxu0 }
 0x11a   :  { %v891_v34 = vpop.f32.mrb[7].mxu1  ;;  %v681_v35 = vadd.f32 %v867_v29, %v641_v24 }
 0x11c   :  { %v721_v36 = vadd.f32 %v889_v30, %v681_v35 }
 0x11e   :  { %727 = vst.msk [vmem:[%s1198_s3] sm:$0xff] %vm726_vm0, %v721_v36 }

</bundles_post_ra>
